<compile_context>
chip_gen: v6e
topology: v6e:2x2x1
jax: 0.10.0
libtpu: 0.0.40
codegen_flags: <defaults>
</compile_context>

<pallas_src>
import jax
import jax.numpy as jnp
from jax.experimental import pallas as pl
from jax.experimental.pallas import tpu as pltpu


def _round_up(x, m):
    return (x + m - 1) // m * m


def _dual_core_kernel(
    # streamed per-step input
    xt_ref,          # (1, B, E)
    # step-invariant inputs (resident in VMEM for the whole decode)
    fcb_ref,         # (B, 4H) f32   fc_feats @ W_fc + b_ih + b_hh  (att LSTM)
    proj_ref,        # (B, LP, H) f32  att_feats @ wp, locations padded to LP
    att_ref,         # (B, L, D) f32
    pooled_ref,      # (B, D) f32      mean over locations
    spmask_ref,      # (1, LP) f32     0 for valid locations, -1e30 for pads
    h0_ref, c0_ref,  # (2, B, H) f32   initial hidden state
    wa_ref,          # (KA, 4H) bf16   rows [W_h_lang | W_xt | W_hh_att | 0]
    wl_ref,          # (KL, 4H) bf16   rows [W_sp | W_ch | W_h_att | W_hh | 0]
    bl_ref,          # (1, 4H) f32
    convw_ref,       # (3, H) f32      edge-masked conv taps [w0, w1, w2]
    convb_ref,       # (1, H) f32
    whc_ref,         # (H, D) bf16
    # outputs
    hlang_ref,       # (1, B, H)   next_h_lang per step (logits done outside)
    hstack_ref,      # (2, B, H)   resident; doubles as the carried h state
    cstack_ref,      # (2, B, H)   resident; doubles as the carried c state
    attw_ref,        # (1, B, LP)  spatial attention weights, lane-dense
    # persistent VMEM scratch: fused-LSTM-input "concat" buffers
    xatt_sc,         # (B, KA) f32
    xlang_sc,        # (B, KL) f32
):
    H = hstack_ref.shape[2]
    E = xt_ref.shape[2]
    L = att_ref.shape[1]
    t = pl.program_id(0)

    @pl.when(t == 0)
    def _init():
        # Seed the carried recurrent state (resident output blocks) and zero
        # the lane padding of the fused-input scratch buffers exactly once.
        hstack_ref[...] = h0_ref[...]
        cstack_ref[...] = c0_ref[...]
        xatt_sc[...] = jnp.zeros_like(xatt_sc)
        xlang_sc[...] = jnp.zeros_like(xlang_sc)

    def dotw(x, w_ref):
        # bf16 MXU operands, f32 accumulation.
        return jnp.dot(x.astype(w_ref.dtype), w_ref[...],
                       preferred_element_type=jnp.float32)

    def lstm_cell(gates, c_prev):
        # PyTorch LSTMCell gate order: i, f, g, o
        i = jax.nn.sigmoid(gates[:, 0 * H:1 * H])
        f = jax.nn.sigmoid(gates[:, 1 * H:2 * H])
        g = jnp.tanh(gates[:, 2 * H:3 * H])
        o = jax.nn.sigmoid(gates[:, 3 * H:4 * H])
        c_new = f * c_prev + i * g
        return o * jnp.tanh(c_new), c_new

    xt = xt_ref[0]                                   # (B, E)
    h_att, h_lang = hstack_ref[0], hstack_ref[1]
    c_att, c_lang = cstack_ref[0], cstack_ref[1]

    # ---- attention LSTM: cat([h_lang, fc, xt]); fc folded into fcb bias ----
    xatt_sc[:, 0:H] = h_lang
    xatt_sc[:, H:H + E] = xt
    xatt_sc[:, H + E:H + E + H] = h_att
    gates_att = dotw(xatt_sc[...], wa_ref) + fcb_ref[...]
    next_h_att, next_c_att = lstm_cell(gates_att, c_att)

    # ---- filter_h: Conv1d(1,1,3,padding=1) + ReLU via rolls + masked taps ----
    # Edge taps are pre-zeroed so roll wraparound cannot leak across the ends.
    roll = pltpu.roll if H % 128 == 0 else jnp.roll   # XLU rotate when aligned
    h_m1 = roll(next_h_att, 1, axis=1)                # h[j-1]
    h_p1 = roll(next_h_att, H - 1, axis=1)            # h[j+1]
    filter_h = jnp.maximum(
        convw_ref[0:1] * h_m1 + convw_ref[1:2] * next_h_att
        + convw_ref[2:3] * h_p1 + convb_ref[...], 0.0)

    # ---- DualAttention (spatial + channel) ----
    # TODO(synk): build_decoder_attention('DualAttention') source not provided;
    # dimension-consistent dual attention (spatial alpha over padded locations
    # is returned as att_weights, channel beta over features).
    proj = proj_ref[...]                                            # (B, LP, H)
    e_sp = jnp.sum(proj * filter_h[:, None, :], axis=-1) + spmask_ref[...]
    alpha = jax.nn.softmax(e_sp, axis=-1)                           # (B, LP)
    w_spatial = jnp.sum(proj * alpha[:, :, None], axis=1)           # (B, H)
    e_ch = pooled_ref[...] * dotw(filter_h, whc_ref)                # (B, D)
    beta = jax.nn.softmax(e_ch, axis=-1)
    w_channel = jnp.sum(att_ref[...] * beta[:, None, :], axis=-1)   # (B, L)

    # ---- language LSTM: cat([w_spatial, w_channel, next_h_att]) ----
    xlang_sc[:, 0:H] = w_spatial
    xlang_sc[:, H:H + L] = w_channel
    xlang_sc[:, H + L:2 * H + L] = next_h_att
    xlang_sc[:, 2 * H + L:3 * H + L] = h_lang
    gates_lang = dotw(xlang_sc[...], wl_ref) + bl_ref[...]
    next_h_lang, next_c_lang = lstm_cell(gates_lang, c_lang)

    # Carry recurrent state in the resident output blocks (single HBM
    # writeback at the end of the decode); stream per-step h_lang / attention.
    hstack_ref[0] = next_h_att
    hstack_ref[1] = next_h_lang
    cstack_ref[0] = next_c_att
    cstack_ref[1] = next_c_lang
    hlang_ref[0] = next_h_lang
    attw_ref[0] = alpha


def init_params(key, *, E, H, D, L, V):
    # TODO(synk): PyTorch uses orthogonal init for lstm weights; deterministic
    # scaled-normal synthetic weights here (no checkpoint available).
    def rnd(k, shape, scale=0.05):
        return scale * jax.random.normal(k, shape, dtype=jnp.float32)

    ks = jax.random.split(key, 14)
    in_att = E + 2 * H      # cat([prev_h_lang (H), fc_feats (H), xt (E)])
    in_lang = L + 2 * H     # cat([w_spatial (H), w_channel (L), next_h_att (H)])
    return dict(
        w_ih_att=rnd(ks[0], (in_att, 4 * H)),     # rows ordered [h_lang, fc, xt]
        w_hh_att=rnd(ks[1], (H, 4 * H)),
        b_att=rnd(ks[2], (1, 4 * H)) + rnd(ks[3], (1, 4 * H)),   # b_ih + b_hh
        w_ih_lang=rnd(ks[4], (in_lang, 4 * H)),   # rows [spatial, channel, h_att]
        w_hh_lang=rnd(ks[5], (H, 4 * H)),
        b_lang=rnd(ks[6], (1, 4 * H)) + rnd(ks[7], (1, 4 * H)),
        conv_w=rnd(ks[8], (3,)),
        conv_b=rnd(ks[9], (1,)),
        wp=rnd(ks[10], (D, H)),
        whc=rnd(ks[11], (H, D)),
        wlogit=rnd(ks[12], (H, V)),
        blogit=rnd(ks[13], (1, V)),
    )


@jax.jit
def conv_hidden_core_decode(xt_steps, fc_feats, att_feats, hidden_states, params):
    """Run T decode steps in one pallas_call; per-step semantics == module.forward."""
    h_stack, c_stack = hidden_states
    T, B, E = xt_steps.shape
    H = h_stack.shape[-1]
    _, L, D = att_feats.shape

    LP = _round_up(L, 128)                 # lane-dense attention-weight width
    BP = max(8, _round_up(B, 8))           # full sublanes for every (B, .) vreg
    KA = _round_up(2 * H + E, 128)         # fused att-LSTM contraction dim
    KL = _round_up(3 * H + L, 128)         # fused lang-LSTM contraction dim

    f32, bf16 = jnp.float32, jnp.bfloat16
    w_ih_att, w_hh_att = params["w_ih_att"], params["w_hh_att"]

    # --- fused weights (stored bf16; matmuls accumulate in f32) ---
    wa_rows = jnp.concatenate(
        [w_ih_att[0:H], w_ih_att[2 * H:2 * H + E], w_hh_att], axis=0)
    wa = jnp.pad(wa_rows, ((0, KA - wa_rows.shape[0]), (0, 0))).astype(bf16)
    wl_rows = jnp.concatenate([params["w_ih_lang"], params["w_hh_lang"]], axis=0)
    wl = jnp.pad(wl_rows, ((0, KL - wl_rows.shape[0]), (0, 0))).astype(bf16)
    bl = params["b_lang"].astype(f32)
    whc = params["whc"].astype(bf16)

    # fc_feats is step-invariant: fold its gate contribution into the bias.
    fcb = (fc_feats @ w_ih_att[H:2 * H] + params["b_att"]).astype(f32)   # (B, 4H)

    # Conv1d(1,1,3,padding=1) taps, pre-masked at the edges so the in-kernel
    # rolls may wrap without contaminating the result.
    lane = jnp.arange(H)
    conv_taps = jnp.stack([
        jnp.where(lane > 0, params["conv_w"][0], 0.0),       # * h[j-1]
        jnp.full((H,), params["conv_w"][1]),                 # * h[j]
        jnp.where(lane < H - 1, params["conv_w"][2], 0.0),   # * h[j+1]
    ]).astype(f32)                                           # (3, H)
    conv_b = jnp.full((1, H), params["conv_b"][0], dtype=f32)

    # --- step-invariant attention precompute (hoisted out of the recurrence) ---
    proj = jnp.einsum("bld,dh->blh", att_feats, params["wp"])   # (B, L, H)
    pooled = jnp.mean(att_feats, axis=1)                        # (B, D)
    spmask = jnp.where(jnp.arange(LP) < L, 0.0, -1e30)[None, :].astype(f32)

    # --- pad batch to BP rows and locations to LP (zeros; sliced off below) ---
    db = BP - B
    xt_p = jnp.pad(xt_steps, ((0, 0), (0, db), (0, 0)))
    fcb_p = jnp.pad(fcb, ((0, db), (0, 0)))
    proj_p = jnp.pad(proj, ((0, db), (0, LP - L), (0, 0)))
    att_p = jnp.pad(att_feats, ((0, db), (0, 0), (0, 0)))
    pooled_p = jnp.pad(pooled, ((0, db), (0, 0)))
    h0_p = jnp.pad(h_stack, ((0, 0), (0, db), (0, 0)))
    c0_p = jnp.pad(c_stack, ((0, 0), (0, db), (0, 0)))

    def full_spec(shape):
        return pl.BlockSpec(shape, lambda t: (0,) * len(shape))

    grid_spec = pltpu.PrefetchScalarGridSpec(
        num_scalar_prefetch=0,
        grid=(T,),
        in_specs=[
            pl.BlockSpec((1, BP, E), lambda t: (t, 0, 0)),   # xt (streamed)
            full_spec((BP, 4 * H)),                          # fcb (fc + bias)
            full_spec((BP, LP, H)),                          # proj
            full_spec((BP, L, D)),                           # att_feats
            full_spec((BP, D)),                              # pooled
            full_spec((1, LP)),                              # spatial softmax mask
            full_spec((2, BP, H)),                           # h0
            full_spec((2, BP, H)),                           # c0
            full_spec((KA, 4 * H)),                          # wa (bf16)
            full_spec((KL, 4 * H)),                          # wl (bf16)
            full_spec((1, 4 * H)),                           # bl
            full_spec((3, H)),                               # conv taps
            full_spec((1, H)),                               # conv bias
            full_spec((H, D)),                               # whc (bf16)
        ],
        out_specs=[
            pl.BlockSpec((1, BP, H), lambda t: (t, 0, 0)),   # next_h_lang per step
            pl.BlockSpec((2, BP, H), lambda t: (0, 0, 0)),   # final h stack (carried)
            pl.BlockSpec((2, BP, H), lambda t: (0, 0, 0)),   # final c stack (carried)
            pl.BlockSpec((1, BP, LP), lambda t: (t, 0, 0)),  # att weights per step
        ],
        scratch_shapes=[pltpu.VMEM((BP, KA), f32),
                        pltpu.VMEM((BP, KL), f32)],
    )

    out_shape = (
        jax.ShapeDtypeStruct((T, BP, H), f32),
        jax.ShapeDtypeStruct((2, BP, H), f32),
        jax.ShapeDtypeStruct((2, BP, H), f32),
        jax.ShapeDtypeStruct((T, BP, LP), f32),
    )

    h_all, h_new, c_new, attw = pl.pallas_call(
        _dual_core_kernel,
        out_shape=out_shape,
        grid_spec=grid_spec,
        compiler_params=pltpu.CompilerParams(
            dimension_semantics=("arbitrary",),     # recurrent over decode steps
            vmem_limit_bytes=32 * 1024 * 1024),
    )(xt_p, fcb_p, proj_p, att_p, pooled_p, spmask, h0_p, c0_p,
      wa, wl, bl, conv_taps, conv_b, whc)

    # Logits hoisted out of the recurrent chain: one batched matmul over all T
    # steps (F.dropout is identity at inference time).
    h_all = h_all[:, :B]
    logits = jnp.einsum("tbh,hv->tbv", h_all, params["wlogit"]) + params["blogit"]
    return logits, (h_new[:, :B], c_new[:, :B]), attw[:, :B, :L]


def conv_hidden_core_forward(xt, fc_feats, att_feats, hidden_states, params):
    """Single-step forward with the original module signature/semantics."""
    logits, hidden, att_w = conv_hidden_core_decode(
        xt[None], fc_feats, att_feats, hidden_states, params)
    return logits[0], hidden, att_w[0]


# ----------------------------- pure-JAX reference -----------------------------

def _reference_step(xt, fc, att, hidden, p):
    h_stack, c_stack = hidden
    H = h_stack.shape[-1]
    h_att, h_lang = h_stack[0], h_stack[1]
    c_att, c_lang = c_stack[0], c_stack[1]

    def cell(x, h, c, w_ih, w_hh, b):
        gates = x @ w_ih + h @ w_hh + b
        i = jax.nn.sigmoid(gates[:, :H])
        f = jax.nn.sigmoid(gates[:, H:2 * H])
        g = jnp.tanh(gates[:, 2 * H:3 * H])
        o = jax.nn.sigmoid(gates[:, 3 * H:])
        c_new = f * c + i * g
        return o * jnp.tanh(c_new), c_new

    x_att = jnp.concatenate([h_lang, fc, xt], axis=1)
    nh_att, nc_att = cell(x_att, h_att, c_att, p["w_ih_att"], p["w_hh_att"], p["b_att"])

    w0, w1, w2 = p["conv_w"][0], p["conv_w"][1], p["conv_w"][2]
    padded = jnp.pad(nh_att, ((0, 0), (1, 1)))
    filt = jnp.maximum(w0 * padded[:, :-2] + w1 * padded[:, 1:-1]
                       + w2 * padded[:, 2:] + p["conv_b"][0], 0.0)

    proj = jnp.einsum("bld,dh->blh", att, p["wp"])
    e_sp = jnp.sum(proj * filt[:, None, :], axis=-1)
    alpha = jax.nn.softmax(e_sp, axis=-1)
    w_spatial = jnp.sum(proj * alpha[:, :, None], axis=1)
    pooled = jnp.mean(att, axis=1)
    e_ch = pooled * (filt @ p["whc"])
    beta = jax.nn.softmax(e_ch, axis=-1)
    w_channel = jnp.sum(att * beta[:, None, :], axis=-1)

    x_lang = jnp.concatenate([w_spatial, w_channel, nh_att], axis=1)
    nh_lang, nc_lang = cell(x_lang, h_lang, c_lang,
                            p["w_ih_lang"], p["w_hh_lang"], p["b_lang"])
    logits = nh_lang @ p["wlogit"] + p["blogit"]
    hidden = (jnp.stack([nh_att, nh_lang]), jnp.stack([nc_att, nc_lang]))
    return logits, hidden, alpha


def _reference_decode(xt_steps, fc, att, hidden, p):
    logits_all, attw_all = [], []
    for t in range(xt_steps.shape[0]):
        logits, hidden, attw = _reference_step(xt_steps[t], fc, att, hidden, p)
        logits_all.append(logits)
        attw_all.append(attw)
    return jnp.stack(logits_all), hidden, jnp.stack(attw_all)


if __name__ == "__main__":
    # cfg-implied small sizes: EMBEDDING_SIZE=32, HIDDEN_SIZE=32, FEATURE_SIZE=32,
    # ATT_SIZE=4 -> L=16 locations, vocab_size=64, batch B=2, T=4 decode steps.
    B, E, H, D = 2, 32, 32, 32
    L = 4 ** 2
    V = 64
    T = 4

    key = jax.random.PRNGKey(0)
    k_in, k_par = jax.random.split(key)
    ks = jax.random.split(k_in, 5)
    xt_steps = jax.random.normal(ks[0], (T, B, E), dtype=jnp.float32)
    fc_feats = jax.random.normal(ks[1], (B, H), dtype=jnp.float32)
    att_feats = jax.random.normal(ks[2], (B, L, D), dtype=jnp.float32)
    h_stack = jax.random.normal(ks[3], (2, B, H), dtype=jnp.float32)
    c_stack = jax.random.normal(ks[4], (2, B, H), dtype=jnp.float32)
    params = init_params(k_par, E=E, H=H, D=D, L=L, V=V)

    # multi-step decode: one pallas_call, T steps, weights resident in VMEM
    logits, (h_new, c_new), att_w = conv_hidden_core_decode(
        xt_steps, fc_feats, att_feats, (h_stack, c_stack), params)
    jax.tree_util.tree_map(jax.block_until_ready, (logits, h_new, c_new, att_w))

    assert logits.shape == (T, B, V)
    assert h_new.shape == (2, B, H) and c_new.shape == (2, B, H)
    assert att_w.shape == (T, B, L)

    # single-step call (original module forward semantics)
    logits1, _, attw1 = conv_hidden_core_forward(
        xt_steps[0], fc_feats, att_feats, (h_stack, c_stack), params)
    assert logits1.shape == (B, V) and attw1.shape == (B, L)

    # correctness vs a pure-JAX reference (tolerance covers bf16 MXU operands)
    ref_logits, (ref_h, ref_c), ref_attw = _reference_decode(
        xt_steps, fc_feats, att_feats, (h_stack, c_stack), params)
    for got, ref in ((logits, ref_logits), (h_new, ref_h),
                     (c_new, ref_c), (att_w, ref_attw)):
        assert jnp.allclose(got, ref, atol=2e-2, rtol=2e-2), \
            float(jnp.max(jnp.abs(got - ref)))

    print("KERNEL_OK")
</pallas_src>

<mosaic_0001>
module attributes {stable_mosaic.version = 11 : i64} {
  func.func @_dual_core_kernel(%arg0: i32, %arg1: memref<1x8x32xf32, #tpu.memory_space<vmem>>, %arg2: memref<8x128xf32, #tpu.memory_space<vmem>>, %arg3: memref<8x128x32xf32, #tpu.memory_space<vmem>>, %arg4: memref<8x16x32xf32, #tpu.memory_space<vmem>>, %arg5: memref<8x32xf32, #tpu.memory_space<vmem>>, %arg6: memref<1x128xf32, #tpu.memory_space<vmem>>, %arg7: memref<2x8x32xf32, #tpu.memory_space<vmem>>, %arg8: memref<2x8x32xf32, #tpu.memory_space<vmem>>, %arg9: memref<128x128xbf16, #tpu.memory_space<vmem>>, %arg10: memref<128x128xbf16, #tpu.memory_space<vmem>>, %arg11: memref<1x128xf32, #tpu.memory_space<vmem>>, %arg12: memref<3x32xf32, #tpu.memory_space<vmem>>, %arg13: memref<1x32xf32, #tpu.memory_space<vmem>>, %arg14: memref<32x32xbf16, #tpu.memory_space<vmem>>, %arg15: memref<1x8x32xf32, #tpu.memory_space<vmem>>, %arg16: memref<2x8x32xf32, #tpu.memory_space<vmem>>, %arg17: memref<2x8x32xf32, #tpu.memory_space<vmem>>, %arg18: memref<1x8x128xf32, #tpu.memory_space<vmem>>, %arg19: memref<8x128xf32, #tpu.memory_space<vmem>>, %arg20: memref<8x128xf32, #tpu.memory_space<vmem>>) attributes {dimension_semantics = [#tpu.dimension_semantics<arbitrary>], iteration_bounds = array<i64: 4>, scalar_prefetch = 0 : i64, scratch_operands = 2 : i64, tpu.core_type = #tpu.core_type<tc>, window_params = [{transform_indices = @transform_0, window_bounds = array<i64: 1, 8, 32>}, {pipeline_mode = #tpu.pipeline_mode<synchronous>, transform_indices = @transform_1, window_bounds = array<i64: 8, 128>}, {pipeline_mode = #tpu.pipeline_mode<synchronous>, transform_indices = @transform_2, window_bounds = array<i64: 8, 128, 32>}, {pipeline_mode = #tpu.pipeline_mode<synchronous>, transform_indices = @transform_3, window_bounds = array<i64: 8, 16, 32>}, {pipeline_mode = #tpu.pipeline_mode<synchronous>, transform_indices = @transform_4, window_bounds = array<i64: 8, 32>}, {pipeline_mode = #tpu.pipeline_mode<synchronous>, transform_indices = @transform_5, window_bounds = array<i64: 1, 128>}, {pipeline_mode = #tpu.pipeline_mode<synchronous>, transform_indices = @transform_6, window_bounds = array<i64: 2, 8, 32>}, {pipeline_mode = #tpu.pipeline_mode<synchronous>, transform_indices = @transform_7, window_bounds = array<i64: 2, 8, 32>}, {pipeline_mode = #tpu.pipeline_mode<synchronous>, transform_indices = @transform_8, window_bounds = array<i64: 128, 128>}, {pipeline_mode = #tpu.pipeline_mode<synchronous>, transform_indices = @transform_9, window_bounds = array<i64: 128, 128>}, {pipeline_mode = #tpu.pipeline_mode<synchronous>, transform_indices = @transform_10, window_bounds = array<i64: 1, 128>}, {pipeline_mode = #tpu.pipeline_mode<synchronous>, transform_indices = @transform_11, window_bounds = array<i64: 3, 32>}, {pipeline_mode = #tpu.pipeline_mode<synchronous>, transform_indices = @transform_12, window_bounds = array<i64: 1, 32>}, {pipeline_mode = #tpu.pipeline_mode<synchronous>, transform_indices = @transform_13, window_bounds = array<i64: 32, 32>}, {transform_indices = @transform_14, window_bounds = array<i64: 1, 8, 32>}, {pipeline_mode = #tpu.pipeline_mode<synchronous>, transform_indices = @transform_15, window_bounds = array<i64: 2, 8, 32>}, {pipeline_mode = #tpu.pipeline_mode<synchronous>, transform_indices = @transform_16, window_bounds = array<i64: 2, 8, 32>}, {transform_indices = @transform_17, window_bounds = array<i64: 1, 8, 128>}]} {
    %c0_i32 = arith.constant 0 : i32
    %0 = arith.cmpi eq, %arg0, %c0_i32 : i32
    %1 = arith.extui %0 : i1 to i32
    %c0_i32_0 = arith.constant 0 : i32
    %2 = arith.cmpi ne, %1, %c0_i32_0 : i32
    scf.if %2 {
      %c0_91 = arith.constant 0 : index
      %c0_92 = arith.constant 0 : index
      %c0_93 = arith.constant 0 : index
      %167 = vector.load %arg7[%c0_91, %c0_92, %c0_93] : memref<2x8x32xf32, #tpu.memory_space<vmem>>, vector<2x8x32xf32>
      %c0_94 = arith.constant 0 : index
      %c0_95 = arith.constant 0 : index
      %c0_96 = arith.constant 0 : index
      %168 = vector.load %arg16[%c0_94, %c0_95, %c0_96] : memref<2x8x32xf32, #tpu.memory_space<vmem>>, vector<2x8x32xf32>
      tpu.vector_store %arg16[%c0_94, %c0_95, %c0_96], %167 {strides = array<i32>} : memref<2x8x32xf32, #tpu.memory_space<vmem>>, vector<2x8x32xf32>,
      %c0_97 = arith.constant 0 : index
      %c0_98 = arith.constant 0 : index
      %c0_99 = arith.constant 0 : index
      %169 = vector.load %arg8[%c0_97, %c0_98, %c0_99] : memref<2x8x32xf32, #tpu.memory_space<vmem>>, vector<2x8x32xf32>
      %c0_100 = arith.constant 0 : index
      %c0_101 = arith.constant 0 : index
      %c0_102 = arith.constant 0 : index
      %170 = vector.load %arg17[%c0_100, %c0_101, %c0_102] : memref<2x8x32xf32, #tpu.memory_space<vmem>>, vector<2x8x32xf32>
      tpu.vector_store %arg17[%c0_100, %c0_101, %c0_102], %169 {strides = array<i32>} : memref<2x8x32xf32, #tpu.memory_space<vmem>>, vector<2x8x32xf32>,
      %cst_103 = arith.constant 0.000000e+00 : f32
      %171 = vector.broadcast %cst_103 : f32 to vector<8x128xf32>
      %c0_104 = arith.constant 0 : index
      %c0_105 = arith.constant 0 : index
      %172 = vector.load %arg19[%c0_104, %c0_105] : memref<8x128xf32, #tpu.memory_space<vmem>>, vector<8x128xf32>
      tpu.vector_store %arg19[%c0_104, %c0_105], %171 {strides = array<i32>} : memref<8x128xf32, #tpu.memory_space<vmem>>, vector<8x128xf32>,
      %cst_106 = arith.constant 0.000000e+00 : f32
      %173 = vector.broadcast %cst_106 : f32 to vector<8x128xf32>
      %c0_107 = arith.constant 0 : index
      %c0_108 = arith.constant 0 : index
      %174 = vector.load %arg20[%c0_107, %c0_108] : memref<8x128xf32, #tpu.memory_space<vmem>>, vector<8x128xf32>
      tpu.vector_store %arg20[%c0_107, %c0_108], %173 {strides = array<i32>} : memref<8x128xf32, #tpu.memory_space<vmem>>, vector<8x128xf32>,
    } else {
    }
    %c0 = arith.constant 0 : index
    %c0_1 = arith.constant 0 : index
    %c0_2 = arith.constant 0 : index
    %3 = vector.load %arg1[%c0, %c0_1, %c0_2] : memref<1x8x32xf32, #tpu.memory_space<vmem>>, vector<1x8x32xf32>
    %4 = vector.shape_cast %3 : vector<1x8x32xf32> to vector<8x32xf32>
    %c0_3 = arith.constant 0 : index
    %c0_4 = arith.constant 0 : index
    %c0_5 = arith.constant 0 : index
    %5 = vector.load %arg16[%c0_3, %c0_4, %c0_5] : memref<2x8x32xf32, #tpu.memory_space<vmem>>, vector<1x8x32xf32>
    %6 = vector.shape_cast %5 : vector<1x8x32xf32> to vector<8x32xf32>
    %c1 = arith.constant 1 : index
    %c0_6 = arith.constant 0 : index
    %c0_7 = arith.constant 0 : index
    %7 = vector.load %arg16[%c1, %c0_6, %c0_7] : memref<2x8x32xf32, #tpu.memory_space<vmem>>, vector<1x8x32xf32>
    %8 = vector.shape_cast %7 : vector<1x8x32xf32> to vector<8x32xf32>
    %c0_8 = arith.constant 0 : index
    %c0_9 = arith.constant 0 : index
    %c0_10 = arith.constant 0 : index
    %9 = vector.load %arg17[%c0_8, %c0_9, %c0_10] : memref<2x8x32xf32, #tpu.memory_space<vmem>>, vector<1x8x32xf32>
    %10 = vector.shape_cast %9 : vector<1x8x32xf32> to vector<8x32xf32>
    %c1_11 = arith.constant 1 : index
    %c0_12 = arith.constant 0 : index
    %c0_13 = arith.constant 0 : index
    %11 = vector.load %arg17[%c1_11, %c0_12, %c0_13] : memref<2x8x32xf32, #tpu.memory_space<vmem>>, vector<1x8x32xf32>
    %12 = vector.shape_cast %11 : vector<1x8x32xf32> to vector<8x32xf32>
    %c0_14 = arith.constant 0 : index
    %c0_15 = arith.constant 0 : index
    %13 = vector.load %arg19[%c0_14, %c0_15] : memref<8x128xf32, #tpu.memory_space<vmem>>, vector<8x32xf32>
    tpu.vector_store %arg19[%c0_14, %c0_15], %8 {strides = array<i32>} : memref<8x128xf32, #tpu.memory_space<vmem>>, vector<8x32xf32>,
    %c0_16 = arith.constant 0 : index
    %c32 = arith.constant 32 : index
    %14 = vector.load %arg19[%c0_16, %c32] : memref<8x128xf32, #tpu.memory_space<vmem>>, vector<8x32xf32>
    tpu.vector_store %arg19[%c0_16, %c32], %4 {strides = array<i32>} : memref<8x128xf32, #tpu.memory_space<vmem>>, vector<8x32xf32>,
    %c0_17 = arith.constant 0 : index
    %c64 = arith.constant 64 : index
    %15 = vector.load %arg19[%c0_17, %c64] : memref<8x128xf32, #tpu.memory_space<vmem>>, vector<8x32xf32>
    tpu.vector_store %arg19[%c0_17, %c64], %6 {strides = array<i32>} : memref<8x128xf32, #tpu.memory_space<vmem>>, vector<8x32xf32>,
    %c0_18 = arith.constant 0 : index
    %c0_19 = arith.constant 0 : index
    %16 = vector.load %arg19[%c0_18, %c0_19] : memref<8x128xf32, #tpu.memory_space<vmem>>, vector<8x128xf32>
    %17 = arith.truncf %16 : vector<8x128xf32> to vector<8x128xbf16>
    %c0_20 = arith.constant 0 : index
    %c0_21 = arith.constant 0 : index
    %18 = vector.load %arg9[%c0_20, %c0_21] : memref<128x128xbf16, #tpu.memory_space<vmem>>, vector<128x128xbf16>
    %cst = arith.constant dense<0.000000e+00> : vector<8x128xf32>
    %19 = tpu.matmul %17, %18, %cst {dimension_numbers = #tpu.dot_dimension_numbers<[1], [0], [0], [1], [0, 0, 1, 1], [], []>} : vector<8x128xbf16>, vector<128x128xbf16>, vector<8x128xf32> -> vector<8x128xf32>
    %c0_22 = arith.constant 0 : index
    %c0_23 = arith.constant 0 : index
    %20 = vector.load %arg2[%c0_22, %c0_23] : memref<8x128xf32, #tpu.memory_space<vmem>>, vector<8x128xf32>
    %21 = arith.addf %19, %20 : vector<8x128xf32>
    %22 = vector.extract_strided_slice %21 {offsets = [0, 0], sizes = [8, 32], strides = [1, 1]} : vector<8x128xf32> to vector<8x32xf32>
    %23 = arith.negf %22 : vector<8x32xf32>
    %24 = math.exp %23 : vector<8x32xf32>
    %cst_24 = arith.constant 1.000000e+00 : f32
    %25 = vector.broadcast %cst_24 : f32 to vector<8x32xf32>
    %26 = arith.addf %25, %24 : vector<8x32xf32>
    %27 = arith.divf %25, %26 : vector<8x32xf32>
    %28 = vector.extract_strided_slice %21 {offsets = [0, 32], sizes = [8, 32], strides = [1, 1]} : vector<8x128xf32> to vector<8x32xf32>
    %29 = arith.negf %28 : vector<8x32xf32>
    %30 = math.exp %29 : vector<8x32xf32>
    %cst_25 = arith.constant 1.000000e+00 : f32
    %31 = vector.broadcast %cst_25 : f32 to vector<8x32xf32>
    %32 = arith.addf %31, %30 : vector<8x32xf32>
    %33 = arith.divf %31, %32 : vector<8x32xf32>
    %34 = vector.extract_strided_slice %21 {offsets = [0, 64], sizes = [8, 32], strides = [1, 1]} : vector<8x128xf32> to vector<8x32xf32>
    %35 = math.tanh %34 : vector<8x32xf32>
    %36 = vector.extract_strided_slice %21 {offsets = [0, 96], sizes = [8, 32], strides = [1, 1]} : vector<8x128xf32> to vector<8x32xf32>
    %37 = arith.negf %36 : vector<8x32xf32>
    %38 = math.exp %37 : vector<8x32xf32>
    %cst_26 = arith.constant 1.000000e+00 : f32
    %39 = vector.broadcast %cst_26 : f32 to vector<8x32xf32>
    %40 = arith.addf %39, %38 : vector<8x32xf32>
    %41 = arith.divf %39, %40 : vector<8x32xf32>
    %42 = arith.mulf %33, %10 : vector<8x32xf32>
    %43 = arith.mulf %27, %35 : vector<8x32xf32>
    %44 = arith.addf %42, %43 : vector<8x32xf32>
    %45 = math.tanh %44 : vector<8x32xf32>
    %46 = arith.mulf %41, %45 : vector<8x32xf32>
    %47 = vector.extract_strided_slice %46 {offsets = [0, 31], sizes = [8, 1], strides = [1, 1]} : vector<8x32xf32> to vector<8x1xf32>
    %48 = vector.extract_strided_slice %46 {offsets = [0, 0], sizes = [8, 31], strides = [1, 1]} : vector<8x32xf32> to vector<8x31xf32>
    %49 = tpu.concatenate %47, %48 in 1 : vector<8x1xf32>, vector<8x31xf32> -> vector<8x32xf32>
    %50 = vector.extract_strided_slice %46 {offsets = [0, 1], sizes = [8, 31], strides = [1, 1]} : vector<8x32xf32> to vector<8x31xf32>
    %51 = vector.extract_strided_slice %46 {offsets = [0, 0], sizes = [8, 1], strides = [1, 1]} : vector<8x32xf32> to vector<8x1xf32>
    %52 = tpu.concatenate %50, %51 in 1 : vector<8x31xf32>, vector<8x1xf32> -> vector<8x32xf32>
    %c0_27 = arith.constant 0 : index
    %c0_28 = arith.constant 0 : index
    %53 = vector.load %arg12[%c0_27, %c0_28] : memref<3x32xf32, #tpu.memory_space<vmem>>, vector<1x32xf32>
    %54 = vector.broadcast %53 : vector<1x32xf32> to vector<8x32xf32>
    %55 = arith.mulf %54, %49 : vector<8x32xf32>
    %c1_29 = arith.constant 1 : index
    %c0_30 = arith.constant 0 : index
    %56 = vector.load %arg12[%c1_29, %c0_30] : memref<3x32xf32, #tpu.memory_space<vmem>>, vector<1x32xf32>
    %57 = vector.broadcast %56 : vector<1x32xf32> to vector<8x32xf32>
    %58 = arith.mulf %57, %46 : vector<8x32xf32>
    %59 = arith.addf %55, %58 : vector<8x32xf32>
    %c2 = arith.constant 2 : index
    %c0_31 = arith.constant 0 : index
    %60 = vector.load %arg12[%c2, %c0_31] : memref<3x32xf32, #tpu.memory_space<vmem>>, vector<1x32xf32>
    %61 = vector.broadcast %60 : vector<1x32xf32> to vector<8x32xf32>
    %62 = arith.mulf %61, %52 : vector<8x32xf32>
    %63 = arith.addf %59, %62 : vector<8x32xf32>
    %c0_32 = arith.constant 0 : index
    %c0_33 = arith.constant 0 : index
    %64 = vector.load %arg13[%c0_32, %c0_33] : memref<1x32xf32, #tpu.memory_space<vmem>>, vector<1x32xf32>
    %65 = vector.broadcast %64 : vector<1x32xf32> to vector<8x32xf32>
    %66 = arith.addf %63, %65 : vector<8x32xf32>
    %cst_34 = arith.constant 0.000000e+00 : f32
    %67 = vector.broadcast %cst_34 : f32 to vector<8x32xf32>
    %68 = arith.maximumf %66, %67 : vector<8x32xf32>
    %c0_35 = arith.constant 0 : index
    %c0_36 = arith.constant 0 : index
    %c0_37 = arith.constant 0 : index
    %69 = vector.load %arg3[%c0_35, %c0_36, %c0_37] : memref<8x128x32xf32, #tpu.memory_space<vmem>>, vector<8x128x32xf32>
    %70 = vector.shape_cast %68 : vector<8x32xf32> to vector<8x1x32xf32>
    %71 = vector.broadcast %70 : vector<8x1x32xf32> to vector<8x128x32xf32>
    %72 = arith.mulf %69, %71 : vector<8x128x32xf32>
    %cst_38 = arith.constant dense<0.000000e+00> : vector<8x128xf32>
    %73 = vector.multi_reduction <add>, %72, %cst_38 [2] : vector<8x128x32xf32> to vector<8x128xf32>
    %c0_39 = arith.constant 0 : index
    %c0_40 = arith.constant 0 : index
    %74 = vector.load %arg6[%c0_39, %c0_40] : memref<1x128xf32, #tpu.memory_space<vmem>>, vector<1x128xf32>
    %75 = vector.broadcast %74 : vector<1x128xf32> to vector<8x128xf32>
    %76 = arith.addf %73, %75 : vector<8x128xf32>
    %cst_41 = arith.constant dense<0xFF800000> : vector<8xf32>
    %77 = vector.multi_reduction <maximumf>, %76, %cst_41 [1] : vector<8x128xf32> to vector<8xf32>
    %cst_42 = arith.constant 0xFF800000 : f32
    %78 = vector.broadcast %cst_42 : f32 to vector<8xf32>
    %79 = arith.maximumf %78, %77 : vector<8xf32>
    %80 = vector.shape_cast %79 : vector<8xf32> to vector<8x1xf32>
    %81 = vector.broadcast %80 : vector<8x1xf32> to vector<8x128xf32>
    %82 = arith.subf %76, %81 : vector<8x128xf32>
    %83 = math.exp %82 : vector<8x128xf32>
    %cst_43 = arith.constant dense<0.000000e+00> : vector<8xf32>
    %84 = vector.multi_reduction <add>, %83, %cst_43 [1] : vector<8x128xf32> to vector<8xf32>
    %85 = vector.shape_cast %84 : vector<8xf32> to vector<8x1xf32>
    %86 = vector.broadcast %85 : vector<8x1xf32> to vector<8x128xf32>
    %87 = arith.divf %83, %86 : vector<8x128xf32>
    %88 = vector.shape_cast %87 : vector<8x128xf32> to vector<8x128x1xf32>
    %89 = vector.broadcast %88 : vector<8x128x1xf32> to vector<8x128x32xf32>
    %90 = arith.mulf %69, %89 : vector<8x128x32xf32>
    %cst_44 = arith.constant dense<0.000000e+00> : vector<8x32xf32>
    %91 = vector.multi_reduction <add>, %90, %cst_44 [1] : vector<8x128x32xf32> to vector<8x32xf32>
    %c0_45 = arith.constant 0 : index
    %c0_46 = arith.constant 0 : index
    %92 = vector.load %arg5[%c0_45, %c0_46] : memref<8x32xf32, #tpu.memory_space<vmem>>, vector<8x32xf32>
    %93 = arith.truncf %68 : vector<8x32xf32> to vector<8x32xbf16>
    %c0_47 = arith.constant 0 : index
    %c0_48 = arith.constant 0 : index
    %94 = vector.load %arg14[%c0_47, %c0_48] : memref<32x32xbf16, #tpu.memory_space<vmem>>, vector<32x32xbf16>
    %cst_49 = arith.constant dense<0.000000e+00> : vector<8x32xf32>
    %95 = tpu.matmul %93, %94, %cst_49 {dimension_numbers = #tpu.dot_dimension_numbers<[1], [0], [0], [1], [0, 0, 1, 1], [], []>} : vector<8x32xbf16>, vector<32x32xbf16>, vector<8x32xf32> -> vector<8x32xf32>
    %96 = arith.mulf %92, %95 : vector<8x32xf32>
    %cst_50 = arith.constant dense<0xFF800000> : vector<8xf32>
    %97 = vector.multi_reduction <maximumf>, %96, %cst_50 [1] : vector<8x32xf32> to vector<8xf32>
    %cst_51 = arith.constant 0xFF800000 : f32
    %98 = vector.broadcast %cst_51 : f32 to vector<8xf32>
    %99 = arith.maximumf %98, %97 : vector<8xf32>
    %100 = vector.shape_cast %99 : vector<8xf32> to vector<8x1xf32>
    %101 = vector.broadcast %100 : vector<8x1xf32> to vector<8x32xf32>
    %102 = arith.subf %96, %101 : vector<8x32xf32>
    %103 = math.exp %102 : vector<8x32xf32>
    %cst_52 = arith.constant dense<0.000000e+00> : vector<8xf32>
    %104 = vector.multi_reduction <add>, %103, %cst_52 [1] : vector<8x32xf32> to vector<8xf32>
    %105 = vector.shape_cast %104 : vector<8xf32> to vector<8x1xf32>
    %106 = vector.broadcast %105 : vector<8x1xf32> to vector<8x32xf32>
    %107 = arith.divf %103, %106 : vector<8x32xf32>
    %c0_53 = arith.constant 0 : index
    %c0_54 = arith.constant 0 : index
    %c0_55 = arith.constant 0 : index
    %108 = vector.load %arg4[%c0_53, %c0_54, %c0_55] : memref<8x16x32xf32, #tpu.memory_space<vmem>>, vector<8x16x32xf32>
    %109 = vector.shape_cast %107 : vector<8x32xf32> to vector<8x1x32xf32>
    %110 = vector.broadcast %109 : vector<8x1x32xf32> to vector<8x16x32xf32>
    %111 = arith.mulf %108, %110 : vector<8x16x32xf32>
    %cst_56 = arith.constant dense<0.000000e+00> : vector<8x16xf32>
    %112 = vector.multi_reduction <add>, %111, %cst_56 [2] : vector<8x16x32xf32> to vector<8x16xf32>
    %c0_57 = arith.constant 0 : index
    %c0_58 = arith.constant 0 : index
    %113 = vector.load %arg20[%c0_57, %c0_58] : memref<8x128xf32, #tpu.memory_space<vmem>>, vector<8x32xf32>
    tpu.vector_store %arg20[%c0_57, %c0_58], %91 {strides = array<i32>} : memref<8x128xf32, #tpu.memory_space<vmem>>, vector<8x32xf32>,
    %c0_59 = arith.constant 0 : index
    %c32_60 = arith.constant 32 : index
    %114 = vector.load %arg20[%c0_59, %c32_60] : memref<8x128xf32, #tpu.memory_space<vmem>>, vector<8x16xf32>
    tpu.vector_store %arg20[%c0_59, %c32_60], %112 {strides = array<i32>} : memref<8x128xf32, #tpu.memory_space<vmem>>, vector<8x16xf32>,
    %c0_61 = arith.constant 0 : index
    %c48 = arith.constant 48 : index
    %115 = vector.load %arg20[%c0_61, %c48] : memref<8x128xf32, #tpu.memory_space<vmem>>, vector<8x32xf32>
    tpu.vector_store %arg20[%c0_61, %c48], %46 {strides = array<i32>} : memref<8x128xf32, #tpu.memory_space<vmem>>, vector<8x32xf32>,
    %c0_62 = arith.constant 0 : index
    %c80 = arith.constant 80 : index
    %116 = vector.load %arg20[%c0_62, %c80] : memref<8x128xf32, #tpu.memory_space<vmem>>, vector<8x32xf32>
    tpu.vector_store %arg20[%c0_62, %c80], %8 {strides = array<i32>} : memref<8x128xf32, #tpu.memory_space<vmem>>, vector<8x32xf32>,
    %c0_63 = arith.constant 0 : index
    %c0_64 = arith.constant 0 : index
    %117 = vector.load %arg20[%c0_63, %c0_64] : memref<8x128xf32, #tpu.memory_space<vmem>>, vector<8x128xf32>
    %118 = arith.truncf %117 : vector<8x128xf32> to vector<8x128xbf16>
    %c0_65 = arith.constant 0 : index
    %c0_66 = arith.constant 0 : index
    %119 = vector.load %arg10[%c0_65, %c0_66] : memref<128x128xbf16, #tpu.memory_space<vmem>>, vector<128x128xbf16>
    %cst_67 = arith.constant dense<0.000000e+00> : vector<8x128xf32>
    %120 = tpu.matmul %118, %119, %cst_67 {dimension_numbers = #tpu.dot_dimension_numbers<[1], [0], [0], [1], [0, 0, 1, 1], [], []>} : vector<8x128xbf16>, vector<128x128xbf16>, vector<8x128xf32> -> vector<8x128xf32>
    %c0_68 = arith.constant 0 : index
    %c0_69 = arith.constant 0 : index
    %121 = vector.load %arg11[%c0_68, %c0_69] : memref<1x128xf32, #tpu.memory_space<vmem>>, vector<1x128xf32>
    %122 = vector.broadcast %121 : vector<1x128xf32> to vector<8x128xf32>
    %123 = arith.addf %120, %122 : vector<8x128xf32>
    %124 = vector.extract_strided_slice %123 {offsets = [0, 0], sizes = [8, 32], strides = [1, 1]} : vector<8x128xf32> to vector<8x32xf32>
    %125 = arith.negf %124 : vector<8x32xf32>
    %126 = math.exp %125 : vector<8x32xf32>
    %cst_70 = arith.constant 1.000000e+00 : f32
    %127 = vector.broadcast %cst_70 : f32 to vector<8x32xf32>
    %128 = arith.addf %127, %126 : vector<8x32xf32>
    %129 = arith.divf %127, %128 : vector<8x32xf32>
    %130 = vector.extract_strided_slice %123 {offsets = [0, 32], sizes = [8, 32], strides = [1, 1]} : vector<8x128xf32> to vector<8x32xf32>
    %131 = arith.negf %130 : vector<8x32xf32>
    %132 = math.exp %131 : vector<8x32xf32>
    %cst_71 = arith.constant 1.000000e+00 : f32
    %133 = vector.broadcast %cst_71 : f32 to vector<8x32xf32>
    %134 = arith.addf %133, %132 : vector<8x32xf32>
    %135 = arith.divf %133, %134 : vector<8x32xf32>
    %136 = vector.extract_strided_slice %123 {offsets = [0, 64], sizes = [8, 32], strides = [1, 1]} : vector<8x128xf32> to vector<8x32xf32>
    %137 = math.tanh %136 : vector<8x32xf32>
    %138 = vector.extract_strided_slice %123 {offsets = [0, 96], sizes = [8, 32], strides = [1, 1]} : vector<8x128xf32> to vector<8x32xf32>
    %139 = arith.negf %138 : vector<8x32xf32>
    %140 = math.exp %139 : vector<8x32xf32>
    %cst_72 = arith.constant 1.000000e+00 : f32
    %141 = vector.broadcast %cst_72 : f32 to vector<8x32xf32>
    %142 = arith.addf %141, %140 : vector<8x32xf32>
    %143 = arith.divf %141, %142 : vector<8x32xf32>
    %144 = arith.mulf %135, %12 : vector<8x32xf32>
    %145 = arith.mulf %129, %137 : vector<8x32xf32>
    %146 = arith.addf %144, %145 : vector<8x32xf32>
    %147 = math.tanh %146 : vector<8x32xf32>
    %148 = arith.mulf %143, %147 : vector<8x32xf32>
    %c0_73 = arith.constant 0 : index
    %c0_74 = arith.constant 0 : index
    %c0_75 = arith.constant 0 : index
    %149 = vector.load %arg16[%c0_73, %c0_74, %c0_75] : memref<2x8x32xf32, #tpu.memory_space<vmem>>, vector<1x8x32xf32>
    %150 = vector.shape_cast %149 : vector<1x8x32xf32> to vector<8x32xf32>
    %151 = vector.shape_cast %46 : vector<8x32xf32> to vector<1x8x32xf32>
    tpu.vector_store %arg16[%c0_73, %c0_74, %c0_75], %151 {strides = array<i32>} : memref<2x8x32xf32, #tpu.memory_space<vmem>>, vector<1x8x32xf32>,
    %c1_76 = arith.constant 1 : index
    %c0_77 = arith.constant 0 : index
    %c0_78 = arith.constant 0 : index
    %152 = vector.load %arg16[%c1_76, %c0_77, %c0_78] : memref<2x8x32xf32, #tpu.memory_space<vmem>>, vector<1x8x32xf32>
    %153 = vector.shape_cast %152 : vector<1x8x32xf32> to vector<8x32xf32>
    %154 = vector.shape_cast %148 : vector<8x32xf32> to vector<1x8x32xf32>
    tpu.vector_store %arg16[%c1_76, %c0_77, %c0_78], %154 {strides = array<i32>} : memref<2x8x32xf32, #tpu.memory_space<vmem>>, vector<1x8x32xf32>,
    %c0_79 = arith.constant 0 : index
    %c0_80 = arith.constant 0 : index
    %c0_81 = arith.constant 0 : index
    %155 = vector.load %arg17[%c0_79, %c0_80, %c0_81] : memref<2x8x32xf32, #tpu.memory_space<vmem>>, vector<1x8x32xf32>
    %156 = vector.shape_cast %155 : vector<1x8x32xf32> to vector<8x32xf32>
    %157 = vector.shape_cast %44 : vector<8x32xf32> to vector<1x8x32xf32>
    tpu.vector_store %arg17[%c0_79, %c0_80, %c0_81], %157 {strides = array<i32>} : memref<2x8x32xf32, #tpu.memory_space<vmem>>, vector<1x8x32xf32>,
    %c1_82 = arith.constant 1 : index
    %c0_83 = arith.constant 0 : index
    %c0_84 = arith.constant 0 : index
    %158 = vector.load %arg17[%c1_82, %c0_83, %c0_84] : memref<2x8x32xf32, #tpu.memory_space<vmem>>, vector<1x8x32xf32>
    %159 = vector.shape_cast %158 : vector<1x8x32xf32> to vector<8x32xf32>
    %160 = vector.shape_cast %146 : vector<8x32xf32> to vector<1x8x32xf32>
    tpu.vector_store %arg17[%c1_82, %c0_83, %c0_84], %160 {strides = array<i32>} : memref<2x8x32xf32, #tpu.memory_space<vmem>>, vector<1x8x32xf32>,
    %c0_85 = arith.constant 0 : index
    %c0_86 = arith.constant 0 : index
    %c0_87 = arith.constant 0 : index
    %161 = vector.load %arg15[%c0_85, %c0_86, %c0_87] : memref<1x8x32xf32, #tpu.memory_space<vmem>>, vector<1x8x32xf32>
    %162 = vector.shape_cast %161 : vector<1x8x32xf32> to vector<8x32xf32>
    %163 = vector.shape_cast %148 : vector<8x32xf32> to vector<1x8x32xf32>
    tpu.vector_store %arg15[%c0_85, %c0_86, %c0_87], %163 {strides = array<i32>} : memref<1x8x32xf32, #tpu.memory_space<vmem>>, vector<1x8x32xf32>,
    %c0_88 = arith.constant 0 : index
    %c0_89 = arith.constant 0 : index
    %c0_90 = arith.constant 0 : index
    %164 = vector.load %arg18[%c0_88, %c0_89, %c0_90] : memref<1x8x128xf32, #tpu.memory_space<vmem>>, vector<1x8x128xf32>
    %165 = vector.shape_cast %164 : vector<1x8x128xf32> to vector<8x128xf32>
    %166 = vector.shape_cast %87 : vector<8x128xf32> to vector<1x8x128xf32>
    tpu.vector_store %arg18[%c0_88, %c0_89, %c0_90], %166 {strides = array<i32>} : memref<1x8x128xf32, #tpu.memory_space<vmem>>, vector<1x8x128xf32>,
    return
  }
  func.func @transform_0(%arg0: i32) -> (i32, i32, i32) {
    %c0_i32 = arith.constant 0 : i32
    %c0_i32_0 = arith.constant 0 : i32
    %c0_i32_1 = arith.constant 0 : i32
    return %arg0, %c0_i32, %c0_i32_0 : i32, i32, i32
  }
  func.func @transform_1(%arg0: i32) -> (i32, i32) {
    %c0_i32 = arith.constant 0 : i32
    %c0_i32_0 = arith.constant 0 : i32
    %c0_i32_1 = arith.constant 0 : i32
    return %c0_i32, %c0_i32_0 : i32, i32
  }
  func.func @transform_2(%arg0: i32) -> (i32, i32, i32) {
    %c0_i32 = arith.constant 0 : i32
    %c0_i32_0 = arith.constant 0 : i32
    %c0_i32_1 = arith.constant 0 : i32
    %c0_i32_2 = arith.constant 0 : i32
    return %c0_i32, %c0_i32_0, %c0_i32_1 : i32, i32, i32
  }
  func.func @transform_3(%arg0: i32) -> (i32, i32, i32) {
    %c0_i32 = arith.constant 0 : i32
    %c0_i32_0 = arith.constant 0 : i32
    %c0_i32_1 = arith.constant 0 : i32
    %c0_i32_2 = arith.constant 0 : i32
    return %c0_i32, %c0_i32_0, %c0_i32_1 : i32, i32, i32
  }
  func.func @transform_4(%arg0: i32) -> (i32, i32) {
    %c0_i32 = arith.constant 0 : i32
    %c0_i32_0 = arith.constant 0 : i32
    %c0_i32_1 = arith.constant 0 : i32
    return %c0_i32, %c0_i32_0 : i32, i32
  }
  func.func @transform_5(%arg0: i32) -> (i32, i32) {
    %c0_i32 = arith.constant 0 : i32
    %c0_i32_0 = arith.constant 0 : i32
    %c0_i32_1 = arith.constant 0 : i32
    return %c0_i32, %c0_i32_0 : i32, i32
  }
  func.func @transform_6(%arg0: i32) -> (i32, i32, i32) {
    %c0_i32 = arith.constant 0 : i32
    %c0_i32_0 = arith.constant 0 : i32
    %c0_i32_1 = arith.constant 0 : i32
    %c0_i32_2 = arith.constant 0 : i32
    return %c0_i32, %c0_i32_0, %c0_i32_1 : i32, i32, i32
  }
  func.func @transform_7(%arg0: i32) -> (i32, i32, i32) {
    %c0_i32 = arith.constant 0 : i32
    %c0_i32_0 = arith.constant 0 : i32
    %c0_i32_1 = arith.constant 0 : i32
    %c0_i32_2 = arith.constant 0 : i32
    return %c0_i32, %c0_i32_0, %c0_i32_1 : i32, i32, i32
  }
  func.func @transform_8(%arg0: i32) -> (i32, i32) {
    %c0_i32 = arith.constant 0 : i32
    %c0_i32_0 = arith.constant 0 : i32
    %c0_i32_1 = arith.constant 0 : i32
    return %c0_i32, %c0_i32_0 : i32, i32
  }
  func.func @transform_9(%arg0: i32) -> (i32, i32) {
    %c0_i32 = arith.constant 0 : i32
    %c0_i32_0 = arith.constant 0 : i32
    %c0_i32_1 = arith.constant 0 : i32
    return %c0_i32, %c0_i32_0 : i32, i32
  }
  func.func @transform_10(%arg0: i32) -> (i32, i32) {
    %c0_i32 = arith.constant 0 : i32
    %c0_i32_0 = arith.constant 0 : i32
    %c0_i32_1 = arith.constant 0 : i32
    return %c0_i32, %c0_i32_0 : i32, i32
  }
  func.func @transform_11(%arg0: i32) -> (i32, i32) {
    %c0_i32 = arith.constant 0 : i32
    %c0_i32_0 = arith.constant 0 : i32
    %c0_i32_1 = arith.constant 0 : i32
    return %c0_i32, %c0_i32_0 : i32, i32
  }
  func.func @transform_12(%arg0: i32) -> (i32, i32) {
    %c0_i32 = arith.constant 0 : i32
    %c0_i32_0 = arith.constant 0 : i32
    %c0_i32_1 = arith.constant 0 : i32
    return %c0_i32, %c0_i32_0 : i32, i32
  }
  func.func @transform_13(%arg0: i32) -> (i32, i32) {
    %c0_i32 = arith.constant 0 : i32
    %c0_i32_0 = arith.constant 0 : i32
    %c0_i32_1 = arith.constant 0 : i32
    return %c0_i32, %c0_i32_0 : i32, i32
  }
  func.func @transform_14(%arg0: i32) -> (i32, i32, i32) {
    %c0_i32 = arith.constant 0 : i32
    %c0_i32_0 = arith.constant 0 : i32
    %c0_i32_1 = arith.constant 0 : i32
    return %arg0, %c0_i32, %c0_i32_0 : i32, i32, i32
  }
  func.func @transform_15(%arg0: i32) -> (i32, i32, i32) {
    %c0_i32 = arith.constant 0 : i32
    %c0_i32_0 = arith.constant 0 : i32
    %c0_i32_1 = arith.constant 0 : i32
    %c0_i32_2 = arith.constant 0 : i32
    return %c0_i32, %c0_i32_0, %c0_i32_1 : i32, i32, i32
  }
  func.func @transform_16(%arg0: i32) -> (i32, i32, i32) {
    %c0_i32 = arith.constant 0 : i32
    %c0_i32_0 = arith.constant 0 : i32
    %c0_i32_1 = arith.constant 0 : i32
    %c0_i32_2 = arith.constant 0 : i32
    return %c0_i32, %c0_i32_0, %c0_i32_1 : i32, i32, i32
  }
  func.func @transform_17(%arg0: i32) -> (i32, i32, i32) {
    %c0_i32 = arith.constant 0 : i32
    %c0_i32_0 = arith.constant 0 : i32
    %c0_i32_1 = arith.constant 0 : i32
    return %arg0, %c0_i32, %c0_i32_0 : i32, i32, i32
  }
}

</mosaic_0001>

<bundles_post_ra>
// kernel: conv_hidden_core_decode.1
= control target key start
LH: loop header
LB: loop body
LE: loop exit
PB: predicated region body
PF: predicated region fallthrough
CT: control target
= control target key end

     0   :  { %s7673_s24 = smov 0   ;;  %s13402_s0 = inlined_call_operand.vmem [shape: f32[4,8,32], index: 0, kind: input, shape index: {}]   ;;  %s13403_s1 = inlined_call_operand.vmem [shape: f32[8,128], index: 1, kind: input, shape index: {}]   ;;  %s13404_s2 = inlined_call_operand.vmem [shape: f32[8,128,32], index: 2, kind: input, shape index: {}]   ;;  %s13405_s3 = inlined_call_operand.vmem [shape: f32[8,16,32], index: 3, kind: input, shape index: {}]   ;;  %s13406_s4 = inlined_call_operand.vmem [shape: f32[8,32], index: 4, kind: input, shape index: {}]   ;;  %s13407_s5 = inlined_call_operand.vmem [shape: f32[1,128], index: 5, kind: input, shape index: {}]   ;;  %s13408_s6 = inlined_call_operand.vmem [shape: f32[2,8,32], index: 6, kind: input, shape index: {}]   ;;  %s13409_s7 = inlined_call_operand.vmem [shape: f32[2,8,32], index: 7, kind: input, shape index: {}]   ;;  %s13410_s8 = inlined_call_operand.vmem [shape: bf16[128,128], index: 8, kind: input, shape index: {}]   ;;  %s13411_s9 = inlined_call_operand.vmem [shape: bf16[128,128], index: 9, kind: input, shape index: {}]   ;;  %s13412_s10 = inlined_call_operand.vmem [shape: f32[1,128], index: 10, kind: input, shape index: {}]   ;;  %s13413_s11 = inlined_call_operand.vmem [shape: f32[3,32], index: 11, kind: input, shape index: {}]   ;;  %s13414_s12 = inlined_call_operand.vmem [shape: f32[1,32], index: 12, kind: input, shape index: {}]   ;;  %s13415_s13 = inlined_call_operand.vmem [shape: bf16[32,32], index: 13, kind: input, shape index: {}]   ;;  %s13416_s14 = inlined_call_operand.vmem [shape: f32[4,8,32], index: 14, kind: output, shape index: {0}]   ;;  %s13417_s15 = inlined_call_operand.vmem [shape: f32[2,8,32], index: 15, kind: output, shape index: {1}]   ;;  %s13418_s16 = inlined_call_operand.vmem [shape: f32[2,8,32], index: 16, kind: output, shape index: {2}]   ;;  %s13419_s17 = inlined_call_operand.vmem [shape: f32[4,8,128], index: 17, kind: output, shape index: {3}]  }
   0x1   :  { %13743 = sst [smem:[#allocation209_spill]] %s13402_s0 }
   0x2   :  { %13744 = sst [smem:[#allocation210_spill]] %s13403_s1 }
   0x3 LB: > { %13745 = sst [smem:[#allocation4_spill]] %s7568_s24  ;;  %s6990_s25 = sadd.s32 4294967295, %s7568_s24   ;;  %s7568_s24 = sphi %s7673_s24, %s28_s24  }
   0x4   : > { %p6994_p0 = scmp.ge.s32.totalorder %s7568_s24, 1  ;;  %p483_p1 = scmp.lt.s32.totalorder %s7568_s24, 5 }
   0x6   : > { %p484_p2 = pnand %p6994_p0, %p483_p1 }
   0x8   : > { %487 = sbr.rel (%p484_p2) target bundleno = 3385 (0xd39), region = 76 }
   0xd   : > { %p537_p3 = scmp.lt.s32.totalorder %s6990_s25, 3  ;;  %s13746_s0 = sld [smem:[#allocation209_spill]] }
   0xe   : > { %p6998_p4 = scmp.ne.s32.totalorder %s6990_s25, 0 }
   0xf   : > { %s538_s26 = scalar_select %p537_p3, %s6990_s25, 3 }
  0x10   : > { %553 = sbr.rel (%p6998_p4) target bundleno = 25 (0x19), region = 80 }
  0x11   : > { %s7681_s27 = sshll.u32 %s538_s26, 3 }
  0x12   : > { %s548_s22 = scalar_lea.vmem %s13419_s17, %s7681_s27 }
  0x13   : > { %s540_s30 = scalar_lea.vmem %s13746_s0, %s7681_s27 }
  0x15   : > { %v554_v0 = vld [vmem:[%s13408_s6] sm:$0xff]  ;;  %vm556_vm0 = vcmask 261120   ;;  %v555_v1 = vld [vmem:[%s13408_s6 + $0x8] sm:$0xff]  ;;  %v7570_v4 = vmov 0.0  }
  0x16   : > { %v559_v2 = vld [vmem:[%s13409_s7] sm:$0xff]  ;;  %557 = vst.msk [vmem:[%s13417_s15] sm:$0xff] %vm556_vm0, %v554_v0  ;;  %558 = vst.msk [vmem:[%s13417_s15 + $0x8] sm:$0xff] %vm556_vm0, %v555_v1  ;;  %v560_v3 = vld [vmem:[%s13409_s7 + $0x8] sm:$0xff] }
  0x17   : > { %561 = vst.msk [vmem:[%s13418_s16] sm:$0xff] %vm556_vm0, %v559_v2  ;;  %563 = vst [vmem:[#allocation2] sm:$0xff] %v7570_v4 }
  0x18   : > { %564 = vst [vmem:[#allocation3] sm:$0xff] %v7570_v4  ;;  %562 = vst.msk [vmem:[%s13418_s16 + $0x8] sm:$0xff] %vm556_vm0, %v560_v3 }
  0x19 PF: > { %v565_v5 = vld [vmem:[%s540_s30] sm:$0xff]  ;;  %v7124_v7 = vld [vmem:[%s13410_s8 + $0x38] sm:$0xff]   ;;  %s7571_s20 = smov 32   ;;  %v13421_v8 = vmov 0.0   ;;  %v7125_v9 = vld [vmem:[%s13410_s8 + $0x30] sm:$0xff]   ;;  %vm13562_vm1 = vcmask 261120   ;;  %s14900_s19 = scalar_lea.vmem %s13416_s14, %s7681_s27 }
  0x1a   : > { %575 = vrot.lane.b32.xlu0 %v565_v5, %s7571_s20  ;;  %7053 = vmatprep.subr.bf16.mxu0 %v13421_v8  ;;  %s7573_s30 = smov 64   ;;  %v7126_v11 = vld [vmem:[%s13410_s8 + $0x28] sm:$0xff]   ;;  %vm7574_vm2 = vmmov 0   ;;  %v7127_v12 = vld [vmem:[%s13410_s8 + $0x20] sm:$0xff]   ;;  %v7128_v15 = vld [vmem:[%s13410_s8 + $0x18] sm:$0xff]   ;;  %vm578_vm3 = vcmask 523520  }
  0x1b   : > { %7054 = vmatpush3.bf16.msra.mxu0 %v7124_v7  ;;  %7073 = vmatprep.subr.bf16.mxu1 %v13421_v8  ;;  %v7014_v14 = vld [vmem:[%s13407_s5] ss:$0 sm:$0xff]  ;;  %v7129_v16 = vld [vmem:[%s13410_s8 + $0x10] sm:$0xff]   ;;  %v7130_v17 = vld [vmem:[%s13410_s8 + $0x8] sm:$0xff]   ;;  %vm584_vm4 = vcmask 785920   ;;  %s13748_s1 = sld [smem:[#allocation210_spill]] }
  0x1c   : > { %7055 = vmatprep.subr.bf16.mxu0 %v13421_v8  ;;  %7069 = vmatprep.mubr.msk.bf16.mxu0 %vm7574_vm2, %v13421_v8  ;;  %v7131_v18 = vld [vmem:[%s13410_s8] sm:$0xff]   ;;  %v7132_v59 = vld [vmem:[%s13415_s13 + $0x8] sm:$0xff]   ;;  %s7575_s23 = smov 33   ;;  %s7576_s26 = smov 1   ;;  %vm728_vm5 = vcmask 7168   ;;  %vm736_vm6 = vcmask 252928  }
  0x1d   : > { %v566_v6 = vld [vmem:[%s13417_s15] sm:$0xff]  ;;  %v7736_v10 = vld [vmem:[%s13417_s15 + $0x8] sm:$0xff]  ;;  %7077 = vmatprep.mubr.msk.bf16.mxu1 %vm7574_vm2, %v13421_v8  ;;  %7074 = vmatpush3.bf16.msra.mxu1 %v7132_v59  ;;  %s7577_s29 = smov 63   ;;  %s7578_s0 = smov 31   ;;  %v7579_v4 = vmov 1966171168  }
  0x1e   : > { %581 = vrot.lane.b32.xlu0 %v566_v6, %s7573_s30  ;;  %13747 = vst [vmem:[#allocation5_spill] sm:$0xff] %v7736_v10  ;;  %573 = vst.msk [vmem:[#allocation2] sm:$0xff] %vm13562_vm1, %v7736_v10  ;;  %v569_v13 = vld [vmem:[%s13418_s16] sm:$0xff]  ;;  %7075 = vmatprep.subr.bf16.mxu1 %v13421_v8  ;;  %v901_v5 = vunpack.c.l.s4 %v7579_v4  ;;  %v13423_v6 = vlaneseq  ;;  %vm2236_vm7 = vcmask 130112   ;;  %vm2243_vm8 = vcmask 195712  }
  0x1f   : > { %7056 = vmatpush3.bf16.msra.mxu0 %v7125_v9  ;;  %701 = vrot.lane.b32.xlu1 %v569_v13, %s7571_s20  ;;  %v7133_v60 = vld [vmem:[%s13415_s13] sm:$0xff]   ;;  %vm2250_vm9 = vcmask 261312   ;;  %vm2257_vm10 = vcmask 326912   ;;  %vm13564_vm11 = vcmask 392512   ;;  %vm2271_vm12 = vcmask 458112  }
  0x20   : > { %7057 = vmatprep.subr.bf16.mxu0 %v13421_v8  ;;  %v7010_v1 = vld [vmem:[%s13413_s11] ss:$0 sm:$0xff]  ;;  %v7011_v3 = vld [vmem:[%s13413_s11 + $0x1] ss:$0 sm:$0xff]  ;;  %v7012_v7 = vld [vmem:[%s13413_s11 + $0x2] ss:$0 sm:$0xff] }
  0x21   : > { %v604_v23 = vld [vmem:[%s13748_s1] sm:$0xff]  ;;  %7076 = vmatpush3.bf16.msra.mxu1 %v7133_v60  ;;  %vm2278_vm13 = vcmask 523712   ;;  %vm2285_vm14 = vcmask 589312   ;;  %vm2292_vm15 = vcmask 654912   ;;  %vm13565_vm0 = vcmask 720512   ;;  %s7581_s1 = smov 80  }
  0x22   : > { %1507 = vbcast.lane.b32.xlu0 %v7014_v14, 256  ;;  %7081 = vmatprep.subr.bf16.mxu1 %v13421_v8  ;;  %v778_v4 = vld [vmem:[%s13404_s2 + $0x40] sm:$0xff] }
  0x23   : > { %7058 = vmatpush3.bf16.msra.mxu0 %v7126_v11  ;;  %1511 = vbcast.lane.b32.xlu1 %v7014_v14, 264 }
  0x24   : > { %7059 = vmatprep.subr.bf16.mxu0 %v13421_v8 }
  0x26   : > { %1519 = vbcast.lane.b32.xlu0 %v7014_v14, 280 }
  0x27   : > { %7060 = vmatpush3.bf16.msra.mxu0 %v7127_v12  ;;  %1515 = vbcast.lane.b32.xlu1 %v7014_v14, 272 }
  0x28   : > { %7061 = vmatprep.subr.bf16.mxu0 %v13421_v8 }
  0x2a   : > { %1527 = vbcast.lane.b32.xlu0 %v7014_v14, 296 }
  0x2b   : > { %7062 = vmatpush3.bf16.msra.mxu0 %v7128_v15  ;;  %1523 = vbcast.lane.b32.xlu1 %v7014_v14, 288  ;;  %v902_v15 = vunpack.c.0.s8 %v901_v5  ;;  %v779_v5 = vld [vmem:[%s13404_s2 + $0x48] sm:$0xff] }
  0x2c   : > { %7063 = vmatprep.subr.bf16.mxu0 %v13421_v8 }
  0x2e   : > { %1535 = vbcast.lane.b32.xlu0 %v7014_v14, 312 }
  0x2f   : > { %7064 = vmatpush3.bf16.msra.mxu0 %v7129_v16  ;;  %1531 = vbcast.lane.b32.xlu1 %v7014_v14, 304  ;;  %v7846_v16 = vshrl.u32 %v13423_v6, 7  ;;  %v870_v6 = vld [vmem:[%s13404_s2 + $0x320] sm:$0xff] }
  0x30   : > { %7065 = vmatprep.subr.bf16.mxu0 %v13421_v8 }
  0x31   : > { %13751 = vst [vmem:[#allocation8_spill] sm:$0xff] %v7846_v16 }
  0x32   : > { %1543 = vbcast.lane.b32.xlu0 %v7014_v14, 328 }
  0x33   : > { %7066 = vmatpush3.bf16.msra.mxu0 %v7130_v17  ;;  %1539 = vbcast.lane.b32.xlu1 %v7014_v14, 320 }
  0x34   : > { %7067 = vmatprep.subr.bf16.mxu0 %v13421_v8 }
  0x36   : > { %1551 = vbcast.lane.b32.xlu0 %v7014_v14, 344 }
  0x37   : > { %7068 = vmatpush3.bf16.msra.mxu0 %v7131_v18  ;;  %1547 = vbcast.lane.b32.xlu1 %v7014_v14, 336  ;;  %v7013_v18 = vld [vmem:[%s13414_s12] ss:$0 sm:$0xff] }
  0x3a   : > { %1559 = vbcast.lane.b32.xlu0 %v7014_v14, 360 }
  0x3b   : > { %1555 = vbcast.lane.b32.xlu1 %v7014_v14, 352 }
  0x3e   : > { %1567 = vbcast.lane.b32.xlu0 %v7014_v14, 376 }
  0x3f   : > { %1563 = vbcast.lane.b32.xlu1 %v7014_v14, 368 }
  0x8c   : > { %v576_v19 = vpop.permute.xlu0 %575 }
  0x8d   : > { %579 = vst.msk [vmem:[#allocation2] sm:$0xff] %vm578_vm3, %v576_v19  ;;  %vm2313_vm3 = vcmask 851712  }
  0x90   : > { %v582_v20 = vpop.permute.xlu0 %581 }
  0x91   : > { %585 = vst.msk [vmem:[#allocation2] sm:$0xff] %vm584_vm4, %v582_v20  ;;  %v702_v30 = vpop.permute.xlu1 %701  ;;  %v7852_v20 = vsub.s32 %v902_v15, %v7846_v16  ;;  %vm2320_vm4 = vcmask 917312  }
  0x93   : > { %13752 = vst [vmem:[#allocation9_spill] sm:$0xff] %v7852_v20 }
  0x94   : > { %v7796_v45 = vpop.permute.xlu0 %1507 }
  0x95   : > { %v7779_v31 = vpop.permute.xlu1 %1511 }
  0x98   : > { %v586_v21 = vld [vmem:[#allocation2] sm:$0xff]  ;;  %v7798_v46 = vpop.permute.xlu0 %1519 }
  0x99   : > { %v587_v22 = vpack.c.bf16 %v586_v21, %v586_v21  ;;  %v7781_v32 = vpop.permute.xlu1 %1515 }
  0x9b   : > { %7070 = vmatmul.mubr.bf16.vlgmr.msra.gmra.mxu0 %v587_v22 }
  0x9c   : > { %v7800_v47 = vpop.permute.xlu0 %1527 }
  0x9d   : > { %v7783_v34 = vpop.permute.xlu1 %1523 }
  0xa0   : > { %v7802_v48 = vpop.permute.xlu0 %1535 }
  0xa1   : > { %v7785_v35 = vpop.permute.xlu1 %1531 }
  0xa4   : > { %v7804_v49 = vpop.permute.xlu0 %1543 }
  0xa5   : > { %v7787_v36 = vpop.permute.xlu1 %1539 }
  0xa8   : > { %v7806_v50 = vpop.permute.xlu0 %1551 }
  0xa9   : > { %v7789_v38 = vpop.permute.xlu1 %1547 }
  0xac   : > { %v7808_v51 = vpop.permute.xlu0 %1559 }
  0xad   : > { %v7791_v40 = vpop.permute.xlu1 %1555 }
  0xb0   : > { %v7810_v52 = vpop.permute.xlu0 %1567 }
  0xb1   : > { %v7793_v41 = vpop.permute.xlu1 %1563 }
 0x15b   : > { %v687_v24 = vpop.f32.mrf.mxu0 }
 0x15c   : > { %v688_v25 = vadd.f32 %v687_v24, %v604_v23 }
 0x15d   : > { %v7071_v26 = vpop.f32.mrf.mxu0 }
 0x15e   : > { %7142 = vtanh.f32 %v688_v25  ;;  %v7009_v33 = vmul.f32 -1.442695, %v688_v25  ;;  %v7861_v25 = vsub.s32 0, %v7846_v16 }
 0x15f   : > { %v690_v27 = vpop.f32.mrf.mxu0 }
 0x160   : > { %7144 = vpow2.f32 %v7009_v33  ;;  %13753 = vst [vmem:[#allocation10_spill] sm:$0xff] %v7861_v25  ;;  %v771_v27 = vld [vmem:[%s13404_s2 + $0x8] sm:$0xff]  ;;  %v773_v33 = vld [vmem:[%s13404_s2 + $0x18] sm:$0xff] }
 0x161   : > { %v7072_v28 = vpop.f32.mrf.mxu0 }
 0x162   : > { %v770_v28 = vld [vmem:[%s13404_s2] sm:$0xff] }
 0x16b   : > { %v7143_v29 = vpop.eup %7142 }
 0x16c   : > { %706 = vrot.lane.b32.xlu1 %v7143_v29, %s7573_s30 }
 0x16d   : > { %v7145_v37 = vpop.eup %7144 }
 0x16e   : > { %v696_v39 = vadd.f32 1.0, %v7145_v37 }
 0x170   : > { %7146 = vrcp.f32 %v696_v39 }
 0x17d   : > { %v7147_v42 = vpop.eup %7146 }
 0x17e   : > { %v704_v53 = vmul.f32 %v7147_v42, %v702_v30  ;;  %v772_v30 = vld [vmem:[%s13404_s2 + $0x10] sm:$0xff] }
 0x1de   : > { %v707_v43 = vpop.permute.xlu1 %706 }
 0x1df   : > { %v709_v44 = vmul.f32 %v7147_v42, %v707_v43 }
 0x1e1   : > { %711 = vrot.lane.b32.xlu0 %v709_v44, %s7571_s20 }
 0x253   : > { %v712_v54 = vpop.permute.xlu0 %711 }
 0x254   : > { %v7812_v55 = vadd.f32 %v712_v54, %v704_v53  ;;  %v774_v54 = vld [vmem:[%s13404_s2 + $0x20] sm:$0xff] }
 0x256   : > { %13749 = vst [vmem:[#allocation6_spill] sm:$0xff] %v7812_v55  ;;  %7148 = vtanh.f32 %v7812_v55 }
 0x263   : > { %v7149_v56 = vpop.eup %7148 }
 0x264   : > { %717 = vrot.lane.b32.xlu1 %v7149_v56, %s7573_s30  ;;  %v775_v56 = vld [vmem:[%s13404_s2 + $0x28] sm:$0xff] }
 0x2d6   : > { %v718_v57 = vpop.permute.xlu1 %717 }
 0x2d7   : > { %v7816_v58 = vmul.f32 %v7147_v42, %v718_v57 }
 0x2d9   : > { %13750 = vst [vmem:[#allocation7_spill] sm:$0xff] %v7816_v58  ;;  %725 = vrot.lane.b32.xlu1 %v7816_v58, %s7575_s23  ;;  %722 = vrot.lane.b32.xlu0 %v7816_v58, %s7576_s26  ;;  %s7582_s26 = smov 96  }
 0x2dd   : > { %733 = vrot.lane.b32.xlu1 %v7816_v58, %s7577_s29  ;;  %730 = vrot.lane.b32.xlu0 %v7816_v58, %s7578_s0 }
 0x2e1   : > { %749 = vrot.lane.b32.xlu0 %v7816_v58, %s7571_s20 }
 0x34b   : > { %v726_v61 = vpop.permute.xlu1 %725  ;;  %v723_v62 = vpop.permute.xlu0 %722 }
 0x34c   : > { %v729_v2 = vsel %vm728_vm5, %v723_v62, %v726_v61  ;;  %v776_v62 = vld [vmem:[%s13404_s2 + $0x30] sm:$0xff]  ;;  %vm2327_vm5 = vcmask 982912  }
 0x34d   : > { %v743_v12 = vmul.f32 %v7010_v1, %v729_v2 }
 0x34f   : > { %v731_v63 = vpop.permute.xlu0 %730  ;;  %v734_v0 = vpop.permute.xlu1 %733 }
 0x350   : > { %v737_v9 = vsel %vm736_vm6, %v731_v63, %v734_v0  ;;  %v777_v63 = vld [vmem:[%s13404_s2 + $0x38] sm:$0xff]  ;;  %vm2334_vm6 = vcmask 1048512  }
 0x351   : > { %v759_v14 = vmul.f32 %v7012_v7, %v737_v9 }
 0x353   : > { %v750_v11 = vpop.permute.xlu0 %749 }
 0x354   : > { %v752_v13 = vmul.f32 %v7011_v3, %v750_v11  ;;  %6236 = vst.msk [vmem:[%s13417_s15] sm:$0xff] %vm13562_vm1, %v750_v11 }
 0x356   : > { %v753_v17 = vadd.f32 %v752_v13, %v743_v12  ;;  %v780_v13 = vld [vmem:[%s13404_s2 + $0x50] sm:$0xff] }
 0x358   : > { %v760_v19 = vadd.f32 %v759_v14, %v753_v17  ;;  %v781_v14 = vld [vmem:[%s13404_s2 + $0x58] sm:$0xff] }
 0x35a   : > { %v768_v21 = vadd.f32 %v7013_v18, %v760_v19 }
 0x35c   : > { %v7854_v22 = vmax.f32 %v768_v21, 0.0 }
 0x35e   : > { %v906_v23 = vrot.slane %v7854_v22, %v7852_v20  ;;  %v5727_v24 = vpack.c.bf16 %v7854_v22, %v7854_v22 }
 0x360   : > { %v7864_v26 = vrot.slane %v906_v23, %v7852_v20  ;;  %7078 = vmatmul.mubr.msk.bf16.vlgmr.msra.gmra.mxu1 %vm13562_vm1, %v5727_v24  ;;  %v914_v15 = vcombine.high %v906_v23, %v906_v23  ;;  %v782_v24 = vld [vmem:[%s13404_s2 + $0x60] sm:$0xff] }
 0x361   : > { %7097 = vmatprep.mubr.msk.bf16.mxu1 %vm7574_vm2, %v13421_v8  ;;  %v868_v8 = vld [vmem:[%s13404_s2 + $0x310] sm:$0xff]  ;;  %vm13566_vm2 = vcmask 786112  }
 0x362   : > { %v951_v29 = vrot.slane %v7864_v26, %v7861_v25 }
 0x364   : > { %v989_v37 = vmul.f32 %v951_v29, %v771_v27  ;;  %v988_v39 = vmul.f32 %v951_v29, %v770_v28  ;;  %v990_v44 = vmul.f32 %v951_v29, %v772_v30  ;;  %v991_v53 = vmul.f32 %v951_v29, %v773_v33  ;;  %v783_v27 = vld [vmem:[%s13404_s2 + $0x68] sm:$0xff] }
 0x365   : > { %v992_v60 = vmul.f32 %v951_v29, %v774_v54  ;;  %v993_v61 = vmul.f32 %v951_v29, %v775_v56  ;;  %v994_v2 = vmul.f32 %v951_v29, %v776_v62  ;;  %v995_v3 = vmul.f32 %v951_v29, %v777_v63 }
 0x366   : > { %v1119_v42 = vsel %vm13562_vm1, %v989_v37, 0.0  ;;  %v1116_v43 = vsel %vm13562_vm1, %v988_v39, 0.0  ;;  %v1122_v57 = vsel %vm13562_vm1, %v990_v44, 0.0  ;;  %v1125_v59 = vsel %vm13562_vm1, %v991_v53, 0.0  ;;  %v784_v39 = vld [vmem:[%s13404_s2 + $0x70] sm:$0xff] }
 0x367   : > { %1120 = vadd.xlane.f32.xlu0 %v1119_v42  ;;  %1117 = vadd.xlane.f32.xlu1 %v1116_v43  ;;  %v1128_v0 = vsel %vm13562_vm1, %v992_v60, 0.0  ;;  %v1131_v1 = vsel %vm13562_vm1, %v993_v61, 0.0  ;;  %v1134_v7 = vsel %vm13562_vm1, %v994_v2, 0.0  ;;  %v1137_v9 = vsel %vm13562_vm1, %v995_v3, 0.0  ;;  %v785_v42 = vld [vmem:[%s13404_s2 + $0x78] sm:$0xff] }
 0x368   : > { %v996_v11 = vmul.f32 %v951_v29, %v778_v4  ;;  %v997_v12 = vmul.f32 %v951_v29, %v779_v5  ;;  %v998_v19 = vmul.f32 %v951_v29, %v780_v13  ;;  %v999_v21 = vmul.f32 %v951_v29, %v781_v14  ;;  %v791_v5 = vld [vmem:[%s13404_s2 + $0xa8] sm:$0xff]  ;;  %v793_v14 = vld [vmem:[%s13404_s2 + $0xb8] sm:$0xff] }
 0x369   : > { %v7924_v28 = vrot.slane %v914_v15, %v7852_v20  ;;  %v1000_v33 = vmul.f32 %v951_v29, %v782_v24  ;;  %v1001_v37 = vmul.f32 %v951_v29, %v783_v27  ;;  %v1002_v54 = vmul.f32 %v951_v29, %v784_v39  ;;  %v792_v15 = vld [vmem:[%s13404_s2 + $0xb0] sm:$0xff]  ;;  %v795_v24 = vld [vmem:[%s13404_s2 + $0xc8] sm:$0xff]  ;;  %v794_v27 = vld [vmem:[%s13404_s2 + $0xc0] sm:$0xff] }
 0x36a   : > { %v1140_v17 = vsel %vm13562_vm1, %v996_v11, 0.0  ;;  %v1143_v18 = vsel %vm13562_vm1, %v997_v12, 0.0  ;;  %v1146_v23 = vsel %vm13562_vm1, %v998_v19, 0.0  ;;  %v1149_v30 = vsel %vm13562_vm1, %v999_v21, 0.0  ;;  %v797_v39 = vld [vmem:[%s13404_s2 + $0xd8] sm:$0xff] }
 0x36b   : > { %1123 = vadd.xlane.f32.xlu0 %v1122_v57  ;;  %1126 = vadd.xlane.f32.xlu1 %v1125_v59  ;;  %v7936_v43 = vrot.slane %v7924_v28, %v7861_v25  ;;  %v1152_v44 = vsel %vm13562_vm1, %v1000_v33, 0.0  ;;  %v1155_v53 = vsel %vm13562_vm1, %v1001_v37, 0.0  ;;  %v1003_v56 = vmul.f32 %v951_v29, %v785_v42  ;;  %v787_v57 = vld [vmem:[%s13404_s2 + $0x88] sm:$0xff]  ;;  %v786_v59 = vld [vmem:[%s13404_s2 + $0x80] sm:$0xff]  ;;  %v789_v29 = vld [vmem:[%s13404_s2 + $0x98] sm:$0xff] }
 0x36c   : > { %v1158_v60 = vsel %vm13562_vm1, %v1002_v54, 0.0  ;;  %v796_v42 = vld [vmem:[%s13404_s2 + $0xd0] sm:$0xff] }
 0x36d   : > { %v1161_v61 = vsel %vm13562_vm1, %v1003_v56, 0.0  ;;  %v1005_v62 = vmul.f32 %v7936_v43, %v787_v57  ;;  %v1004_v63 = vmul.f32 %v7936_v43, %v786_v59  ;;  %v1007_v3 = vmul.f32 %v7936_v43, %v789_v29  ;;  %v799_v57 = vld [vmem:[%s13404_s2 + $0xe8] sm:$0xff]  ;;  %v798_v59 = vld [vmem:[%s13404_s2 + $0xe0] sm:$0xff] }
 0x36e   : > { %v1009_v12 = vmul.f32 %v7936_v43, %v791_v5  ;;  %v1011_v19 = vmul.f32 %v7936_v43, %v793_v14  ;;  %v1010_v21 = vmul.f32 %v7936_v43, %v792_v15  ;;  %v1013_v33 = vmul.f32 %v7936_v43, %v795_v24  ;;  %v804_v15 = vld [vmem:[%s13404_s2 + $0x110] sm:$0xff]  ;;  %v807_v24 = vld [vmem:[%s13404_s2 + $0x128] sm:$0xff] }
 0x36f   : > { %1129 = vadd.xlane.f32.xlu0 %v1128_v0  ;;  %1132 = vadd.xlane.f32.xlu1 %v1131_v1  ;;  %v788_v0 = vld [vmem:[%s13404_s2 + $0x90] sm:$0xff]  ;;  %v1167_v1 = vsel %vm13562_vm1, %v1005_v62, 0.0  ;;  %v1164_v2 = vsel %vm13562_vm1, %v1004_v63, 0.0  ;;  %v1012_v37 = vmul.f32 %v7936_v43, %v794_v27  ;;  %v1015_v54 = vmul.f32 %v7936_v43, %v797_v39  ;;  %v806_v27 = vld [vmem:[%s13404_s2 + $0x120] sm:$0xff]  ;;  %v809_v39 = vld [vmem:[%s13404_s2 + $0x138] sm:$0xff] }
 0x370   : > { %v1006_v4 = vmul.f32 %v7936_v43, %v788_v0  ;;  %v1014_v56 = vmul.f32 %v7936_v43, %v796_v42  ;;  %v1017_v63 = vmul.f32 %v7936_v43, %v799_v57  ;;  %v1016_v29 = vmul.f32 %v7936_v43, %v798_v59  ;;  %v801_v0 = vld [vmem:[%s13404_s2 + $0xf8] sm:$0xff]  ;;  %v808_v42 = vld [vmem:[%s13404_s2 + $0x130] sm:$0xff]  ;;  %v811_v57 = vld [vmem:[%s13404_s2 + $0x148] sm:$0xff] }
 0x371   : > { %v810_v59 = vld [vmem:[%s13404_s2 + $0x140] sm:$0xff] }
 0x372   : > { %v1170_v11 = vsel %vm13562_vm1, %v1006_v4, 0.0  ;;  %v1194_v62 = vsel %vm13562_vm1, %v1014_v56, 0.0  ;;  %v1019_v4 = vmul.f32 %v7936_v43, %v801_v0  ;;  %v813_v0 = vld [vmem:[%s13404_s2 + $0x158] sm:$0xff] }
 0x373   : > { %1135 = vadd.xlane.f32.xlu0 %v1134_v7  ;;  %1138 = vadd.xlane.f32.xlu1 %v1137_v9  ;;  %v790_v7 = vld [vmem:[%s13404_s2 + $0xa0] sm:$0xff]  ;;  %v1173_v9 = vsel %vm13562_vm1, %v1007_v3, 0.0  ;;  %v1200_v3 = vsel %vm13562_vm1, %v1016_v29, 0.0 }
 0x374   : > { %v1008_v13 = vmul.f32 %v7936_v43, %v790_v7  ;;  %v803_v7 = vld [vmem:[%s13404_s2 + $0x108] sm:$0xff] }
 0x377   : > { %1141 = vadd.xlane.f32.xlu0 %v1140_v17  ;;  %1144 = vadd.xlane.f32.xlu1 %v1143_v18  ;;  %v1179_v17 = vsel %vm13562_vm1, %v1009_v12, 0.0  ;;  %v1176_v18 = vsel %vm13562_vm1, %v1008_v13, 0.0 }
 0x37b   : > { %1147 = vadd.xlane.f32.xlu0 %v1146_v23  ;;  %1150 = vadd.xlane.f32.xlu1 %v1149_v30  ;;  %v1185_v23 = vsel %vm13562_vm1, %v1011_v19, 0.0  ;;  %v1182_v30 = vsel %vm13562_vm1, %v1010_v21, 0.0 }
 0x37f   : > { %1153 = vadd.xlane.f32.xlu0 %v1152_v44  ;;  %1156 = vadd.xlane.f32.xlu1 %v1155_v53  ;;  %v1191_v44 = vsel %vm13562_vm1, %v1013_v33, 0.0  ;;  %v1188_v53 = vsel %vm13562_vm1, %v1012_v37, 0.0 }
 0x383   : > { %1159 = vadd.xlane.f32.xlu0 %v1158_v60  ;;  %1162 = vadd.xlane.f32.xlu1 %v1161_v61  ;;  %v944_v60 = vcombine.high %v7864_v26, %v7864_v26  ;;  %v1197_v61 = vsel %vm13562_vm1, %v1015_v54, 0.0 }
 0x385   : > { %v8019_v26 = vrot.slane %v944_v60, %v7861_v25  ;;  %v899_v60 = vcombine.high %v7854_v22, %v7854_v22 }
 0x387   : > { %1168 = vadd.xlane.f32.xlu1 %v1167_v1  ;;  %1165 = vadd.xlane.f32.xlu0 %v1164_v2  ;;  %v800_v1 = vld [vmem:[%s13404_s2 + $0xf0] sm:$0xff]  ;;  %v1203_v2 = vsel %vm13562_vm1, %v1017_v63, 0.0  ;;  %v1021_v13 = vmul.f32 %v8019_v26, %v803_v7  ;;  %v1022_v21 = vmul.f32 %v8019_v26, %v804_v15  ;;  %v1025_v33 = vmul.f32 %v8019_v26, %v807_v24  ;;  %v815_v7 = vld [vmem:[%s13404_s2 + $0x168] sm:$0xff]  ;;  %v817_v15 = vld [vmem:[%s13404_s2 + $0x178] sm:$0xff] }
 0x388   : > { %v1018_v5 = vmul.f32 %v7936_v43, %v800_v1  ;;  %v805_v43 = vld [vmem:[%s13404_s2 + $0x118] sm:$0xff]  ;;  %v1024_v37 = vmul.f32 %v8019_v26, %v806_v27  ;;  %v1027_v54 = vmul.f32 %v8019_v26, %v809_v39  ;;  %v1026_v56 = vmul.f32 %v8019_v26, %v808_v42  ;;  %v812_v1 = vld [vmem:[%s13404_s2 + $0x150] sm:$0xff] }
 0x389   : > { %v1023_v19 = vmul.f32 %v8019_v26, %v805_v43  ;;  %v1029_v63 = vmul.f32 %v8019_v26, %v811_v57  ;;  %v1028_v29 = vmul.f32 %v8019_v26, %v810_v59  ;;  %v8084_v22 = vrot.slane %v899_v60, %v7852_v20  ;;  %v839_v59 = vld [vmem:[%s13404_s2 + $0x228] sm:$0xff]  ;;  %v838_v60 = vld [vmem:[%s13404_s2 + $0x220] sm:$0xff] }
 0x38a   : > { %v1206_v12 = vsel %vm13562_vm1, %v1018_v5, 0.0  ;;  %v1030_v5 = vmul.f32 %v8019_v26, %v812_v1  ;;  %v1035_v24 = vmul.f32 %v8019_v26, %v817_v15  ;;  %v840_v1 = vld [vmem:[%s13404_s2 + $0x230] sm:$0xff]  ;;  %v845_v15 = vld [vmem:[%s13404_s2 + $0x258] sm:$0xff] }
 0x38b   : > { %1174 = vadd.xlane.f32.xlu1 %v1173_v9  ;;  %1171 = vadd.xlane.f32.xlu0 %v1170_v11  ;;  %v802_v9 = vld [vmem:[%s13404_s2 + $0x100] sm:$0xff]  ;;  %v1209_v11 = vsel %vm13562_vm1, %v1019_v4, 0.0  ;;  %v1031_v4 = vmul.f32 %v8019_v26, %v813_v0  ;;  %v841_v0 = vld [vmem:[%s13404_s2 + $0x238] sm:$0xff] }
 0x38c   : > { %v1020_v14 = vmul.f32 %v8019_v26, %v802_v9  ;;  %v814_v9 = vld [vmem:[%s13404_s2 + $0x160] sm:$0xff] }
 0x38d   : > { %v1032_v43 = vmul.f32 %v8019_v26, %v814_v9  ;;  %v842_v9 = vld [vmem:[%s13404_s2 + $0x240] sm:$0xff] }
 0x38f   : > { %1180 = vadd.xlane.f32.xlu1 %v1179_v17  ;;  %1177 = vadd.xlane.f32.xlu0 %v1176_v18  ;;  %v1215_v17 = vsel %vm13562_vm1, %v1021_v13, 0.0  ;;  %v1212_v18 = vsel %vm13562_vm1, %v1020_v14, 0.0  ;;  %v1242_v13 = vsel %vm13562_vm1, %v1030_v5, 0.0  ;;  %v1033_v14 = vmul.f32 %v8019_v26, %v815_v7  ;;  %v843_v7 = vld [vmem:[%s13404_s2 + $0x248] sm:$0xff] }
 0x393   : > { %1186 = vadd.xlane.f32.xlu1 %v1185_v23  ;;  %1183 = vadd.xlane.f32.xlu0 %v1182_v30  ;;  %v1221_v23 = vsel %vm13562_vm1, %v1023_v19, 0.0  ;;  %v1218_v30 = vsel %vm13562_vm1, %v1022_v21, 0.0  ;;  %v1251_v19 = vsel %vm13562_vm1, %v1033_v14, 0.0  ;;  %v1248_v21 = vsel %vm13562_vm1, %v1032_v43, 0.0 }
 0x397   : > { %1192 = vadd.xlane.f32.xlu1 %v1191_v44  ;;  %1189 = vadd.xlane.f32.xlu0 %v1188_v53  ;;  %v1227_v44 = vsel %vm13562_vm1, %v1025_v33, 0.0  ;;  %v1224_v53 = vsel %vm13562_vm1, %v1024_v37, 0.0  ;;  %v1257_v33 = vsel %vm13562_vm1, %v1035_v24, 0.0 }
 0x39b   : > { %1198 = vadd.xlane.f32.xlu1 %v1197_v61  ;;  %1195 = vadd.xlane.f32.xlu0 %v1194_v62  ;;  %v1233_v61 = vsel %vm13562_vm1, %v1027_v54, 0.0  ;;  %v1230_v62 = vsel %vm13562_vm1, %v1026_v56, 0.0 }
 0x39f   : > { %1204 = vadd.xlane.f32.xlu1 %v1203_v2  ;;  %1201 = vadd.xlane.f32.xlu0 %v1200_v3  ;;  %v1239_v2 = vsel %vm13562_vm1, %v1029_v63, 0.0  ;;  %v1236_v3 = vsel %vm13562_vm1, %v1028_v29, 0.0 }
 0x3a3   : > { %1210 = vadd.xlane.f32.xlu1 %v1209_v11  ;;  %1207 = vadd.xlane.f32.xlu0 %v1206_v12  ;;  %v8098_v11 = vrot.slane %v8084_v22, %v7852_v20  ;;  %v1245_v12 = vsel %vm13562_vm1, %v1031_v4, 0.0 }
 0x3a7   : > { %1216 = vadd.xlane.f32.xlu1 %v1215_v17  ;;  %1213 = vadd.xlane.f32.xlu0 %v1212_v18  ;;  %v816_v17 = vld [vmem:[%s13404_s2 + $0x170] sm:$0xff]  ;;  %v8112_v18 = vrot.slane %v8098_v11, %v7861_v25 }
 0x3a8   : > { %v1034_v27 = vmul.f32 %v8019_v26, %v816_v17  ;;  %v837_v26 = vld [vmem:[%s13404_s2 + $0x218] sm:$0xff]  ;;  %v844_v17 = vld [vmem:[%s13404_s2 + $0x250] sm:$0xff] }
 0x3a9   : > { %v1055_v56 = vmul.f32 %v8112_v18, %v837_v26  ;;  %v1057_v63 = vmul.f32 %v8112_v18, %v839_v59  ;;  %v1056_v29 = vmul.f32 %v8112_v18, %v838_v60  ;;  %v1059_v4 = vmul.f32 %v8112_v18, %v841_v0  ;;  %v819_v60 = vld [vmem:[%s13404_s2 + $0x188] sm:$0xff] }
 0x3aa   : > { %v1254_v37 = vsel %vm13562_vm1, %v1034_v27, 0.0  ;;  %v1058_v5 = vmul.f32 %v8112_v18, %v840_v1  ;;  %v1061_v14 = vmul.f32 %v8112_v18, %v843_v7  ;;  %v1060_v43 = vmul.f32 %v8112_v18, %v842_v9  ;;  %v820_v1 = vld [vmem:[%s13404_s2 + $0x190] sm:$0xff]  ;;  %v823_v7 = vld [vmem:[%s13404_s2 + $0x1a8] sm:$0xff]  ;;  %v822_v9 = vld [vmem:[%s13404_s2 + $0x1a0] sm:$0xff] }
 0x3ab   : > { %1222 = vadd.xlane.f32.xlu1 %v1221_v23  ;;  %1219 = vadd.xlane.f32.xlu0 %v1218_v30  ;;  %v835_v23 = vld [vmem:[%s13404_s2 + $0x208] sm:$0xff]  ;;  %v834_v30 = vld [vmem:[%s13404_s2 + $0x200] sm:$0xff]  ;;  %v1063_v24 = vmul.f32 %v8112_v18, %v845_v15  ;;  %v1062_v27 = vmul.f32 %v8112_v18, %v844_v17  ;;  %v825_v15 = vld [vmem:[%s13404_s2 + $0x1b8] sm:$0xff] }
 0x3ac   : > { %v1053_v39 = vmul.f32 %v8112_v18, %v835_v23  ;;  %v1052_v42 = vmul.f32 %v8112_v18, %v834_v30  ;;  %v847_v23 = vld [vmem:[%s13404_s2 + $0x268] sm:$0xff]  ;;  %v846_v30 = vld [vmem:[%s13404_s2 + $0x260] sm:$0xff]  ;;  %v824_v17 = vld [vmem:[%s13404_s2 + $0x1b0] sm:$0xff] }
 0x3ad   : > { %v1064_v26 = vmul.f32 %v8112_v18, %v846_v30  ;;  %v826_v30 = vld [vmem:[%s13404_s2 + $0x1c0] sm:$0xff] }
 0x3ae   : > { %v1308_v54 = vsel %vm13562_vm1, %v1052_v42, 0.0  ;;  %v1065_v42 = vmul.f32 %v8112_v18, %v847_v23  ;;  %v827_v23 = vld [vmem:[%s13404_s2 + $0x1c8] sm:$0xff] }
 0x3af   : > { %1228 = vadd.xlane.f32.xlu1 %v1227_v44  ;;  %1225 = vadd.xlane.f32.xlu0 %v1224_v53  ;;  %v836_v44 = vld [vmem:[%s13404_s2 + $0x210] sm:$0xff]  ;;  %v1311_v53 = vsel %vm13562_vm1, %v1053_v39, 0.0  ;;  %v1338_v39 = vsel %vm13562_vm1, %v1062_v27, 0.0 }
 0x3b0   : > { %v1054_v57 = vmul.f32 %v8112_v18, %v836_v44  ;;  %v849_v44 = vld [vmem:[%s13404_s2 + $0x278] sm:$0xff] }
 0x3b3   : > { %1234 = vadd.xlane.f32.xlu1 %v1233_v61  ;;  %1231 = vadd.xlane.f32.xlu0 %v1230_v62  ;;  %v1317_v61 = vsel %vm13562_vm1, %v1055_v56, 0.0  ;;  %v1314_v62 = vsel %vm13562_vm1, %v1054_v57, 0.0  ;;  %v1344_v56 = vsel %vm13562_vm1, %v1064_v26, 0.0  ;;  %v1067_v57 = vmul.f32 %v8112_v18, %v849_v44 }
 0x3b7   : > { %1240 = vadd.xlane.f32.xlu1 %v1239_v2  ;;  %1237 = vadd.xlane.f32.xlu0 %v1236_v3  ;;  %v1323_v2 = vsel %vm13562_vm1, %v1057_v63, 0.0  ;;  %v1320_v3 = vsel %vm13562_vm1, %v1056_v29, 0.0 }
 0x3bb   : > { %1246 = vadd.xlane.f32.xlu1 %v1245_v12  ;;  %1243 = vadd.xlane.f32.xlu0 %v1242_v13  ;;  %v1329_v12 = vsel %vm13562_vm1, %v1059_v4, 0.0  ;;  %v1326_v13 = vsel %vm13562_vm1, %v1058_v5, 0.0 }
 0x3bf   : > { %1252 = vadd.xlane.f32.xlu1 %v1251_v19  ;;  %1249 = vadd.xlane.f32.xlu0 %v1248_v21  ;;  %v1335_v19 = vsel %vm13562_vm1, %v1061_v14, 0.0  ;;  %v1332_v21 = vsel %vm13562_vm1, %v1060_v43, 0.0 }
 0x3c3   : > { %1258 = vadd.xlane.f32.xlu1 %v1257_v33  ;;  %1255 = vadd.xlane.f32.xlu0 %v1254_v37  ;;  %v946_v33 = vcombine.high %v7924_v28, %v7924_v28  ;;  %v1341_v37 = vsel %vm13562_vm1, %v1063_v24, 0.0 }
 0x3c5   : > { %v8197_v28 = vrot.slane %v946_v33, %v7861_v25 }
 0x3c7   : > { %1312 = vadd.xlane.f32.xlu1 %v1311_v53  ;;  %1309 = vadd.xlane.f32.xlu0 %v1308_v54  ;;  %v848_v53 = vld [vmem:[%s13404_s2 + $0x270] sm:$0xff]  ;;  %v1347_v54 = vsel %vm13562_vm1, %v1065_v42, 0.0  ;;  %v1037_v29 = vmul.f32 %v8197_v28, %v819_v60  ;;  %v1038_v5 = vmul.f32 %v8197_v28, %v820_v1  ;;  %v1041_v14 = vmul.f32 %v8197_v28, %v823_v7 }
 0x3c8   : > { %v1066_v59 = vmul.f32 %v8112_v18, %v848_v53  ;;  %v821_v18 = vld [vmem:[%s13404_s2 + $0x198] sm:$0xff]  ;;  %v1040_v43 = vmul.f32 %v8197_v28, %v822_v9  ;;  %v1043_v24 = vmul.f32 %v8197_v28, %v825_v15  ;;  %v1042_v27 = vmul.f32 %v8197_v28, %v824_v17 }
 0x3c9   : > { %v1039_v4 = vmul.f32 %v8197_v28, %v821_v18  ;;  %v1045_v26 = vmul.f32 %v8197_v28, %v827_v23  ;;  %v1044_v44 = vmul.f32 %v8197_v28, %v826_v30  ;;  %v7580_v53 = vmov 0   ;;  %v830_v18 = vld [vmem:[%s13404_s2 + $0x1e0] sm:$0xff]  ;;  %v833_v9 = vld [vmem:[%s13404_s2 + $0x1f8] sm:$0xff] }
 0x3ca   : > { %v1350_v63 = vsel %vm13562_vm1, %v1066_v59, 0.0  ;;  %v1278_v42 = vsel %vm13562_vm1, %v1042_v27, 0.0  ;;  %7122 = vset.pattern.permute.xlu1 %v7580_v53  ;;  %7123 = vset.pattern.permute.xlu0 %v7580_v53  ;;  %v915_v60 = vcombine.high %v8084_v22, %v8084_v22  ;;  %v1048_v7 = vmul.f32 %v8197_v28, %v830_v18  ;;  %v850_v27 = vld [vmem:[%s13404_s2 + $0x280] sm:$0xff]  ;;  %v852_v53 = vld [vmem:[%s13404_s2 + $0x290] sm:$0xff] }
 0x3cb   : > { %1318 = vadd.xlane.f32.xlu1 %v1317_v61  ;;  %1315 = vadd.xlane.f32.xlu0 %v1314_v62  ;;  %v818_v61 = vld [vmem:[%s13404_s2 + $0x180] sm:$0xff]  ;;  %v1353_v62 = vsel %vm13562_vm1, %v1067_v57, 0.0 }
 0x3cc   : > { %v1036_v0 = vmul.f32 %v8197_v28, %v818_v61  ;;  %v1287_v61 = vsel %vm13562_vm1, %v1045_v26, 0.0  ;;  %v1296_v17 = vsel %vm13562_vm1, %v1048_v7, 0.0 }
 0x3cf   : > { %1324 = vadd.xlane.f32.xlu1 %v1323_v2  ;;  %1321 = vadd.xlane.f32.xlu0 %v1320_v3  ;;  %v1263_v2 = vsel %vm13562_vm1, %v1037_v29, 0.0  ;;  %v1260_v3 = vsel %vm13562_vm1, %v1036_v0, 0.0  ;;  %v831_v0 = vld [vmem:[%s13404_s2 + $0x1e8] sm:$0xff] }
 0x3d3   : > { %1330 = vadd.xlane.f32.xlu1 %v1329_v12  ;;  %1327 = vadd.xlane.f32.xlu0 %v1326_v13  ;;  %v1269_v12 = vsel %vm13562_vm1, %v1039_v4, 0.0  ;;  %v1266_v13 = vsel %vm13562_vm1, %v1038_v5, 0.0  ;;  %v1049_v5 = vmul.f32 %v8197_v28, %v831_v0  ;;  %v854_v0 = vld [vmem:[%s13404_s2 + $0x2a0] sm:$0xff] }
 0x3d5   : > { %v1299_v15 = vsel %vm13562_vm1, %v1049_v5, 0.0 }
 0x3d7   : > { %1336 = vadd.xlane.f32.xlu1 %v1335_v19  ;;  %1333 = vadd.xlane.f32.xlu0 %v1332_v21  ;;  %v1275_v19 = vsel %vm13562_vm1, %v1041_v14, 0.0  ;;  %v1272_v21 = vsel %vm13562_vm1, %v1040_v43, 0.0 }
 0x3db   : > { %1342 = vadd.xlane.f32.xlu1 %v1341_v37  ;;  %1339 = vadd.xlane.f32.xlu0 %v1338_v39  ;;  %v1281_v39 = vsel %vm13562_vm1, %v1043_v24, 0.0  ;;  %v851_v24 = vld [vmem:[%s13404_s2 + $0x288] sm:$0xff] }
 0x3df   : > { %1348 = vadd.xlane.f32.xlu1 %v1347_v54  ;;  %1345 = vadd.xlane.f32.xlu0 %v1344_v56  ;;  %v829_v54 = vld [vmem:[%s13404_s2 + $0x1d8] sm:$0xff]  ;;  %v828_v56 = vld [vmem:[%s13404_s2 + $0x1d0] sm:$0xff] }
 0x3e0   : > { %v1046_v29 = vmul.f32 %v8197_v28, %v828_v56 }
 0x3e2   : > { %v1290_v4 = vsel %vm13562_vm1, %v1046_v29, 0.0  ;;  %v855_v29 = vld [vmem:[%s13404_s2 + $0x2a8] sm:$0xff] }
 0x3e3   : > { %1354 = vadd.xlane.f32.xlu1 %v1353_v62  ;;  %1351 = vadd.xlane.f32.xlu0 %v1350_v63  ;;  %v1284_v62 = vsel %vm13562_vm1, %v1044_v44, 0.0  ;;  %v1047_v63 = vmul.f32 %v8197_v28, %v829_v54  ;;  %v853_v44 = vld [vmem:[%s13404_s2 + $0x298] sm:$0xff] }
 0x3e7   : > { %1264 = vadd.xlane.f32.xlu1 %v1263_v2  ;;  %1261 = vadd.xlane.f32.xlu0 %v1260_v3  ;;  %v8284_v2 = vrot.slane %v915_v60, %v7852_v20  ;;  %v1293_v3 = vsel %vm13562_vm1, %v1047_v63, 0.0 }
 0x3e9   : > { %v8302_v43 = vrot.slane %v8284_v2, %v7861_v25 }
 0x3eb   : > { %1270 = vadd.xlane.f32.xlu1 %v1269_v12  ;;  %1267 = vadd.xlane.f32.xlu0 %v1266_v13  ;;  %v832_v12 = vld [vmem:[%s13404_s2 + $0x1f0] sm:$0xff]  ;;  %v1068_v26 = vmul.f32 %v8302_v43, %v850_v27  ;;  %v1070_v63 = vmul.f32 %v8302_v43, %v852_v53  ;;  %v1073_v7 = vmul.f32 %v8302_v43, %v855_v29 }
 0x3ec   : > { %v860_v29 = vld [vmem:[%s13404_s2 + $0x2d0] sm:$0xff] }
 0x3ed   : > { %v1362_v5 = vsel %vm13562_vm1, %v1070_v63, 0.0  ;;  %v861_v63 = vld [vmem:[%s13404_s2 + $0x2d8] sm:$0xff] }
 0x3ef   : > { %1276 = vadd.xlane.f32.xlu1 %v1275_v19  ;;  %1273 = vadd.xlane.f32.xlu0 %v1272_v21  ;;  %v1051_v19 = vmul.f32 %v8197_v28, %v833_v9  ;;  %v1050_v21 = vmul.f32 %v8197_v28, %v832_v12  ;;  %v1069_v28 = vmul.f32 %v8302_v43, %v851_v24  ;;  %v857_v12 = vld [vmem:[%s13404_s2 + $0x2b8] sm:$0xff] }
 0x3f0   : > { %v8249_v33 = vpop.xlane.xlu0 %1120  ;;  %v8251_v37 = vpop.xlane.xlu1 %1117  ;;  %v1072_v9 = vmul.f32 %v8302_v43, %v854_v0  ;;  %v1075_v27 = vmul.f32 %v8302_v43, %v857_v12  ;;  %v1078_v12 = vmul.f32 %v8302_v43, %v860_v29 }
 0x3f1   : > { %v1359_v60 = vsel %vm13562_vm1, %v1069_v28, 0.0  ;;  %v858_v28 = vld [vmem:[%s13404_s2 + $0x2c0] sm:$0xff] }
 0x3f2   : > { %v1368_v24 = vsel %vm13562_vm1, %v1072_v9, 0.0  ;;  %v1377_v53 = vsel %vm13562_vm1, %v1075_v27, 0.0  ;;  %v1079_v9 = vmul.f32 %v8302_v43, %v861_v63 }
 0x3f3   : > { %1282 = vadd.xlane.f32.xlu1 %v1281_v39  ;;  %1279 = vadd.xlane.f32.xlu0 %v1278_v42  ;;  %v1305_v39 = vsel %vm13562_vm1, %v1051_v19, 0.0  ;;  %v1302_v42 = vsel %vm13562_vm1, %v1050_v21, 0.0  ;;  %v1371_v21 = vsel %vm13562_vm1, %v1073_v7, 0.0 }
 0x3f4   : > { %v8263_v57 = vpop.xlane.xlu0 %1123  ;;  %v8265_v59 = vpop.xlane.xlu1 %1126 }
 0x3f7   : > { %1288 = vadd.xlane.f32.xlu1 %v1287_v61  ;;  %1285 = vadd.xlane.f32.xlu0 %v1284_v62  ;;  %v1356_v61 = vsel %vm13562_vm1, %v1068_v26, 0.0  ;;  %v1071_v62 = vmul.f32 %v8302_v43, %v853_v44 }
 0x3f8   : > { %v8279_v1 = vpop.xlane.xlu0 %1129  ;;  %v8281_v22 = vpop.xlane.xlu1 %1132 }
 0x3fb   : > { %1294 = vadd.xlane.f32.xlu1 %v1293_v3  ;;  %1291 = vadd.xlane.f32.xlu0 %v1290_v4  ;;  %v1365_v4 = vsel %vm13562_vm1, %v1071_v62, 0.0  ;;  %v1076_v62 = vmul.f32 %v8302_v43, %v858_v28  ;;  %v1386_v28 = vsel %vm13562_vm1, %v1078_v12, 0.0 }
 0x3fc   : > { %v8296_v13 = vpop.xlane.xlu0 %1135  ;;  %v8298_v14 = vpop.xlane.xlu1 %1138 }
 0x3fd   : > { %v1380_v7 = vsel %vm13562_vm1, %v1076_v62, 0.0  ;;  %v864_v62 = vld [vmem:[%s13404_s2 + $0x2f0] sm:$0xff] }
 0x3fe   : > { %v1082_v12 = vmul.f32 %v8302_v43, %v864_v62 }
 0x3ff   : > { %1300 = vadd.xlane.f32.xlu1 %v1299_v15  ;;  %1297 = vadd.xlane.f32.xlu0 %v1296_v17  ;;  %v856_v15 = vld [vmem:[%s13404_s2 + $0x2b0] sm:$0xff] }
 0x400   : > { %v8314_v23 = vpop.xlane.xlu0 %1141  ;;  %v8316_v30 = vpop.xlane.xlu1 %1144 }
 0x403   : > { %1306 = vadd.xlane.f32.xlu1 %v1305_v39  ;;  %1303 = vadd.xlane.f32.xlu0 %v1302_v42  ;;  %v1074_v39 = vmul.f32 %v8302_v43, %v856_v15  ;;  %v859_v42 = vld [vmem:[%s13404_s2 + $0x2c8] sm:$0xff] }
 0x404   : > { %v8328_v54 = vpop.xlane.xlu0 %1147  ;;  %v8330_v56 = vpop.xlane.xlu1 %1150  ;;  %v863_v15 = vld [vmem:[%s13404_s2 + $0x2e8] sm:$0xff] }
 0x407   : > { %1360 = vadd.xlane.f32.xlu1 %v1359_v60  ;;  %1357 = vadd.xlane.f32.xlu0 %v1356_v61  ;;  %v1374_v60 = vsel %vm13562_vm1, %v1074_v39, 0.0  ;;  %v1077_v61 = vmul.f32 %v8302_v43, %v859_v42  ;;  %v945_v39 = vcombine.high %v8098_v11, %v8098_v11  ;;  %v1389_v42 = vsel %vm13562_vm1, %v1079_v9, 0.0 }
 0x408   : > { %v8342_v18 = vpop.xlane.xlu0 %1153  ;;  %v8344_v3 = vpop.xlane.xlu1 %1156 }
 0x409   : > { %v8419_v29 = vrot.slane %v945_v39, %v7861_v25  ;;  %v866_v39 = vld [vmem:[%s13404_s2 + $0x300] sm:$0xff] }
 0x40b   : > { %1366 = vadd.xlane.f32.xlu1 %v1365_v4  ;;  %1363 = vadd.xlane.f32.xlu0 %v1362_v5  ;;  %v1383_v5 = vsel %vm13562_vm1, %v1077_v61, 0.0  ;;  %v865_v61 = vld [vmem:[%s13404_s2 + $0x2f8] sm:$0xff]  ;;  %v1084_v62 = vmul.f32 %v8419_v29, %v866_v39 }
 0x40c   : > { %v8356_v17 = vpop.xlane.xlu0 %1159  ;;  %v8358_v19 = vpop.xlane.xlu1 %1162  ;;  %v1083_v9 = vmul.f32 %v8302_v43, %v865_v61 }
 0x40d   : > { %v1404_v39 = vsel %vm13562_vm1, %v1084_v62, 0.0 }
 0x40f   : > { %1372 = vadd.xlane.f32.xlu1 %v1371_v21  ;;  %1369 = vadd.xlane.f32.xlu0 %v1368_v24  ;;  %v862_v21 = vld [vmem:[%s13404_s2 + $0x2e0] sm:$0xff] }
 0x410   : > { %v8370_v26 = vpop.xlane.xlu1 %1168  ;;  %v8372_v44 = vpop.xlane.xlu0 %1165 }
 0x413   : > { %1378 = vadd.xlane.f32.xlu1 %v1377_v53  ;;  %1375 = vadd.xlane.f32.xlu0 %v1374_v60  ;;  %v1081_v53 = vmul.f32 %v8302_v43, %v863_v15  ;;  %v1080_v60 = vmul.f32 %v8302_v43, %v862_v21  ;;  %v867_v21 = vld [vmem:[%s13404_s2 + $0x308] sm:$0xff]  ;;  %v1398_v43 = vsel %vm13562_vm1, %v1082_v12, 0.0 }
 0x414   : > { %v8384_v0 = vpop.xlane.xlu1 %1174  ;;  %v8386_v4 = vpop.xlane.xlu0 %1171  ;;  %v1085_v61 = vmul.f32 %v8419_v29, %v867_v21 }
 0x416   : > { %v1407_v21 = vsel %vm13562_vm1, %v1085_v61, 0.0 }
 0x417   : > { %1384 = vadd.xlane.f32.xlu1 %v1383_v5  ;;  %1381 = vadd.xlane.f32.xlu0 %v1380_v7  ;;  %v1395_v5 = vsel %vm13562_vm1, %v1081_v53, 0.0  ;;  %v1392_v7 = vsel %vm13562_vm1, %v1080_v60, 0.0  ;;  %v1401_v60 = vsel %vm13562_vm1, %v1083_v9, 0.0 }
 0x418   : > { %v8398_v24 = vpop.xlane.xlu1 %1180  ;;  %v8400_v27 = vpop.xlane.xlu0 %1177 }
 0x41b   : > { %1390 = vadd.xlane.f32.xlu1 %v1389_v42  ;;  %1387 = vadd.xlane.f32.xlu0 %v1386_v28 }
 0x41c   : > { %v8414_v63 = vpop.xlane.xlu1 %1186  ;;  %v8416_v11 = vpop.xlane.xlu0 %1183 }
 0x41f   : > { %1396 = vadd.xlane.f32.xlu1 %v1395_v5  ;;  %1393 = vadd.xlane.f32.xlu0 %v1392_v7  ;;  %v869_v7 = vld [vmem:[%s13404_s2 + $0x318] sm:$0xff] }
 0x420   : > { %v8425_v15 = vpop.f32.mrf.mxu1  ;;  %v8433_v42 = vpop.xlane.xlu1 %1192 }
 0x421   : > { %13754 = vst [vmem:[#allocation11_spill] sm:$0xff] %v8425_v15  ;;  %v8435_v28 = vpop.xlane.xlu0 %1189 }
 0x422   : > { %v7079_v53 = vpop.f32.mrf.mxu1 }
 0x423   : > { %1402 = vadd.xlane.f32.xlu1 %v1401_v60  ;;  %1399 = vadd.xlane.f32.xlu0 %v1398_v43  ;;  %v1087_v60 = vmul.f32 %v8419_v29, %v869_v7  ;;  %v1086_v43 = vmul.f32 %v8419_v29, %v868_v8  ;;  %v1088_v7 = vmul.f32 %v8419_v29, %v870_v6 }
 0x424   : > { %v5784_v5 = vpop.f32.mrf.mxu1  ;;  %v8447_v53 = vpop.xlane.xlu1 %1198 }
 0x425   : > { %v8449_v9 = vpop.xlane.xlu0 %1195  ;;  %v871_v5 = vld [vmem:[%s13404_s2 + $0x328] sm:$0xff]  ;;  %v1413_v61 = vsel %vm13562_vm1, %v1087_v60, 0.0  ;;  %v1410_v62 = vsel %vm13562_vm1, %v1086_v43, 0.0  ;;  %v1416_v43 = vsel %vm13562_vm1, %v1088_v7, 0.0 }
 0x426   : > { %v7080_v12 = vpop.f32.mrf.mxu1  ;;  %v1089_v8 = vmul.f32 %v8419_v29, %v871_v5 }
 0x427   : > { %1408 = vadd.xlane.f32.xlu1 %v1407_v21  ;;  %1405 = vadd.xlane.f32.xlu0 %v1404_v39  ;;  %v873_v21 = vld [vmem:[%s13404_s2 + $0x338] sm:$0xff]  ;;  %v872_v39 = vld [vmem:[%s13404_s2 + $0x330] sm:$0xff] }
 0x428   : > { %v8461_v55 = vpop.xlane.xlu1 %1204  ;;  %v1419_v60 = vsel %vm13562_vm1, %v1089_v8, 0.0  ;;  %v1091_v6 = vmul.f32 %v8419_v29, %v873_v21  ;;  %v1090_v5 = vmul.f32 %v8419_v29, %v872_v39 }
 0x429   : > { %v8463_v12 = vpop.xlane.xlu0 %1201 }
 0x42a   : > { %v1425_v8 = vsel %vm13562_vm1, %v1091_v6, 0.0  ;;  %v1422_v7 = vsel %vm13562_vm1, %v1090_v5, 0.0 }
 0x42b   : > { %1414 = vadd.xlane.f32.xlu1 %v1413_v61  ;;  %1411 = vadd.xlane.f32.xlu0 %v1410_v62  ;;  %v875_v61 = vld [vmem:[%s13404_s2 + $0x348] sm:$0xff]  ;;  %v874_v62 = vld [vmem:[%s13404_s2 + $0x340] sm:$0xff] }
 0x42c   : > { %v8475_v10 = vpop.xlane.xlu1 %1210  ;;  %v1093_v21 = vmul.f32 %v8419_v29, %v875_v61  ;;  %v1092_v39 = vmul.f32 %v8419_v29, %v874_v62 }
 0x42d   : > { %v8477_v58 = vpop.xlane.xlu0 %1207 }
 0x42e   : > { %v1431_v6 = vsel %vm13562_vm1, %v1093_v21, 0.0  ;;  %v1428_v5 = vsel %vm13562_vm1, %v1092_v39, 0.0  ;;  %v947_v21 = vcombine.high %v8284_v2, %v8284_v2 }
 0x42f   : > { %1420 = vadd.xlane.f32.xlu1 %v1419_v60  ;;  %1417 = vadd.xlane.f32.xlu0 %v1416_v43  ;;  %v877_v60 = vld [vmem:[%s13404_s2 + $0x358] sm:$0xff]  ;;  %v876_v43 = vld [vmem:[%s13404_s2 + $0x350] sm:$0xff] }
 0x430   : > { %v8489_v20 = vpop.xlane.xlu1 %1216  ;;  %v1095_v61 = vmul.f32 %v8419_v29, %v877_v60  ;;  %v1094_v62 = vmul.f32 %v8419_v29, %v876_v43 }
 0x431   : > { %13755 = vst [vmem:[#allocation12_spill] sm:$0xff] %v8489_v20  ;;  %v8491_v16 = vpop.xlane.xlu0 %1213 }
 0x432   : > { %v1437_v39 = vsel %vm13562_vm1, %v1095_v61, 0.0  ;;  %v1434_v60 = vsel %vm13562_vm1, %v1094_v62, 0.0  ;;  %v8538_v61 = vrot.slane %v947_v21, %v7861_v25 }
 0x433   : > { %1426 = vadd.xlane.f32.xlu1 %v1425_v8  ;;  %1423 = vadd.xlane.f32.xlu0 %v1422_v7  ;;  %v879_v8 = vld [vmem:[%s13404_s2 + $0x368] sm:$0xff]  ;;  %v878_v7 = vld [vmem:[%s13404_s2 + $0x360] sm:$0xff] }
 0x434   : > { %v8503_v15 = vpop.xlane.xlu1 %1222  ;;  %v1097_v43 = vmul.f32 %v8419_v29, %v879_v8 }
 0x435   : > { %13756 = vst [vmem:[#allocation13_spill] sm:$0xff] %v8503_v15  ;;  %v8505_v20 = vpop.xlane.xlu0 %1219 }
 0x436   : > { %13757 = vst [vmem:[#allocation14_spill] sm:$0xff] %v8505_v20  ;;  %v1443_v62 = vsel %vm13562_vm1, %v1097_v43, 0.0 }
 0x437   : > { %1432 = vadd.xlane.f32.xlu1 %v1431_v6  ;;  %1429 = vadd.xlane.f32.xlu0 %v1428_v5  ;;  %v1096_v6 = vmul.f32 %v8419_v29, %v878_v7  ;;  %v881_v5 = vld [vmem:[%s13404_s2 + $0x378] sm:$0xff] }
 0x438   : > { %v8517_v15 = vpop.xlane.xlu1 %1228  ;;  %v1099_v7 = vmul.f32 %v8419_v29, %v881_v5  ;;  %v885_v5 = vld [vmem:[%s13404_s2 + $0x398] sm:$0xff] }
 0x439   : > { %13758 = vst [vmem:[#allocation15_spill] sm:$0xff] %v8517_v15  ;;  %v8519_v20 = vpop.xlane.xlu0 %1225  ;;  %v880_v15 = vld [vmem:[%s13404_s2 + $0x370] sm:$0xff]  ;;  %v1440_v8 = vsel %vm13562_vm1, %v1096_v6, 0.0 }
 0x43a   : > { %13759 = vst [vmem:[#allocation16_spill] sm:$0xff] %v8519_v20  ;;  %v1449_v43 = vsel %vm13562_vm1, %v1099_v7, 0.0 }
 0x43b   : > { %1438 = vadd.xlane.f32.xlu1 %v1437_v39  ;;  %1435 = vadd.xlane.f32.xlu0 %v1434_v60  ;;  %v1098_v39 = vmul.f32 %v8419_v29, %v880_v15  ;;  %v883_v60 = vld [vmem:[%s13404_s2 + $0x388] sm:$0xff] }
 0x43c   : > { %v8533_v20 = vpop.xlane.xlu1 %1234  ;;  %v1101_v29 = vmul.f32 %v8538_v61, %v883_v60 }
 0x43d   : > { %13760 = vst [vmem:[#allocation17_spill] sm:$0xff] %v8533_v20  ;;  %v8535_v2 = vpop.xlane.xlu0 %1231  ;;  %v882_v20 = vld [vmem:[%s13404_s2 + $0x380] sm:$0xff]  ;;  %v1446_v6 = vsel %vm13562_vm1, %v1098_v39, 0.0 }
 0x43e   : > { %v1100_v15 = vmul.f32 %v8538_v61, %v882_v20  ;;  %v1455_v7 = vsel %vm13562_vm1, %v1101_v29, 0.0  ;;  %v1103_v20 = vmul.f32 %v8538_v61, %v885_v5 }
 0x43f   : > { %1444 = vadd.xlane.f32.xlu1 %v1443_v62  ;;  %1441 = vadd.xlane.f32.xlu0 %v1440_v8  ;;  %v884_v62 = vld [vmem:[%s13404_s2 + $0x390] sm:$0xff] }
 0x440   : > { %v8550_v21 = vpop.xlane.xlu1 %1240  ;;  %v1452_v39 = vsel %vm13562_vm1, %v1100_v15, 0.0  ;;  %v1102_v60 = vmul.f32 %v8538_v61, %v884_v62  ;;  %v1461_v29 = vsel %vm13562_vm1, %v1103_v20, 0.0 }
 0x441   : > { %13761 = vst [vmem:[#allocation18_spill] sm:$0xff] %v8550_v21  ;;  %v8552_v25 = vpop.xlane.xlu0 %1237 }
 0x442   : > { %13762 = vst [vmem:[#allocation19_spill] sm:$0xff] %v8552_v25  ;;  %v1458_v15 = vsel %vm13562_vm1, %v1102_v60, 0.0 }
 0x443   : > { %1450 = vadd.xlane.f32.xlu1 %v1449_v43  ;;  %1447 = vadd.xlane.f32.xlu0 %v1446_v6  ;;  %v887_v43 = vld [vmem:[%s13404_s2 + $0x3a8] sm:$0xff]  ;;  %v886_v6 = vld [vmem:[%s13404_s2 + $0x3a0] sm:$0xff] }
 0x444   : > { %v8564_v8 = vpop.xlane.xlu1 %1246  ;;  %v1105_v5 = vmul.f32 %v8538_v61, %v887_v43  ;;  %v1104_v62 = vmul.f32 %v8538_v61, %v886_v6 }
 0x445   : > { %13763 = vst [vmem:[#allocation20_spill] sm:$0xff] %v8564_v8  ;;  %v8566_v21 = vpop.xlane.xlu0 %1243 }
 0x446   : > { %13764 = vst [vmem:[#allocation21_spill] sm:$0xff] %v8566_v21  ;;  %v1467_v20 = vsel %vm13562_vm1, %v1105_v5, 0.0  ;;  %v1464_v60 = vsel %vm13562_vm1, %v1104_v62, 0.0 }
 0x447   : > { %1456 = vadd.xlane.f32.xlu1 %v1455_v7  ;;  %1453 = vadd.xlane.f32.xlu0 %v1452_v39  ;;  %v889_v7 = vld [vmem:[%s13404_s2 + $0x3b8] sm:$0xff]  ;;  %v888_v39 = vld [vmem:[%s13404_s2 + $0x3b0] sm:$0xff] }
 0x448   : > { %v8578_v8 = vpop.xlane.xlu1 %1252  ;;  %v1107_v43 = vmul.f32 %v8538_v61, %v889_v7  ;;  %v1106_v6 = vmul.f32 %v8538_v61, %v888_v39 }
 0x449   : > { %13765 = vst [vmem:[#allocation22_spill] sm:$0xff] %v8578_v8  ;;  %v8580_v21 = vpop.xlane.xlu0 %1249 }
 0x44a   : > { %13766 = vst [vmem:[#allocation23_spill] sm:$0xff] %v8580_v21  ;;  %v1473_v5 = vsel %vm13562_vm1, %v1107_v43, 0.0  ;;  %v1470_v62 = vsel %vm13562_vm1, %v1106_v6, 0.0 }
 0x44b   : > { %1462 = vadd.xlane.f32.xlu1 %v1461_v29  ;;  %1459 = vadd.xlane.f32.xlu0 %v1458_v15  ;;  %v891_v29 = vld [vmem:[%s13404_s2 + $0x3c8] sm:$0xff]  ;;  %v890_v15 = vld [vmem:[%s13404_s2 + $0x3c0] sm:$0xff] }
 0x44c   : > { %v8592_v8 = vpop.xlane.xlu1 %1258  ;;  %v1109_v7 = vmul.f32 %v8538_v61, %v891_v29  ;;  %v1108_v39 = vmul.f32 %v8538_v61, %v890_v15 }
 0x44d   : > { %13767 = vst [vmem:[#allocation24_spill] sm:$0xff] %v8592_v8  ;;  %v8594_v21 = vpop.xlane.xlu0 %1255 }
 0x44e   : > { %13768 = vst [vmem:[#allocation25_spill] sm:$0xff] %v8594_v21  ;;  %v1479_v43 = vsel %vm13562_vm1, %v1109_v7, 0.0  ;;  %v1476_v6 = vsel %vm13562_vm1, %v1108_v39, 0.0 }
 0x44f   : > { %1468 = vadd.xlane.f32.xlu1 %v1467_v20  ;;  %1465 = vadd.xlane.f32.xlu0 %v1464_v60  ;;  %v893_v20 = vld [vmem:[%s13404_s2 + $0x3d8] sm:$0xff]  ;;  %v892_v60 = vld [vmem:[%s13404_s2 + $0x3d0] sm:$0xff] }
 0x450   : > { %v8606_v8 = vpop.xlane.xlu1 %1312  ;;  %v1111_v29 = vmul.f32 %v8538_v61, %v893_v20  ;;  %v1110_v15 = vmul.f32 %v8538_v61, %v892_v60 }
 0x451   : > { %13769 = vst [vmem:[#allocation26_spill] sm:$0xff] %v8606_v8  ;;  %v8608_v21 = vpop.xlane.xlu0 %1309 }
 0x452   : > { %13770 = vst [vmem:[#allocation27_spill] sm:$0xff] %v8608_v21  ;;  %v1485_v7 = vsel %vm13562_vm1, %v1111_v29, 0.0  ;;  %v1482_v39 = vsel %vm13562_vm1, %v1110_v15, 0.0 }
 0x453   : > { %1474 = vadd.xlane.f32.xlu1 %v1473_v5  ;;  %1471 = vadd.xlane.f32.xlu0 %v1470_v62  ;;  %v895_v5 = vld [vmem:[%s13404_s2 + $0x3e8] sm:$0xff]  ;;  %v894_v62 = vld [vmem:[%s13404_s2 + $0x3e0] sm:$0xff] }
 0x454   : > { %v8620_v8 = vpop.xlane.xlu1 %1318  ;;  %v1113_v20 = vmul.f32 %v8538_v61, %v895_v5  ;;  %v1112_v60 = vmul.f32 %v8538_v61, %v894_v62 }
 0x455   : > { %13771 = vst [vmem:[#allocation28_spill] sm:$0xff] %v8620_v8  ;;  %v8622_v21 = vpop.xlane.xlu0 %1315 }
 0x456   : > { %13772 = vst [vmem:[#allocation29_spill] sm:$0xff] %v8622_v21  ;;  %v1491_v29 = vsel %vm13562_vm1, %v1113_v20, 0.0  ;;  %v1488_v15 = vsel %vm13562_vm1, %v1112_v60, 0.0 }
 0x457   : > { %1480 = vadd.xlane.f32.xlu1 %v1479_v43  ;;  %1477 = vadd.xlane.f32.xlu0 %v1476_v6  ;;  %v897_v43 = vld [vmem:[%s13404_s2 + $0x3f8] sm:$0xff]  ;;  %v896_v6 = vld [vmem:[%s13404_s2 + $0x3f0] sm:$0xff] }
 0x458   : > { %v8634_v8 = vpop.xlane.xlu1 %1324  ;;  %v1115_v5 = vmul.f32 %v8538_v61, %v897_v43  ;;  %v1114_v62 = vmul.f32 %v8538_v61, %v896_v6 }
 0x459   : > { %13773 = vst [vmem:[#allocation30_spill] sm:$0xff] %v8634_v8  ;;  %v8636_v21 = vpop.xlane.xlu0 %1321 }
 0x45a   : > { %13774 = vst [vmem:[#allocation31_spill] sm:$0xff] %v8636_v21  ;;  %v1497_v25 = vsel %vm13562_vm1, %v1115_v5, 0.0 }
 0x45b   : > { %1486 = vadd.xlane.f32.xlu1 %v1485_v7  ;;  %1483 = vadd.xlane.f32.xlu0 %v1482_v39 }
 0x45c   : > { %v8648_v8 = vpop.xlane.xlu1 %1330 }
 0x45d   : > { %13775 = vst [vmem:[#allocation32_spill] sm:$0xff] %v8648_v8  ;;  %v8650_v21 = vpop.xlane.xlu0 %1327  ;;  %v1494_v8 = vsel %vm13562_vm1, %v1114_v62, 0.0  ;;  %v8689_v62 = vadd.f32 %v7781_v32, %v8263_v57  ;;  %v8707_v57 = vadd.f32 %v7783_v34, %v8279_v1 }
 0x45e   : > { %13776 = vst [vmem:[#allocation33_spill] sm:$0xff] %v8650_v21 }
 0x45f   : > { %1492 = vadd.xlane.f32.xlu1 %v1491_v29  ;;  %1489 = vadd.xlane.f32.xlu0 %v1488_v15  ;;  %13781 = vst [vmem:[#allocation38_spill] sm:$0xff] %v8689_v62  ;;  %13784 = vst [vmem:[#allocation41_spill] sm:$0xff] %v8707_v57 }
 0x460   : > { %v8656_v7 = vpop.xlane.xlu1 %1336 }
 0x461   : > { %v8658_v39 = vpop.xlane.xlu0 %1333 }
 0x463   : > { %1498 = vadd.xlane.f32.xlu1 %v1497_v25  ;;  %1495 = vadd.xlane.f32.xlu0 %v1494_v8  ;;  %v8680_v25 = vadd.f32 %v7796_v45, %v8251_v37  ;;  %v8703_v37 = vadd.f32 %v7798_v46, %v8265_v59  ;;  %v8721_v59 = vadd.f32 %v7785_v35, %v8296_v13 }
 0x464   : > { %v8662_v21 = vpop.xlane.xlu1 %1342 }
 0x465   : > { %v8664_v20 = vpop.xlane.xlu0 %1339  ;;  %13780 = vst [vmem:[#allocation37_spill] sm:$0xff] %v8680_v25  ;;  %13783 = vst [vmem:[#allocation40_spill] sm:$0xff] %v8703_v37 }
 0x466   : > { %13786 = vst [vmem:[#allocation43_spill] sm:$0xff] %v8721_v59 }
 0x468   : > { %v8666_v60 = vpop.xlane.xlu1 %1348 }
 0x469   : > { %v8668_v43 = vpop.xlane.xlu0 %1345 }
 0x46c   : > { %v8670_v61 = vpop.xlane.xlu1 %1354 }
 0x46d   : > { %13777 = vst [vmem:[#allocation34_spill] sm:$0xff] %v8670_v61  ;;  %v8672_v6 = vpop.xlane.xlu0 %1351  ;;  %v8693_v61 = vadd.f32 %v7779_v31, %v8249_v33 }
 0x46f   : > { %13782 = vst [vmem:[#allocation39_spill] sm:$0xff] %v8693_v61 }
 0x470   : > { %v8674_v29 = vpop.xlane.xlu1 %1264 }
 0x471   : > { %13778 = vst [vmem:[#allocation35_spill] sm:$0xff] %v8674_v29  ;;  %v8676_v15 = vpop.xlane.xlu0 %1261 }
 0x472   : > { %13779 = vst [vmem:[#allocation36_spill] sm:$0xff] %v8676_v15 }
 0x474   : > { %v8682_v8 = vpop.xlane.xlu1 %1270  ;;  %1842 = vperm.xlu1 %7122, %v8680_v25  }
 0x475   : > { %v8684_v5 = vpop.xlane.xlu0 %1267 }
 0x478   : > { %v8695_v29 = vpop.xlane.xlu1 %1276  ;;  %1848 = vperm.xlu1 %7122, %v8689_v62   ;;  %v8717_v62 = vadd.f32 %v7800_v47, %v8281_v22  ;;  %v8735_v22 = vadd.f32 %v7787_v36, %v8314_v23 }
 0x479   : > { %v8697_v15 = vpop.xlane.xlu0 %1273  ;;  %1845 = vperm.xlu0 %7123, %v8693_v61  }
 0x47a   : > { %13785 = vst [vmem:[#allocation42_spill] sm:$0xff] %v8717_v62  ;;  %13788 = vst [vmem:[#allocation45_spill] sm:$0xff] %v8735_v22 }
 0x47c   : > { %v8709_v25 = vpop.xlane.xlu1 %1282  ;;  %1851 = vperm.xlu1 %7122, %v8703_v37   ;;  %v8731_v37 = vadd.f32 %v7802_v48, %v8298_v14  ;;  %v8749_v14 = vadd.f32 %v7789_v38, %v8328_v54 }
 0x47d   : > { %v8711_v33 = vpop.xlane.xlu0 %1279  ;;  %1854 = vperm.xlu0 %7123, %v8707_v57  }
 0x47e   : > { %13787 = vst [vmem:[#allocation44_spill] sm:$0xff] %v8731_v37  ;;  %13790 = vst [vmem:[#allocation47_spill] sm:$0xff] %v8749_v14 }
 0x480   : > { %v8723_v61 = vpop.xlane.xlu1 %1288  ;;  %1857 = vperm.xlu1 %7122, %v8717_v62   ;;  %v8745_v62 = vadd.f32 %v7804_v49, %v8316_v30  ;;  %v8763_v30 = vadd.f32 %v7791_v40, %v8342_v18 }
 0x481   : > { %v8725_v1 = vpop.xlane.xlu0 %1285  ;;  %1860 = vperm.xlu0 %7123, %v8721_v59  }
 0x482   : > { %13789 = vst [vmem:[#allocation46_spill] sm:$0xff] %v8745_v62  ;;  %13792 = vst [vmem:[#allocation49_spill] sm:$0xff] %v8763_v30 }
 0x484   : > { %v8737_v57 = vpop.xlane.xlu1 %1294  ;;  %1863 = vperm.xlu1 %7122, %v8731_v37   ;;  %v8759_v37 = vadd.f32 %v7806_v50, %v8330_v56  ;;  %v8777_v56 = vadd.f32 %v7793_v41, %v8356_v17 }
 0x485   : > { %v8739_v13 = vpop.xlane.xlu0 %1291  ;;  %1866 = vperm.xlu0 %7123, %v8735_v22  }
 0x486   : > { %13791 = vst [vmem:[#allocation48_spill] sm:$0xff] %v8759_v37  ;;  %13794 = vst [vmem:[#allocation51_spill] sm:$0xff] %v8777_v56 }
 0x488   : > { %v8751_v59 = vpop.xlane.xlu1 %1300  ;;  %1869 = vperm.xlu1 %7122, %v8745_v62   ;;  %v8773_v62 = vadd.f32 %v7808_v51, %v8344_v3  ;;  %v8791_v3 = vadd.f32 %v7796_v45, %v8372_v44 }
 0x489   : > { %v8753_v23 = vpop.xlane.xlu0 %1297  ;;  %1872 = vperm.xlu0 %7123, %v8749_v14  }
 0x48a   : > { %13793 = vst [vmem:[#allocation50_spill] sm:$0xff] %v8773_v62  ;;  %13796 = vst [vmem:[#allocation53_spill] sm:$0xff] %v8791_v3 }
 0x48c   : > { %v8765_v22 = vpop.xlane.xlu1 %1306  ;;  %1875 = vperm.xlu1 %7122, %v8759_v37   ;;  %v8787_v37 = vadd.f32 %v7810_v52, %v8358_v19  ;;  %v8805_v19 = vadd.f32 %v7781_v32, %v8386_v4 }
 0x48d   : > { %v8767_v54 = vpop.xlane.xlu0 %1303  ;;  %1878 = vperm.xlu0 %7123, %v8763_v30  }
 0x48e   : > { %13795 = vst [vmem:[#allocation52_spill] sm:$0xff] %v8787_v37  ;;  %13798 = vst [vmem:[#allocation55_spill] sm:$0xff] %v8805_v19 }
 0x490   : > { %v8779_v14 = vpop.xlane.xlu1 %1360  ;;  %1881 = vperm.xlu1 %7122, %v8773_v62   ;;  %v8801_v62 = vadd.f32 %v7779_v31, %v8370_v26  ;;  %v8819_v26 = vadd.f32 %v7783_v34, %v8400_v27 }
 0x491   : > { %v8781_v18 = vpop.xlane.xlu0 %1357  ;;  %1884 = vperm.xlu0 %7123, %v8777_v56  }
 0x492   : > { %13797 = vst [vmem:[#allocation54_spill] sm:$0xff] %v8801_v62  ;;  %13800 = vst [vmem:[#allocation57_spill] sm:$0xff] %v8819_v26 }
 0x494   : > { %v8793_v30 = vpop.xlane.xlu1 %1366  ;;  %1887 = vperm.xlu1 %7122, %v8787_v37   ;;  %v8815_v37 = vadd.f32 %v7798_v46, %v8384_v0  ;;  %v8833_v0 = vadd.f32 %v7785_v35, %v8416_v11 }
 0x495   : > { %v8795_v17 = vpop.xlane.xlu0 %1363  ;;  %1890 = vperm.xlu0 %7123, %v8791_v3  }
 0x496   : > { %13799 = vst [vmem:[#allocation56_spill] sm:$0xff] %v8815_v37  ;;  %13802 = vst [vmem:[#allocation59_spill] sm:$0xff] %v8833_v0 }
 0x498   : > { %v8807_v56 = vpop.xlane.xlu1 %1372  ;;  %1893 = vperm.xlu1 %7122, %v8801_v62   ;;  %v8829_v62 = vadd.f32 %v7800_v47, %v8398_v24  ;;  %v8847_v24 = vadd.f32 %v7787_v36, %v8435_v28 }
 0x499   : > { %v8809_v44 = vpop.xlane.xlu0 %1369  ;;  %1896 = vperm.xlu0 %7123, %v8805_v19  }
 0x49a   : > { %13801 = vst [vmem:[#allocation58_spill] sm:$0xff] %v8829_v62  ;;  %13804 = vst [vmem:[#allocation61_spill] sm:$0xff] %v8847_v24 }
 0x49c   : > { %v8821_v3 = vpop.xlane.xlu1 %1378  ;;  %1899 = vperm.xlu1 %7122, %v8815_v37   ;;  %v8843_v37 = vadd.f32 %v7802_v48, %v8414_v63  ;;  %v8861_v63 = vadd.f32 %v7789_v38, %v8449_v9 }
 0x49d   : > { %v8823_v4 = vpop.xlane.xlu0 %1375  ;;  %1902 = vperm.xlu0 %7123, %v8819_v26  }
 0x49e   : > { %13803 = vst [vmem:[#allocation60_spill] sm:$0xff] %v8843_v37  ;;  %13806 = vst [vmem:[#allocation63_spill] sm:$0xff] %v8861_v63 }
 0x4a0   : > { %v8835_v19 = vpop.xlane.xlu1 %1384  ;;  %1905 = vperm.xlu1 %7122, %v8829_v62   ;;  %v8857_v62 = vadd.f32 %v7804_v49, %v8433_v42  ;;  %v8875_v42 = vadd.f32 %v7791_v40, %v8463_v12 }
 0x4a1   : > { %v8837_v27 = vpop.xlane.xlu0 %1381  ;;  %1908 = vperm.xlu0 %7123, %v8833_v0  }
 0x4a2   : > { %13805 = vst [vmem:[#allocation62_spill] sm:$0xff] %v8857_v62  ;;  %13808 = vst [vmem:[#allocation65_spill] sm:$0xff] %v8875_v42 }
 0x4a4   : > { %v8849_v26 = vpop.xlane.xlu1 %1390  ;;  %1911 = vperm.xlu1 %7122, %v8843_v37   ;;  %v8871_v37 = vadd.f32 %v7806_v50, %v8447_v53  ;;  %v8889_v53 = vadd.f32 %v7793_v41, %v8477_v58 }
 0x4a5   : > { %v8851_v11 = vpop.xlane.xlu0 %1387  ;;  %1914 = vperm.xlu0 %7123, %v8847_v24  }
 0x4a6   : > { %13807 = vst [vmem:[#allocation64_spill] sm:$0xff] %v8871_v37  ;;  %13810 = vst [vmem:[#allocation67_spill] sm:$0xff] %v8889_v53 }
 0x4a8   : > { %v8863_v0 = vpop.xlane.xlu1 %1396  ;;  %1917 = vperm.xlu1 %7122, %v8857_v62   ;;  %v8885_v62 = vadd.f32 %v7808_v51, %v8461_v55  ;;  %v8903_v55 = vadd.f32 %v7796_v45, %v8491_v16 }
 0x4a9   : > { %v8865_v28 = vpop.xlane.xlu0 %1393  ;;  %1920 = vperm.xlu0 %7123, %v8861_v63  }
 0x4aa   : > { %13809 = vst [vmem:[#allocation66_spill] sm:$0xff] %v8885_v62  ;;  %13814 = vst [vmem:[#allocation71_spill] sm:$0xff] %v8903_v55 }
 0x4ac   : > { %v8877_v24 = vpop.xlane.xlu1 %1402  ;;  %1923 = vperm.xlu1 %7122, %v8871_v37   ;;  %v8899_v37 = vadd.f32 %v7810_v52, %v8475_v10 }
 0x4ad   : > { %v8879_v9 = vpop.xlane.xlu0 %1399  ;;  %1926 = vperm.xlu0 %7123, %v8875_v42  }
 0x4ae   : > { %13813 = vst [vmem:[#allocation70_spill] sm:$0xff] %v8899_v37 }
 0x4b0   : > { %v8891_v63 = vpop.xlane.xlu1 %1408  ;;  %1929 = vperm.xlu1 %7122, %v8885_v62  }
 0x4b1   : > { %13811 = vst [vmem:[#allocation68_spill] sm:$0xff] %v8891_v63  ;;  %v8893_v12 = vpop.xlane.xlu0 %1405  ;;  %1932 = vperm.xlu0 %7123, %v8889_v53   ;;  %v13817_v63 = vld [vmem:[#allocation12_spill] sm:$0xff]  ;;  %v13819_v53 = vld [vmem:[#allocation14_spill] sm:$0xff] }
 0x4b2   : > { %13812 = vst [vmem:[#allocation69_spill] sm:$0xff] %v8893_v12  ;;  %v8913_v62 = vadd.f32 %v7779_v31, %v13817_v63  ;;  %v8917_v10 = vadd.f32 %v7781_v32, %v13819_v53 }
 0x4b4   : > { %v8905_v42 = vpop.xlane.xlu1 %1414  ;;  %1935 = vperm.xlu1 %7122, %v8899_v37   ;;  %13818 = vst [vmem:[#allocation12_spill] sm:$0xff] %v8913_v62  ;;  %13820 = vst [vmem:[#allocation14_spill] sm:$0xff] %v8917_v10 }
 0x4b5   : > { %13815 = vst [vmem:[#allocation72_spill] sm:$0xff] %v8905_v42  ;;  %v8907_v58 = vpop.xlane.xlu0 %1411  ;;  %1938 = vperm.xlu0 %7123, %v8903_v55   ;;  %v13822_v42 = vld [vmem:[#allocation13_spill] sm:$0xff]  ;;  %v13824_v55 = vld [vmem:[#allocation16_spill] sm:$0xff] }
 0x4b6   : > { %13816 = vst [vmem:[#allocation73_spill] sm:$0xff] %v8907_v58  ;;  %v8927_v37 = vadd.f32 %v7798_v46, %v13822_v42  ;;  %v8931_v63 = vadd.f32 %v7783_v34, %v13824_v55  ;;  %v8945_v42 = vadd.f32 %v7785_v35, %v8535_v2 }
 0x4b8   : > { %v8919_v12 = vpop.xlane.xlu1 %1420  ;;  %1941 = vperm.xlu1 %7122, %v8913_v62   ;;  %13823 = vst [vmem:[#allocation13_spill] sm:$0xff] %v8927_v37  ;;  %13825 = vst [vmem:[#allocation16_spill] sm:$0xff] %v8931_v63 }
 0x4b9   : > { %13821 = vst [vmem:[#allocation74_spill] sm:$0xff] %v8919_v12  ;;  %v8921_v16 = vpop.xlane.xlu0 %1417  ;;  %1944 = vperm.xlu0 %7123, %v8917_v10   ;;  %v13828_v12 = vld [vmem:[#allocation15_spill] sm:$0xff]  ;;  %13830 = vst [vmem:[#allocation77_spill] sm:$0xff] %v8945_v42 }
 0x4ba   : > { %v8941_v62 = vadd.f32 %v7800_v47, %v13828_v12 }
 0x4bc   : > { %v8933_v58 = vpop.xlane.xlu1 %1426  ;;  %1947 = vperm.xlu1 %7122, %v8927_v37   ;;  %13829 = vst [vmem:[#allocation15_spill] sm:$0xff] %v8941_v62 }
 0x4bd   : > { %13826 = vst [vmem:[#allocation75_spill] sm:$0xff] %v8933_v58  ;;  %v8935_v53 = vpop.xlane.xlu0 %1423  ;;  %1950 = vperm.xlu0 %7123, %v8931_v63   ;;  %v13833_v58 = vld [vmem:[#allocation17_spill] sm:$0xff]  ;;  %v13835_v63 = vld [vmem:[#allocation19_spill] sm:$0xff] }
 0x4be   : > { %13827 = vst [vmem:[#allocation76_spill] sm:$0xff] %v8935_v53  ;;  %v8955_v37 = vadd.f32 %v7802_v48, %v13833_v58  ;;  %v8959_v12 = vadd.f32 %v7787_v36, %v13835_v63 }
 0x4c0   : > { %v8947_v10 = vpop.xlane.xlu1 %1432  ;;  %1953 = vperm.xlu1 %7122, %v8941_v62   ;;  %13834 = vst [vmem:[#allocation17_spill] sm:$0xff] %v8955_v37  ;;  %13836 = vst [vmem:[#allocation19_spill] sm:$0xff] %v8959_v12 }
 0x4c1   : > { %13831 = vst [vmem:[#allocation78_spill] sm:$0xff] %v8947_v10  ;;  %v8949_v55 = vpop.xlane.xlu0 %1429  ;;  %1956 = vperm.xlu0 %7123, %v8945_v42   ;;  %v13839_v10 = vld [vmem:[#allocation18_spill] sm:$0xff]  ;;  %v13841_v42 = vld [vmem:[#allocation21_spill] sm:$0xff] }
 0x4c2   : > { %13832 = vst [vmem:[#allocation79_spill] sm:$0xff] %v8949_v55  ;;  %v8969_v62 = vadd.f32 %v7804_v49, %v13839_v10  ;;  %v8973_v58 = vadd.f32 %v7789_v38, %v13841_v42 }
 0x4c4   : > { %v8961_v53 = vpop.xlane.xlu1 %1438  ;;  %1959 = vperm.xlu1 %7122, %v8955_v37   ;;  %13840 = vst [vmem:[#allocation18_spill] sm:$0xff] %v8969_v62  ;;  %13842 = vst [vmem:[#allocation21_spill] sm:$0xff] %v8973_v58 }
 0x4c5   : > { %13837 = vst [vmem:[#allocation80_spill] sm:$0xff] %v8961_v53  ;;  %v8963_v2 = vpop.xlane.xlu0 %1435  ;;  %1962 = vperm.xlu0 %7123, %v8959_v12   ;;  %v13845_v53 = vld [vmem:[#allocation20_spill] sm:$0xff]  ;;  %v13847_v12 = vld [vmem:[#allocation23_spill] sm:$0xff] }
 0x4c6   : > { %13838 = vst [vmem:[#allocation81_spill] sm:$0xff] %v8963_v2  ;;  %v8983_v37 = vadd.f32 %v7806_v50, %v13845_v53  ;;  %v8987_v10 = vadd.f32 %v7791_v40, %v13847_v12 }
 0x4c8   : > { %v8975_v55 = vpop.xlane.xlu1 %1444  ;;  %1965 = vperm.xlu1 %7122, %v8969_v62   ;;  %13846 = vst [vmem:[#allocation20_spill] sm:$0xff] %v8983_v37  ;;  %13848 = vst [vmem:[#allocation23_spill] sm:$0xff] %v8987_v10 }
 0x4c9   : > { %13843 = vst [vmem:[#allocation82_spill] sm:$0xff] %v8975_v55  ;;  %v8977_v63 = vpop.xlane.xlu0 %1441  ;;  %1968 = vperm.xlu0 %7123, %v8973_v58   ;;  %v13851_v55 = vld [vmem:[#allocation22_spill] sm:$0xff]  ;;  %v13853_v58 = vld [vmem:[#allocation25_spill] sm:$0xff] }
 0x4ca   : > { %13844 = vst [vmem:[#allocation83_spill] sm:$0xff] %v8977_v63  ;;  %v8997_v62 = vadd.f32 %v7808_v51, %v13851_v55  ;;  %v9001_v53 = vadd.f32 %v7793_v41, %v13853_v58 }
 0x4cc   : > { %v8989_v2 = vpop.xlane.xlu1 %1450  ;;  %1971 = vperm.xlu1 %7122, %v8983_v37   ;;  %13852 = vst [vmem:[#allocation22_spill] sm:$0xff] %v8997_v62  ;;  %13854 = vst [vmem:[#allocation25_spill] sm:$0xff] %v9001_v53 }
 0x4cd   : > { %13849 = vst [vmem:[#allocation84_spill] sm:$0xff] %v8989_v2  ;;  %v8991_v42 = vpop.xlane.xlu0 %1447  ;;  %1974 = vperm.xlu0 %7123, %v8987_v10   ;;  %v13857_v2 = vld [vmem:[#allocation24_spill] sm:$0xff]  ;;  %v13859_v10 = vld [vmem:[#allocation27_spill] sm:$0xff] }
 0x4ce   : > { %13850 = vst [vmem:[#allocation85_spill] sm:$0xff] %v8991_v42  ;;  %v9011_v37 = vadd.f32 %v7810_v52, %v13857_v2  ;;  %v9015_v55 = vadd.f32 %v7796_v45, %v13859_v10 }
 0x4d0   : > { %1977 = vperm.xlu1 %7122, %v8997_v62   ;;  %v9004_v12 = vpop.xlane.xlu1 %1456  ;;  %13858 = vst [vmem:[#allocation24_spill] sm:$0xff] %v9011_v37  ;;  %13860 = vst [vmem:[#allocation27_spill] sm:$0xff] %v9015_v55  ;;  %v13863_v62 = vld [vmem:[#allocation26_spill] sm:$0xff] }
 0x4d1   : > { %13855 = vst [vmem:[#allocation86_spill] sm:$0xff] %v9004_v12  ;;  %v9006_v63 = vpop.xlane.xlu0 %1453  ;;  %1980 = vperm.xlu0 %7123, %v9001_v53   ;;  %v9025_v12 = vadd.f32 %v7779_v31, %v13863_v62  ;;  %v13865_v53 = vld [vmem:[#allocation29_spill] sm:$0xff] }
 0x4d2   : > { %13856 = vst [vmem:[#allocation87_spill] sm:$0xff] %v9006_v63  ;;  %v9029_v2 = vadd.f32 %v7781_v32, %v13865_v53 }
 0x4d3   : > { %13864 = vst [vmem:[#allocation26_spill] sm:$0xff] %v9025_v12 }
 0x4d4   : > { %1983 = vperm.xlu1 %7122, %v9011_v37   ;;  %v9018_v58 = vpop.xlane.xlu1 %1462  ;;  %13866 = vst [vmem:[#allocation29_spill] sm:$0xff] %v9029_v2  ;;  %v13869_v37 = vld [vmem:[#allocation28_spill] sm:$0xff] }
 0x4d5   : > { %13861 = vst [vmem:[#allocation88_spill] sm:$0xff] %v9018_v58  ;;  %v9020_v42 = vpop.xlane.xlu0 %1459  ;;  %2034 = vperm.xlu0 %7123, %v9015_v55   ;;  %v9039_v58 = vadd.f32 %v7798_v46, %v13869_v37  ;;  %v13871_v55 = vld [vmem:[#allocation31_spill] sm:$0xff] }
 0x4d6   : > { %13862 = vst [vmem:[#allocation89_spill] sm:$0xff] %v9020_v42  ;;  %v9043_v62 = vadd.f32 %v7783_v34, %v13871_v55 }
 0x4d7   : > { %13870 = vst [vmem:[#allocation28_spill] sm:$0xff] %v9039_v58 }
 0x4d8   : > { %2037 = vperm.xlu1 %7122, %v9025_v12   ;;  %v9032_v10 = vpop.xlane.xlu1 %1468  ;;  %13872 = vst [vmem:[#allocation31_spill] sm:$0xff] %v9043_v62  ;;  %v13874_v12 = vld [vmem:[#allocation30_spill] sm:$0xff] }
 0x4d9   : > { %13867 = vst [vmem:[#allocation90_spill] sm:$0xff] %v9032_v10  ;;  %v9034_v63 = vpop.xlane.xlu0 %1465  ;;  %2040 = vperm.xlu0 %7123, %v9029_v2   ;;  %v9053_v10 = vadd.f32 %v7800_v47, %v13874_v12  ;;  %v13876_v2 = vld [vmem:[#allocation33_spill] sm:$0xff]  ;;  %v9071_v12 = vadd.f32 %v7787_v36, %v8658_v39 }
 0x4da   : > { %13868 = vst [vmem:[#allocation91_spill] sm:$0xff] %v9034_v63  ;;  %v9057_v37 = vadd.f32 %v7785_v35, %v13876_v2 }
 0x4db   : > { %13875 = vst [vmem:[#allocation30_spill] sm:$0xff] %v9053_v10  ;;  %13880 = vst [vmem:[#allocation93_spill] sm:$0xff] %v9071_v12 }
 0x4dc   : > { %2043 = vperm.xlu1 %7122, %v9039_v58   ;;  %v9046_v53 = vpop.xlane.xlu1 %1474  ;;  %13877 = vst [vmem:[#allocation33_spill] sm:$0xff] %v9057_v37  ;;  %v13878_v58 = vld [vmem:[#allocation32_spill] sm:$0xff] }
 0x4dd   : > { %13873 = vst [vmem:[#allocation92_spill] sm:$0xff] %v9046_v53  ;;  %v9048_v42 = vpop.xlane.xlu0 %1471  ;;  %2046 = vperm.xlu0 %7123, %v9043_v62   ;;  %v9067_v53 = vadd.f32 %v7802_v48, %v13878_v58  ;;  %v9085_v58 = vadd.f32 %v7789_v38, %v8664_v20 }
 0x4df   : > { %13879 = vst [vmem:[#allocation32_spill] sm:$0xff] %v9067_v53  ;;  %13882 = vst [vmem:[#allocation95_spill] sm:$0xff] %v9085_v58 }
 0x4e0   : > { %2049 = vperm.xlu1 %7122, %v9053_v10   ;;  %v9060_v55 = vpop.xlane.xlu1 %1480  ;;  %v9081_v10 = vadd.f32 %v7804_v49, %v8656_v7  ;;  %v9099_v7 = vadd.f32 %v7791_v40, %v8668_v43 }
 0x4e1   : > { %v9062_v63 = vpop.xlane.xlu0 %1477  ;;  %2052 = vperm.xlu0 %7123, %v9057_v37   ;;  %v9093_v37 = vadd.f32 %v7806_v50, %v8662_v21  ;;  %v9111_v21 = vadd.f32 %v7793_v41, %v8672_v6 }
 0x4e2   : > { %13881 = vst [vmem:[#allocation94_spill] sm:$0xff] %v9081_v10  ;;  %13884 = vst [vmem:[#allocation97_spill] sm:$0xff] %v9099_v7 }
 0x4e3   : > { %13883 = vst [vmem:[#allocation96_spill] sm:$0xff] %v9093_v37  ;;  %13887 = vst [vmem:[#allocation100_spill] sm:$0xff] %v9111_v21 }
 0x4e4   : > { %2055 = vperm.xlu1 %7122, %v9067_v53   ;;  %v9074_v2 = vpop.xlane.xlu1 %1486 }
 0x4e5   : > { %v9076_v62 = vpop.xlane.xlu0 %1483  ;;  %2058 = vperm.xlu0 %7123, %v9071_v12   ;;  %v9107_v12 = vadd.f32 %v7808_v51, %v8666_v60 }
 0x4e7   : > { %13886 = vst [vmem:[#allocation99_spill] sm:$0xff] %v9107_v12 }
 0x4e8   : > { %2061 = vperm.xlu1 %7122, %v9081_v10   ;;  %v9088_v39 = vpop.xlane.xlu1 %1492 }
 0x4e9   : > { %2064 = vperm.xlu0 %7123, %v9085_v58   ;;  %v9095_v53 = vpop.xlane.xlu0 %1489 }
 0x4ec   : > { %2067 = vperm.xlu1 %7122, %v9093_v37   ;;  %v9102_v20 = vpop.xlane.xlu1 %1498  ;;  %v13889_v37 = vld [vmem:[#allocation34_spill] sm:$0xff] }
 0x4ed   : > { %13885 = vst [vmem:[#allocation98_spill] sm:$0xff] %v9102_v20  ;;  %2070 = vperm.xlu0 %7123, %v9099_v7   ;;  %v9113_v58 = vpop.xlane.xlu0 %1495  ;;  %v9121_v10 = vadd.f32 %v7810_v52, %v13889_v37  ;;  %v13891_v7 = vld [vmem:[#allocation36_spill] sm:$0xff]  ;;  %v9139_v37 = vadd.f32 %v7781_v32, %v8684_v5 }
 0x4ee   : > { %v9125_v60 = vadd.f32 %v7796_v45, %v13891_v7 }
 0x4ef   : > { %13890 = vst [vmem:[#allocation34_spill] sm:$0xff] %v9121_v10  ;;  %13895 = vst [vmem:[#allocation102_spill] sm:$0xff] %v9139_v37 }
 0x4f0   : > { %2073 = vperm.xlu1 %7122, %v9107_v12   ;;  %v9116_v43 = vpop.permute.xlu1 %1842  ;;  %13892 = vst [vmem:[#allocation36_spill] sm:$0xff] %v9125_v60  ;;  %v13893_v12 = vld [vmem:[#allocation35_spill] sm:$0xff] }
 0x4f1   : > { %13888 = vst [vmem:[#allocation101_spill] sm:$0xff] %v9116_v43  ;;  %2076 = vperm.xlu0 %7123, %v9111_v21   ;;  %v9135_v43 = vadd.f32 %v7779_v31, %v13893_v12  ;;  %v9153_v12 = vadd.f32 %v7783_v34, %v8697_v15 }
 0x4f3   : > { %13894 = vst [vmem:[#allocation35_spill] sm:$0xff] %v9135_v43  ;;  %13897 = vst [vmem:[#allocation104_spill] sm:$0xff] %v9153_v12 }
 0x4f4   : > { %2079 = vperm.xlu1 %7122, %v9121_v10   ;;  %v9128_v6 = vpop.permute.xlu1 %1848  ;;  %v9130_v20 = vpop.permute.xlu0 %1845  ;;  %v9149_v10 = vadd.f32 %v7798_v46, %v8682_v8  ;;  %v9167_v8 = vadd.f32 %v7785_v35, %v8711_v33 }
 0x4f5   : > { %1986 = vperm.xlu0 %7123, %v9125_v60  }
 0x4f6   : > { %13896 = vst [vmem:[#allocation103_spill] sm:$0xff] %v9149_v10  ;;  %13899 = vst [vmem:[#allocation106_spill] sm:$0xff] %v9167_v8 }
 0x4f8   : > { %1989 = vperm.xlu1 %7122, %v9135_v43   ;;  %v9142_v7 = vpop.permute.xlu1 %1851  ;;  %v9144_v21 = vpop.permute.xlu0 %1854  ;;  %v9163_v43 = vadd.f32 %v7800_v47, %v8695_v29  ;;  %v9181_v29 = vadd.f32 %v7787_v36, %v8725_v1 }
 0x4f9   : > { %1992 = vperm.xlu0 %7123, %v9139_v37  }
 0x4fa   : > { %13898 = vst [vmem:[#allocation105_spill] sm:$0xff] %v9163_v43  ;;  %13901 = vst [vmem:[#allocation108_spill] sm:$0xff] %v9181_v29 }
 0x4fc   : > { %1995 = vperm.xlu1 %7122, %v9149_v10   ;;  %v9156_v5 = vpop.permute.xlu1 %1857  ;;  %v9158_v60 = vpop.permute.xlu0 %1860  ;;  %v9177_v10 = vadd.f32 %v7802_v48, %v8709_v25  ;;  %v9195_v25 = vadd.f32 %v7789_v38, %v8739_v13 }
 0x4fd   : > { %1998 = vperm.xlu0 %7123, %v9153_v12  }
 0x4fe   : > { %13900 = vst [vmem:[#allocation107_spill] sm:$0xff] %v9177_v10  ;;  %13903 = vst [vmem:[#allocation110_spill] sm:$0xff] %v9195_v25 }
 0x500   : > { %2001 = vperm.xlu1 %7122, %v9163_v43   ;;  %v9170_v15 = vpop.permute.xlu1 %1863  ;;  %v9172_v37 = vpop.permute.xlu0 %1866  ;;  %v9191_v43 = vadd.f32 %v7804_v49, %v8723_v61  ;;  %v9209_v61 = vadd.f32 %v7791_v40, %v8753_v23 }
 0x501   : > { %2004 = vperm.xlu0 %7123, %v9167_v8  }
 0x502   : > { %13902 = vst [vmem:[#allocation109_spill] sm:$0xff] %v9191_v43  ;;  %13905 = vst [vmem:[#allocation112_spill] sm:$0xff] %v9209_v61 }
 0x504   : > { %2007 = vperm.xlu1 %7122, %v9177_v10   ;;  %v9184_v33 = vpop.permute.xlu1 %1869  ;;  %v9186_v12 = vpop.permute.xlu0 %1872  ;;  %v9205_v10 = vadd.f32 %v7806_v50, %v8737_v57  ;;  %v9223_v57 = vadd.f32 %v7793_v41, %v8767_v54 }
 0x505   : > { %2010 = vperm.xlu0 %7123, %v9181_v29  }
 0x506   : > { %13904 = vst [vmem:[#allocation111_spill] sm:$0xff] %v9205_v10  ;;  %13909 = vst [vmem:[#allocation116_spill] sm:$0xff] %v9223_v57 }
 0x508   : > { %2013 = vperm.xlu1 %7122, %v9191_v43   ;;  %v9198_v1 = vpop.permute.xlu1 %1875  ;;  %v9200_v8 = vpop.permute.xlu0 %1878  ;;  %v9219_v43 = vadd.f32 %v7808_v51, %v8751_v59  ;;  %v9237_v59 = vadd.f32 %v7796_v45, %v8781_v18 }
 0x509   : > { %2016 = vperm.xlu0 %7123, %v9195_v25  }
 0x50a   : > { %13908 = vst [vmem:[#allocation115_spill] sm:$0xff] %v9219_v43  ;;  %13912 = vst [vmem:[#allocation119_spill] sm:$0xff] %v9237_v59 }
 0x50c   : > { %2019 = vperm.xlu1 %7122, %v9205_v10   ;;  %v9212_v13 = vpop.permute.xlu1 %1881  ;;  %v9214_v29 = vpop.permute.xlu0 %1884  ;;  %v9233_v10 = vadd.f32 %v7810_v52, %v8765_v22  ;;  %v9251_v22 = vadd.f32 %v7781_v32, %v8795_v17 }
 0x50d   : > { %13906 = vst [vmem:[#allocation113_spill] sm:$0xff] %v9212_v13  ;;  %13907 = vst [vmem:[#allocation114_spill] sm:$0xff] %v9214_v29  ;;  %2022 = vperm.xlu0 %7123, %v9209_v61  }
 0x50e   : > { %13911 = vst [vmem:[#allocation118_spill] sm:$0xff] %v9233_v10  ;;  %13914 = vst [vmem:[#allocation121_spill] sm:$0xff] %v9251_v22 }
 0x510   : > { %2025 = vperm.xlu1 %7122, %v9219_v43   ;;  %v9226_v23 = vpop.permute.xlu1 %1887  ;;  %v9228_v25 = vpop.permute.xlu0 %1890  ;;  %v9247_v43 = vadd.f32 %v7779_v31, %v8779_v14  ;;  %v9265_v14 = vadd.f32 %v7783_v34, %v8809_v44 }
 0x511   : > { %13910 = vst [vmem:[#allocation117_spill] sm:$0xff] %v9226_v23  ;;  %2028 = vperm.xlu0 %7123, %v9223_v57  }
 0x512   : > { %13913 = vst [vmem:[#allocation120_spill] sm:$0xff] %v9247_v43  ;;  %13916 = vst [vmem:[#allocation123_spill] sm:$0xff] %v9265_v14 }
 0x514   : > { %2031 = vperm.xlu1 %7122, %v9233_v10   ;;  %v9240_v54 = vpop.permute.xlu1 %1893  ;;  %v9242_v61 = vpop.permute.xlu0 %1896  ;;  %v9261_v10 = vadd.f32 %v7798_v46, %v8793_v30  ;;  %v9279_v30 = vadd.f32 %v7785_v35, %v8823_v4 }
 0x515   : > { %2082 = vperm.xlu0 %7123, %v9237_v59  }
 0x516   : > { %13915 = vst [vmem:[#allocation122_spill] sm:$0xff] %v9261_v10  ;;  %13918 = vst [vmem:[#allocation125_spill] sm:$0xff] %v9279_v30 }
 0x518   : > { %2085 = vperm.xlu1 %7122, %v9247_v43   ;;  %v9254_v18 = vpop.permute.xlu1 %1899  ;;  %v9256_v57 = vpop.permute.xlu0 %1902  ;;  %v9275_v43 = vadd.f32 %v7800_v47, %v8807_v56  ;;  %v9293_v56 = vadd.f32 %v7787_v36, %v8837_v27 }
 0x519   : > { %2088 = vperm.xlu0 %7123, %v9251_v22  }
 0x51a   : > { %13917 = vst [vmem:[#allocation124_spill] sm:$0xff] %v9275_v43  ;;  %13920 = vst [vmem:[#allocation127_spill] sm:$0xff] %v9293_v56 }
 0x51c   : > { %2091 = vperm.xlu1 %7122, %v9261_v10   ;;  %v9268_v17 = vpop.permute.xlu1 %1905  ;;  %v9270_v59 = vpop.permute.xlu0 %1908  ;;  %v9289_v10 = vadd.f32 %v7802_v48, %v8821_v3  ;;  %v9307_v3 = vadd.f32 %v7789_v38, %v8851_v11 }
 0x51d   : > { %2094 = vperm.xlu0 %7123, %v9265_v14  }
 0x51e   : > { %13919 = vst [vmem:[#allocation126_spill] sm:$0xff] %v9289_v10  ;;  %13923 = vst [vmem:[#allocation130_spill] sm:$0xff] %v9307_v3 }
 0x520   : > { %2097 = vperm.xlu1 %7122, %v9275_v43   ;;  %v9282_v44 = vpop.permute.xlu1 %1911  ;;  %v9284_v22 = vpop.permute.xlu0 %1914  ;;  %v9303_v43 = vadd.f32 %v7804_v49, %v8835_v19  ;;  %v9321_v19 = vadd.f32 %v7791_v40, %v8865_v28 }
 0x521   : > { %2100 = vperm.xlu0 %7123, %v9279_v30  }
 0x522   : > { %13922 = vst [vmem:[#allocation129_spill] sm:$0xff] %v9303_v43  ;;  %13927 = vst [vmem:[#allocation134_spill] sm:$0xff] %v9321_v19 }
 0x524   : > { %2103 = vperm.xlu1 %7122, %v9289_v10   ;;  %v9296_v4 = vpop.permute.xlu1 %1917  ;;  %v9298_v14 = vpop.permute.xlu0 %1920  ;;  %v9317_v10 = vadd.f32 %v7806_v50, %v8849_v26  ;;  %v9335_v26 = vadd.f32 %v7793_v41, %v8879_v9 }
 0x525   : > { %13921 = vst [vmem:[#allocation128_spill] sm:$0xff] %v9298_v14  ;;  %2106 = vperm.xlu0 %7123, %v9293_v56  }
 0x526   : > { %13926 = vst [vmem:[#allocation133_spill] sm:$0xff] %v9317_v10  ;;  %13931 = vst [vmem:[#allocation138_spill] sm:$0xff] %v9335_v26 }
 0x528   : > { %2109 = vperm.xlu1 %7122, %v9303_v43   ;;  %v9310_v27 = vpop.permute.xlu1 %1923  ;;  %v9312_v30 = vpop.permute.xlu0 %1926  ;;  %v9331_v43 = vadd.f32 %v7808_v51, %v8863_v0 }
 0x529   : > { %13924 = vst [vmem:[#allocation131_spill] sm:$0xff] %v9310_v27  ;;  %13925 = vst [vmem:[#allocation132_spill] sm:$0xff] %v9312_v30  ;;  %2112 = vperm.xlu0 %7123, %v9307_v3  }
 0x52a   : > { %13930 = vst [vmem:[#allocation137_spill] sm:$0xff] %v9331_v43 }
 0x52c   : > { %2115 = vperm.xlu1 %7122, %v9317_v10   ;;  %v9324_v11 = vpop.permute.xlu1 %1929  ;;  %v9326_v56 = vpop.permute.xlu0 %1932  ;;  %v9345_v10 = vadd.f32 %v7810_v52, %v8877_v24 }
 0x52d   : > { %13928 = vst [vmem:[#allocation135_spill] sm:$0xff] %v9324_v11  ;;  %13929 = vst [vmem:[#allocation136_spill] sm:$0xff] %v9326_v56  ;;  %2118 = vperm.xlu0 %7123, %v9321_v19   ;;  %v13934_v19 = vld [vmem:[#allocation69_spill] sm:$0xff] }
 0x52e   : > { %13933 = vst [vmem:[#allocation140_spill] sm:$0xff] %v9345_v10  ;;  %v9349_v0 = vadd.f32 %v7796_v45, %v13934_v19 }
 0x530   : > { %2121 = vperm.xlu1 %7122, %v9331_v43   ;;  %v9338_v28 = vpop.permute.xlu1 %1935  ;;  %v9340_v3 = vpop.permute.xlu0 %1938  ;;  %13935 = vst [vmem:[#allocation69_spill] sm:$0xff] %v9349_v0  ;;  %v13936_v43 = vld [vmem:[#allocation68_spill] sm:$0xff] }
 0x531   : > { %13932 = vst [vmem:[#allocation139_spill] sm:$0xff] %v9338_v28  ;;  %2124 = vperm.xlu0 %7123, %v9335_v26   ;;  %v9359_v28 = vadd.f32 %v7779_v31, %v13936_v43  ;;  %v13938_v26 = vld [vmem:[#allocation73_spill] sm:$0xff]  ;;  %v9377_v43 = vadd.f32 %v7783_v34, %v8921_v16 }
 0x532   : > { %v9363_v24 = vadd.f32 %v7781_v32, %v13938_v26 }
 0x533   : > { %13937 = vst [vmem:[#allocation68_spill] sm:$0xff] %v9359_v28  ;;  %13942 = vst [vmem:[#allocation141_spill] sm:$0xff] %v9377_v43 }
 0x534   : > { %2127 = vperm.xlu1 %7122, %v9345_v10   ;;  %v9352_v9 = vpop.permute.xlu1 %1941  ;;  %v9354_v56 = vpop.permute.xlu0 %1944  ;;  %13939 = vst [vmem:[#allocation73_spill] sm:$0xff] %v9363_v24  ;;  %v13940_v10 = vld [vmem:[#allocation72_spill] sm:$0xff] }
 0x535   : > { %2130 = vperm.xlu0 %7123, %v9349_v0   ;;  %v9373_v11 = vadd.f32 %v7798_v46, %v13940_v10 }
 0x537   : > { %13941 = vst [vmem:[#allocation72_spill] sm:$0xff] %v9373_v11 }
 0x538   : > { %2133 = vperm.xlu1 %7122, %v9359_v28   ;;  %v9366_v19 = vpop.permute.xlu1 %1947  ;;  %v9368_v23 = vpop.permute.xlu0 %1950  ;;  %v13943_v28 = vld [vmem:[#allocation74_spill] sm:$0xff] }
 0x539   : > { %2136 = vperm.xlu0 %7123, %v9363_v24   ;;  %v9387_v30 = vadd.f32 %v7800_v47, %v13943_v28  ;;  %v13945_v24 = vld [vmem:[#allocation76_spill] sm:$0xff] }
 0x53a   : > { %v9391_v10 = vadd.f32 %v7785_v35, %v13945_v24 }
 0x53b   : > { %13944 = vst [vmem:[#allocation74_spill] sm:$0xff] %v9387_v30 }
 0x53c   : > { %2139 = vperm.xlu1 %7122, %v9373_v11   ;;  %v9380_v26 = vpop.permute.xlu1 %1953  ;;  %v9382_v0 = vpop.permute.xlu0 %1956  ;;  %13946 = vst [vmem:[#allocation76_spill] sm:$0xff] %v9391_v10  ;;  %v13948_v11 = vld [vmem:[#allocation75_spill] sm:$0xff] }
 0x53d   : > { %2142 = vperm.xlu0 %7123, %v9377_v43   ;;  %v9401_v27 = vadd.f32 %v7802_v48, %v13948_v11  ;;  %v13950_v43 = vld [vmem:[#allocation79_spill] sm:$0xff] }
 0x53e   : > { %v9405_v28 = vadd.f32 %v7787_v36, %v13950_v43 }
 0x53f   : > { %13949 = vst [vmem:[#allocation75_spill] sm:$0xff] %v9401_v27 }
 0x540   : > { %2145 = vperm.xlu1 %7122, %v9387_v30   ;;  %v9394_v16 = vpop.permute.xlu1 %1959  ;;  %v9396_v29 = vpop.permute.xlu0 %1962  ;;  %13951 = vst [vmem:[#allocation79_spill] sm:$0xff] %v9405_v28  ;;  %v13954_v30 = vld [vmem:[#allocation78_spill] sm:$0xff] }
 0x541   : > { %13947 = vst [vmem:[#allocation142_spill] sm:$0xff] %v9396_v29  ;;  %2148 = vperm.xlu0 %7123, %v9391_v10   ;;  %v9415_v29 = vadd.f32 %v7804_v49, %v13954_v30  ;;  %v13956_v10 = vld [vmem:[#allocation81_spill] sm:$0xff] }
 0x542   : > { %v9419_v11 = vadd.f32 %v7789_v38, %v13956_v10 }
 0x543   : > { %13955 = vst [vmem:[#allocation78_spill] sm:$0xff] %v9415_v29 }
 0x544   : > { %2151 = vperm.xlu1 %7122, %v9401_v27   ;;  %v9408_v24 = vpop.permute.xlu1 %1965  ;;  %v9410_v14 = vpop.permute.xlu0 %1968  ;;  %13957 = vst [vmem:[#allocation81_spill] sm:$0xff] %v9419_v11  ;;  %v13960_v27 = vld [vmem:[#allocation80_spill] sm:$0xff] }
 0x545   : > { %13952 = vst [vmem:[#allocation143_spill] sm:$0xff] %v9408_v24  ;;  %13953 = vst [vmem:[#allocation144_spill] sm:$0xff] %v9410_v14  ;;  %2154 = vperm.xlu0 %7123, %v9405_v28   ;;  %v9429_v14 = vadd.f32 %v7806_v50, %v13960_v27  ;;  %v13962_v28 = vld [vmem:[#allocation83_spill] sm:$0xff] }
 0x546   : > { %v9433_v30 = vadd.f32 %v7791_v40, %v13962_v28 }
 0x547   : > { %13961 = vst [vmem:[#allocation80_spill] sm:$0xff] %v9429_v14 }
 0x548   : > { %2157 = vperm.xlu1 %7122, %v9415_v29   ;;  %v9422_v43 = vpop.permute.xlu1 %1971  ;;  %v9424_v13 = vpop.permute.xlu0 %1974  ;;  %13963 = vst [vmem:[#allocation83_spill] sm:$0xff] %v9433_v30  ;;  %v13966_v29 = vld [vmem:[#allocation82_spill] sm:$0xff] }
 0x549   : > { %13958 = vst [vmem:[#allocation145_spill] sm:$0xff] %v9422_v43  ;;  %13959 = vst [vmem:[#allocation146_spill] sm:$0xff] %v9424_v13  ;;  %2160 = vperm.xlu0 %7123, %v9419_v11   ;;  %v9443_v13 = vadd.f32 %v7808_v51, %v13966_v29  ;;  %v13968_v11 = vld [vmem:[#allocation85_spill] sm:$0xff] }
 0x54a   : > { %v9447_v27 = vadd.f32 %v7793_v41, %v13968_v11 }
 0x54b   : > { %13967 = vst [vmem:[#allocation82_spill] sm:$0xff] %v9443_v13 }
 0x54c   : > { %2163 = vperm.xlu1 %7122, %v9429_v14   ;;  %v9436_v10 = vpop.permute.xlu1 %1977  ;;  %v9438_v24 = vpop.permute.xlu0 %1980  ;;  %13969 = vst [vmem:[#allocation85_spill] sm:$0xff] %v9447_v27  ;;  %v13971_v14 = vld [vmem:[#allocation84_spill] sm:$0xff] }
 0x54d   : > { %13964 = vst [vmem:[#allocation147_spill] sm:$0xff] %v9436_v10  ;;  %13965 = vst [vmem:[#allocation148_spill] sm:$0xff] %v9438_v24  ;;  %2166 = vperm.xlu0 %7123, %v9433_v30   ;;  %v9457_v24 = vadd.f32 %v7810_v52, %v13971_v14  ;;  %v13973_v30 = vld [vmem:[#allocation87_spill] sm:$0xff] }
 0x54e   : > { %v9461_v29 = vadd.f32 %v7796_v45, %v13973_v30 }
 0x54f   : > { %13972 = vst [vmem:[#allocation84_spill] sm:$0xff] %v9457_v24 }
 0x550   : > { %2169 = vperm.xlu1 %7122, %v9443_v13   ;;  %v9450_v28 = vpop.permute.xlu1 %1983  ;;  %v9452_v43 = vpop.permute.xlu0 %2034  ;;  %13974 = vst [vmem:[#allocation87_spill] sm:$0xff] %v9461_v29  ;;  %v13976_v13 = vld [vmem:[#allocation86_spill] sm:$0xff] }
 0x551   : > { %13970 = vst [vmem:[#allocation149_spill] sm:$0xff] %v9450_v28  ;;  %2172 = vperm.xlu0 %7123, %v9447_v27   ;;  %v9471_v28 = vadd.f32 %v7779_v31, %v13976_v13  ;;  %v13978_v27 = vld [vmem:[#allocation89_spill] sm:$0xff] }
 0x552   : > { %v9475_v14 = vadd.f32 %v7781_v32, %v13978_v27  ;;  %v13984_v27 = vld [vmem:[#allocation90_spill] sm:$0xff] }
 0x553   : > { %13977 = vst [vmem:[#allocation86_spill] sm:$0xff] %v9471_v28 }
 0x554   : > { %2175 = vperm.xlu1 %7122, %v9457_v24   ;;  %v9464_v11 = vpop.permute.xlu1 %2037  ;;  %v9466_v10 = vpop.permute.xlu0 %2040  ;;  %13979 = vst [vmem:[#allocation89_spill] sm:$0xff] %v9475_v14  ;;  %v13980_v24 = vld [vmem:[#allocation88_spill] sm:$0xff] }
 0x555   : > { %13975 = vst [vmem:[#allocation150_spill] sm:$0xff] %v9466_v10  ;;  %2178 = vperm.xlu0 %7123, %v9461_v29   ;;  %v9485_v10 = vadd.f32 %v7798_v46, %v13980_v24  ;;  %v13982_v29 = vld [vmem:[#allocation91_spill] sm:$0xff]  ;;  %v9503_v46 = vadd.f32 %v7785_v35, %v9048_v42 }
 0x556   : > { %v9489_v31 = vadd.f32 %v7783_v34, %v13982_v29  ;;  %v13987_v29 = vld [vmem:[#allocation92_spill] sm:$0xff] }
 0x557   : > { %13981 = vst [vmem:[#allocation88_spill] sm:$0xff] %v9485_v10  ;;  %13986 = vst [vmem:[#allocation151_spill] sm:$0xff] %v9503_v46 }
 0x558   : > { %2181 = vperm.xlu1 %7122, %v9471_v28   ;;  %v9478_v45 = vpop.permute.xlu1 %2043  ;;  %v9480_v30 = vpop.permute.xlu0 %2046  ;;  %13983 = vst [vmem:[#allocation91_spill] sm:$0xff] %v9489_v31  ;;  %v9499_v28 = vadd.f32 %v7800_v47, %v13984_v27  ;;  %v9517_v47 = vadd.f32 %v7787_v36, %v9062_v63  ;;  %v9527_v27 = vadd.f32 %v7804_v49, %v9060_v55 }
 0x559   : > { %2184 = vperm.xlu0 %7123, %v9475_v14   ;;  %v9545_v49 = vadd.f32 %v7791_v40, %v9095_v53  ;;  %v9555_v55 = vadd.f32 %v7808_v51, %v9088_v39 }
 0x55a   : > { %13985 = vst [vmem:[#allocation90_spill] sm:$0xff] %v9499_v28  ;;  %13989 = vst [vmem:[#allocation152_spill] sm:$0xff] %v9517_v47 }
 0x55b   : > { %13992 = vst [vmem:[#allocation155_spill] sm:$0xff] %v9527_v27  ;;  %13997 = vst [vmem:[#allocation160_spill] sm:$0xff] %v9545_v49 }
 0x55c   : > { %2187 = vperm.xlu1 %7122, %v9485_v10   ;;  %v9492_v32 = vpop.permute.xlu1 %2049  ;;  %v9494_v13 = vpop.permute.xlu0 %2052  ;;  %v9513_v10 = vadd.f32 %v7802_v48, %v13987_v29  ;;  %v9531_v48 = vadd.f32 %v7789_v38, %v9076_v62  ;;  %v9541_v29 = vadd.f32 %v7806_v50, %v9074_v2  ;;  %14000 = vst [vmem:[#allocation163_spill] sm:$0xff] %v9555_v55  ;;  %v14003_v2 = vld [vmem:[#allocation98_spill] sm:$0xff] }
 0x55d   : > { %2190 = vperm.xlu0 %7123, %v9489_v31   ;;  %v9559_v50 = vadd.f32 %v7793_v41, %v9113_v58  ;;  %v5726_v31 = vld [vmem:[%s13406_s4] sm:$0xff] }
 0x55e   : > { %13988 = vst [vmem:[#allocation92_spill] sm:$0xff] %v9513_v10  ;;  %13993 = vst [vmem:[#allocation156_spill] sm:$0xff] %v9531_v48 }
 0x55f   : > { %13996 = vst [vmem:[#allocation159_spill] sm:$0xff] %v9541_v29  ;;  %14001 = vst [vmem:[#allocation164_spill] sm:$0xff] %v9559_v50 }
 0x560   : > { %2193 = vperm.xlu1 %7122, %v9499_v28   ;;  %v9506_v34 = vpop.permute.xlu1 %2055  ;;  %v9508_v24 = vpop.permute.xlu0 %2058 }
 0x561   : > { %2196 = vperm.xlu0 %7123, %v9503_v46  }
 0x564   : > { %2199 = vperm.xlu1 %7122, %v9513_v10   ;;  %v9520_v35 = vpop.permute.xlu1 %2061  ;;  %v9522_v42 = vpop.permute.xlu0 %2064 }
 0x565   : > { %13990 = vst [vmem:[#allocation153_spill] sm:$0xff] %v9520_v35  ;;  %13991 = vst [vmem:[#allocation154_spill] sm:$0xff] %v9522_v42  ;;  %2202 = vperm.xlu0 %7123, %v9517_v47   ;;  %v14030_v42 = vld [vmem:[#allocation101_spill] sm:$0xff] }
 0x568   : > { %2205 = vperm.xlu1 %7122, %v9527_v27   ;;  %v9534_v36 = vpop.permute.xlu1 %2067  ;;  %v9536_v63 = vpop.permute.xlu0 %2070 }
 0x569   : > { %13994 = vst [vmem:[#allocation157_spill] sm:$0xff] %v9534_v36  ;;  %13995 = vst [vmem:[#allocation158_spill] sm:$0xff] %v9536_v63  ;;  %2208 = vperm.xlu0 %7123, %v9531_v48  }
 0x56c   : > { %2211 = vperm.xlu1 %7122, %v9541_v29   ;;  %v9548_v38 = vpop.permute.xlu1 %2073  ;;  %v9550_v62 = vpop.permute.xlu0 %2076  ;;  %v9569_v29 = vadd.f32 %v7810_v52, %v14003_v2 }
 0x56d   : > { %13998 = vst [vmem:[#allocation161_spill] sm:$0xff] %v9548_v38  ;;  %13999 = vst [vmem:[#allocation162_spill] sm:$0xff] %v9550_v62  ;;  %2214 = vperm.xlu0 %7123, %v9545_v49   ;;  %v14016_v49 = vld [vmem:[#allocation11_spill] sm:$0xff] }
 0x56e   : > { %14004 = vst [vmem:[#allocation98_spill] sm:$0xff] %v9569_v29 }
 0x570   : > { %2217 = vperm.xlu1 %7122, %v9555_v55   ;;  %v9562_v40 = vpop.permute.xlu1 %2079  ;;  %v9564_v53 = vpop.permute.xlu0 %1986 }
 0x571   : > { %14002 = vst [vmem:[#allocation165_spill] sm:$0xff] %v9562_v40  ;;  %2220 = vperm.xlu0 %7123, %v9559_v50   ;;  %v9608_v40 = vmul.f32 %v14016_v49, %v5726_v31 }
 0x573   : > { %14017 = vst [vmem:[#allocation11_spill] sm:$0xff] %v9608_v40 }
 0x574   : > { %2223 = vperm.xlu1 %7122, %v9569_v29   ;;  %v9572_v51 = vpop.permute.xlu1 %1989  ;;  %v9574_v39 = vpop.permute.xlu0 %1992 }
 0x578   : > { %v9576_v41 = vpop.permute.xlu1 %1995  ;;  %v9578_v58 = vpop.permute.xlu0 %1998 }
 0x57c   : > { %v9580_v55 = vpop.permute.xlu1 %2001  ;;  %v9582_v48 = vpop.permute.xlu0 %2004 }
 0x57d   : > { %14005 = vst [vmem:[#allocation166_spill] sm:$0xff] %v9582_v48 }
 0x580   : > { %v9584_v27 = vpop.permute.xlu1 %2007  ;;  %v9586_v50 = vpop.permute.xlu0 %2010 }
 0x581   : > { %14006 = vst [vmem:[#allocation167_spill] sm:$0xff] %v9584_v27  ;;  %14007 = vst [vmem:[#allocation168_spill] sm:$0xff] %v9586_v50 }
 0x584   : > { %v9588_v52 = vpop.permute.xlu1 %2013  ;;  %v9590_v2 = vpop.permute.xlu0 %2016 }
 0x585   : > { %14008 = vst [vmem:[#allocation169_spill] sm:$0xff] %v9588_v52  ;;  %14009 = vst [vmem:[#allocation170_spill] sm:$0xff] %v9590_v2 }
 0x588   : > { %v9592_v47 = vpop.permute.xlu1 %2019  ;;  %v9594_v10 = vpop.permute.xlu0 %2022 }
 0x589   : > { %14010 = vst [vmem:[#allocation171_spill] sm:$0xff] %v9592_v47  ;;  %14011 = vst [vmem:[#allocation172_spill] sm:$0xff] %v9594_v10  ;;  %v14022_v47 = vlaneseq }
 0x58b   : > { %v9621_v63 = vand.u32 127, %v14022_v47 }
 0x58c   : > { %v9596_v46 = vpop.permute.xlu1 %2025  ;;  %v9598_v28 = vpop.permute.xlu0 %2028 }
 0x58d   : > { %14012 = vst [vmem:[#allocation173_spill] sm:$0xff] %v9596_v46  ;;  %14013 = vst [vmem:[#allocation174_spill] sm:$0xff] %v9598_v28  ;;  %v5788_v46 = vsel %vm13562_vm1, %v9608_v40, -inf  ;;  %v2231_v31 = vadd.s32 4294967288, %v9621_v63  ;;  %v2238_v40 = vadd.s32 4294967280, %v9621_v63  ;;  %vm13563_vm1 = vcmask 1041409  }
 0x590   : > { %v9603_v29 = vpop.permute.xlu1 %2031  ;;  %v9605_v14 = vpop.permute.xlu0 %2082 }
 0x591   : > { %14014 = vst [vmem:[#allocation175_spill] sm:$0xff] %v9603_v29  ;;  %14015 = vst [vmem:[#allocation176_spill] sm:$0xff] %v9605_v14 }
 0x594   : > { %v9610_v62 = vpop.permute.xlu1 %2085  ;;  %v9612_v38 = vpop.permute.xlu0 %2088 }
 0x595   : > { %14018 = vst [vmem:[#allocation177_spill] sm:$0xff] %v9610_v62  ;;  %14019 = vst [vmem:[#allocation178_spill] sm:$0xff] %v9612_v38 }
 0x598   : > { %5789 = vmax.xlane.f32.xlu1 %v5788_v46  ;;  %v9616_v28 = vpop.permute.xlu1 %2091  ;;  %v9618_v10 = vpop.permute.xlu0 %2094  ;;  %v14027_v46 = vld [vmem:[#allocation8_spill] sm:$0xff] }
 0x599   : > { %14020 = vst [vmem:[#allocation179_spill] sm:$0xff] %v9616_v28  ;;  %14021 = vst [vmem:[#allocation180_spill] sm:$0xff] %v9618_v10  ;;  %v9634_v52 = vsub.s32 %v2231_v31, %v14027_v46  ;;  %v2245_v10 = vadd.s32 4294967272, %v9621_v63  ;;  %v9639_v47 = vsub.s32 %v9621_v63, %v14027_v46  ;;  %v9646_v50 = vsub.s32 %v2238_v40, %v14027_v46 }
 0x59a   : > { %v2259_v28 = vadd.s32 4294967256, %v9621_v63 }
 0x59b   : > { %v9652_v31 = vsub.s32 %v2245_v10, %v14027_v46  ;;  %v2230_v38 = vrot.slane %v14030_v42, %v9639_v47  ;;  %v2242_v40 = vrot.slane %v9128_v6, %v9646_v50  ;;  %v2266_v42 = vadd.s32 4294967248, %v9621_v63 }
 0x59c   : > { %v9623_v29 = vpop.permute.xlu1 %2097  ;;  %v9625_v36 = vpop.permute.xlu0 %2100  ;;  %v9670_v27 = vsub.s32 %v2259_v28, %v14027_v46  ;;  %v2343_v6 = vrot.slane %v9240_v54, %v9634_v52  ;;  %v2339_v48 = vrot.slane %v9228_v25, %v9639_v47 }
 0x59d   : > { %14023 = vst [vmem:[#allocation181_spill] sm:$0xff] %v9623_v29  ;;  %14024 = vst [vmem:[#allocation182_spill] sm:$0xff] %v9625_v36  ;;  %v2249_v10 = vrot.slane %v9142_v7, %v9652_v31  ;;  %v9691_v62 = vsub.s32 %v2266_v42, %v14027_v46  ;;  %v2353_v25 = vrot.slane %v9254_v18, %v9652_v31 }
 0x59e   : > { %14033 = vst [vmem:[#allocation188_spill] sm:$0xff] %v9670_v27  ;;  %v2263_v35 = vrot.slane %v9156_v5, %v9670_v27  ;;  %v2294_v5 = vadd.s32 4294967216, %v9621_v63  ;;  %v2422_v18 = vrot.slane %v9352_v9, %v9634_v52  ;;  %v2418_v9 = vrot.slane %v9340_v3, %v9639_v47 }
 0x59f   : > { %14036 = vst [vmem:[#allocation191_spill] sm:$0xff] %v9691_v62 }
 0x5a0   : > { %v9628_v49 = vpop.permute.xlu1 %2103  ;;  %v9630_v2 = vpop.permute.xlu0 %2106  ;;  %v2423_v3 = vsel %vm2236_vm7, %v2422_v18, %v2418_v9 }
 0x5a1   : > { %14025 = vst [vmem:[#allocation183_spill] sm:$0xff] %v9628_v49  ;;  %14026 = vst [vmem:[#allocation184_spill] sm:$0xff] %v9630_v2  ;;  %v2252_v2 = vadd.s32 4294967264, %v9621_v63  ;;  %v2235_v49 = vrot.slane %v9130_v20, %v9634_v52 }
 0x5a3   : > { %v9664_v14 = vsub.s32 %v2252_v2, %v14027_v46  ;;  %v2237_v20 = vsel %vm2236_vm7, %v2235_v49, %v2230_v38  ;;  %v2280_v2 = vadd.s32 4294967232, %v9621_v63 }
 0x5a4   : > { %v9641_v29 = vpop.permute.xlu1 %2109  ;;  %v9643_v36 = vpop.permute.xlu0 %2112  ;;  %v2244_v7 = vsel %vm2243_vm8, %v2242_v40, %v2237_v20 }
 0x5a5   : > { %14028 = vst [vmem:[#allocation185_spill] sm:$0xff] %v9641_v29  ;;  %14029 = vst [vmem:[#allocation186_spill] sm:$0xff] %v9643_v36  ;;  %v2256_v28 = vrot.slane %v9144_v21, %v9664_v14  ;;  %v2251_v54 = vsel %vm2250_vm9, %v2249_v10, %v2244_v7  ;;  %v2344_v21 = vsel %vm2236_vm7, %v2343_v6, %v2339_v48  ;;  %v2301_v48 = vadd.s32 4294967208, %v9621_v63 }
 0x5a6   : > { %v9702_v20 = vsub.s32 %v2280_v2, %v14027_v46  ;;  %v2270_v2 = vrot.slane %v9158_v60, %v9691_v62  ;;  %v2308_v60 = vadd.s32 4294967200, %v9621_v63 }
 0x5a8   : > { %v9657_v29 = vpop.permute.xlu1 %2115  ;;  %v9659_v36 = vpop.permute.xlu0 %2118  ;;  %14038 = vst [vmem:[#allocation193_spill] sm:$0xff] %v9702_v20 }
 0x5a9   : > { %14031 = vst [vmem:[#allocation101_spill] sm:$0xff] %v9657_v29  ;;  %14032 = vst [vmem:[#allocation187_spill] sm:$0xff] %v9659_v36  ;;  %v2273_v36 = vadd.s32 4294967240, %v9621_v63  ;;  %v2287_v29 = vadd.s32 4294967224, %v9621_v63 }
 0x5ab   : > { %v9696_v40 = vsub.s32 %v2273_v36, %v14027_v46  ;;  %v9711_v36 = vsub.s32 %v2287_v29, %v14027_v46 }
 0x5ac   : > { %v9677_v38 = vpop.permute.xlu1 %2121  ;;  %v9679_v49 = vpop.permute.xlu0 %2124 }
 0x5ad   : > { %14034 = vst [vmem:[#allocation189_spill] sm:$0xff] %v9677_v38  ;;  %14035 = vst [vmem:[#allocation190_spill] sm:$0xff] %v9679_v49  ;;  %v2348_v49 = vrot.slane %v9242_v61, %v9646_v50  ;;  %v2258_v61 = vsel %vm2257_vm10, %v2256_v28, %v2251_v54  ;;  %v2277_v28 = vrot.slane %v9170_v15, %v9696_v40 }
 0x5ae   : > { %14037 = vst [vmem:[#allocation192_spill] sm:$0xff] %v9696_v40  ;;  %14040 = vst [vmem:[#allocation195_spill] sm:$0xff] %v9711_v36  ;;  %v2265_v6 = vsel %vm13564_vm11, %v2263_v35, %v2258_v61  ;;  %v2363_v54 = vrot.slane %v9268_v17, %v9670_v27  ;;  %v9730_v35 = vsub.s32 %v2294_v5, %v14027_v46  ;;  %v2315_v17 = vadd.s32 4294967192, %v9621_v63 }
 0x5af   : > { %v2349_v7 = vsel %vm2243_vm8, %v2348_v49, %v2344_v21  ;;  %v9740_v21 = vsub.s32 %v2301_v48, %v14027_v46  ;;  %v2272_v5 = vsel %vm2271_vm12, %v2270_v2, %v2265_v6  ;;  %v2284_v61 = vrot.slane %v9172_v37, %v9702_v20 }
 0x5b0   : > { %v9705_v10 = vpop.permute.xlu1 %2127  ;;  %v9707_v42 = vpop.permute.xlu0 %2130  ;;  %v2354_v29 = vsel %vm2250_vm9, %v2353_v25, %v2349_v7  ;;  %14041 = vst [vmem:[#allocation196_spill] sm:$0xff] %v9730_v35  ;;  %v2432_v25 = vrot.slane %v9366_v19, %v9652_v31  ;;  %v2368_v7 = vrot.slane %v9270_v59, %v9691_v62  ;;  %v2279_v48 = vsel %vm2278_vm13, %v2277_v28, %v2272_v5 }
 0x5b1   : > { %14039 = vst [vmem:[#allocation194_spill] sm:$0xff] %v9705_v10  ;;  %v2358_v10 = vrot.slane %v9256_v57, %v9664_v14  ;;  %v2427_v57 = vrot.slane %v9354_v56, %v9646_v50  ;;  %14042 = vst [vmem:[#allocation197_spill] sm:$0xff] %v9740_v21  ;;  %v2291_v38 = vrot.slane %v9184_v33, %v9711_v36  ;;  %v2322_v28 = vadd.s32 4294967184, %v9621_v63 }
 0x5b2   : > { %v2373_v19 = vrot.slane %v9282_v44, %v9696_v40  ;;  %v9759_v6 = vsub.s32 %v2308_v60, %v14027_v46  ;;  %v9769_v33 = vsub.s32 %v2315_v17, %v14027_v46  ;;  %v2298_v9 = vrot.slane %v9186_v12, %v9730_v35 }
 0x5b3   : > { %v2359_v56 = vsel %vm2257_vm10, %v2358_v10, %v2354_v29  ;;  %v2428_v37 = vsel %vm2243_vm8, %v2427_v57, %v2423_v3  ;;  %v2437_v10 = vrot.slane %v9368_v23, %v9664_v14  ;;  %v2442_v29 = vrot.slane %v9380_v26, %v9670_v27 }
 0x5b4   : > { %v9735_v49 = vpop.permute.xlu1 %2133  ;;  %v9737_v15 = vpop.permute.xlu0 %2136  ;;  %v2364_v18 = vsel %vm13564_vm11, %v2363_v54, %v2359_v56  ;;  %14043 = vst [vmem:[#allocation198_spill] sm:$0xff] %v9759_v6  ;;  %14044 = vst [vmem:[#allocation199_spill] sm:$0xff] %v9769_v33  ;;  %v2433_v44 = vsel %vm2250_vm9, %v2432_v25, %v2428_v37  ;;  %v2286_v54 = vsel %vm2285_vm14, %v2284_v61, %v2279_v48 }
 0x5b5   : > { %v2369_v23 = vsel %vm2271_vm12, %v2368_v7, %v2364_v18  ;;  %v2378_v60 = vrot.slane %v9284_v22, %v9702_v20  ;;  %v2293_v57 = vsel %vm2292_vm15, %v2291_v38, %v2286_v54  ;;  %v2305_v17 = vrot.slane %v9198_v1, %v9740_v21 }
 0x5b6   : > { %v2374_v3 = vsel %vm2278_vm13, %v2373_v19, %v2369_v23  ;;  %v2383_v26 = vrot.slane %v9296_v4, %v9711_v36  ;;  %v2438_v25 = vsel %vm2257_vm10, %v2437_v10, %v2433_v44  ;;  %v2447_v12 = vrot.slane %v9382_v0, %v9691_v62  ;;  %v14046_v19 = vld [vmem:[#allocation113_spill] sm:$0xff]  ;;  %v14047_v10 = vld [vmem:[#allocation128_spill] sm:$0xff] }
 0x5b7   : > { %v9795_v38 = vsub.s32 %v2322_v28, %v14027_v46  ;;  %v2329_v1 = vadd.s32 4294967176, %v9621_v63  ;;  %v2443_v61 = vsel %vm13564_vm11, %v2442_v29, %v2438_v25  ;;  %v2452_v4 = vrot.slane %v9394_v16, %v9696_v40  ;;  %v14048_v28 = vld [vmem:[#allocation131_spill] sm:$0xff]  ;;  %v14049_v29 = vld [vmem:[#allocation142_spill] sm:$0xff] }
 0x5b8   : > { %v9764_v59 = vpop.permute.xlu1 %2139  ;;  %v9766_v2 = vpop.permute.xlu0 %2142  ;;  %v2300_v56 = vsel %vm13565_vm0, %v2298_v9, %v2293_v57  ;;  %v2312_v7 = vrot.slane %v9200_v8, %v9759_v6  ;;  %v2379_v0 = vsel %vm2285_vm14, %v2378_v60, %v2374_v3  ;;  %v2580_v48 = vrot.slane %v9464_v11, %v9634_v52  ;;  %v14050_v57 = vld [vmem:[#allocation143_spill] sm:$0xff]  ;;  %v14051_v3 = vld [vmem:[#allocation150_spill] sm:$0xff] }
 0x5b9   : > { %14045 = vst [vmem:[#allocation200_spill] sm:$0xff] %v9795_v38  ;;  %v2307_v18 = vsel %vm13566_vm2, %v2305_v17, %v2300_v56  ;;  %v2319_v63 = vrot.slane %v14046_v19, %v9769_v33  ;;  %v2384_v37 = vsel %vm2292_vm15, %v2383_v26, %v2379_v0  ;;  %v2388_v16 = vrot.slane %v14047_v10, %v9730_v35  ;;  %v14054_v10 = vld [vmem:[#allocation132_spill] sm:$0xff] }
 0x5ba   : > { %v2393_v44 = vrot.slane %v14048_v28, %v9740_v21  ;;  %v2448_v8 = vsel %vm2271_vm12, %v2447_v12, %v2443_v61  ;;  %v2457_v54 = vrot.slane %v14049_v29, %v9702_v20  ;;  %v2576_v11 = vrot.slane %v9452_v43, %v9639_v47 }
 0x5bb   : > { %v2453_v60 = vsel %vm2278_vm13, %v2452_v4, %v2448_v8  ;;  %v2462_v17 = vrot.slane %v14050_v57, %v9711_v36  ;;  %v2585_v26 = vrot.slane %v14051_v3, %v9646_v50  ;;  %v2314_v25 = vsel %vm2313_vm3, %v2312_v7, %v2307_v18  ;;  %v14053_v4 = vld [vmem:[#allocation114_spill] sm:$0xff]  ;;  %v14057_v57 = vld [vmem:[#allocation145_spill] sm:$0xff] }
 0x5bc   : > { %v9790_v5 = vpop.permute.xlu1 %2145  ;;  %v9792_v22 = vpop.permute.xlu0 %2148  ;;  %v9831_v12 = vsub.s32 %v2329_v1, %v14027_v46  ;;  %v2581_v43 = vsel %vm2236_vm7, %v2580_v48, %v2576_v11  ;;  %v2590_v61 = vrot.slane %v9478_v45, %v9652_v31  ;;  %v2321_v56 = vsel %vm2320_vm4, %v2319_v63, %v2314_v25  ;;  %v14055_v1 = vld [vmem:[#allocation135_spill] sm:$0xff] }
 0x5bd   : > { %v2326_v0 = vrot.slane %v14053_v4, %v9795_v38  ;;  %v2389_v19 = vsel %vm13565_vm0, %v2388_v16, %v2384_v37  ;;  %v2398_v28 = vrot.slane %v14054_v10, %v9759_v6  ;;  %v2403_v18 = vrot.slane %v14055_v1, %v9769_v33  ;;  %v14056_v37 = vld [vmem:[#allocation144_spill] sm:$0xff] }
 0x5be   : > { %14052 = vst [vmem:[#allocation113_spill] sm:$0xff] %v9831_v12  ;;  %v2394_v7 = vsel %vm13566_vm2, %v2393_v44, %v2389_v19  ;;  %v2458_v48 = vsel %vm2285_vm14, %v2457_v54, %v2453_v60  ;;  %v2501_v45 = vrot.slane %v9572_v51, %v9634_v52  ;;  %v2467_v16 = vrot.slane %v14056_v37, %v9730_v35 }
 0x5bf   : > { %v2463_v29 = vsel %vm2292_vm15, %v2462_v17, %v2458_v48  ;;  %v2586_v11 = vsel %vm2243_vm8, %v2585_v26, %v2581_v43  ;;  %v2595_v44 = vrot.slane %v9480_v30, %v9664_v14  ;;  %v2472_v54 = vrot.slane %v14057_v57, %v9740_v21  ;;  %v14058_v17 = vld [vmem:[#allocation117_spill] sm:$0xff]  ;;  %v14059_v26 = vld [vmem:[#allocation136_spill] sm:$0xff] }
 0x5c0   : > { %v9820_v9 = vpop.permute.xlu1 %2151  ;;  %v9822_v23 = vpop.permute.xlu0 %2154  ;;  %v2591_v60 = vsel %vm2250_vm9, %v2590_v61, %v2586_v11  ;;  %v2600_v51 = vrot.slane %v9492_v32, %v9670_v27  ;;  %v2497_v3 = vrot.slane %v9564_v53, %v9639_v47  ;;  %v2333_v25 = vrot.slane %v14058_v17, %v9831_v12  ;;  %v14060_v61 = vld [vmem:[#allocation139_spill] sm:$0xff] }
 0x5c1   : > { %v2399_v4 = vsel %vm2313_vm3, %v2398_v28, %v2394_v7  ;;  %v2408_v43 = vrot.slane %v14059_v26, %v9795_v38  ;;  %v2506_v30 = vrot.slane %v9574_v39, %v9646_v50  ;;  %v2413_v10 = vrot.slane %v14060_v61, %v9831_v12  ;;  %v14061_v7 = vld [vmem:[#allocation146_spill] sm:$0xff]  ;;  %v14063_v26 = vld [vmem:[#allocation148_spill] sm:$0xff] }
 0x5c2   : > { %v2404_v19 = vsel %vm2320_vm4, %v2403_v18, %v2399_v4  ;;  %v2502_v32 = vsel %vm2236_vm7, %v2501_v45, %v2497_v3  ;;  %v2511_v53 = vrot.slane %v9576_v41, %v9652_v31  ;;  %v2468_v28 = vsel %vm13565_vm0, %v2467_v16, %v2463_v29  ;;  %v14062_v45 = vld [vmem:[#allocation147_spill] sm:$0xff] }
 0x5c3   : > { %v2477_v37 = vrot.slane %v14061_v7, %v9759_v6  ;;  %v2596_v39 = vsel %vm2257_vm10, %v2595_v44, %v2591_v60  ;;  %v2605_v18 = vrot.slane %v9494_v13, %v9691_v62  ;;  %v2473_v11 = vsel %vm13566_vm2, %v2472_v54, %v2468_v28  ;;  %v14066_v7 = vld [vmem:[#allocation166_spill] sm:$0xff] }
 0x5c4   : > { %v9848_v63 = vpop.permute.xlu1 %2157  ;;  %v9850_v8 = vpop.permute.xlu0 %2160  ;;  %v2482_v57 = vrot.slane %v14062_v45, %v9769_v33  ;;  %v2601_v41 = vsel %vm13564_vm11, %v2600_v51, %v2596_v39  ;;  %v2610_v3 = vrot.slane %v9506_v34, %v9696_v40  ;;  %v2409_v29 = vsel %vm2327_vm5, %v2408_v43, %v2404_v19  ;;  %v14064_v19 = vld [vmem:[#allocation177_spill] sm:$0xff] }
 0x5c5   : > { %v2507_v16 = vsel %vm2243_vm8, %v2506_v30, %v2502_v32  ;;  %v2516_v44 = vrot.slane %v9578_v58, %v9664_v14  ;;  %v2328_v13 = vsel %vm2327_vm5, %v2326_v0, %v2321_v56  ;;  %v2414_v54 = vsel %vm2334_vm6, %v2413_v10, %v2409_v29  ;;  %v14065_v32 = vld [vmem:[#allocation153_spill] sm:$0xff] }
 0x5c6   : > { %v2512_v60 = vsel %vm2250_vm9, %v2511_v53, %v2507_v16  ;;  %v2521_v51 = vrot.slane %v9580_v55, %v9670_v27  ;;  %v2478_v4 = vsel %vm2313_vm3, %v2477_v37, %v2473_v11  ;;  %v2487_v43 = vrot.slane %v14063_v26, %v9795_v38  ;;  %v14067_v37 = vld [vmem:[#allocation167_spill] sm:$0xff]  ;;  %v14069_v29 = vld [vmem:[#allocation149_spill] sm:$0xff] }
 0x5c7   : > { %v2606_v58 = vsel %vm2271_vm12, %v2605_v18, %v2601_v41  ;;  %v2615_v56 = vrot.slane %v9508_v24, %v9702_v20  ;;  %v2335_v0 = vsel %vm2334_vm6, %v2333_v25, %v2328_v13  ;;  %v2483_v30 = vsel %vm2320_vm4, %v2482_v57, %v2478_v4  ;;  %v14068_v18 = vld [vmem:[#allocation176_spill] sm:$0xff]  ;;  %v14070_v13 = vld [vmem:[#allocation178_spill] sm:$0xff] }
 0x5c8   : > { %v9878_v1 = vpop.permute.xlu1 %2163  ;;  %v9880_v48 = vpop.permute.xlu0 %2166  ;;  %v2611_v55 = vsel %vm2278_vm13, %v2610_v3, %v2606_v58  ;;  %v2659_v61 = vrot.slane %v14064_v19, %v9634_v52  ;;  %v9919_v10 = vsel %vm13563_vm1, %v2414_v54, %v2335_v0  ;;  %v2620_v53 = vrot.slane %v14065_v32, %v9711_v36 }
 0x5c9   : > { %v2517_v28 = vsel %vm2257_vm10, %v2516_v44, %v2512_v60  ;;  %v2526_v24 = vrot.slane %v14066_v7, %v9691_v62  ;;  %v2531_v39 = vrot.slane %v14067_v37, %v9696_v40  ;;  %v2655_v11 = vrot.slane %v14068_v18, %v9639_v47  ;;  %v14071_v60 = vld [vmem:[#allocation154_spill] sm:$0xff] }
 0x5ca   : > { %v2522_v25 = vsel %vm13564_vm11, %v2521_v51, %v2517_v28  ;;  %v2738_v45 = vrot.slane %v9735_v49, %v9634_v52  ;;  %v2488_v3 = vsel %vm2327_vm5, %v2487_v43, %v2483_v30  ;;  %v2492_v16 = vrot.slane %v14069_v29, %v9831_v12  ;;  %v14072_v49 = vld [vmem:[#allocation179_spill] sm:$0xff] }
 0x5cb   : > { %v2616_v44 = vsel %vm2285_vm14, %v2615_v56, %v2611_v55  ;;  %v2664_v54 = vrot.slane %v14070_v13, %v9646_v50  ;;  %v2625_v51 = vrot.slane %v14071_v60, %v9730_v35  ;;  %v2660_v4 = vsel %vm2236_vm7, %v2659_v61, %v2655_v11  ;;  %v14073_v56 = vld [vmem:[#allocation168_spill] sm:$0xff]  ;;  %v14074_v61 = vld [vmem:[#allocation169_spill] sm:$0xff] }
 0x5cc   : > { %v9903_v17 = vpop.permute.xlu1 %2169  ;;  %v9905_v34 = vpop.permute.xlu0 %2172  ;;  %v2669_v26 = vrot.slane %v14072_v49, %v9652_v31  ;;  %v2734_v58 = vrot.slane %v9707_v42, %v9639_v47  ;;  %v2621_v43 = vsel %vm2292_vm15, %v2620_v53, %v2616_v44  ;;  %v2527_v0 = vsel %vm2271_vm12, %v2526_v24, %v2522_v25  ;;  %v14075_v25 = vld [vmem:[#allocation180_spill] sm:$0xff] }
 0x5cd   : > { %v2536_v30 = vrot.slane %v14073_v56, %v9702_v20  ;;  %v2743_v55 = vrot.slane %v9737_v15, %v9646_v50  ;;  %v2532_v19 = vsel %vm2278_vm13, %v2531_v39, %v2527_v0  ;;  %v2541_v32 = vrot.slane %v14074_v61, %v9711_v36 }
 0x5ce   : > { %v2739_v28 = vsel %vm2236_vm7, %v2738_v45, %v2734_v58  ;;  %v2748_v42 = vrot.slane %v9764_v59, %v9652_v31  ;;  %v2665_v24 = vsel %vm2243_vm8, %v2664_v54, %v2660_v4  ;;  %v2674_v37 = vrot.slane %v14075_v25, %v9664_v14  ;;  %v14076_v45 = vld [vmem:[#allocation181_spill] sm:$0xff] }
 0x5cf   : > { %v9966_v39 = vsel %vm2334_vm6, %v2492_v16, %v2488_v3  ;;  %v2670_v11 = vsel %vm2250_vm9, %v2669_v26, %v2665_v24  ;;  %v2679_v29 = vrot.slane %v14076_v45, %v9670_v27  ;;  %v2626_v44 = vsel %vm13565_vm0, %v2625_v51, %v2621_v43  ;;  %v14077_v3 = vld [vmem:[#allocation170_spill] sm:$0xff] }
 0x5d0   : > { %v9933_v57 = vpop.permute.xlu1 %2175  ;;  %v2179_v41 = vpop.permute.xlu0 %2178  ;;  %v2744_v13 = vsel %vm2243_vm8, %v2743_v55, %v2739_v28  ;;  %v2753_v54 = vrot.slane %v9766_v2, %v9664_v14  ;;  %v2537_v60 = vsel %vm2285_vm14, %v2536_v30, %v2532_v19  ;;  %v2546_v16 = vrot.slane %v14077_v3, %v9730_v35  ;;  %v14078_v2 = vld [vmem:[#allocation182_spill] sm:$0xff]  ;;  %v14079_v55 = vld [vmem:[#allocation183_spill] sm:$0xff]  ;;  %v14080_v28 = vld [vmem:[#allocation157_spill] sm:$0xff] }
 0x5d1   : > { %v2813_v18 = vrot.slane %v2179_v41, %v9639_v47  ;;  %v2749_v4 = vsel %vm2250_vm9, %v2748_v42, %v2744_v13  ;;  %v2758_v49 = vrot.slane %v9790_v5, %v9670_v27  ;;  %v2542_v51 = vsel %vm2292_vm15, %v2541_v32, %v2537_v60  ;;  %v14081_v24 = vld [vmem:[#allocation158_spill] sm:$0xff]  ;;  %v14084_v3 = vld [vmem:[#allocation185_spill] sm:$0xff] }
 0x5d2   : > { %v2675_v43 = vsel %vm2257_vm10, %v2674_v37, %v2670_v11  ;;  %v2684_v0 = vrot.slane %v14078_v2, %v9691_v62  ;;  %v2689_v19 = vrot.slane %v14079_v55, %v9696_v40  ;;  %v2630_v42 = vrot.slane %v14080_v28, %v9740_v21  ;;  %v14082_v37 = vld [vmem:[#allocation171_spill] sm:$0xff] }
 0x5d3   : > { %v2680_v30 = vsel %vm13564_vm11, %v2679_v29, %v2675_v43  ;;  %v2754_v32 = vsel %vm2257_vm10, %v2753_v54, %v2749_v4  ;;  %v2635_v25 = vrot.slane %v14081_v24, %v9759_v6  ;;  %v2768_v11 = vrot.slane %v9820_v9, %v9696_v40  ;;  %v14088_v24 = vld [vmem:[#allocation101_spill] sm:$0xff] }
 0x5d4   : > { %v2182_v7 = vpop.permute.xlu1 %2181  ;;  %v2185_v53 = vpop.permute.xlu0 %2184  ;;  %v2685_v13 = vsel %vm2271_vm12, %v2684_v0, %v2680_v30  ;;  %v2699_v4 = vrot.slane %v14084_v3, %v9711_v36  ;;  %v14086_v0 = vld [vmem:[#allocation173_spill] sm:$0xff]  ;;  %v2778_v55 = vrot.slane %v9848_v63, %v9711_v36  ;;  %vm13568_vm1 = vcmask 1042434  }
 0x5d5   : > { %v2817_v15 = vrot.slane %v2182_v7, %v9634_v52  ;;  %v2822_v59 = vrot.slane %v2185_v53, %v9646_v50  ;;  %v2763_v7 = vrot.slane %v9792_v22, %v9691_v62  ;;  %v14083_v22 = vld [vmem:[#allocation184_spill] sm:$0xff]  ;;  %v2690_v60 = vsel %vm2278_vm13, %v2689_v19, %v2685_v13 }
 0x5d6   : > { %v2694_v54 = vrot.slane %v14083_v22, %v9702_v20  ;;  %v2788_v22 = vrot.slane %v9878_v1, %v9740_v21 }
 0x5d7   : > { %v2818_v41 = vsel %vm2236_vm7, %v2817_v15, %v2813_v18  ;;  %v2551_v18 = vrot.slane %v14082_v37, %v9740_v21  ;;  %v2759_v15 = vsel %vm13564_vm11, %v2758_v49, %v2754_v32  ;;  %v2709_v37 = vrot.slane %v14088_v24, %v9740_v21 }
 0x5d8   : > { %v2188_v26 = vpop.permute.xlu1 %2187  ;;  %v2191_v58 = vpop.permute.xlu0 %2190  ;;  %v2823_v61 = vsel %vm2243_vm8, %v2822_v59, %v2818_v41  ;;  %v2547_v59 = vsel %vm13565_vm0, %v2546_v16, %v2542_v51  ;;  %v2764_v16 = vsel %vm2271_vm12, %v2763_v7, %v2759_v15  ;;  %v2773_v51 = vrot.slane %v9822_v23, %v9702_v20  ;;  %v14087_v23 = vld [vmem:[#allocation186_spill] sm:$0xff] }
 0x5d9   : > { %v2827_v56 = vrot.slane %v2188_v26, %v9652_v31  ;;  %v2832_v5 = vrot.slane %v2191_v58, %v9664_v14  ;;  %v14085_v26 = vld [vmem:[#allocation172_spill] sm:$0xff]  ;;  %v2552_v2 = vsel %vm13566_vm2, %v2551_v18, %v2547_v59  ;;  %v2769_v30 = vsel %vm2278_vm13, %v2768_v11, %v2764_v16 }
 0x5da   : > { %v2556_v58 = vrot.slane %v14085_v26, %v9759_v6  ;;  %v2695_v28 = vsel %vm2285_vm14, %v2694_v54, %v2690_v60  ;;  %v2704_v32 = vrot.slane %v14087_v23, %v9730_v35  ;;  %v14090_v60 = vld [vmem:[#allocation175_spill] sm:$0xff] }
 0x5db   : > { %v2828_v53 = vsel %vm2250_vm9, %v2827_v56, %v2823_v61  ;;  %v2561_v56 = vrot.slane %v14086_v0, %v9769_v33  ;;  %v2571_v3 = vrot.slane %v14090_v60, %v9831_v12  ;;  %v2793_v0 = vrot.slane %v9880_v48, %v9759_v6 }
 0x5dc   : > { %v2194_v45 = vpop.permute.xlu1 %2193  ;;  %v2197_v29 = vpop.permute.xlu0 %2196  ;;  %v2833_v49 = vsel %vm2257_vm10, %v2832_v5, %v2828_v53  ;;  %v2631_v5 = vsel %vm13566_vm2, %v2630_v42, %v2626_v44  ;;  %v2700_v53 = vsel %vm2292_vm15, %v2699_v4, %v2695_v28  ;;  %v2557_v15 = vsel %vm2313_vm3, %v2556_v58, %v2552_v2  ;;  %v14092_v58 = vld [vmem:[#allocation189_spill] sm:$0xff] }
 0x5dd   : > { %v2837_v41 = vrot.slane %v2194_v45, %v9670_v27  ;;  %v2842_v9 = vrot.slane %v2197_v29, %v9691_v62  ;;  %v2774_v44 = vsel %vm2285_vm14, %v2773_v51, %v2769_v30  ;;  %v2783_v42 = vrot.slane %v9850_v8, %v9730_v35  ;;  %v14089_v29 = vld [vmem:[#allocation174_spill] sm:$0xff]  ;;  %v14091_v8 = vld [vmem:[#allocation187_spill] sm:$0xff]  ;;  %v14093_v30 = vld [vmem:[#allocation161_spill] sm:$0xff] }
 0x5de   : > { %v2562_v45 = vsel %vm2320_vm4, %v2561_v56, %v2557_v15  ;;  %v2566_v59 = vrot.slane %v14089_v29, %v9795_v38  ;;  %v2779_v13 = vsel %vm2292_vm15, %v2778_v55, %v2774_v44  ;;  %v2705_v4 = vsel %vm13565_vm0, %v2704_v32, %v2700_v53  ;;  %v14096_v15 = vld [vmem:[#allocation194_spill] sm:$0xff] }
 0x5df   : > { %v2838_v43 = vsel %vm13564_vm11, %v2837_v41, %v2833_v49  ;;  %vm13567_vm11 = vcmask 1043459   ;;  %v2714_v49 = vrot.slane %v14091_v8, %v9759_v6  ;;  %v2710_v26 = vsel %vm13566_vm2, %v2709_v37, %v2705_v4  ;;  %v14095_v37 = vld [vmem:[#allocation190_spill] sm:$0xff] }
 0x5e0   : > { %v2200_v19 = vpop.permute.xlu1 %2199  ;;  %v2203_v61 = vpop.permute.xlu0 %2202  ;;  %v2843_v18 = vsel %vm2271_vm12, %v2842_v9, %v2838_v43  ;;  %v2719_v16 = vrot.slane %v14092_v58, %v9769_v33  ;;  %v2636_v43 = vsel %vm2313_vm3, %v2635_v25, %v2631_v5  ;;  %v2784_v2 = vsel %vm13565_vm0, %v2783_v42, %v2779_v13  ;;  %v14094_v25 = vld [vmem:[#allocation162_spill] sm:$0xff] }
 0x5e1   : > { %v2847_v7 = vrot.slane %v2200_v19, %v9696_v40  ;;  %v2852_v63 = vrot.slane %v2203_v61, %v9702_v20  ;;  %v2640_v55 = vrot.slane %v14093_v30, %v9769_v33  ;;  %v2567_v19 = vsel %vm2327_vm5, %v2566_v59, %v2562_v45  ;;  %v14097_v59 = vld [vmem:[#allocation165_spill] sm:$0xff] }
 0x5e2   : > { %v2789_v61 = vsel %vm13566_vm2, %v2788_v22, %v2784_v2  ;;  %v2798_v28 = vrot.slane %v9903_v17, %v9769_v33  ;;  %v2645_v5 = vrot.slane %v14094_v25, %v9795_v38  ;;  %v2715_v48 = vsel %vm2313_vm3, %v2714_v49, %v2710_v26 }
 0x5e3   : > { %v2848_v11 = vsel %vm2278_vm13, %v2847_v7, %v2843_v18  ;;  %v2572_v7 = vsel %vm2334_vm6, %v2571_v3, %v2567_v19  ;;  %v2720_v24 = vsel %vm2320_vm4, %v2719_v16, %v2715_v48  ;;  %v2724_v18 = vrot.slane %v14095_v37, %v9795_v38  ;;  %v14100_v48 = vld [vmem:[#allocation10_spill] sm:$0xff]  ;;  %v14101_v37 = vld [vmem:[#allocation45_spill] sm:$0xff] }
 0x5e4   : > { %v2206_v54 = vpop.permute.xlu1 %2205  ;;  %v2209_v41 = vpop.permute.xlu0 %2208  ;;  %v2853_v51 = vsel %vm2285_vm14, %v2852_v63, %v2848_v11  ;;  %v2729_v44 = vrot.slane %v14096_v15, %v9831_v12  ;;  %v2794_v42 = vsel %vm2313_vm3, %v2793_v0, %v2789_v61  ;;  %v2803_v11 = vrot.slane %v9905_v34, %v9795_v38  ;;  %v14098_v61 = vld [vmem:[#allocation11_spill] sm:$0xff]  ;;  %v14103_v15 = vld [vmem:[#allocation52_spill] sm:$0xff] }
 0x5e5   : > { %v2857_v9 = vrot.slane %v2206_v54, %v9711_v36  ;;  %v2862_v1 = vrot.slane %v2209_v41, %v9730_v35  ;;  %v2641_v29 = vsel %vm2320_vm4, %v2640_v55, %v2636_v43  ;;  %v2650_v13 = vrot.slane %v14097_v59, %v9831_v12 }
 0x5e6   : > { %v2799_v22 = vsel %vm2320_vm4, %v2798_v28, %v2794_v42  ;;  %v2808_v54 = vrot.slane %v9933_v57, %v9831_v12  ;;  %v2892_v3 = vsel %vm13568_vm1, %v9966_v39, %v9919_v10  ;;  %v2725_v8 = vsel %vm2327_vm5, %v2724_v18, %v2720_v24  ;;  %v14104_v42 = vld [vmem:[#allocation39_spill] sm:$0xff] }
 0x5e7   : > { %v2858_v56 = vsel %vm2292_vm15, %v2857_v9, %v2853_v51  ;;  %v2894_v4 = vsel %vm13567_vm11, %v2572_v7, %v2892_v3  ;;  %v2646_v57 = vsel %vm2327_vm5, %v2645_v5, %v2641_v29  ;;  %v2730_v26 = vsel %vm2334_vm6, %v2729_v44, %v2725_v8 }
 0x5e8   : > { %v2212_v23 = vpop.permute.xlu1 %2211  ;;  %v2215_v32 = vpop.permute.xlu0 %2214  ;;  %v2863_v63 = vsel %vm13565_vm0, %v2862_v1, %v2858_v56  ;;  %vm13569_vm0 = vcmask 1044484   ;;  %v2804_v58 = vsel %vm2327_vm5, %v2803_v11, %v2799_v22  ;;  %v2651_v39 = vsel %vm2334_vm6, %v2650_v13, %v2646_v57  ;;  %v14105_v13 = vld [vmem:[#allocation54_spill] sm:$0xff] }
 0x5e9   : > { %v2867_v53 = vrot.slane %v2212_v23, %v9740_v21  ;;  %v2872_v17 = vrot.slane %v2215_v32, %v9759_v6  ;;  %v2809_v51 = vsel %vm2334_vm6, %v2808_v54, %v2804_v58  ;;  %vm13718_vm11 = vcmask 1046534  }
 0x5ea   : > { %v2896_v43 = vsel %vm13569_vm0, %v2651_v39, %v2894_v4  ;;  %vm13711_vm1 = vcmask 1047559   ;;  %vm14099_vm0 = vcmask 261120   ;;  %v13572_v5 = vsub.s32 1, %v14027_v46  ;;  %v14110_v39 = vld [vmem:[#allocation41_spill] sm:$0xff] }
 0x5eb   : > { %v2868_v45 = vsel %vm13566_vm2, %v2867_v53, %v2863_v63  ;;  %vm2897_vm2 = vcmask 1045509   ;;  %v14102_v63 = vld [vmem:[#allocation37_spill] sm:$0xff] }
 0x5ec   : > { %v2218_v41 = vpop.permute.xlu1 %2217  ;;  %v2221_v60 = vpop.permute.xlu0 %2220  ;;  %v2873_v49 = vsel %vm2313_vm3, %v2872_v17, %v2868_v45  ;;  %v2898_v0 = vsel %vm2897_vm2, %v2730_v26, %v2896_v43  ;;  %v14109_v26 = vld [vmem:[#allocation58_spill] sm:$0xff] }
 0x5ed   : > { %v2877_v34 = vrot.slane %v2218_v41, %v9769_v33  ;;  %v2882_v9 = vrot.slane %v2221_v60, %v9795_v38  ;;  %v2900_v30 = vsel %vm13718_vm11, %v2809_v51, %v2898_v0  ;;  %v14106_v41 = vld [vmem:[#allocation38_spill] sm:$0xff] }
 0x5ef   : > { %v2878_v10 = vsel %vm2320_vm4, %v2877_v34, %v2873_v49  ;;  %v14107_v34 = vld [vmem:[#allocation56_spill] sm:$0xff] }
 0x5f0   : > { %v2224_v16 = vpop.permute.xlu1 %2223  ;;  %v2883_v2 = vsel %vm2327_vm5, %v2882_v9, %v2878_v10  ;;  %v14108_v49 = vld [vmem:[#allocation40_spill] sm:$0xff] }
 0x5f1   : > { %v2887_v1 = vrot.slane %v2224_v16, %v9831_v12 }
 0x5f3   : > { %v2888_v56 = vsel %vm2334_vm6, %v2887_v1, %v2883_v2  ;;  %v14111_v1 = vld [vmem:[#allocation60_spill] sm:$0xff] }
 0x5f4   : > { %v2902_v55 = vsel %vm13711_vm1, %v2888_v56, %v2900_v30  ;;  %v14113_v56 = vld [vmem:[#allocation42_spill] sm:$0xff]  ;;  %vm14399_vm1 = vmmov %vm14099_vm0 }
 0x5f5   : > { %2904 = vmax.xlane.f32.xlu0 %v2902_v55 }
 0x621   : > { %v5790_v19 = vpop.xlane.xlu1 %5789 }
 0x622   : > { %v5791_v28 = vsub.f32 %v14098_v61, %v5790_v19  ;;  %v14115_v61 = vld [vmem:[#allocation62_spill] sm:$0xff] }
 0x624   : > { %v5792_v23 = vmul.f32 1.442695, %v5791_v28 }
 0x626   : > { %7150 = vpow2.f32 %v5792_v23 }
 0x633   : > { %v10115_v32 = vpop.eup %7150 }
 0x634   : > { %v5794_v25 = vsel %vm14099_vm0, %v10115_v32, 0.0 }
 0x635   : > { %5795 = vadd.xlane.f32.xlu0 %v5794_v25 }
 0x67e   : > { %v10120_v7 = vpop.xlane.xlu0 %2904 }
 0x67f   : > { %v10124_v53 = vrot.slane %v10120_v7, %v14100_v48  ;;  %v10129_v24 = vrot.slane %v10120_v7, %v13572_v5 }
 0x681   : > { %v2955_v18 = vsub.f32 %v14101_v37, %v10124_v53  ;;  %v2947_v17 = vsub.f32 %v14102_v63, %v10124_v53  ;;  %v2962_v44 = vsub.f32 %v14103_v15, %v10124_v53  ;;  %v2948_v11 = vsub.f32 %v14104_v42, %v10124_v53  ;;  %v14117_v37 = vld [vmem:[#allocation43_spill] sm:$0xff]  ;;  %v14119_v15 = vld [vmem:[#allocation64_spill] sm:$0xff] }
 0x682   : > { %v2964_v22 = vsub.f32 %v14105_v13, %v10129_v24  ;;  %v2949_v60 = vsub.f32 %v14106_v41, %v10124_v53  ;;  %v2966_v4 = vsub.f32 %v14107_v34, %v10129_v24  ;;  %v2950_v9 = vsub.f32 %v14108_v49, %v10124_v53  ;;  %v14125_v34 = vld [vmem:[#allocation46_spill] sm:$0xff] }
 0x683   : > { %v3091_v45 = vmul.f32 1.442695, %v2955_v18  ;;  %v3075_v29 = vmul.f32 1.442695, %v2947_v17  ;;  %v3105_v59 = vmul.f32 1.442695, %v2962_v44  ;;  %v2968_v58 = vsub.f32 %v14109_v26, %v10129_v24 }
 0x684   : > { %v3077_v54 = vmul.f32 1.442695, %v2948_v11  ;;  %v3109_v3 = vmul.f32 1.442695, %v2964_v22  ;;  %v3079_v8 = vmul.f32 1.442695, %v2949_v60  ;;  %v2951_v16 = vsub.f32 %v14110_v39, %v10124_v53 }
 0x685   : > { %7152 = vpow2.f32 %v3091_v45  ;;  %v3113_v57 = vmul.f32 1.442695, %v2966_v4  ;;  %v3081_v10 = vmul.f32 1.442695, %v2950_v9  ;;  %v3117_v51 = vmul.f32 1.442695, %v2968_v58 }
 0x686   : > { %7154 = vpow2.f32 %v3075_v29  ;;  %v2970_v43 = vsub.f32 %v14111_v1, %v10129_v24  ;;  %v3083_v0 = vmul.f32 1.442695, %v2951_v16  ;;  %v2952_v30 = vsub.f32 %v14113_v56, %v10124_v53  ;;  %v14121_v45 = vld [vmem:[#allocation44_spill] sm:$0xff]  ;;  %v14129_v39 = vld [vmem:[#allocation47_spill] sm:$0xff] }
 0x687   : > { %7156 = vpow2.f32 %v3105_v59  ;;  %v2972_v28 = vsub.f32 %v14115_v61, %v10129_v24  ;;  %v2953_v18 = vsub.f32 %v14117_v37, %v10124_v53  ;;  %v2974_v44 = vsub.f32 %v14119_v15, %v10129_v24  ;;  %v14135_v37 = vld [vmem:[#allocation13_spill] sm:$0xff] }
 0x688   : > { %7158 = vpow2.f32 %v3077_v54  ;;  %v3121_v19 = vmul.f32 1.442695, %v2970_v43  ;;  %v3085_v25 = vmul.f32 1.442695, %v2952_v30  ;;  %v2954_v29 = vsub.f32 %v14121_v45, %v10124_v53  ;;  %v14123_v54 = vld [vmem:[#allocation66_spill] sm:$0xff]  ;;  %v14131_v43 = vld [vmem:[#allocation12_spill] sm:$0xff] }
 0x689   : > { %7160 = vpow2.f32 %v3109_v3  ;;  %v3125_v17 = vmul.f32 1.442695, %v2972_v28  ;;  %v3087_v11 = vmul.f32 1.442695, %v2953_v18  ;;  %v13571_v13 = vsub.s32 2, %v14027_v46 }
 0x68a   : > { %7162 = vpow2.f32 %v3079_v8  ;;  %v3129_v22 = vmul.f32 1.442695, %v2974_v44  ;;  %v2976_v41 = vsub.f32 %v14123_v54, %v10129_v24  ;;  %v3089_v3 = vmul.f32 1.442695, %v2954_v29  ;;  %v14137_v44 = vld [vmem:[#allocation49_spill] sm:$0xff] }
 0x68b   : > { %7164 = vpow2.f32 %v3113_v57  ;;  %v2956_v4 = vsub.f32 %v14125_v34, %v10124_v53  ;;  %v10195_v49 = vrot.slane %v10120_v7, %v13571_v13  ;;  %v14127_v57 = vld [vmem:[#allocation70_spill] sm:$0xff]  ;;  %v2957_v16 = vsub.f32 %v14129_v39, %v10124_v53 }
 0x68c   : > { %7166 = vpow2.f32 %v3081_v10  ;;  %v3133_v9 = vmul.f32 1.442695, %v2976_v41  ;;  %v2978_v26 = vsub.f32 %v14127_v57, %v10129_v24  ;;  %v14141_v34 = vld [vmem:[#allocation50_spill] sm:$0xff] }
 0x68d   : > { %7168 = vpow2.f32 %v3117_v51  ;;  %v3093_v10 = vmul.f32 1.442695, %v2956_v4  ;;  %v3095_v30 = vmul.f32 1.442695, %v2957_v16  ;;  %v2982_v18 = vsub.f32 %v14135_v37, %v10195_v49 }
 0x68e   : > { %7170 = vpow2.f32 %v3083_v0  ;;  %v3137_v1 = vmul.f32 1.442695, %v2978_v26  ;;  %v2980_v0 = vsub.f32 %v14131_v43, %v10195_v49  ;;  %v2960_v4 = vsub.f32 %v14141_v34, %v10124_v53  ;;  %v14143_v26 = vld [vmem:[#allocation17_spill] sm:$0xff] }
 0x68f   : > { %7172 = vpow2.f32 %v3121_v19  ;;  %v14133_v19 = vld [vmem:[#allocation48_spill] sm:$0xff]  ;;  %v3145_v29 = vmul.f32 1.442695, %v2982_v18  ;;  %v14149_v18 = vld [vmem:[#allocation53_spill] sm:$0xff] }
 0x690   : > { %7174 = vpow2.f32 %v3085_v25  ;;  %v2958_v61 = vsub.f32 %v14133_v19, %v10124_v53  ;;  %v3141_v25 = vmul.f32 1.442695, %v2980_v0  ;;  %v3101_v16 = vmul.f32 1.442695, %v2960_v4  ;;  %v14147_v19 = vld [vmem:[#allocation18_spill] sm:$0xff] }
 0x691   : > { %7176 = vpow2.f32 %v3125_v17 }
 0x692   : > { %v10153_v2 = vpop.eup %7152  ;;  %7178 = vpow2.f32 %v3087_v11  ;;  %v3097_v15 = vmul.f32 1.442695, %v2958_v61  ;;  %v2959_v11 = vsub.f32 %v14137_v44, %v10124_v53  ;;  %v2988_v61 = vsub.f32 %v14147_v19, %v10195_v49 }
 0x693   : > { %14112 = vst [vmem:[#allocation128_spill] sm:$0xff] %v10153_v2  ;;  %v10157_v55 = vpop.eup %7154  ;;  %3484 = vperm.xlu0 %7123, %v10153_v2   ;;  %7180 = vpow2.f32 %v3129_v22  ;;  %v14139_v22 = vld [vmem:[#allocation15_spill] sm:$0xff] }
 0x694   : > { %14114 = vst [vmem:[#allocation131_spill] sm:$0xff] %v10157_v55  ;;  %3460 = vperm.xlu1 %7122, %v10157_v55   ;;  %v10163_v23 = vpop.eup %7156  ;;  %7182 = vpow2.f32 %v3089_v3  ;;  %v2984_v54 = vsub.f32 %v14139_v22, %v10195_v49  ;;  %v3099_v3 = vmul.f32 1.442695, %v2959_v11  ;;  %v14151_v11 = vld [vmem:[#allocation20_spill] sm:$0xff] }
 0x695   : > { %14116 = vst [vmem:[#allocation142_spill] sm:$0xff] %v10163_v23  ;;  %v10167_v63 = vpop.eup %7158  ;;  %7184 = vpow2.f32 %v3133_v9 }
 0x696   : > { %14118 = vst [vmem:[#allocation143_spill] sm:$0xff] %v10167_v63  ;;  %v10173_v42 = vpop.eup %7160  ;;  %7186 = vpow2.f32 %v3093_v10  ;;  %v3149_v57 = vmul.f32 1.442695, %v2984_v54  ;;  %v2986_v10 = vsub.f32 %v14143_v26, %v10195_v49 }
 0x697   : > { %3505 = vperm.xlu0 %7123, %v10163_v23   ;;  %14120 = vst [vmem:[#allocation150_spill] sm:$0xff] %v10173_v42  ;;  %v10177_v59 = vpop.eup %7162  ;;  %7188 = vpow2.f32 %v3137_v1  ;;  %v14145_v1 = vld [vmem:[#allocation51_spill] sm:$0xff] }
 0x698   : > { %3463 = vperm.xlu1 %7122, %v10167_v63   ;;  %14122 = vst [vmem:[#allocation114_spill] sm:$0xff] %v10177_v59  ;;  %v10184_v60 = vpop.eup %7164  ;;  %7190 = vpow2.f32 %v3095_v30  ;;  %v2961_v43 = vsub.f32 %v14145_v1, %v10124_v53  ;;  %v3153_v30 = vmul.f32 1.442695, %v2986_v10  ;;  %v3157_v53 = vmul.f32 1.442695, %v2988_v61  ;;  %v14155_v10 = vld [vmem:[#allocation22_spill] sm:$0xff] }
 0x699   : > { %14124 = vst [vmem:[#allocation132_spill] sm:$0xff] %v10184_v60  ;;  %v10188_v8 = vpop.eup %7166  ;;  %7192 = vpow2.f32 %v3141_v25 }
 0x69a   : > { %14126 = vst [vmem:[#allocation135_spill] sm:$0xff] %v10188_v8  ;;  %v10199_v58 = vpop.eup %7168  ;;  %7194 = vpow2.f32 %v3097_v15  ;;  %v3103_v37 = vmul.f32 1.442695, %v2961_v43  ;;  %v2963_v15 = vsub.f32 %v14149_v18, %v10129_v24 }
 0x69b   : > { %3511 = vperm.xlu0 %7123, %v10173_v42   ;;  %14128 = vst [vmem:[#allocation144_spill] sm:$0xff] %v10199_v58  ;;  %v10203_v51 = vpop.eup %7170  ;;  %7196 = vpow2.f32 %v3145_v29  ;;  %v2990_v29 = vsub.f32 %v14151_v11, %v10195_v49 }
 0x69c   : > { %3466 = vperm.xlu1 %7122, %v10177_v59   ;;  %14130 = vst [vmem:[#allocation145_spill] sm:$0xff] %v10203_v51  ;;  %v10209_v56 = vpop.eup %7172  ;;  %7198 = vpow2.f32 %v3099_v3  ;;  %v3107_v54 = vmul.f32 1.442695, %v2963_v15  ;;  %v14153_v3 = vld [vmem:[#allocation55_spill] sm:$0xff]  ;;  %v14159_v15 = vld [vmem:[#allocation24_spill] sm:$0xff] }
 0x69d   : > { %14132 = vst [vmem:[#allocation117_spill] sm:$0xff] %v10209_v56  ;;  %v10213_v28 = vpop.eup %7174  ;;  %7200 = vpow2.f32 %v3149_v57  ;;  %v2965_v34 = vsub.f32 %v14153_v3, %v10129_v24  ;;  %v13570_v57 = vsub.s32 3, %v14027_v46  ;;  %v3161_v26 = vmul.f32 1.442695, %v2990_v29 }
 0x69e   : > { %14134 = vst [vmem:[#allocation136_spill] sm:$0xff] %v10213_v28  ;;  %v10219_v17 = vpop.eup %7176  ;;  %7202 = vpow2.f32 %v3101_v16  ;;  %v2992_v16 = vsub.f32 %v14155_v10, %v10195_v49 }
 0x69f   : > { %3517 = vperm.xlu0 %7123, %v10184_v60   ;;  %14136 = vst [vmem:[#allocation139_spill] sm:$0xff] %v10219_v17  ;;  %v10223_v45 = vpop.eup %7178  ;;  %7204 = vpow2.f32 %v3153_v30  ;;  %v3111_v43 = vmul.f32 1.442695, %v2965_v34  ;;  %v14157_v30 = vld [vmem:[#allocation57_spill] sm:$0xff] }
 0x6a0   : > { %3469 = vperm.xlu1 %7122, %v10188_v8   ;;  %14138 = vst [vmem:[#allocation146_spill] sm:$0xff] %v10223_v45  ;;  %v10229_v41 = vpop.eup %7180  ;;  %7206 = vpow2.f32 %v3103_v37  ;;  %v2967_v19 = vsub.f32 %v14157_v30, %v10129_v24  ;;  %v10281_v37 = vrot.slane %v10120_v7, %v13570_v57  ;;  %v3165_v18 = vmul.f32 1.442695, %v2992_v16 }
 0x6a1   : > { %14140 = vst [vmem:[#allocation147_spill] sm:$0xff] %v10229_v41  ;;  %v10233_v9 = vpop.eup %7182  ;;  %7208 = vpow2.f32 %v3157_v53  ;;  %v2994_v53 = vsub.f32 %v14159_v15, %v10195_v49 }
 0x6a2   : > { %14142 = vst [vmem:[#allocation148_spill] sm:$0xff] %v10233_v9  ;;  %v10239_v39 = vpop.eup %7184  ;;  %7210 = vpow2.f32 %v3107_v54  ;;  %v3115_v29 = vmul.f32 1.442695, %v2967_v19  ;;  %v14161_v54 = vld [vmem:[#allocation59_spill] sm:$0xff] }
 0x6a3   : > { %3523 = vperm.xlu0 %7123, %v10199_v58   ;;  %14144 = vst [vmem:[#allocation177_spill] sm:$0xff] %v10239_v39  ;;  %v10243_v0 = vpop.eup %7186  ;;  %7212 = vpow2.f32 %v3161_v26  ;;  %v2969_v3 = vsub.f32 %v14161_v54, %v10129_v24  ;;  %v3169_v10 = vmul.f32 1.442695, %v2994_v53  ;;  %v14163_v26 = vld [vmem:[#allocation35_spill] sm:$0xff] }
 0x6a4   : > { %3472 = vperm.xlu1 %7122, %v10203_v51   ;;  %14146 = vst [vmem:[#allocation153_spill] sm:$0xff] %v10243_v0  ;;  %v10249_v25 = vpop.eup %7188  ;;  %7214 = vpow2.f32 %v3111_v43  ;;  %v2996_v16 = vsub.f32 %v14163_v26, %v10281_v37  ;;  %v14165_v43 = vld [vmem:[#allocation61_spill] sm:$0xff] }
 0x6a5   : > { %14148 = vst [vmem:[#allocation166_spill] sm:$0xff] %v10249_v25  ;;  %v10253_v44 = vpop.eup %7190  ;;  %7216 = vpow2.f32 %v3165_v18  ;;  %v3119_v15 = vmul.f32 1.442695, %v2969_v3  ;;  %v2971_v19 = vsub.f32 %v14165_v43, %v10129_v24  ;;  %v14167_v18 = vld [vmem:[#allocation103_spill] sm:$0xff] }
 0x6a6   : > { %14150 = vst [vmem:[#allocation167_spill] sm:$0xff] %v10253_v44  ;;  %v10259_v22 = vpop.eup %7192  ;;  %7218 = vpow2.f32 %v3115_v29  ;;  %v3173_v54 = vmul.f32 1.442695, %v2996_v16  ;;  %v2998_v53 = vsub.f32 %v14167_v18, %v10281_v37  ;;  %v14169_v29 = vld [vmem:[#allocation63_spill] sm:$0xff] }
 0x6a7   : > { %3529 = vperm.xlu0 %7123, %v10209_v56   ;;  %14152 = vst [vmem:[#allocation176_spill] sm:$0xff] %v10259_v22  ;;  %v10263_v4 = vpop.eup %7194  ;;  %7220 = vpow2.f32 %v3169_v10  ;;  %v3123_v26 = vmul.f32 1.442695, %v2971_v19  ;;  %v2973_v3 = vsub.f32 %v14169_v29, %v10129_v24  ;;  %v14171_v10 = vld [vmem:[#allocation105_spill] sm:$0xff] }
 0x6a8   : > { %3475 = vperm.xlu1 %7122, %v10213_v28   ;;  %14154 = vst [vmem:[#allocation149_spill] sm:$0xff] %v10263_v4  ;;  %v10270_v1 = vpop.eup %7196  ;;  %7222 = vpow2.f32 %v3119_v15  ;;  %v3177_v43 = vmul.f32 1.442695, %v2998_v53  ;;  %v3000_v16 = vsub.f32 %v14171_v10, %v10281_v37  ;;  %v14173_v15 = vld [vmem:[#allocation65_spill] sm:$0xff] }
 0x6a9   : > { %14156 = vst [vmem:[#allocation178_spill] sm:$0xff] %v10270_v1  ;;  %v10274_v61 = vpop.eup %7198  ;;  %7224 = vpow2.f32 %v3173_v54  ;;  %v3127_v18 = vmul.f32 1.442695, %v2973_v3  ;;  %v2975_v19 = vsub.f32 %v14173_v15, %v10129_v24  ;;  %v14175_v54 = vld [vmem:[#allocation107_spill] sm:$0xff] }
 0x6aa   : > { %14158 = vst [vmem:[#allocation154_spill] sm:$0xff] %v10274_v61  ;;  %v10285_v11 = vpop.eup %7200  ;;  %7226 = vpow2.f32 %v3123_v26  ;;  %v3181_v29 = vmul.f32 1.442695, %v3000_v16  ;;  %v3002_v53 = vsub.f32 %v14175_v54, %v10281_v37  ;;  %v14177_v26 = vld [vmem:[#allocation67_spill] sm:$0xff] }
 0x6ab   : > { %3535 = vperm.xlu0 %7123, %v10219_v17   ;;  %14160 = vst [vmem:[#allocation179_spill] sm:$0xff] %v10285_v11  ;;  %v10289_v34 = vpop.eup %7202  ;;  %7228 = vpow2.f32 %v3177_v43  ;;  %v3131_v10 = vmul.f32 1.442695, %v2975_v19  ;;  %v2977_v3 = vsub.f32 %v14177_v26, %v10129_v24  ;;  %v14179_v43 = vld [vmem:[#allocation109_spill] sm:$0xff] }
 0x6ac   : > { %3478 = vperm.xlu1 %7122, %v10223_v45   ;;  %14162 = vst [vmem:[#allocation168_spill] sm:$0xff] %v10289_v34  ;;  %v10295_v30 = vpop.eup %7204  ;;  %7230 = vpow2.f32 %v3127_v18  ;;  %v3185_v15 = vmul.f32 1.442695, %v3002_v53  ;;  %v3004_v16 = vsub.f32 %v14179_v43, %v10281_v37  ;;  %v14181_v18 = vld [vmem:[#allocation71_spill] sm:$0xff] }
 0x6ad   : > { %14164 = vst [vmem:[#allocation169_spill] sm:$0xff] %v10295_v30  ;;  %v10299_v57 = vpop.eup %7206  ;;  %7232 = vpow2.f32 %v3181_v29  ;;  %v3135_v54 = vmul.f32 1.442695, %v2977_v3  ;;  %v2979_v19 = vsub.f32 %v14181_v18, %v10195_v49  ;;  %v14183_v29 = vld [vmem:[#allocation111_spill] sm:$0xff]  ;;  %v13585_v18 = vsub.s32 4, %v14027_v46 }
 0x6ae   : > { %14166 = vst [vmem:[#allocation180_spill] sm:$0xff] %v10299_v57  ;;  %v10305_v13 = vpop.eup %7208  ;;  %7234 = vpow2.f32 %v3131_v10  ;;  %v3189_v24 = vmul.f32 1.442695, %v3004_v16  ;;  %v3006_v53 = vsub.f32 %v14183_v29, %v10281_v37  ;;  %v14185_v10 = vld [vmem:[#allocation14_spill] sm:$0xff]  ;;  %v14187_v16 = vld [vmem:[#allocation115_spill] sm:$0xff] }
 0x6af   : > { %3541 = vperm.xlu0 %7123, %v10229_v41   ;;  %14168 = vst [vmem:[#allocation181_spill] sm:$0xff] %v10305_v13  ;;  %v10309_v5 = vpop.eup %7210  ;;  %7236 = vpow2.f32 %v3185_v15  ;;  %v3139_v43 = vmul.f32 1.442695, %v2979_v19  ;;  %v2981_v3 = vsub.f32 %v14185_v10, %v10195_v49  ;;  %v3008_v29 = vsub.f32 %v14187_v16, %v10281_v37  ;;  %v14189_v19 = vld [vmem:[#allocation16_spill] sm:$0xff]  ;;  %v14191_v16 = vld [vmem:[#allocation118_spill] sm:$0xff] }
 0x6b0   : > { %3481 = vperm.xlu1 %7122, %v10233_v9   ;;  %14170 = vst [vmem:[#allocation170_spill] sm:$0xff] %v10309_v5  ;;  %v10315_v23 = vpop.eup %7212  ;;  %7238 = vpow2.f32 %v3135_v54  ;;  %v3193_v15 = vmul.f32 1.442695, %v3006_v53  ;;  %v2983_v10 = vsub.f32 %v14189_v19, %v10195_v49 }
 0x6b1   : > { %14172 = vst [vmem:[#allocation182_spill] sm:$0xff] %v10315_v23  ;;  %7240 = vpow2.f32 %v3189_v24  ;;  %v3143_v54 = vmul.f32 1.442695, %v2981_v3  ;;  %v10367_v24 = vrot.slane %v10120_v7, %v13585_v18  ;;  %v3197_v53 = vmul.f32 1.442695, %v3008_v29 }
 0x6b2   : > { %7242 = vpow2.f32 %v3139_v43  ;;  %v3010_v43 = vsub.f32 %v14191_v16, %v10281_v37  ;;  %v3147_v19 = vmul.f32 1.442695, %v2983_v10 }
 0x6b3   : > { %3547 = vperm.xlu0 %7123, %v10239_v39   ;;  %7244 = vpow2.f32 %v3193_v15  ;;  %v14195_v15 = vld [vmem:[#allocation26_spill] sm:$0xff] }
 0x6b4   : > { %3487 = vperm.xlu1 %7122, %v10243_v0   ;;  %v3201_v18 = vmul.f32 1.442695, %v3010_v43  ;;  %v3012_v29 = vsub.f32 %v14195_v15, %v10367_v24 }
 0x6b7   : > { %3553 = vperm.xlu0 %7123, %v10249_v25   ;;  %v10319_v25 = vpop.eup %7214  ;;  %7246 = vpow2.f32 %v3143_v54  ;;  %v14197_v54 = vld [vmem:[#allocation19_spill] sm:$0xff] }
 0x6b8   : > { %3490 = vperm.xlu1 %7122, %v10253_v44   ;;  %14174 = vst [vmem:[#allocation183_spill] sm:$0xff] %v10319_v25  ;;  %v2987_v10 = vsub.f32 %v14197_v54, %v10195_v49 }
 0x6ba   : > { %v3155_v15 = vmul.f32 1.442695, %v2987_v10 }
 0x6bb   : > { %3559 = vperm.xlu0 %7123, %v10259_v22  }
 0x6bc   : > { %3493 = vperm.xlu1 %7122, %v10263_v4   ;;  %v14193_v4 = vld [vmem:[#allocation77_spill] sm:$0xff] }
 0x6bd   : > { %v2985_v41 = vsub.f32 %v14193_v4, %v10195_v49  ;;  %v3205_v4 = vmul.f32 1.442695, %v3012_v29 }
 0x6bf   : > { %3565 = vperm.xlu0 %7123, %v10270_v1   ;;  %v3151_v16 = vmul.f32 1.442695, %v2985_v41  ;;  %v14201_v41 = vld [vmem:[#allocation21_spill] sm:$0xff] }
 0x6c0   : > { %3496 = vperm.xlu1 %7122, %v10274_v61  }
 0x6c3   : > { %3571 = vperm.xlu0 %7123, %v10285_v11  }
 0x6c4   : > { %3499 = vperm.xlu1 %7122, %v10289_v34  }
 0x6c7   : > { %3577 = vperm.xlu0 %7123, %v10295_v30  }
 0x6c8   : > { %3502 = vperm.xlu1 %7122, %v10299_v57   ;;  %v10325_v57 = vpop.eup %7216  ;;  %7248 = vpow2.f32 %v3197_v53  ;;  %v14199_v53 = vld [vmem:[#allocation28_spill] sm:$0xff] }
 0x6c9   : > { %14176 = vst [vmem:[#allocation157_spill] sm:$0xff] %v10325_v57  ;;  %v10329_v34 = vpop.eup %7218  ;;  %7250 = vpow2.f32 %v3147_v19  ;;  %v3014_v43 = vsub.f32 %v14199_v53, %v10367_v24  ;;  %v2989_v19 = vsub.f32 %v14201_v41, %v10195_v49 }
 0x6ca   : > { %14178 = vst [vmem:[#allocation158_spill] sm:$0xff] %v10329_v34  ;;  %v10335_v39 = vpop.eup %7220  ;;  %7252 = vpow2.f32 %v3201_v18  ;;  %v14203_v18 = vld [vmem:[#allocation30_spill] sm:$0xff] }
 0x6cb   : > { %3583 = vperm.xlu0 %7123, %v10305_v13   ;;  %14180 = vst [vmem:[#allocation171_spill] sm:$0xff] %v10335_v39  ;;  %v10339_v61 = vpop.eup %7222  ;;  %7254 = vpow2.f32 %v3151_v16  ;;  %v3209_v54 = vmul.f32 1.442695, %v3014_v43  ;;  %v3016_v29 = vsub.f32 %v14203_v18, %v10367_v24  ;;  %v3159_v53 = vmul.f32 1.442695, %v2989_v19  ;;  %v14205_v16 = vld [vmem:[#allocation23_spill] sm:$0xff] }
 0x6cc   : > { %3508 = vperm.xlu1 %7122, %v10309_v5   ;;  %14182 = vst [vmem:[#allocation184_spill] sm:$0xff] %v10339_v61  ;;  %v10345_v26 = vpop.eup %7224  ;;  %7256 = vpow2.f32 %v3205_v4  ;;  %v2991_v10 = vsub.f32 %v14205_v16, %v10195_v49  ;;  %v14207_v4 = vld [vmem:[#allocation32_spill] sm:$0xff] }
 0x6cd   : > { %14184 = vst [vmem:[#allocation185_spill] sm:$0xff] %v10345_v26  ;;  %v3213_v41 = vmul.f32 1.442695, %v3016_v29  ;;  %v3018_v43 = vsub.f32 %v14207_v4, %v10367_v24 }
 0x6ce   : > { %v3163_v18 = vmul.f32 1.442695, %v2991_v10 }
 0x6cf   : > { %3589 = vperm.xlu0 %7123, %v10315_v23   ;;  %v3217_v16 = vmul.f32 1.442695, %v3018_v43 }
 0x6d0   : > { %3514 = vperm.xlu1 %7122, %v10319_v25  }
 0x6d3   : > { %3595 = vperm.xlu0 %7123, %v10325_v57   ;;  %v10349_v57 = vpop.eup %7226  ;;  %7258 = vpow2.f32 %v3155_v15  ;;  %v14209_v15 = vld [vmem:[#allocation25_spill] sm:$0xff] }
 0x6d4   : > { %3520 = vperm.xlu1 %7122, %v10329_v34   ;;  %14186 = vst [vmem:[#allocation172_spill] sm:$0xff] %v10349_v57  ;;  %v2993_v19 = vsub.f32 %v14209_v15, %v10195_v49 }
 0x6d6   : > { %v3167_v4 = vmul.f32 1.442695, %v2993_v19 }
 0x6d7   : > { %3601 = vperm.xlu0 %7123, %v10335_v39   ;;  %v10356_v39 = vpop.eup %7228  ;;  %7260 = vpow2.f32 %v3209_v54  ;;  %v14211_v54 = vld [vmem:[#allocation94_spill] sm:$0xff] }
 0x6d8   : > { %3526 = vperm.xlu1 %7122, %v10339_v61   ;;  %14188 = vst [vmem:[#allocation173_spill] sm:$0xff] %v10356_v39  ;;  %v10360_v23 = vpop.eup %7230  ;;  %7262 = vpow2.f32 %v3159_v53  ;;  %v3020_v29 = vsub.f32 %v14211_v54, %v10367_v24  ;;  %v14213_v53 = vld [vmem:[#allocation36_spill] sm:$0xff] }
 0x6d9   : > { %14190 = vst [vmem:[#allocation186_spill] sm:$0xff] %v10360_v23  ;;  %v10371_v3 = vpop.eup %7232  ;;  %7264 = vpow2.f32 %v3213_v41  ;;  %v2995_v10 = vsub.f32 %v14213_v53, %v10281_v37  ;;  %v14215_v41 = vld [vmem:[#allocation96_spill] sm:$0xff]  ;;  %v13602_v53 = vsub.s32 5, %v14027_v46 }
 0x6da   : > { %14192 = vst [vmem:[#allocation101_spill] sm:$0xff] %v10371_v3  ;;  %v10375_v44 = vpop.eup %7234  ;;  %7266 = vpow2.f32 %v3163_v18  ;;  %v3221_v49 = vmul.f32 1.442695, %v3020_v29  ;;  %v3022_v43 = vsub.f32 %v14215_v41, %v10367_v24  ;;  %v14217_v18 = vld [vmem:[#allocation102_spill] sm:$0xff]  ;;  %v14219_v29 = vld [vmem:[#allocation99_spill] sm:$0xff] }
 0x6db   : > { %3607 = vperm.xlu0 %7123, %v10345_v26   ;;  %14194 = vst [vmem:[#allocation174_spill] sm:$0xff] %v10375_v44  ;;  %v3171_v54 = vmul.f32 1.442695, %v2995_v10  ;;  %v2997_v19 = vsub.f32 %v14217_v18, %v10281_v37  ;;  %v3024_v41 = vsub.f32 %v14219_v29, %v10367_v24  ;;  %v14221_v10 = vld [vmem:[#allocation104_spill] sm:$0xff]  ;;  %v14223_v29 = vld [vmem:[#allocation34_spill] sm:$0xff] }
 0x6dc   : > { %3532 = vperm.xlu1 %7122, %v10349_v57   ;;  %v2999_v18 = vsub.f32 %v14221_v10, %v10281_v37 }
 0x6de   : > { %v3179_v10 = vmul.f32 1.442695, %v2999_v18 }
 0x6df   : > { %3613 = vperm.xlu0 %7123, %v10356_v39  }
 0x6e0   : > { %3538 = vperm.xlu1 %7122, %v10360_v23   ;;  %v10381_v23 = vpop.eup %7236  ;;  %7268 = vpow2.f32 %v3217_v16  ;;  %v3225_v16 = vmul.f32 1.442695, %v3022_v43  ;;  %v3229_v43 = vmul.f32 1.442695, %v3024_v41 }
 0x6e1   : > { %14196 = vst [vmem:[#allocation175_spill] sm:$0xff] %v10381_v23  ;;  %v10385_v13 = vpop.eup %7238  ;;  %7270 = vpow2.f32 %v3167_v4  ;;  %v3175_v4 = vmul.f32 1.442695, %v2997_v19 }
 0x6e2   : > { %14198 = vst [vmem:[#allocation187_spill] sm:$0xff] %v10385_v13 }
 0x6e3   : > { %3619 = vperm.xlu0 %7123, %v10371_v3  }
 0x6e4   : > { %3544 = vperm.xlu1 %7122, %v10375_v44   ;;  %v10391_v44 = vpop.eup %7240  ;;  %7272 = vpow2.f32 %v3221_v49  ;;  %v10453_v49 = vrot.slane %v10120_v7, %v13602_v53 }
 0x6e5   : > { %14200 = vst [vmem:[#allocation189_spill] sm:$0xff] %v10391_v44  ;;  %v10395_v0 = vpop.eup %7242  ;;  %7274 = vpow2.f32 %v3171_v54  ;;  %v3026_v54 = vsub.f32 %v14223_v29, %v10367_v24 }
 0x6e6   : > { %14202 = vst [vmem:[#allocation161_spill] sm:$0xff] %v10395_v0 }
 0x6e7   : > { %3625 = vperm.xlu0 %7123, %v10381_v23   ;;  %v3233_v53 = vmul.f32 1.442695, %v3026_v54 }
 0x6e8   : > { %3550 = vperm.xlu1 %7122, %v10385_v13   ;;  %v10401_v13 = vpop.eup %7244  ;;  %7276 = vpow2.f32 %v3225_v16  ;;  %v14227_v16 = vld [vmem:[#allocation120_spill] sm:$0xff] }
 0x6e9   : > { %14204 = vst [vmem:[#allocation162_spill] sm:$0xff] %v10401_v13  ;;  %v10405_v17 = vpop.eup %7246  ;;  %7278 = vpow2.f32 %v3175_v4  ;;  %v3028_v41 = vsub.f32 %v14227_v16, %v10453_v49  ;;  %v14229_v4 = vld [vmem:[#allocation108_spill] sm:$0xff]  ;;  %v10479_v16 = vpop.xlane.xlu0 %5795 }
 0x6ea   : > { %14206 = vst [vmem:[#allocation190_spill] sm:$0xff] %v10405_v17  ;;  %v3003_v18 = vsub.f32 %v14229_v4, %v10281_v37 }
 0x6eb   : > { %3631 = vperm.xlu0 %7123, %v10391_v44   ;;  %v10411_v44 = vpop.eup %7248  ;;  %7280 = vpow2.f32 %v3229_v43  ;;  %v14231_v43 = vld [vmem:[#allocation122_spill] sm:$0xff] }
 0x6ec   : > { %3556 = vperm.xlu1 %7122, %v10395_v0   ;;  %14208 = vst [vmem:[#allocation194_spill] sm:$0xff] %v10411_v44  ;;  %v10415_v23 = vpop.eup %7250  ;;  %7282 = vpow2.f32 %v3179_v10  ;;  %v3030_v54 = vsub.f32 %v14231_v43, %v10453_v49  ;;  %v14233_v10 = vld [vmem:[#allocation110_spill] sm:$0xff] }
 0x6ed   : > { %14210 = vst [vmem:[#allocation165_spill] sm:$0xff] %v10415_v23  ;;  %v3005_v4 = vsub.f32 %v14233_v10, %v10281_v37 }
 0x6ef   : > { %3637 = vperm.xlu0 %7123, %v10401_v13   ;;  %v10421_v13 = vpop.eup %7252  ;;  %7284 = vpow2.f32 %v3233_v53  ;;  %v3241_v53 = vmul.f32 1.442695, %v3030_v54  ;;  %v14239_v54 = vld [vmem:[#allocation126_spill] sm:$0xff] }
 0x6f0   : > { %3562 = vperm.xlu1 %7122, %v10405_v17   ;;  %14212 = vst [vmem:[#allocation11_spill] sm:$0xff] %v10421_v13  ;;  %v10425_v2 = vpop.eup %7254 }
 0x6f1   : > { %14214 = vst [vmem:[#allocation45_spill] sm:$0xff] %v10425_v2  ;;  %v10431_v15 = vpop.eup %7256 }
 0x6f2   : > { %14216 = vst [vmem:[#allocation37_spill] sm:$0xff] %v10431_v15 }
 0x6f3   : > { %3643 = vperm.xlu0 %7123, %v10411_v44   ;;  %v10435_v44 = vpop.eup %7258 }
 0x6f4   : > { %3568 = vperm.xlu1 %7122, %v10415_v23   ;;  %14218 = vst [vmem:[#allocation52_spill] sm:$0xff] %v10435_v44 }
 0x6f7   : > { %3649 = vperm.xlu0 %7123, %v10421_v13   ;;  %v10442_v13 = vpop.eup %7260 }
 0x6f8   : > { %3574 = vperm.xlu1 %7122, %v10425_v2   ;;  %14220 = vst [vmem:[#allocation39_spill] sm:$0xff] %v10442_v13  ;;  %v10446_v57 = vpop.eup %7262 }
 0x6f9   : > { %14222 = vst [vmem:[#allocation54_spill] sm:$0xff] %v10446_v57  ;;  %v10457_v19 = vpop.eup %7264 }
 0x6fa   : > { %14224 = vst [vmem:[#allocation38_spill] sm:$0xff] %v10457_v19  ;;  %v10461_v9 = vpop.eup %7266 }
 0x6fb   : > { %3655 = vperm.xlu0 %7123, %v10431_v15   ;;  %14226 = vst [vmem:[#allocation56_spill] sm:$0xff] %v10461_v9 }
 0x6fc   : > { %3580 = vperm.xlu1 %7122, %v10435_v44   ;;  %v14225_v44 = vld [vmem:[#allocation106_spill] sm:$0xff] }
 0x6fd   : > { %v3001_v30 = vsub.f32 %v14225_v44, %v10281_v37  ;;  %v3237_v44 = vmul.f32 1.442695, %v3028_v41  ;;  %v14235_v41 = vld [vmem:[#allocation124_spill] sm:$0xff] }
 0x6fe   : > { %v3032_v43 = vsub.f32 %v14235_v41, %v10453_v49  ;;  %v3034_v41 = vsub.f32 %v14239_v54, %v10453_v49 }
 0x6ff   : > { %3661 = vperm.xlu0 %7123, %v10442_v13   ;;  %v3183_v29 = vmul.f32 1.442695, %v3001_v30  ;;  %v3187_v30 = vmul.f32 1.442695, %v3003_v18  ;;  %v14237_v18 = vld [vmem:[#allocation112_spill] sm:$0xff] }
 0x700   : > { %3586 = vperm.xlu1 %7122, %v10446_v57   ;;  %v10467_v57 = vpop.eup %7268  ;;  %v3007_v10 = vsub.f32 %v14237_v18, %v10281_v37  ;;  %v14242_v18 = vld [vmem:[#allocation116_spill] sm:$0xff] }
 0x701   : > { %14228 = vst [vmem:[#allocation40_spill] sm:$0xff] %v10467_v57  ;;  %v10471_v56 = vpop.eup %7270  ;;  %7286 = vpow2.f32 %v3183_v29  ;;  %v3191_v29 = vmul.f32 1.442695, %v3005_v4  ;;  %v3009_v45 = vsub.f32 %v14242_v18, %v10281_v37  ;;  %v14246_v37 = vld [vmem:[#allocation27_spill] sm:$0xff] }
 0x702   : > { %14230 = vst [vmem:[#allocation58_spill] sm:$0xff] %v10471_v56  ;;  %7288 = vpow2.f32 %v3237_v44  ;;  %v3245_v44 = vmul.f32 1.442695, %v3032_v43  ;;  %v3195_v4 = vmul.f32 1.442695, %v3007_v10  ;;  %v14244_v43 = vld [vmem:[#allocation129_spill] sm:$0xff]  ;;  %v3011_v18 = vsub.f32 %v14246_v37, %v10367_v24 }
 0x703   : > { %3667 = vperm.xlu0 %7123, %v10457_v19   ;;  %7290 = vpow2.f32 %v3187_v30  ;;  %v3036_v54 = vsub.f32 %v14244_v43, %v10453_v49  ;;  %v3199_v10 = vmul.f32 1.442695, %v3009_v45  ;;  %v14248_v43 = vld [vmem:[#allocation133_spill] sm:$0xff] }
 0x704   : > { %3592 = vperm.xlu1 %7122, %v10461_v9   ;;  %v10477_v9 = vpop.eup %7272  ;;  %7292 = vpow2.f32 %v3241_v53  ;;  %v3249_v53 = vmul.f32 1.442695, %v3034_v41  ;;  %v3203_v37 = vmul.f32 1.442695, %v3011_v18  ;;  %v14252_v18 = vld [vmem:[#allocation137_spill] sm:$0xff] }
 0x705   : > { %14232 = vst [vmem:[#allocation41_spill] sm:$0xff] %v10477_v9  ;;  %v10483_v19 = vpop.eup %7274  ;;  %7294 = vpow2.f32 %v3191_v29  ;;  %v3253_v41 = vmul.f32 1.442695, %v3036_v54 }
 0x706   : > { %14234 = vst [vmem:[#allocation60_spill] sm:$0xff] %v10483_v19  ;;  %7296 = vpow2.f32 %v3245_v44  ;;  %v13628_v44 = vsub.s32 6, %v14027_v46 }
 0x707   : > { %3673 = vperm.xlu0 %7123, %v10467_v57   ;;  %7298 = vpow2.f32 %v3195_v4 }
 0x708   : > { %3598 = vperm.xlu1 %7122, %v10471_v56   ;;  %v10489_v56 = vpop.eup %7276  ;;  %7300 = vpow2.f32 %v3249_v53  ;;  %v10548_v54 = vrot.slane %v10120_v7, %v13628_v44  ;;  %v14254_v53 = vld [vmem:[#allocation31_spill] sm:$0xff] }
 0x709   : > { %14236 = vst [vmem:[#allocation42_spill] sm:$0xff] %v10489_v56  ;;  %v10495_v2 = vpop.eup %7278  ;;  %7302 = vpow2.f32 %v3199_v10  ;;  %v3015_v39 = vsub.f32 %v14254_v53, %v10367_v24 }
 0x70a   : > { %14238 = vst [vmem:[#allocation62_spill] sm:$0xff] %v10495_v2  ;;  %7304 = vpow2.f32 %v3253_v41 }
 0x70b   : > { %3679 = vperm.xlu0 %7123, %v10477_v9   ;;  %v10503_v9 = vpop.eup %7280  ;;  %7306 = vpow2.f32 %v3203_v37 }
 0x70c   : > { %3604 = vperm.xlu1 %7122, %v10483_v19   ;;  %14240 = vst [vmem:[#allocation43_spill] sm:$0xff] %v10503_v9  ;;  %v10509_v61 = vpop.eup %7282 }
 0x70d   : > { %14243 = vst [vmem:[#allocation44_spill] sm:$0xff] %v10509_v61 }
 0x70e   : > { %v10491_v57 = vpop.permute.xlu0 %3484 }
 0x70f   : > { %v10497_v3 = vpop.permute.xlu1 %3460  ;;  %3685 = vperm.xlu0 %7123, %v10489_v56   ;;  %v10517_v56 = vpop.eup %7284 }
 0x710   : > { %3610 = vperm.xlu1 %7122, %v10495_v2   ;;  %14245 = vst [vmem:[#allocation66_spill] sm:$0xff] %v10517_v56  ;;  %v10523_v28 = vpop.eup %7286 }
 0x711   : > { %14247 = vst [vmem:[#allocation46_spill] sm:$0xff] %v10523_v28  ;;  %v10532_v4 = vpop.eup %7288 }
 0x712   : > { %v10505_v30 = vpop.permute.xlu0 %3505  ;;  %14249 = vst [vmem:[#allocation70_spill] sm:$0xff] %v10532_v4  ;;  %v10538_v23 = vpop.eup %7290 }
 0x713   : > { %14241 = vst [vmem:[#allocation64_spill] sm:$0xff] %v10505_v30  ;;  %v10511_v11 = vpop.permute.xlu1 %3463  ;;  %3691 = vperm.xlu0 %7123, %v10503_v9   ;;  %v3038_v9 = vsub.f32 %v14248_v43, %v10453_v49  ;;  %14251 = vst [vmem:[#allocation47_spill] sm:$0xff] %v10538_v23  ;;  %v10552_v43 = vpop.eup %7292 }
 0x714   : > { %3616 = vperm.xlu1 %7122, %v10509_v61   ;;  %v14250_v61 = vld [vmem:[#allocation29_spill] sm:$0xff]  ;;  %14253 = vst [vmem:[#allocation12_spill] sm:$0xff] %v10552_v43 }
 0x715   : > { %v3013_v13 = vsub.f32 %v14250_v61, %v10367_v24  ;;  %v3257_v10 = vmul.f32 1.442695, %v3038_v9  ;;  %v3040_v61 = vsub.f32 %v14252_v18, %v10453_v49  ;;  %v14256_v9 = vsub.s32 7, %v14027_v46 }
 0x716   : > { %v10519_v29 = vpop.permute.xlu0 %3511 }
 0x717   : > { %v10525_v58 = vpop.permute.xlu1 %3466  ;;  %3697 = vperm.xlu0 %7123, %v10517_v56   ;;  %v3207_v34 = vmul.f32 1.442695, %v3013_v13  ;;  %v10567_v41 = vrot.slane %v10120_v7, %v14256_v9  ;;  %7308 = vpow2.f32 %v3257_v10  ;;  %v3261_v18 = vmul.f32 1.442695, %v3040_v61  ;;  %v14257_v13 = vld [vmem:[#allocation68_spill] sm:$0xff]  ;;  %v14261_v10 = vld [vmem:[#allocation87_spill] sm:$0xff] }
 0x718   : > { %3622 = vperm.xlu1 %7122, %v10523_v28   ;;  %v3044_v37 = vsub.f32 %v14257_v13, %v10548_v54 }
 0x719   : > { %7310 = vpow2.f32 %v3207_v34  ;;  %v3059_v61 = vsub.f32 %v14261_v10, %v10567_v41 }
 0x71a   : > { %v10534_v45 = vpop.permute.xlu0 %3517  ;;  %7312 = vpow2.f32 %v3261_v18  ;;  %v3269_v7 = vmul.f32 1.442695, %v3044_v37  ;;  %v14265_v37 = vld [vmem:[#allocation72_spill] sm:$0xff] }
 0x71b   : > { %v10540_v56 = vpop.permute.xlu1 %3469  ;;  %3703 = vperm.xlu0 %7123, %v10532_v4   ;;  %v3211_v4 = vmul.f32 1.442695, %v3015_v39  ;;  %v3299_v18 = vmul.f32 1.442695, %v3059_v61  ;;  %v3046_v10 = vsub.f32 %v14265_v37, %v10548_v54  ;;  %v14269_v61 = vld [vmem:[#allocation141_spill] sm:$0xff] }
 0x71c   : > { %3628 = vperm.xlu1 %7122, %v10538_v23   ;;  %v10558_v23 = vpop.eup %7294  ;;  %v3047_v37 = vsub.f32 %v14269_v61, %v10548_v54 }
 0x71d   : > { %14255 = vst [vmem:[#allocation48_spill] sm:$0xff] %v10558_v23  ;;  %v10571_v44 = vpop.eup %7296  ;;  %7314 = vpow2.f32 %v3211_v4 }
 0x71e   : > { %v10554_v28 = vpop.permute.xlu0 %3523  ;;  %14258 = vst [vmem:[#allocation13_spill] sm:$0xff] %v10571_v44  ;;  %7316 = vpow2.f32 %v3269_v7  ;;  %v3273_v7 = vmul.f32 1.442695, %v3046_v10  ;;  %v14274_v10 = vld [vmem:[#allocation74_spill] sm:$0xff] }
 0x71f   : > { %v10560_v51 = vpop.permute.xlu1 %3472  ;;  %3709 = vperm.xlu0 %7123, %v10552_v43   ;;  %v14259_v43 = vld [vmem:[#allocation33_spill] sm:$0xff]  ;;  %v3048_v61 = vsub.f32 %v14274_v10, %v10548_v54 }
 0x720   : > { %3634 = vperm.xlu1 %7122, %v10558_v23   ;;  %v3017_v1 = vsub.f32 %v14259_v43, %v10367_v24  ;;  %v10577_v23 = vpop.eup %7298  ;;  %v14263_v43 = vld [vmem:[#allocation93_spill] sm:$0xff] }
 0x721   : > { %14260 = vst [vmem:[#allocation49_spill] sm:$0xff] %v10577_v23  ;;  %v10585_v9 = vpop.eup %7300  ;;  %v3019_v13 = vsub.f32 %v14263_v43, %v10367_v24  ;;  %v14267_v43 = vld [vmem:[#allocation95_spill] sm:$0xff] }
 0x722   : > { %v10573_v53 = vpop.permute.xlu0 %3529  ;;  %14262 = vst [vmem:[#allocation15_spill] sm:$0xff] %v10585_v9  ;;  %v3215_v39 = vmul.f32 1.442695, %v3017_v1  ;;  %v10591_v8 = vpop.eup %7302 }
 0x723   : > { %v10579_v2 = vpop.permute.xlu1 %3475  ;;  %3715 = vperm.xlu0 %7123, %v10571_v44   ;;  %14264 = vst [vmem:[#allocation50_spill] sm:$0xff] %v10591_v8  ;;  %v3219_v1 = vmul.f32 1.442695, %v3019_v13  ;;  %v3021_v44 = vsub.f32 %v14267_v43, %v10367_v24  ;;  %v14272_v43 = vld [vmem:[#allocation97_spill] sm:$0xff] }
 0x724   : > { %3640 = vperm.xlu1 %7122, %v10577_v23   ;;  %v10599_v23 = vpop.eup %7304  ;;  %7318 = vpow2.f32 %v3215_v39 }
 0x725   : > { %14266 = vst [vmem:[#allocation17_spill] sm:$0xff] %v10599_v23  ;;  %v10605_v15 = vpop.eup %7306  ;;  %7320 = vpow2.f32 %v3299_v18  ;;  %v3223_v13 = vmul.f32 1.442695, %v3021_v44  ;;  %v3275_v18 = vmul.f32 1.442695, %v3047_v37  ;;  %v14279_v37 = vld [vmem:[#allocation76_spill] sm:$0xff] }
 0x726   : > { %v10587_v34 = vpop.permute.xlu0 %3535  ;;  %14268 = vst [vmem:[#allocation51_spill] sm:$0xff] %v10605_v15  ;;  %7322 = vpow2.f32 %v3219_v1  ;;  %v3049_v10 = vsub.f32 %v14279_v37, %v10548_v54 }
 0x727   : > { %v10593_v60 = vpop.permute.xlu1 %3478  ;;  %3721 = vperm.xlu0 %7123, %v10585_v9   ;;  %v3023_v9 = vsub.f32 %v14272_v43, %v10367_v24  ;;  %7324 = vpow2.f32 %v3273_v7  ;;  %v14277_v43 = vld [vmem:[#allocation100_spill] sm:$0xff]  ;;  %v3277_v7 = vmul.f32 1.442695, %v3048_v61  ;;  %v14283_v61 = vld [vmem:[#allocation75_spill] sm:$0xff] }
 0x728   : > { %3646 = vperm.xlu1 %7122, %v10591_v8   ;;  %v10613_v8 = vpop.eup %7308  ;;  %7326 = vpow2.f32 %v3223_v13  ;;  %v3050_v37 = vsub.f32 %v14283_v61, %v10548_v54 }
 0x729   : > { %14270 = vst [vmem:[#allocation18_spill] sm:$0xff] %v10613_v8  ;;  %v10619_v17 = vpop.eup %7310  ;;  %v3227_v44 = vmul.f32 1.442695, %v3023_v9  ;;  %7328 = vpow2.f32 %v3275_v18  ;;  %v3279_v18 = vmul.f32 1.442695, %v3049_v10  ;;  %v14288_v10 = vld [vmem:[#allocation79_spill] sm:$0xff] }
 0x72a   : > { %v10601_v4 = vpop.permute.xlu0 %3541  ;;  %14273 = vst [vmem:[#allocation20_spill] sm:$0xff] %v10619_v17  ;;  %v3051_v61 = vsub.f32 %v14288_v10, %v10548_v54 }
 0x72b   : > { %v10607_v26 = vpop.permute.xlu1 %3481  ;;  %3727 = vperm.xlu0 %7123, %v10599_v23   ;;  %v10627_v23 = vpop.eup %7312  ;;  %7330 = vpow2.f32 %v3227_v44 }
 0x72c   : > { %3652 = vperm.xlu1 %7122, %v10605_v15   ;;  %14275 = vst [vmem:[#allocation55_spill] sm:$0xff] %v10627_v23  ;;  %v3025_v15 = vsub.f32 %v14277_v43, %v10367_v24  ;;  %v10633_v19 = vpop.eup %7314  ;;  %v14281_v24 = vld [vmem:[#allocation119_spill] sm:$0xff]  ;;  %7332 = vpow2.f32 %v3277_v7  ;;  %v3281_v7 = vmul.f32 1.442695, %v3050_v37  ;;  %v14294_v37 = vld [vmem:[#allocation78_spill] sm:$0xff] }
 0x72d   : > { %14278 = vst [vmem:[#allocation57_spill] sm:$0xff] %v10633_v19  ;;  %v3027_v43 = vsub.f32 %v14281_v24, %v10453_v49  ;;  %v14286_v24 = vld [vmem:[#allocation121_spill] sm:$0xff]  ;;  %v3052_v10 = vsub.f32 %v14294_v37, %v10548_v54 }
 0x72e   : > { %v10615_v39 = vpop.permute.xlu0 %3547  ;;  %v3231_v9 = vmul.f32 1.442695, %v3025_v15 }
 0x72f   : > { %14271 = vst [vmem:[#allocation53_spill] sm:$0xff] %v10615_v39  ;;  %v10621_v25 = vpop.permute.xlu1 %3487  ;;  %3733 = vperm.xlu0 %7123, %v10613_v8   ;;  %v10641_v8 = vpop.eup %7316  ;;  %v3235_v15 = vmul.f32 1.442695, %v3027_v43 }
 0x730   : > { %3658 = vperm.xlu1 %7122, %v10619_v17   ;;  %14280 = vst [vmem:[#allocation24_spill] sm:$0xff] %v10641_v8  ;;  %7334 = vpow2.f32 %v3231_v9 }
 0x731   : > { %v10647_v17 = vpop.eup %7318  ;;  %7336 = vpow2.f32 %v3279_v18  ;;  %v3283_v18 = vmul.f32 1.442695, %v3051_v61  ;;  %v14300_v61 = vld [vmem:[#allocation81_spill] sm:$0xff] }
 0x732   : > { %v10629_v1 = vpop.permute.xlu0 %3553  ;;  %14282 = vst [vmem:[#allocation59_spill] sm:$0xff] %v10647_v17  ;;  %7338 = vpow2.f32 %v3235_v15  ;;  %v3053_v37 = vsub.f32 %v14300_v61, %v10548_v54 }
 0x733   : > { %14276 = vst [vmem:[#allocation22_spill] sm:$0xff] %v10629_v1  ;;  %v10635_v22 = vpop.permute.xlu1 %3490  ;;  %3739 = vperm.xlu0 %7123, %v10627_v23   ;;  %v10655_v23 = vpop.eup %7320  ;;  %7340 = vpow2.f32 %v3281_v7  ;;  %v3285_v7 = vmul.f32 1.442695, %v3052_v10  ;;  %v14305_v10 = vld [vmem:[#allocation80_spill] sm:$0xff] }
 0x734   : > { %3664 = vperm.xlu1 %7122, %v10633_v19   ;;  %14284 = vst [vmem:[#allocation35_spill] sm:$0xff] %v10655_v23  ;;  %v3029_v19 = vsub.f32 %v14286_v24, %v10453_v49  ;;  %v10661_v42 = vpop.eup %7322  ;;  %v14291_v24 = vld [vmem:[#allocation123_spill] sm:$0xff]  ;;  %v3054_v61 = vsub.f32 %v14305_v10, %v10548_v54 }
 0x735   : > { %14287 = vst [vmem:[#allocation103_spill] sm:$0xff] %v10661_v42 }
 0x736   : > { %v10643_v13 = vpop.permute.xlu0 %3559  ;;  %v3239_v43 = vmul.f32 1.442695, %v3029_v19 }
 0x737   : > { %v10649_v59 = vpop.permute.xlu1 %3493  ;;  %3751 = vperm.xlu0 %7123, %v10641_v8   ;;  %v3031_v8 = vsub.f32 %v14291_v24, %v10453_v49  ;;  %v14297_v24 = vld [vmem:[#allocation125_spill] sm:$0xff] }
 0x738   : > { %3670 = vperm.xlu1 %7122, %v10647_v17   ;;  %v10669_v17 = vpop.eup %7324  ;;  %7342 = vpow2.f32 %v3239_v43 }
 0x739   : > { %14289 = vst [vmem:[#allocation63_spill] sm:$0xff] %v10669_v17  ;;  %v10675_v5 = vpop.eup %7326  ;;  %v3243_v19 = vmul.f32 1.442695, %v3031_v8  ;;  %7344 = vpow2.f32 %v3283_v18  ;;  %v3287_v18 = vmul.f32 1.442695, %v3053_v37  ;;  %v14310_v37 = vld [vmem:[#allocation83_spill] sm:$0xff] }
 0x73a   : > { %v10657_v44 = vpop.permute.xlu0 %3565  ;;  %14292 = vst [vmem:[#allocation65_spill] sm:$0xff] %v10675_v5  ;;  %v3055_v10 = vsub.f32 %v14310_v37, %v10548_v54 }
 0x73b   : > { %14285 = vst [vmem:[#allocation61_spill] sm:$0xff] %v10657_v44  ;;  %v10663_v0 = vpop.permute.xlu1 %3496  ;;  %3796 = vperm.xlu0 %7123, %v10655_v23   ;;  %v3033_v23 = vsub.f32 %v14297_v24, %v10453_v49  ;;  %7346 = vpow2.f32 %v3243_v19  ;;  %v14303_v24 = vld [vmem:[#allocation127_spill] sm:$0xff] }
 0x73c   : > { %3676 = vperm.xlu1 %7122, %v10661_v42   ;;  %v10683_v42 = vpop.eup %7328  ;;  %7348 = vpow2.f32 %v3285_v7  ;;  %v3289_v7 = vmul.f32 1.442695, %v3054_v61  ;;  %v14315_v61 = vld [vmem:[#allocation138_spill] sm:$0xff] }
 0x73d   : > { %14295 = vst [vmem:[#allocation67_spill] sm:$0xff] %v10683_v42  ;;  %v10689_v63 = vpop.eup %7330  ;;  %v3247_v8 = vmul.f32 1.442695, %v3033_v23  ;;  %v3041_v37 = vsub.f32 %v14315_v61, %v10453_v49 }
 0x73e   : > { %v10671_v9 = vpop.permute.xlu0 %3571  ;;  %14298 = vst [vmem:[#allocation71_spill] sm:$0xff] %v10689_v63 }
 0x73f   : > { %14290 = vst [vmem:[#allocation105_spill] sm:$0xff] %v10671_v9  ;;  %v10677_v55 = vpop.permute.xlu1 %3499  ;;  %3757 = vperm.xlu0 %7123, %v10669_v17   ;;  %v3035_v17 = vsub.f32 %v14303_v24, %v10453_v49  ;;  %7350 = vpow2.f32 %v3247_v8  ;;  %v14308_v24 = vld [vmem:[#allocation130_spill] sm:$0xff] }
 0x740   : > { %14293 = vst [vmem:[#allocation107_spill] sm:$0xff] %v10677_v55  ;;  %3682 = vperm.xlu1 %7122, %v10675_v5   ;;  %v10697_v5 = vpop.eup %7332  ;;  %7352 = vpow2.f32 %v3287_v18  ;;  %v3291_v18 = vmul.f32 1.442695, %v3055_v10  ;;  %v14320_v10 = vld [vmem:[#allocation160_spill] sm:$0xff] }
 0x741   : > { %14301 = vst [vmem:[#allocation14_spill] sm:$0xff] %v10697_v5  ;;  %v3251_v23 = vmul.f32 1.442695, %v3035_v17  ;;  %v3071_v61 = vsub.f32 %v14320_v10, %v10567_v41 }
 0x742   : > { %v10685_v15 = vpop.permute.xlu0 %3577 }
 0x743   : > { %14296 = vst [vmem:[#allocation109_spill] sm:$0xff] %v10685_v15  ;;  %v10691_v46 = vpop.permute.xlu1 %3502  ;;  %3760 = vperm.xlu0 %7123, %v10683_v42   ;;  %v10703_v15 = vpop.eup %7334  ;;  %v3037_v42 = vsub.f32 %v14308_v24, %v10453_v49  ;;  %7354 = vpow2.f32 %v3251_v23  ;;  %v14313_v24 = vld [vmem:[#allocation134_spill] sm:$0xff] }
 0x744   : > { %14299 = vst [vmem:[#allocation111_spill] sm:$0xff] %v10691_v46  ;;  %3688 = vperm.xlu1 %7122, %v10689_v63   ;;  %14304 = vst [vmem:[#allocation16_spill] sm:$0xff] %v10703_v15  ;;  %v10711_v63 = vpop.eup %7336  ;;  %7356 = vpow2.f32 %v3289_v7  ;;  %v3263_v7 = vmul.f32 1.442695, %v3041_v37  ;;  %v14325_v37 = vld [vmem:[#allocation85_spill] sm:$0xff] }
 0x745   : > { %14306 = vst [vmem:[#allocation118_spill] sm:$0xff] %v10711_v63  ;;  %v3255_v17 = vmul.f32 1.442695, %v3037_v42  ;;  %v3057_v10 = vsub.f32 %v14325_v37, %v10548_v54 }
 0x746   : > { %v10699_v43 = vpop.permute.xlu0 %3583 }
 0x747   : > { %14302 = vst [vmem:[#allocation115_spill] sm:$0xff] %v10699_v43  ;;  %v10705_v1 = vpop.permute.xlu1 %3508  ;;  %3763 = vperm.xlu0 %7123, %v10697_v5   ;;  %v10717_v43 = vpop.eup %7338  ;;  %v3039_v5 = vsub.f32 %v14313_v24, %v10453_v49  ;;  %7358 = vpow2.f32 %v3255_v17  ;;  %v14318_v24 = vld [vmem:[#allocation69_spill] sm:$0xff] }
 0x748   : > { %3694 = vperm.xlu1 %7122, %v10703_v15   ;;  %14309 = vst [vmem:[#allocation26_spill] sm:$0xff] %v10717_v43  ;;  %v10725_v15 = vpop.eup %7340  ;;  %7360 = vpow2.f32 %v3291_v18  ;;  %v3323_v18 = vmul.f32 1.442695, %v3071_v61  ;;  %v14330_v61 = vld [vmem:[#allocation84_spill] sm:$0xff] }
 0x749   : > { %14311 = vst [vmem:[#allocation19_spill] sm:$0xff] %v10725_v15  ;;  %v3259_v42 = vmul.f32 1.442695, %v3039_v5  ;;  %v3058_v37 = vsub.f32 %v14330_v61, %v10548_v54 }
 0x74a   : > { %v10713_v19 = vpop.permute.xlu0 %3589 }
 0x74b   : > { %14307 = vst [vmem:[#allocation77_spill] sm:$0xff] %v10713_v19  ;;  %v10719_v30 = vpop.permute.xlu1 %3514  ;;  %3766 = vperm.xlu0 %7123, %v10711_v63   ;;  %v10731_v19 = vpop.eup %7342  ;;  %7362 = vpow2.f32 %v3259_v42 }
 0x74c   : > { %3700 = vperm.xlu1 %7122, %v10717_v43   ;;  %14314 = vst [vmem:[#allocation21_spill] sm:$0xff] %v10731_v19  ;;  %v10739_v63 = vpop.eup %7344  ;;  %v3043_v43 = vsub.f32 %v14318_v24, %v10548_v54  ;;  %v14323_v24 = vld [vmem:[#allocation73_spill] sm:$0xff]  ;;  %7364 = vpow2.f32 %v3263_v7  ;;  %v3295_v7 = vmul.f32 1.442695, %v3057_v10  ;;  %v14335_v10 = vld [vmem:[#allocation98_spill] sm:$0xff] }
 0x74d   : > { %14316 = vst [vmem:[#allocation30_spill] sm:$0xff] %v10739_v63  ;;  %v3074_v61 = vsub.f32 %v14335_v10, %v10567_v41 }
 0x74e   : > { %v10727_v8 = vpop.permute.xlu0 %3595  ;;  %v3267_v5 = vmul.f32 1.442695, %v3043_v43 }
 0x74f   : > { %14312 = vst [vmem:[#allocation28_spill] sm:$0xff] %v10727_v8  ;;  %v10733_v12 = vpop.permute.xlu1 %3520  ;;  %3769 = vperm.xlu0 %7123, %v10725_v15   ;;  %v10745_v8 = vpop.eup %7346 }
 0x750   : > { %3706 = vperm.xlu1 %7122, %v10731_v19   ;;  %14319 = vst [vmem:[#allocation32_spill] sm:$0xff] %v10745_v8  ;;  %v10753_v15 = vpop.eup %7348  ;;  %v3045_v19 = vsub.f32 %v14323_v24, %v10548_v54  ;;  %7366 = vpow2.f32 %v3267_v5  ;;  %v14328_v24 = vld [vmem:[#allocation86_spill] sm:$0xff] }
 0x751   : > { %14321 = vst [vmem:[#allocation25_spill] sm:$0xff] %v10753_v15  ;;  %7368 = vpow2.f32 %v3323_v18  ;;  %v3297_v18 = vmul.f32 1.442695, %v3058_v37 }
 0x752   : > { %v10741_v23 = vpop.permute.xlu0 %3601  ;;  %v3271_v43 = vmul.f32 1.442695, %v3045_v19 }
 0x753   : > { %14317 = vst [vmem:[#allocation23_spill] sm:$0xff] %v10741_v23  ;;  %v10747_v9 = vpop.permute.xlu1 %3526  ;;  %3772 = vperm.xlu0 %7123, %v10739_v63   ;;  %v10759_v23 = vpop.eup %7350 }
 0x754   : > { %3712 = vperm.xlu1 %7122, %v10745_v8   ;;  %14324 = vst [vmem:[#allocation36_spill] sm:$0xff] %v10759_v23  ;;  %v10767_v63 = vpop.eup %7352  ;;  %v3060_v8 = vsub.f32 %v14328_v24, %v10567_v41  ;;  %7370 = vpow2.f32 %v3271_v43  ;;  %v14333_v24 = vld [vmem:[#allocation89_spill] sm:$0xff] }
 0x755   : > { %14326 = vst [vmem:[#allocation96_spill] sm:$0xff] %v10767_v63  ;;  %7372 = vpow2.f32 %v3295_v7  ;;  %v3329_v7 = vmul.f32 1.442695, %v3074_v61 }
 0x756   : > { %v10755_v17 = vpop.permute.xlu0 %3607  ;;  %v3301_v19 = vmul.f32 1.442695, %v3060_v8 }
 0x757   : > { %14322 = vst [vmem:[#allocation94_spill] sm:$0xff] %v10755_v17  ;;  %v10761_v39 = vpop.permute.xlu1 %3532  ;;  %3775 = vperm.xlu0 %7123, %v10753_v15   ;;  %v10773_v17 = vpop.eup %7354 }
 0x758   : > { %3718 = vperm.xlu1 %7122, %v10759_v23   ;;  %14329 = vst [vmem:[#allocation99_spill] sm:$0xff] %v10773_v17  ;;  %v10781_v15 = vpop.eup %7356  ;;  %v3061_v23 = vsub.f32 %v14333_v24, %v10567_v41  ;;  %7374 = vpow2.f32 %v3301_v19  ;;  %v14338_v24 = vld [vmem:[#allocation88_spill] sm:$0xff] }
 0x759   : > { %14331 = vst [vmem:[#allocation104_spill] sm:$0xff] %v10781_v15  ;;  %7376 = vpow2.f32 %v3297_v18 }
 0x75a   : > { %v10769_v42 = vpop.permute.xlu0 %3613  ;;  %v3303_v8 = vmul.f32 1.442695, %v3061_v23  ;;  %v14343_v23 = vld [vmem:[#allocation91_spill] sm:$0xff] }
 0x75b   : > { %14327 = vst [vmem:[#allocation102_spill] sm:$0xff] %v10769_v42  ;;  %v10775_v46 = vpop.permute.xlu1 %3538  ;;  %3778 = vperm.xlu0 %7123, %v10767_v63   ;;  %v10787_v42 = vpop.eup %7358 }
 0x75c   : > { %3724 = vperm.xlu1 %7122, %v10773_v17   ;;  %14334 = vst [vmem:[#allocation106_spill] sm:$0xff] %v10787_v42  ;;  %v10795_v63 = vpop.eup %7360  ;;  %v3062_v17 = vsub.f32 %v14338_v24, %v10567_v41  ;;  %7378 = vpow2.f32 %v3303_v8 }
 0x75d   : > { %14336 = vst [vmem:[#allocation120_spill] sm:$0xff] %v10795_v63  ;;  %7380 = vpow2.f32 %v3329_v7 }
 0x75e   : > { %v10783_v5 = vpop.permute.xlu0 %3619  ;;  %v3305_v19 = vmul.f32 1.442695, %v3062_v17  ;;  %v14347_v17 = vld [vmem:[#allocation90_spill] sm:$0xff] }
 0x75f   : > { %14332 = vst [vmem:[#allocation34_spill] sm:$0xff] %v10783_v5  ;;  %v10789_v38 = vpop.permute.xlu1 %3544  ;;  %3781 = vperm.xlu0 %7123, %v10781_v15   ;;  %v10801_v5 = vpop.eup %7362  ;;  %v3063_v15 = vsub.f32 %v14343_v23, %v10567_v41  ;;  %v3064_v8 = vsub.f32 %v14347_v17, %v10567_v41 }
 0x760   : > { %3730 = vperm.xlu1 %7122, %v10787_v42   ;;  %14339 = vst [vmem:[#allocation122_spill] sm:$0xff] %v10801_v5  ;;  %v10807_v37 = vpop.eup %7364  ;;  %7382 = vpow2.f32 %v3305_v19  ;;  %v14351_v19 = vld [vmem:[#allocation151_spill] sm:$0xff] }
 0x761   : > { %14341 = vst [vmem:[#allocation124_spill] sm:$0xff] %v10807_v37  ;;  %v10813_v24 = vpop.eup %7366 }
 0x762   : > { %v10797_v43 = vpop.permute.xlu0 %3625  ;;  %14344 = vst [vmem:[#allocation126_spill] sm:$0xff] %v10813_v24  ;;  %v10819_v18 = vpop.eup %7368 }
 0x763   : > { %14337 = vst [vmem:[#allocation108_spill] sm:$0xff] %v10797_v43  ;;  %v10803_v55 = vpop.permute.xlu1 %3550  ;;  %3784 = vperm.xlu0 %7123, %v10795_v63   ;;  %14345 = vst [vmem:[#allocation116_spill] sm:$0xff] %v10819_v18  ;;  %v3307_v63 = vmul.f32 1.442695, %v3063_v15  ;;  %v3065_v15 = vsub.f32 %v14351_v19, %v10567_v41  ;;  %v14364_v43 = vld [vmem:[#allocation155_spill] sm:$0xff] }
 0x764   : > { %14340 = vst [vmem:[#allocation110_spill] sm:$0xff] %v10803_v55  ;;  %3736 = vperm.xlu1 %7122, %v10801_v5   ;;  %v10825_v5 = vpop.eup %7370 }
 0x765   : > { %14348 = vst [vmem:[#allocation27_spill] sm:$0xff] %v10825_v5  ;;  %7384 = vpow2.f32 %v3307_v63  ;;  %v3311_v63 = vmul.f32 1.442695, %v3065_v15 }
 0x766   : > { %v10809_v10 = vpop.permute.xlu0 %3631  ;;  %7386 = vrcp.f32 %v10479_v16 }
 0x767   : > { %14342 = vst [vmem:[#allocation112_spill] sm:$0xff] %v10809_v10  ;;  %v10815_v42 = vpop.permute.xlu1 %3556  ;;  %3742 = vperm.xlu0 %7123, %v10807_v37   ;;  %v10831_v37 = vpop.eup %7372 }
 0x768   : > { %3748 = vperm.xlu1 %7122, %v10813_v24   ;;  %14349 = vst [vmem:[#allocation133_spill] sm:$0xff] %v10831_v37  ;;  %v3309_v24 = vmul.f32 1.442695, %v3064_v8  ;;  %v14355_v8 = vld [vmem:[#allocation92_spill] sm:$0xff] }
 0x76a   : > { %v10821_v61 = vpop.permute.xlu0 %3637  ;;  %7388 = vpow2.f32 %v3309_v24  ;;  %v14360_v24 = vld [vmem:[#allocation152_spill] sm:$0xff] }
 0x76b   : > { %14346 = vst [vmem:[#allocation129_spill] sm:$0xff] %v10821_v61  ;;  %v10827_v23 = vpop.permute.xlu1 %3562  ;;  %3832 = vperm.xlu0 %7123, %v10819_v18   ;;  %v10837_v61 = vpop.eup %7374  ;;  %7390 = vpow2.f32 %v3311_v63  ;;  %v3067_v15 = vsub.f32 %v14360_v24, %v10567_v41 }
 0x76c   : > { %3754 = vperm.xlu1 %7122, %v10825_v5   ;;  %14352 = vst [vmem:[#allocation137_spill] sm:$0xff] %v10837_v61  ;;  %v10844_v18 = vpop.eup %7376 }
 0x76d   : > { %14353 = vst [vmem:[#allocation31_spill] sm:$0xff] %v10844_v18  ;;  %v10850_v19 = vpop.eup %7378 }
 0x76e   : > { %v10833_v7 = vpop.permute.xlu0 %3643  ;;  %14356 = vst [vmem:[#allocation33_spill] sm:$0xff] %v10850_v19 }
 0x76f   : > { %14350 = vst [vmem:[#allocation29_spill] sm:$0xff] %v10833_v7  ;;  %v10839_v17 = vpop.permute.xlu1 %3568  ;;  %3790 = vperm.xlu0 %7123, %v10831_v37   ;;  %v3066_v7 = vsub.f32 %v14355_v8, %v10567_v41  ;;  %v10856_v37 = vpop.eup %7380 }
 0x770   : > { %3799 = vperm.xlu1 %7122, %v10837_v61   ;;  %14358 = vst [vmem:[#allocation93_spill] sm:$0xff] %v10856_v37 }
 0x771   : > { %v3313_v61 = vmul.f32 1.442695, %v3066_v7 }
 0x772   : > { %v10846_v5 = vpop.permute.xlu0 %3649 }
 0x773   : > { %14354 = vst [vmem:[#allocation68_spill] sm:$0xff] %v10846_v5  ;;  %v10852_v10 = vpop.permute.xlu1 %3574  ;;  %3793 = vperm.xlu0 %7123, %v10844_v18   ;;  %v10862_v5 = vpop.eup %7382  ;;  %7392 = vpow2.f32 %v3313_v61 }
 0x774   : > { %14357 = vst [vmem:[#allocation87_spill] sm:$0xff] %v10852_v10  ;;  %3802 = vperm.xlu1 %7122, %v10850_v19   ;;  %14361 = vst [vmem:[#allocation95_spill] sm:$0xff] %v10862_v5  ;;  %v3315_v19 = vmul.f32 1.442695, %v3067_v15  ;;  %v10872_v63 = vpop.eup %7384 }
 0x775   : > { %14365 = vst [vmem:[#allocation74_spill] sm:$0xff] %v10872_v63  ;;  %v7387_v24 = vpop.eup %7386 }
 0x776   : > { %v10858_v16 = vpop.permute.xlu0 %3655  ;;  %7394 = vpow2.f32 %v3315_v19 }
 0x777   : > { %14359 = vst [vmem:[#allocation72_spill] sm:$0xff] %v10858_v16  ;;  %v10864_v8 = vpop.permute.xlu1 %3580  ;;  %3841 = vperm.xlu0 %7123, %v10856_v37   ;;  %v3068_v16 = vsub.f32 %v14364_v43, %v10567_v41  ;;  %v5798_v43 = vmul.f32 %v7387_v24, %v10115_v32  ;;  %v14377_v32 = vld [vmem:[#allocation82_spill] sm:$0xff] }
 0x778   : > { %14362 = vst [vmem:[#allocation141_spill] sm:$0xff] %v10864_v8  ;;  %3805 = vperm.xlu1 %7122, %v10862_v5   ;;  %v14368_v5 = vld [vmem:[#allocation156_spill] sm:$0xff]  ;;  %v3056_v24 = vsub.f32 %v14377_v32, %v10548_v54 }
 0x779   : > { %v3317_v37 = vmul.f32 1.442695, %v3068_v16  ;;  %v3069_v8 = vsub.f32 %v14368_v5, %v10567_v41  ;;  %v14375_v5 = vld [vmem:[#allocation9_spill] sm:$0xff] }
 0x77a   : > { %v10868_v18 = vpop.permute.xlu0 %3661  ;;  %v5823_v55 = vrot.slane %v5798_v43, %v14375_v5 }
 0x77b   : > { %14363 = vst [vmem:[#allocation97_spill] sm:$0xff] %v10868_v18  ;;  %v10874_v7 = vpop.permute.xlu1 %3586  ;;  %v10881_v18 = vpop.eup %7388  ;;  %7396 = vpow2.f32 %v3317_v37 }
 0x77c   : > { %14366 = vst [vmem:[#allocation100_spill] sm:$0xff] %v10874_v7  ;;  %3808 = vperm.xlu1 %7122, %v10872_v63   ;;  %14369 = vst [vmem:[#allocation119_spill] sm:$0xff] %v10881_v18  ;;  %v3319_v63 = vmul.f32 1.442695, %v3069_v8  ;;  %v14372_v7 = vld [vmem:[#allocation159_spill] sm:$0xff]  ;;  %v10891_v19 = vpop.eup %7390 }
 0x77d   : > { %14373 = vst [vmem:[#allocation79_spill] sm:$0xff] %v10891_v19 }
 0x77e   : > { %v10877_v10 = vpop.permute.xlu0 %3667  ;;  %7398 = vpow2.f32 %v3319_v63 }
 0x77f   : > { %14367 = vst [vmem:[#allocation76_spill] sm:$0xff] %v10877_v10  ;;  %v10883_v61 = vpop.permute.xlu1 %3592  ;;  %v3070_v10 = vsub.f32 %v14372_v7, %v10567_v41  ;;  %v5839_v7 = vrot.slane %v5823_v55, %v14375_v5 }
 0x780   : > { %14370 = vst [vmem:[#allocation75_spill] sm:$0xff] %v10883_v61  ;;  %3811 = vperm.xlu1 %7122, %v10881_v18   ;;  %v10901_v37 = vpop.eup %7392 }
 0x781   : > { %v3321_v18 = vmul.f32 1.442695, %v3070_v10  ;;  %14378 = vst [vmem:[#allocation125_spill] sm:$0xff] %v10901_v37  ;;  %v10917_v54 = vrot.slane %v5839_v7, %v14100_v48 }
 0x782   : > { %v10887_v15 = vpop.permute.xlu0 %3673 }
 0x783   : > { %14371 = vst [vmem:[#allocation121_spill] sm:$0xff] %v10887_v15  ;;  %v10893_v16 = vpop.permute.xlu1 %3598  ;;  %v5831_v15 = vcombine.high %v5823_v55, %v5823_v55  ;;  %7400 = vpow2.f32 %v3321_v18  ;;  %v10911_v10 = vpop.eup %7394  ;;  %v5799_v55 = vld [vmem:[%s13405_s3] sm:$0xff] }
 0x784   : > { %14374 = vst [vmem:[#allocation123_spill] sm:$0xff] %v10893_v16  ;;  %3814 = vperm.xlu1 %7122, %v10891_v19   ;;  %v3293_v19 = vmul.f32 1.442695, %v3056_v24  ;;  %14382 = vst [vmem:[#allocation80_spill] sm:$0xff] %v10911_v10 }
 0x785   : > { %v5853_v32 = vrot.slane %v5831_v15, %v14375_v5 }
 0x786   : > { %v10897_v61 = vpop.permute.xlu0 %3679  ;;  %7402 = vpow2.f32 %v3293_v19  ;;  %v5801_v19 = vld [vmem:[%s13405_s3 + $0x10] sm:$0xff] }
 0x787   : > { %14376 = vst [vmem:[#allocation78_spill] sm:$0xff] %v10897_v61  ;;  %v10903_v8 = vpop.permute.xlu1 %3604  ;;  %v14381_v61 = vld [vmem:[#allocation140_spill] sm:$0xff]  ;;  %v5872_v15 = vrot.slane %v5853_v32, %v14100_v48 }
 0x788   : > { %14379 = vst [vmem:[#allocation81_spill] sm:$0xff] %v10903_v8  ;;  %3817 = vperm.xlu1 %7122, %v10901_v37   ;;  %v3042_v63 = vsub.f32 %v14381_v61, %v10453_v49  ;;  %v14385_v49 = vld [vmem:[#allocation163_spill] sm:$0xff]  ;;  %v10927_v24 = vpop.eup %7396 }
 0x789   : > { %v3072_v61 = vsub.f32 %v14385_v49, %v10567_v41  ;;  %14386 = vst [vmem:[#allocation134_spill] sm:$0xff] %v10927_v24  ;;  %v14389_v49 = vld [vmem:[#allocation164_spill] sm:$0xff] }
 0x78a   : > { %v10907_v16 = vpop.permute.xlu0 %3685  ;;  %v3265_v18 = vmul.f32 1.442695, %v3042_v63  ;;  %v3073_v8 = vsub.f32 %v14389_v49, %v10567_v41 }
 0x78b   : > { %14380 = vst [vmem:[#allocation127_spill] sm:$0xff] %v10907_v16  ;;  %v10913_v33 = vpop.permute.xlu1 %3610  ;;  %v3325_v63 = vmul.f32 1.442695, %v3072_v61  ;;  %v10941_v44 = vpop.eup %7398 }
 0x78c   : > { %14383 = vst [vmem:[#allocation130_spill] sm:$0xff] %v10913_v33  ;;  %3820 = vperm.xlu1 %7122, %v10911_v10   ;;  %v5905_v10 = vmul.f32 %v10917_v54, %v5799_v55  ;;  %7404 = vpow2.f32 %v3265_v18  ;;  %14390 = vst [vmem:[#allocation160_spill] sm:$0xff] %v10941_v44  ;;  %v5802_v18 = vld [vmem:[%s13405_s3 + $0x18] sm:$0xff]  ;;  %v3327_v61 = vmul.f32 1.442695, %v3073_v8  ;;  %v5803_v8 = vld [vmem:[%s13405_s3 + $0x20] sm:$0xff] }
 0x78d   : > { %7406 = vpow2.f32 %v3325_v63 }
 0x78e   : > { %v10920_v37 = vpop.permute.xlu0 %3691  ;;  %v5921_v55 = vsel %vm14099_vm0, %v5905_v10, 0.0  ;;  %7408 = vpow2.f32 %v3327_v61  ;;  %v5807_v61 = vld [vmem:[%s13405_s3 + $0x40] sm:$0xff] }
 0x78f   : > { %14384 = vst [vmem:[#allocation83_spill] sm:$0xff] %v10920_v37  ;;  %v10929_v16 = vpop.permute.xlu1 %3616  ;;  %v5816_v37 = vcombine.high %v5798_v43, %v5798_v43  ;;  %v5907_v43 = vmul.f32 %v5872_v15, %v5801_v19 }
 0x790   : > { %14387 = vst [vmem:[#allocation138_spill] sm:$0xff] %v10929_v16  ;;  %3823 = vperm.xlu1 %7122, %v10927_v24   ;;  %v5861_v24 = vcombine.high %v5839_v7, %v5839_v7  ;;  %v10951_v41 = vpop.eup %7400  ;;  %v5908_v7 = vmul.f32 %v5872_v15, %v5802_v18 }
 0x791   : > { %14392 = vst [vmem:[#allocation85_spill] sm:$0xff] %v10951_v41  ;;  %v5927_v10 = vsel %vm14099_vm0, %v5907_v43, 0.0 }
 0x792   : > { %v10934_v33 = vpop.permute.xlu0 %3697  ;;  %v5930_v15 = vsel %vm14099_vm0, %v5908_v7, 0.0 }
 0x793   : > { %14388 = vst [vmem:[#allocation69_spill] sm:$0xff] %v10934_v33  ;;  %v10943_v16 = vpop.permute.xlu1 %3622  ;;  %v5830_v33 = vrot.slane %v5816_v37, %v14375_v5  ;;  %v10960_v37 = vrot.slane %v5861_v24, %v14100_v48  ;;  %v10966_v63 = vpop.eup %7402 }
 0x794   : > { %14391 = vst [vmem:[#allocation73_spill] sm:$0xff] %v10943_v16  ;;  %3826 = vperm.xlu1 %7122, %v10941_v44   ;;  %14394 = vst [vmem:[#allocation84_spill] sm:$0xff] %v10966_v63 }
 0x795   : > { %v5846_v19 = vrot.slane %v5830_v33, %v14375_v5  ;;  %v5909_v24 = vmul.f32 %v10960_v37, %v5803_v8  ;;  %v5832_v18 = vcombine.high %v5830_v33, %v5830_v33 }
 0x796   : > { %5922 = vadd.xlane.f32.xlu0 %v5921_v55  ;;  %v10955_v16 = vpop.permute.xlu0 %3703 }
 0x797   : > { %v10953_v49 = vpop.permute.xlu1 %3628  ;;  %14393 = vst [vmem:[#allocation86_spill] sm:$0xff] %v10955_v16  ;;  %v5884_v43 = vrot.slane %v5846_v19, %v14100_v48  ;;  %v10987_v33 = vrot.slane %v5832_v18, %v14375_v5  ;;  %v5809_v18 = vld [vmem:[%s13405_s3 + $0x50] sm:$0xff] }
 0x798   : > { %3829 = vperm.xlu1 %7122, %v10951_v41   ;;  %v5863_v41 = vcombine.high %v5853_v32, %v5853_v32  ;;  %v5933_v32 = vsel %vm14399_vm1, %v5909_v24, 0.0  ;;  %vm14404_vm1 = vmmov %vm14099_vm0 }
 0x799   : > { %v10979_v44 = vpop.eup %7404  ;;  %v5913_v7 = vmul.f32 %v5884_v43, %v5807_v61  ;;  %14400 = vst [vmem:[#allocation90_spill] sm:$0xff] %v10987_v33  ;;  %v5888_v5 = vrot.slane %v10987_v33, %v14100_v48 }
 0x79a   : > { %5928 = vadd.xlane.f32.xlu0 %v5927_v10  ;;  %v10974_v10 = vpop.permute.xlu0 %3709  ;;  %14397 = vst [vmem:[#allocation88_spill] sm:$0xff] %v10979_v44  ;;  %v5880_v8 = vrot.slane %v5863_v41, %v14100_v48  ;;  %v5862_v41 = vcombine.high %v5846_v19, %v5846_v19  ;;  %v5811_v19 = vld [vmem:[%s13405_s3 + $0x60] sm:$0xff] }
 0x79b   : > { %v10968_v55 = vpop.permute.xlu1 %3634  ;;  %14396 = vst [vmem:[#allocation98_spill] sm:$0xff] %v10974_v10  ;;  %v5945_v24 = vsel %vm14404_vm1, %v5913_v7, 0.0  ;;  %vm14407_vm1 = vmmov %vm14099_vm0 }
 0x79c   : > { %14395 = vst [vmem:[#allocation89_spill] sm:$0xff] %v10968_v55  ;;  %3787 = vperm.xlu1 %7122, %v10966_v63   ;;  %v10992_v63 = vpop.eup %7406  ;;  %v5892_v7 = vrot.slane %v5862_v41, %v14100_v48 }
 0x79d   : > { %14401 = vst [vmem:[#allocation151_spill] sm:$0xff] %v10992_v63 }
 0x79e   : > { %5931 = vadd.xlane.f32.xlu0 %v5930_v15  ;;  %v5805_v15 = vld [vmem:[%s13405_s3 + $0x30] sm:$0xff] }
 0x79f   : > { %v10981_v55 = vpop.permute.xlu1 %3640  ;;  %v5911_v61 = vmul.f32 %v5880_v8, %v5805_v15 }
 0x7a0   : > { %14398 = vst [vmem:[#allocation91_spill] sm:$0xff] %v10981_v55  ;;  %3745 = vperm.xlu1 %7122, %v10979_v44   ;;  %v10996_v55 = vpop.permute.xlu0 %3715 }
 0x7a1   : > { %14403 = vst [vmem:[#allocation152_spill] sm:$0xff] %v10996_v55  ;;  %v5917_v55 = vmul.f32 %v5892_v7, %v5811_v19 }
 0x7a2   : > { %5934 = vadd.xlane.f32.xlu0 %v5933_v32  ;;  %v11005_v32 = vpop.eup %7408 }
 0x7a3   : > { %v10994_v10 = vpop.permute.xlu1 %3646  ;;  %14405 = vst [vmem:[#allocation155_spill] sm:$0xff] %v11005_v32 }
 0x7a4   : > { %14402 = vst [vmem:[#allocation92_spill] sm:$0xff] %v10994_v10  ;;  %3835 = vperm.xlu1 %7122, %v10992_v63   ;;  %v5939_v63 = vsel %vm14099_vm0, %v5911_v61, 0.0  ;;  %v5915_v10 = vmul.f32 %v5888_v5, %v5809_v18  ;;  %v11012_v15 = vpop.permute.xlu0 %3721  ;;  %v5957_v61 = vsel %vm14099_vm0, %v5917_v55, 0.0  ;;  %v5800_v55 = vld [vmem:[%s13405_s3 + $0x8] sm:$0xff] }
 0x7a5   : > { %14406 = vst [vmem:[#allocation156_spill] sm:$0xff] %v11012_v15 }
 0x7a6   : > { %5946 = vadd.xlane.f32.xlu0 %v5945_v24  ;;  %v5951_v33 = vsel %vm14407_vm1, %v5915_v10, 0.0  ;;  %vm14419_vm1 = vmmov %vm14099_vm0 }
 0x7a7   : > { %v11007_v44 = vpop.permute.xlu1 %3652 }
 0x7a8   : > { %3838 = vperm.xlu1 %7122, %v11005_v32   ;;  %v11022_v32 = vpop.permute.xlu0 %3727 }
 0x7a9   : > { %14408 = vst [vmem:[#allocation159_spill] sm:$0xff] %v11022_v32 }
 0x7aa   : > { %5940 = vadd.xlane.f32.xlu0 %v5939_v63 }
 0x7ab   : > { %v11017_v24 = vpop.permute.xlu1 %3658 }
 0x7ac   : > { %v11027_v63 = vpop.permute.xlu0 %3733 }
 0x7ad   : > { %14410 = vst [vmem:[#allocation82_spill] sm:$0xff] %v11027_v63  ;;  %v5906_v63 = vmul.f32 %v10917_v54, %v5800_v55 }
 0x7ae   : > { %5952 = vadd.xlane.f32.xlu0 %v5951_v33 }
 0x7af   : > { %v11020_v16 = vpop.permute.xlu1 %3664 }
 0x7b0   : > { %v11033_v15 = vpop.permute.xlu0 %3739 }
 0x7b1   : > { %14413 = vst [vmem:[#allocation164_spill] sm:$0xff] %v11033_v15  ;;  %v5804_v15 = vld [vmem:[%s13405_s3 + $0x28] sm:$0xff] }
 0x7b2   : > { %5958 = vadd.xlane.f32.xlu0 %v5957_v61 }
 0x7b3   : > { %v11025_v41 = vpop.permute.xlu1 %3670 }
 0x7b4   : > { %14409 = vst [vmem:[#allocation9_spill] sm:$0xff] %v11025_v41  ;;  %v11037_v33 = vpop.permute.xlu0 %3751 }
 0x7b7   : > { %v11029_v18 = vpop.permute.xlu1 %3676 }
 0x7b8   : > { %14411 = vst [vmem:[#allocation140_spill] sm:$0xff] %v11029_v18  ;;  %v11047_v32 = vpop.permute.xlu0 %3796  ;;  %v5808_v18 = vld [vmem:[%s13405_s3 + $0x48] sm:$0xff] }
 0x7b9   : > { %14417 = vst [vmem:[#allocation204_spill] sm:$0xff] %v11047_v32  ;;  %v5914_v32 = vmul.f32 %v5884_v43, %v5808_v18 }
 0x7bb   : > { %v11031_v48 = vpop.permute.xlu1 %3682 }
 0x7bc   : > { %14412 = vst [vmem:[#allocation163_spill] sm:$0xff] %v11031_v48  ;;  %v11059_v41 = vpop.permute.xlu0 %3757 }
 0x7bf   : > { %v11035_v10 = vpop.permute.xlu1 %3688 }
 0x7c0   : > { %14414 = vst [vmem:[#allocation201_spill] sm:$0xff] %v11035_v10  ;;  %v5924_v10 = vsel %vm14419_vm1, %v5906_v63, 0.0  ;;  %vm14421_vm1 = vmmov %vm14099_vm0 }
 0x7c3   : > { %v11039_v19 = vpop.permute.xlu1 %3694 }
 0x7c4   : > { %14415 = vst [vmem:[#allocation202_spill] sm:$0xff] %v11039_v19  ;;  %v5910_v19 = vmul.f32 %v10960_v37, %v5804_v15  ;;  %v5948_v37 = vsel %vm14421_vm1, %v5914_v32, 0.0  ;;  %vm14424_vm1 = vmmov %vm14099_vm0 }
 0x7c6   : > { %v5936_v55 = vsel %vm14099_vm0, %v5910_v19, 0.0  ;;  %v5812_v19 = vld [vmem:[%s13405_s3 + $0x68] sm:$0xff] }
 0x7c7   : > { %v11044_v61 = vpop.permute.xlu1 %3700 }
 0x7c8   : > { %14416 = vst [vmem:[#allocation203_spill] sm:$0xff] %v11044_v61 }
 0x7cb   : > { %v11052_v48 = vpop.permute.xlu1 %3706 }
 0x7cc   : > { %14418 = vst [vmem:[#allocation205_spill] sm:$0xff] %v11052_v48  ;;  %5925 = vadd.xlane.f32.xlu1 %v5924_v10  ;;  %v5806_v48 = vld [vmem:[%s13405_s3 + $0x38] sm:$0xff]  ;;  %v11070_v10 = vpop.permute.xlu0 %3760 }
 0x7cd   : > { %v5912_v15 = vmul.f32 %v5880_v8, %v5806_v48  ;;  %v3925_v48 = vrot.slane %v10705_v1, %v9639_v47 }
 0x7cf   : > { %v11061_v54 = vpop.permute.xlu1 %3712  ;;  %v5942_v43 = vsel %vm14099_vm0, %v5912_v15, 0.0 }
 0x7d0   : > { %14420 = vst [vmem:[#allocation206_spill] sm:$0xff] %v11061_v54  ;;  %5937 = vadd.xlane.f32.xlu1 %v5936_v55  ;;  %v5810_v54 = vld [vmem:[%s13405_s3 + $0x58] sm:$0xff]  ;;  %v11081_v55 = vpop.permute.xlu0 %3763 }
 0x7d1   : > { %v5916_v18 = vmul.f32 %v5888_v5, %v5810_v54  ;;  %v3929_v5 = vrot.slane %v10519_v29, %v9634_v52  ;;  %v3939_v29 = vrot.slane %v10534_v45, %v9652_v31  ;;  %v3954_v45 = vrot.slane %v10747_v9, %v9691_v62 }
 0x7d2   : > { %v3880_v9 = vrot.slane %v10607_v26, %v9696_v40 }
 0x7d3   : > { %v11067_v63 = vpop.permute.xlu1 %3718  ;;  %v5954_v32 = vsel %vm14424_vm1, %v5916_v18, 0.0  ;;  %v3930_v54 = vsel %vm2236_vm7, %v3929_v5, %v3925_v48  ;;  %v3875_v5 = vrot.slane %v10593_v60, %v9691_v62  ;;  %vm14425_vm1 = vcmask 392512  }
 0x7d4   : > { %5949 = vadd.xlane.f32.xlu1 %v5948_v37  ;;  %v5918_v37 = vmul.f32 %v5892_v7, %v5812_v19  ;;  %v11099_v18 = vpop.permute.xlu0 %3766  ;;  %v3855_v7 = vrot.slane %v10525_v58, %v9646_v50  ;;  %v3846_v19 = vrot.slane %v10497_v3, %v9639_v47  ;;  %v3949_v3 = vrot.slane %v10554_v28, %v9670_v27 }
 0x7d7   : > { %v11075_v61 = vpop.permute.xlu1 %3724 }
 0x7d8   : > { %14422 = vst [vmem:[#allocation207_spill] sm:$0xff] %v11075_v61  ;;  %5943 = vadd.xlane.f32.xlu1 %v5942_v43  ;;  %v3934_v61 = vrot.slane %v10719_v30, %v9646_v50  ;;  %v5960_v43 = vsel %vm14099_vm0, %v5918_v37, 0.0  ;;  %v3850_v30 = vrot.slane %v10511_v11, %v9634_v52  ;;  %vm14426_vm0 = vmmov %vm14425_vm1 }
 0x7da   : > { %v3935_v1 = vsel %vm2243_vm8, %v3934_v61, %v3930_v54  ;;  %v3860_v61 = vrot.slane %v10540_v56, %v9652_v31  ;;  %v3851_v58 = vsel %vm2236_vm7, %v3850_v30, %v3846_v19  ;;  %v3870_v56 = vrot.slane %v10579_v2, %v9670_v27  ;;  %v11127_v54 = vpop.permute.xlu0 %3769 }
 0x7db   : > { %v11085_v8 = vpop.permute.xlu1 %3730  ;;  %v3856_v37 = vsel %vm2243_vm8, %v3855_v7, %v3851_v58  ;;  %v3959_v30 = vrot.slane %v10573_v53, %v9696_v40  ;;  %v3890_v7 = vrot.slane %v10621_v25, %v9711_v36  ;;  %v3974_v53 = vrot.slane %v10775_v46, %v9730_v35 }
 0x7dc   : > { %14423 = vst [vmem:[#allocation208_spill] sm:$0xff] %v11085_v8  ;;  %5955 = vadd.xlane.f32.xlu1 %v5954_v32  ;;  %v3944_v8 = vrot.slane %v10733_v12, %v9664_v14  ;;  %v3940_v12 = vsel %vm2250_vm9, %v3939_v29, %v3935_v1  ;;  %v3865_v32 = vrot.slane %v10560_v51, %v9664_v14 }
 0x7dd   : > { %v3861_v51 = vsel %vm2250_vm9, %v3860_v61, %v3856_v37  ;;  %v3964_v1 = vrot.slane %v10761_v39, %v9702_v20  ;;  %v4004_v61 = vrot.slane %v10815_v42, %v9639_v47  ;;  %v3885_v39 = vrot.slane %v10491_v57, %v9702_v20 }
 0x7de   : > { %v3945_v11 = vsel %vm2257_vm10, %v3944_v8, %v3940_v12  ;;  %v3866_v28 = vsel %vm2257_vm10, %v3865_v32, %v3861_v51  ;;  %v3969_v25 = vrot.slane %v10587_v34, %v9711_v36  ;;  %v3895_v42 = vrot.slane %v10635_v22, %v9730_v35 }
 0x7df   : > { %v11093_v15 = vpop.permute.xlu1 %3736  ;;  %v3950_v8 = vsel %vm14425_vm1, %v3949_v3, %v3945_v11  ;;  %v3871_v60 = vsel %vm14426_vm0, %v3870_v56, %v3866_v28  ;;  %v4013_v11 = vrot.slane %v10827_v23, %v9646_v50  ;;  %v4008_v58 = vrot.slane %v10643_v13, %v9634_v52  ;;  %v14430_v28 = vld [vmem:[#allocation199_spill] sm:$0xff] }
 0x7e0   : > { %5961 = vadd.xlane.f32.xlu1 %v5960_v43  ;;  %v3955_v2 = vsel %vm2271_vm12, %v3954_v45, %v3950_v8  ;;  %v3876_v29 = vsel %vm2271_vm12, %v3875_v5, %v3871_v60  ;;  %v11158_v45 = vpop.permute.xlu0 %3772  ;;  %v3900_v3 = vrot.slane %v10649_v59, %v9740_v21  ;;  %v3905_v23 = vrot.slane %v10663_v0, %v9759_v6 }
 0x7e1   : > { %v3881_v26 = vsel %vm2278_vm13, %v3880_v9, %v3876_v29  ;;  %v3960_v19 = vsel %vm2278_vm13, %v3959_v30, %v3955_v2  ;;  %v4009_v34 = vsel %vm2236_vm7, %v4008_v58, %v4004_v61  ;;  %vm14427_vm1 = vcmask 720512   ;;  %v14429_v9 = vld [vmem:[#allocation61_spill] sm:$0xff]  ;;  %v14431_v2 = vld [vmem:[#allocation107_spill] sm:$0xff]  ;;  %v14433_v30 = vld [vmem:[#allocation200_spill] sm:$0xff] }
 0x7e2   : > { %v3965_v32 = vsel %vm2285_vm14, %v3964_v1, %v3960_v19  ;;  %v3886_v57 = vsel %vm2285_vm14, %v3885_v39, %v3881_v26  ;;  %v3984_v13 = vrot.slane %v10789_v38, %v9759_v6  ;;  %v4014_v5 = vsel %vm2243_vm8, %v4013_v11, %v4009_v34  ;;  %vm14428_vm0 = vmmov %vm14427_vm1  ;;  %v14434_v38 = vld [vmem:[#allocation111_spill] sm:$0xff]  ;;  %v14436_v39 = vld [vmem:[#allocation110_spill] sm:$0xff] }
 0x7e3   : > { %v11112_v48 = vpop.permute.xlu1 %3748  ;;  %v3891_v46 = vsel %vm2292_vm15, %v3890_v7, %v3886_v57  ;;  %v3970_v56 = vsel %vm2292_vm15, %v3969_v25, %v3965_v32  ;;  %v4023_v59 = vrot.slane %v10839_v17, %v9664_v14  ;;  %v3979_v51 = vrot.slane %v10601_v4, %v9740_v21  ;;  %v14437_v11 = vld [vmem:[#allocation87_spill] sm:$0xff] }
 0x7e4   : > { %v3975_v22 = vsel %vm14427_vm1, %v3974_v53, %v3970_v56  ;;  %v3896_v0 = vsel %vm14428_vm0, %v3895_v42, %v3891_v46  ;;  %v4018_v8 = vrot.slane %v14429_v9, %v9652_v31  ;;  %v3910_v1 = vrot.slane %v14431_v2, %v14430_v28  ;;  %v11192_v26 = vpop.permute.xlu0 %3775  ;;  %v14438_v42 = vld [vmem:[#allocation53_spill] sm:$0xff] }
 0x7e5   : > { %vm14432_vm1 = vcmask 786112   ;;  %v3915_v29 = vrot.slane %v14434_v38, %v14433_v30  ;;  %v3994_v32 = vrot.slane %v14436_v39, %v14433_v30  ;;  %v4033_v25 = vrot.slane %v14437_v11, %v9691_v62 }
 0x7e6   : > { %v3901_v60 = vsel %vm14432_vm1, %v3900_v3, %v3896_v0  ;;  %vm14435_vm11 = vmmov %vm14432_vm1  ;;  %v4019_v4 = vsel %vm2250_vm9, %v4018_v8, %v4014_v5  ;;  %v3989_v58 = vrot.slane %v14438_v42, %v14430_v28  ;;  %v14439_v3 = vld [vmem:[#allocation105_spill] sm:$0xff]  ;;  %v14444_v0 = vld [vmem:[#allocation94_spill] sm:$0xff]  ;;  %vm14459_vm0 = vcmask 1041409  }
 0x7e7   : > { %v11133_v43 = vpop.permute.xlu1 %3754  ;;  %v3906_v17 = vsel %vm2313_vm3, %v3905_v23, %v3901_v60  ;;  %v3980_v7 = vsel %vm14435_vm11, %v3979_v51, %v3975_v22  ;;  %v4024_v53 = vsel %vm2257_vm10, %v4023_v59, %v4019_v4  ;;  %v4028_v46 = vrot.slane %v14439_v3, %v9670_v27  ;;  %v14440_v23 = vld [vmem:[#allocation81_spill] sm:$0xff]  ;;  %v14441_v22 = vld [vmem:[#allocation130_spill] sm:$0xff]  ;;  %v14443_v59 = vld [vmem:[#allocation64_spill] sm:$0xff] }
 0x7e8   : > { %v3985_v61 = vsel %vm2313_vm3, %v3984_v13, %v3980_v7  ;;  %v3911_v57 = vsel %vm2320_vm4, %v3910_v1, %v3906_v17  ;;  %v4083_v56 = vrot.slane %v14440_v23, %v9639_v47  ;;  %v4092_v13 = vrot.slane %v14441_v22, %v9646_v50  ;;  %v14442_v5 = vld [vmem:[#allocation113_spill] sm:$0xff]  ;;  %v14446_v60 = vld [vmem:[#allocation22_spill] sm:$0xff]  ;;  %v11229_v39 = vpop.permute.xlu0 %3778 }
 0x7e9   : > { %v3916_v34 = vsel %vm2327_vm5, %v3915_v29, %v3911_v57  ;;  %v3920_v51 = vrot.slane %v14443_v59, %v14442_v5  ;;  %v4087_v9 = vrot.slane %v14444_v0, %v9634_v52  ;;  %v3990_v8 = vsel %vm2320_vm4, %v3989_v58, %v3985_v61  ;;  %v14447_v7 = vld [vmem:[#allocation141_spill] sm:$0xff]  ;;  %v14452_v22 = vld [vmem:[#allocation138_spill] sm:$0xff] }
 0x7ea   : > { %vm14445_vm11 = vcmask 392512   ;;  %v3999_v38 = vrot.slane %v14446_v60, %v14442_v5  ;;  %v3995_v29 = vsel %vm2327_vm5, %v3994_v32, %v3990_v8  ;;  %v4043_v4 = vrot.slane %v14447_v7, %v9702_v20  ;;  %v14448_v61 = vld [vmem:[#allocation109_spill] sm:$0xff]  ;;  %v14454_v0 = vld [vmem:[#allocation102_spill] sm:$0xff]  ;;  %v14455_v7 = vld [vmem:[#allocation100_spill] sm:$0xff] }
 0x7eb   : > { %v11149_v12 = vpop.permute.xlu1 %3799  ;;  %v4029_v2 = vsel %vm14445_vm11, %v4028_v46, %v4024_v53  ;;  %v3921_v11 = vsel %vm2334_vm6, %v3920_v51, %v3916_v34  ;;  %v4038_v42 = vrot.slane %v14448_v61, %v9696_v40  ;;  %v14449_v53 = vld [vmem:[#allocation115_spill] sm:$0xff]  ;;  %v4088_v57 = vsel %vm2236_vm7, %v4087_v9, %v4083_v56  ;;  %v14450_v3 = vld [vmem:[#allocation77_spill] sm:$0xff] }
 0x7ec   : > { %v4034_v17 = vsel %vm2271_vm12, %v4033_v25, %v4029_v2  ;;  %v4048_v58 = vrot.slane %v14449_v53, %v9711_v36  ;;  %v4058_v32 = vrot.slane %v14450_v3, %v9740_v21  ;;  %v14451_v25 = vld [vmem:[#allocation28_spill] sm:$0xff]  ;;  %v4093_v23 = vsel %vm2243_vm8, %v4092_v13, %v4088_v57  ;;  %v14453_v34 = vld [vmem:[#allocation23_spill] sm:$0xff]  ;;  %v14456_v57 = vld [vmem:[#allocation34_spill] sm:$0xff] }
 0x7ed   : > { %v4068_v46 = vrot.slane %v14451_v25, %v14430_v28  ;;  %v4102_v59 = vrot.slane %v14452_v22, %v9664_v14  ;;  %v4097_v8 = vrot.slane %v14454_v0, %v9652_v31  ;;  %v4000_v2 = vsel %vm2334_vm6, %v3999_v38, %v3995_v29 }
 0x7ee   : > { %v4039_v56 = vsel %vm2278_vm13, %v4038_v42, %v4034_v17  ;;  %v4053_v13 = vrot.slane %v14455_v7, %v9730_v35  ;;  %v4162_v61 = vrot.slane %v11007_v44, %v9639_v47  ;;  %v4320_v53 = vrot.slane %v11112_v48, %v9639_v47  ;;  %v14458_v44 = vld [vmem:[#allocation73_spill] sm:$0xff] }
 0x7ef   : > { %v11174_v37 = vpop.permute.xlu1 %3802  ;;  %v4044_v60 = vsel %vm2285_vm14, %v4043_v4, %v4039_v56  ;;  %v4107_v3 = vrot.slane %v14456_v57, %v9670_v27  ;;  %v4098_v38 = vsel %vm2250_vm9, %v4097_v8, %v4093_v23  ;;  %v4171_v29 = vrot.slane %v11017_v24, %v9646_v50  ;;  %v14457_v4 = vld [vmem:[#allocation72_spill] sm:$0xff]  ;;  %v11273_v56 = vpop.permute.xlu0 %3781 }
 0x7f0   : > { %v4329_v17 = vrot.slane %v11133_v43, %v9646_v50  ;;  %v4166_v42 = vrot.slane %v14457_v4, %v9634_v52  ;;  %v4103_v22 = vsel %vm2257_vm10, %v4102_v59, %v4098_v38  ;;  %v4112_v0 = vrot.slane %v14458_v44, %v9691_v62  ;;  %v14460_v24 = vld [vmem:[#allocation108_spill] sm:$0xff]  ;;  %v14463_v4 = vld [vmem:[#allocation97_spill] sm:$0xff] }
 0x7f1   : > { %v4324_v48 = vrot.slane %v11037_v33, %v9634_v52  ;;  %v11276_v23 = vsel %vm14459_vm0, %v4000_v2, %v3921_v11  ;;  %v4117_v8 = vrot.slane %v14460_v24, %v9696_v40  ;;  %v14461_v43 = vld [vmem:[#allocation112_spill] sm:$0xff]  ;;  %v4049_v57 = vsel %vm2292_vm15, %v4048_v58, %v4044_v60 }
 0x7f2   : > { %v4127_v7 = vrot.slane %v14461_v43, %v9711_v36  ;;  %vm14462_vm1 = vcmask 720512   ;;  %v4176_v33 = vrot.slane %v14463_v4, %v9652_v31  ;;  %v4167_v44 = vsel %vm2236_vm7, %v4166_v42, %v4162_v61  ;;  %v14464_v61 = vld [vmem:[#allocation203_spill] sm:$0xff] }
 0x7f3   : > { %v11197_v19 = vpop.permute.xlu1 %3805  ;;  %v4054_v38 = vsel %vm14462_vm1, %v4053_v13, %v4049_v57  ;;  %v4325_v11 = vsel %vm2236_vm7, %v4324_v48, %v4320_v53  ;;  %v4108_v2 = vsel %vm14445_vm11, %v4107_v3, %v4103_v22  ;;  %v4172_v24 = vsel %vm2243_vm8, %v4171_v29, %v4167_v44  ;;  %v14465_v3 = vld [vmem:[#allocation129_spill] sm:$0xff]  ;;  %vm14477_vm1 = vmmov %vm14445_vm11 }
 0x7f4   : > { %v4181_v43 = vrot.slane %v11020_v16, %v9664_v14  ;;  %v4330_v58 = vsel %vm2243_vm8, %v4329_v17, %v4325_v11  ;;  %v4113_v60 = vsel %vm2271_vm12, %v4112_v0, %v4108_v2  ;;  %v4122_v13 = vrot.slane %v10953_v49, %v9702_v20  ;;  %v14466_v29 = vld [vmem:[#allocation29_spill] sm:$0xff]  ;;  %v14467_v16 = vld [vmem:[#allocation75_spill] sm:$0xff]  ;;  %v11316_v2 = vpop.permute.xlu0 %3784 }
 0x7f5   : > { %v4334_v57 = vrot.slane %v11059_v41, %v9652_v31  ;;  %v4241_v53 = vrot.slane %v14464_v61, %v9639_v47  ;;  %v4137_v42 = vrot.slane %v14465_v3, %v9740_v21  ;;  %v4063_v17 = vrot.slane %v14467_v16, %v9759_v6  ;;  %v14468_v0 = vld [vmem:[#allocation205_spill] sm:$0xff]  ;;  %v14470_v41 = vld [vmem:[#allocation86_spill] sm:$0xff] }
 0x7f6   : > { %v4250_v48 = vrot.slane %v14468_v0, %v9646_v50  ;;  %vm14469_vm0 = vcmask 786112   ;;  %v4245_v44 = vrot.slane %v14470_v41, %v9634_v52  ;;  %v4177_v11 = vsel %vm2250_vm9, %v4176_v33, %v4172_v24  ;;  %v14471_v22 = vld [vmem:[#allocation9_spill] sm:$0xff] }
 0x7f7   : > { %v11221_v1 = vpop.permute.xlu1 %3808  ;;  %v4059_v49 = vsel %vm14469_vm0, %v4058_v32, %v4054_v38  ;;  %v4335_v61 = vsel %vm2250_vm9, %v4334_v57, %v4330_v58  ;;  %v4118_v3 = vsel %vm2278_vm13, %v4117_v8, %v4113_v60  ;;  %v4182_v16 = vsel %vm2257_vm10, %v4181_v43, %v4177_v11  ;;  %v14472_v32 = vld [vmem:[#allocation76_spill] sm:$0xff]  ;;  %v14473_v33 = vld [vmem:[#allocation89_spill] sm:$0xff]  ;;  %v14474_v60 = vld [vmem:[#allocation206_spill] sm:$0xff] }
 0x7f8   : > { %v4191_v0 = vrot.slane %v14471_v22, %v9691_v62  ;;  %v4339_v51 = vrot.slane %v11070_v10, %v9664_v14  ;;  %v4186_v38 = vrot.slane %v14472_v32, %v9670_v27  ;;  %v4123_v41 = vsel %vm2285_vm14, %v4122_v13, %v4118_v3  ;;  %v14475_v11 = vld [vmem:[#allocation123_spill] sm:$0xff]  ;;  %v14476_v13 = vld [vmem:[#allocation98_spill] sm:$0xff]  ;;  %vm14482_vm0 = vmmov %vm14477_vm1 }
 0x7f9   : > { %v4132_v24 = vrot.slane %v14473_v33, %v9730_v35  ;;  %v4246_v58 = vsel %vm2236_vm7, %v4245_v44, %v4241_v53  ;;  %v4064_v8 = vsel %vm2313_vm3, %v4063_v17, %v4059_v49  ;;  %v4260_v57 = vrot.slane %v14474_v60, %v9664_v14  ;;  %v14478_v17 = vld [vmem:[#allocation121_spill] sm:$0xff]  ;;  %v14479_v44 = vld [vmem:[#allocation140_spill] sm:$0xff]  ;;  %v14481_v60 = vld [vmem:[#allocation91_spill] sm:$0xff] }
 0x7fa   : > { %v4251_v43 = vsel %vm2243_vm8, %v4250_v48, %v4246_v58  ;;  %v4340_v22 = vsel %vm2257_vm10, %v4339_v51, %v4335_v61  ;;  %v4073_v32 = vrot.slane %v14475_v11, %v14433_v30  ;;  %v4255_v3 = vrot.slane %v14476_v13, %v9652_v31 }
 0x7fb   : > { %v11250_v9 = vpop.permute.xlu1 %3811  ;;  %v4187_v33 = vsel %vm14477_vm1, %v4186_v38, %v4182_v16  ;;  %v4344_v53 = vrot.slane %v11081_v55, %v9670_v27  ;;  %v4196_v48 = vrot.slane %v14478_v17, %v9696_v40  ;;  %v4128_v49 = vsel %vm2292_vm15, %v4127_v7, %v4123_v41  ;;  %v11355_v38 = vpop.permute.xlu0 %3742 }
 0x7fc   : > { %v4192_v51 = vsel %vm2271_vm12, %v4191_v0, %v4187_v33  ;;  %v4201_v61 = vrot.slane %v14479_v44, %v9702_v20  ;;  %vm14480_vm11 = vcmask 720512   ;;  %v4142_v11 = vrot.slane %v14481_v60, %v9759_v6  ;;  %v14484_v33 = vld [vmem:[#allocation152_spill] sm:$0xff] }
 0x7fd   : > { %v4133_v58 = vsel %vm14480_vm11, %v4132_v24, %v4128_v49  ;;  %v4256_v16 = vsel %vm2250_vm9, %v4255_v3, %v4251_v43  ;;  %v4345_v55 = vsel %vm14482_vm0, %v4344_v53, %v4340_v22  ;;  %v4069_v7 = vsel %vm2320_vm4, %v4068_v46, %v4064_v8  ;;  %v14483_v3 = vld [vmem:[#allocation78_spill] sm:$0xff]  ;;  %vm14488_vm11 = vmmov %vm14482_vm0 }
 0x7fe   : > { %v4349_v0 = vrot.slane %v11099_v18, %v9691_v62  ;;  %v4261_v41 = vsel %vm2257_vm10, %v4260_v57, %v4256_v16  ;;  %v4270_v24 = vrot.slane %v11067_v63, %v9691_v62  ;;  %v4074_v43 = vsel %vm2327_vm5, %v4073_v32, %v4069_v7  ;;  %v14486_v57 = vld [vmem:[#allocation163_spill] sm:$0xff]  ;;  %v14487_v32 = vld [vmem:[#allocation92_spill] sm:$0xff] }
 0x7ff   : > { %v11283_v59 = vpop.permute.xlu1 %3814  ;;  %v4206_v22 = vrot.slane %v14483_v3, %v9711_v36  ;;  %v4265_v25 = vrot.slane %v14484_v33, %v9670_v27  ;;  %v4197_v46 = vsel %vm2278_vm13, %v4196_v48, %v4192_v51  ;;  %vm14485_vm1 = vcmask 786112   ;;  %v14489_v48 = vld [vmem:[#allocation68_spill] sm:$0xff]  ;;  %v11405_v33 = vpop.permute.xlu0 %3832 }
 0x800   : > { %v4138_v8 = vsel %vm14485_vm1, %v4137_v42, %v4133_v58  ;;  %v4202_v18 = vsel %vm2285_vm14, %v4201_v61, %v4197_v46  ;;  %v4211_v53 = vrot.slane %v14486_v57, %v9730_v35  ;;  %v4350_v63 = vsel %vm2271_vm12, %v4349_v0, %v4345_v55  ;;  %v14493_v0 = vld [vmem:[#allocation156_spill] sm:$0xff]  ;;  %v14496_v46 = vld [vmem:[#allocation201_spill] sm:$0xff] }
 0x801   : > { %v4143_v17 = vsel %vm2313_vm3, %v4142_v11, %v4138_v8  ;;  %v4152_v49 = vrot.slane %v14487_v32, %v14433_v30  ;;  %v4354_v44 = vrot.slane %v11127_v54, %v9696_v40  ;;  %v4266_v60 = vsel %vm14488_vm11, %v4265_v25, %v4261_v41  ;;  %v14491_v11 = vld [vmem:[#allocation207_spill] sm:$0xff] }
 0x802   : > { %v4157_v42 = vrot.slane %v14489_v48, %v14442_v5  ;;  %v14490_v51 = vrot.slane %v14453_v34, %v14442_v5  ;;  %v4271_v58 = vsel %vm2271_vm12, %v4270_v24, %v4266_v60  ;;  %v4280_v16 = vrot.slane %v14491_v11, %v9702_v20  ;;  %v14492_v54 = vld [vmem:[#allocation127_spill] sm:$0xff] }
 0x803   : > { %v11310_v4 = vpop.permute.xlu1 %3817  ;;  %v4216_v7 = vrot.slane %v14492_v54, %v9740_v21  ;;  %v4275_v41 = vrot.slane %v14493_v0, %v9696_v40  ;;  %v4207_v3 = vsel %vm2292_vm15, %v4206_v22, %v4202_v18  ;;  %v4355_v34 = vsel %vm2278_vm13, %v4354_v44, %v4350_v63  ;;  %v14497_v32 = vld [vmem:[#allocation83_spill] sm:$0xff]  ;;  %v14500_v54 = vld [vmem:[#allocation82_spill] sm:$0xff] }
 0x804   : > { %v11392_v61 = vsel %vm2334_vm6, %v14490_v51, %v4074_v43  ;;  %v14494_v24 = vrot.slane %v14466_v29, %v14430_v28  ;;  %vm14495_vm0 = vcmask 720512   ;;  %v4221_v8 = vrot.slane %v14496_v46, %v9759_v6  ;;  %v14498_v63 = vld [vmem:[#allocation159_spill] sm:$0xff] }
 0x805   : > { %v4212_v25 = vsel %vm14495_vm0, %v4211_v53, %v4207_v3  ;;  %v4359_v57 = vrot.slane %v11158_v45, %v9702_v20  ;;  %v4226_v22 = vrot.slane %v14497_v32, %v14430_v28  ;;  %v4285_v44 = vrot.slane %v14498_v63, %v9711_v36  ;;  %v14499_v53 = vld [vmem:[#allocation208_spill] sm:$0xff]  ;;  %vm14503_vm11 = vmmov %vm14495_vm0 }
 0x806   : > { %v4148_v43 = vsel %vm2320_vm4, %v14494_v24, %v4143_v17  ;;  %v4276_v29 = vsel %vm2278_vm13, %v4275_v41, %v4271_v58  ;;  %v4290_v60 = vrot.slane %v14499_v53, %v9730_v35  ;;  %v4403_v51 = vrot.slane %v11149_v12, %v9634_v52  ;;  %v14502_v12 = vld [vmem:[#allocation202_spill] sm:$0xff] }
 0x807   : > { %v11336_v10 = vpop.permute.xlu1 %3820  ;;  %v4153_v18 = vsel %vm2327_vm5, %v4152_v49, %v4148_v43  ;;  %v4281_v17 = vsel %vm2285_vm14, %v4280_v16, %v4276_v29  ;;  %v4360_v45 = vsel %vm2285_vm14, %v4359_v57, %v4355_v34  ;;  %v4295_v0 = vrot.slane %v14500_v54, %v9740_v21  ;;  %v14501_v16 = vld [vmem:[#allocation204_spill] sm:$0xff] }
 0x808   : > { %v4217_v49 = vsel %vm14485_vm1, %v4216_v7, %v4212_v25  ;;  %v4364_v3 = vrot.slane %v11192_v26, %v9711_v36  ;;  %v4408_v58 = vrot.slane %v11174_v37, %v9646_v50  ;;  %v4399_v41 = vrot.slane %v14501_v16, %v9639_v47  ;;  %v3791_v26 = vpop.permute.xlu0 %3790 }
 0x809   : > { %v4222_v24 = vsel %vm2313_vm3, %v4221_v8, %v4217_v49  ;;  %v4231_v43 = vrot.slane %v14502_v12, %v14433_v30  ;;  %v4413_v34 = vrot.slane %v11197_v19, %v9652_v31  ;;  %v4369_v7 = vrot.slane %v11229_v39, %v9730_v35  ;;  %v14504_v39 = vld [vmem:[#allocation164_spill] sm:$0xff] }
 0x80a   : > { %v4286_v25 = vsel %vm2292_vm15, %v4285_v44, %v4281_v17  ;;  %v4418_v37 = vrot.slane %v11221_v1, %v9664_v14  ;;  %v4365_v46 = vsel %vm2292_vm15, %v4364_v3, %v4360_v45  ;;  %v4300_v8 = vrot.slane %v11093_v15, %v9759_v6 }
 0x80b   : > { %v11367_v13 = vpop.permute.xlu1 %3823  ;;  %v4291_v57 = vsel %vm14503_vm11, %v4290_v60, %v4286_v25  ;;  %v4404_v32 = vsel %vm2236_vm7, %v4403_v51, %v4399_v41  ;;  %v4423_v19 = vrot.slane %v11250_v9, %v9670_v27  ;;  %v4305_v44 = vrot.slane %v14504_v39, %v14430_v28  ;;  %v7434_v27 = vld [vmem:[%s13404_s2 + $0x8] sm:$0xff] }
 0x80c   : > { %v4227_v29 = vsel %vm2320_vm4, %v4226_v22, %v4222_v24  ;;  %v4409_v1 = vsel %vm2243_vm8, %v4408_v58, %v4404_v32  ;;  %v4428_v17 = vrot.slane %v11283_v59, %v9691_v62  ;;  %v4433_v60 = vrot.slane %v11310_v4, %v9696_v40  ;;  %v3794_v16 = vpop.permute.xlu0 %3793  ;;  %v14649_v40 = vld [vmem:[#allocation180_spill] sm:$0xff]  ;;  %v14651_v62 = vld [vmem:[#allocation122_spill] sm:$0xff] }
 0x80d   : > { %v4232_v53 = vsel %vm2327_vm5, %v4231_v43, %v4227_v29  ;;  %v4414_v15 = vsel %vm2250_vm9, %v4413_v34, %v4409_v1  ;;  %v4370_v9 = vsel %vm14495_vm0, %v4369_v7, %v4365_v46  ;;  %v4374_v51 = vrot.slane %v11273_v56, %v9740_v21  ;;  %vm14506_vm0 = vmmov %vm14485_vm1  ;;  %v14508_v34 = vld [vmem:[#allocation69_spill] sm:$0xff] }
 0x80e   : > { %v4296_v45 = vsel %vm14485_vm1, %v4295_v0, %v4291_v57  ;;  %v4419_v22 = vsel %vm2257_vm10, %v4418_v37, %v4414_v15  ;;  %v4438_v54 = vrot.slane %v11336_v10, %v9702_v20  ;;  %v4310_v49 = vrot.slane %v11355_v38, %v14433_v30  ;;  %v14647_v20 = vld [vmem:[#allocation187_spill] sm:$0xff] }
 0x80f   : > { %v11397_v55 = vpop.permute.xlu1 %3826  ;;  %v4301_v59 = vsel %vm2313_vm3, %v4300_v8, %v4296_v45  ;;  %vm14505_vm11 = vcmask 392512   ;;  %v4443_v4 = vrot.slane %v11367_v13, %v9711_v36  ;;  %v4375_v41 = vsel %vm14506_vm0, %v4374_v51, %v4370_v9  ;;  %v14645_v36 = vld [vmem:[#allocation71_spill] sm:$0xff] }
 0x810   : > { %v4424_v3 = vsel %vm14505_vm11, %v4423_v19, %v4419_v22  ;;  %v4448_v0 = vrot.slane %v11397_v55, %v9730_v35  ;;  %v4379_v24 = vrot.slane %v11316_v2, %v9759_v6  ;;  %vm14507_vm1 = vcmask 1042434  }
 0x811   : > { %v4429_v56 = vsel %vm2271_vm12, %v4428_v17, %v4424_v3  ;;  %v4476_v43 = vsel %vm14507_vm1, %v11392_v61, %v11276_v23  ;;  %v4236_v55 = vrot.slane %v14508_v34, %v14442_v5  ;;  %v4158_v2 = vsel %vm2334_vm6, %v4157_v42, %v4153_v18 }
 0x812   : > { %v4434_v38 = vsel %vm2278_vm13, %v4433_v60, %v4429_v56  ;;  %v4306_v25 = vsel %vm2320_vm4, %v4305_v44, %v4301_v59  ;;  %v4380_v37 = vsel %vm2313_vm3, %v4379_v24, %v4375_v41  ;;  %vm14509_vm11 = vcmask 720512  }
 0x813   : > { %v3830_v11 = vpop.permute.xlu1 %3829  ;;  %v4439_v7 = vsel %vm2285_vm14, %v4438_v54, %v4434_v38  ;;  %v4237_v57 = vsel %vm2334_vm6, %v4236_v55, %v4232_v53  ;;  %v4311_v23 = vsel %vm2327_vm5, %v4310_v49, %v4306_v25  ;;  %v4389_v32 = vrot.slane %v3791_v26, %v14433_v30  ;;  %v14523_v38 = vld [vmem:[#allocation8_spill] sm:$0xff] }
 0x814   : > { %v4453_v12 = vrot.slane %v3830_v11, %v9740_v21  ;;  %v4444_v11 = vsel %vm2292_vm15, %v4443_v4, %v4439_v7  ;;  %v4458_v19 = vrot.slane %v11405_v33, %v9759_v6  ;;  %vm14510_vm1 = vcmask 1043459   ;;  %v14638_v6 = vld [vmem:[#allocation49_spill] sm:$0xff]  ;;  %v14641_v21 = vld [vmem:[#allocation160_spill] sm:$0xff] }
 0x815   : > { %v4449_v61 = vsel %vm14509_vm11, %v4448_v0, %v4444_v11  ;;  %v4477_v39 = vsel %vm14510_vm1, %v4158_v2, %v4476_v43  ;;  %vm14511_vm11 = vcmask 1044484   ;;  %v4394_v17 = vrot.slane %v3794_v16, %v14442_v5 }
 0x816   : > { %v4454_v48 = vsel %vm14506_vm0, %v4453_v12, %v4449_v61  ;;  %v4478_v1 = vsel %vm14511_vm11, %v4237_v57, %v4477_v39  ;;  %vm14512_vm0 = vcmask 1046534   ;;  %vm14513_vm1 = vcmask 1047559   ;;  %v14533_v39 = vld [vmem:[#allocation150_spill] sm:$0xff] }
 0x817   : > { %v3788_v63 = vpop.permute.xlu1 %3787  ;;  %v4459_v26 = vsel %vm2313_vm3, %v4458_v19, %v4454_v48  ;;  %v14524_v12 = vsub.s32 1, %v14523_v38  ;;  %v14525_v43 = vsub.s32 2, %v14523_v38  ;;  %v14526_v55 = vsub.s32 3, %v14523_v38 }
 0x818   : > { %v4384_v10 = vrot.slane %v3788_v63, %v14430_v28  ;;  %v3842_v63 = vpop.permute.xlu0 %3841  ;;  %v14527_v11 = vsub.s32 4, %v14523_v38  ;;  %v14532_v19 = vsub.s32 5, %v14523_v38  ;;  %vm14673_vm11 = vcmask 261120  }
 0x819   : > { %v4473_v60 = vrot.slane %v3842_v63, %v14442_v5 }
 0x81a   : > { %v4385_v8 = vsel %vm2320_vm4, %v4384_v10, %v4380_v37  ;;  %v14522_v10 = vld [vmem:[#allocation10_spill] sm:$0xff] }
 0x81b   : > { %v3746_v58 = vpop.permute.xlu1 %3745  ;;  %v4390_v29 = vsel %vm2327_vm5, %v4389_v32, %v4385_v8  ;;  %v14530_v32 = vld [vmem:[#allocation170_spill] sm:$0xff] }
 0x81c   : > { %v4315_v13 = vrot.slane %v3746_v58, %v14442_v5  ;;  %v4395_v9 = vsel %vm2334_vm6, %v4394_v17, %v4390_v29  ;;  %v14534_v29 = vld [vmem:[#allocation114_spill] sm:$0xff]  ;;  %v14635_v5 = vld [vmem:[#allocation177_spill] sm:$0xff] }
 0x81e   : > { %v4316_v42 = vsel %vm2334_vm6, %v4315_v13, %v4311_v23  ;;  %v14529_v23 = vld [vmem:[#allocation131_spill] sm:$0xff] }
 0x81f   : > { %v3836_v46 = vpop.permute.xlu1 %3835  ;;  %v4479_v15 = vsel %vm2897_vm2, %v4316_v42, %v4478_v1  ;;  %v11524_v59 = vpop.xlane.xlu0 %5922  ;;  %v14531_v42 = vld [vmem:[#allocation161_spill] sm:$0xff] }
 0x820   : > { %v4463_v18 = vrot.slane %v3836_v46, %v14430_v28  ;;  %v4480_v22 = vsel %vm14512_vm0, %v4395_v9, %v4479_v15  ;;  %14514 = vst [vmem:[#allocation61_spill] sm:$0xff] %v11524_v59  ;;  %v14528_v46 = vld [vmem:[#allocation143_spill] sm:$0xff]  ;;  %v14536_v15 = vld [vmem:[#allocation60_spill] sm:$0xff]  ;;  %v14637_v28 = vld [vmem:[#allocation18_spill] sm:$0xff] }
 0x821   : > { %v14631_v59 = vld [vmem:[#allocation56_spill] sm:$0xff]  ;;  %vm14674_vm0 = vmmov %vm14673_vm11 }
 0x822   : > { %v4464_v33 = vsel %vm2320_vm4, %v4463_v18, %v4459_v26  ;;  %v14535_v26 = vld [vmem:[#allocation176_spill] sm:$0xff] }
 0x823   : > { %v3839_v44 = vpop.permute.xlu1 %3838  ;;  %v11526_v49 = vpop.xlane.xlu0 %5928 }
 0x824   : > { %v4468_v53 = vrot.slane %v3839_v44, %v14433_v30  ;;  %14515 = vst [vmem:[#allocation107_spill] sm:$0xff] %v11526_v49  ;;  %v14636_v30 = vld [vmem:[#allocation168_spill] sm:$0xff] }
 0x826   : > { %v4469_v51 = vsel %vm2327_vm5, %v4468_v53, %v4464_v33  ;;  %v14537_v33 = vsub.s32 6, %v14523_v38 }
 0x827   : > { %v4474_v45 = vsel %vm2334_vm6, %v4473_v60, %v4469_v51  ;;  %v11528_v3 = vpop.xlane.xlu0 %5931  ;;  %v14538_v51 = vld [vmem:[#allocation183_spill] sm:$0xff] }
 0x828   : > { %v4481_v54 = vsel %vm14513_vm1, %v4474_v45, %v4480_v22  ;;  %14516 = vst [vmem:[#allocation111_spill] sm:$0xff] %v11528_v3  ;;  %v14539_v22 = vld [vmem:[#allocation190_spill] sm:$0xff]  ;;  %vm14683_vm1 = vmmov %vm14674_vm0 }
 0x829   : > { %4483 = vadd.xlane.f32.xlu0 %v4481_v54 }
 0x82b   : > { %v11530_v4 = vpop.xlane.xlu0 %5934 }
 0x82c   : > { %14517 = vst [vmem:[#allocation110_spill] sm:$0xff] %v11530_v4  ;;  %v14626_v4 = vld [vmem:[#allocation65_spill] sm:$0xff] }
 0x82f   : > { %v11532_v58 = vpop.xlane.xlu0 %5946 }
 0x830   : > { %14518 = vst [vmem:[#allocation87_spill] sm:$0xff] %v11532_v58 }
 0x833   : > { %v11534_v16 = vpop.xlane.xlu0 %5940 }
 0x834   : > { %14519 = vst [vmem:[#allocation53_spill] sm:$0xff] %v11534_v16 }
 0x837   : > { %v11536_v56 = vpop.xlane.xlu0 %5952 }
 0x838   : > { %14520 = vst [vmem:[#allocation105_spill] sm:$0xff] %v11536_v56 }
 0x83b   : > { %v11538_v0 = vpop.xlane.xlu0 %5958 }
 0x83c   : > { %14521 = vst [vmem:[#allocation81_spill] sm:$0xff] %v11538_v0 }
 0x8b2   : > { %v4484_v41 = vpop.xlane.xlu0 %4483 }
 0x8b3   : > { %v4489_v24 = vrot.slane %v4484_v41, %v14522_v10  ;;  %v4493_v13 = vrot.slane %v4484_v41, %v14524_v12  ;;  %v4497_v34 = vrot.slane %v4484_v41, %v14525_v43  ;;  %v4501_v7 = vrot.slane %v4484_v41, %v14526_v55  ;;  %v14540_v12 = vld [vmem:[#allocation185_spill] sm:$0xff]  ;;  %v14542_v55 = vld [vmem:[#allocation51_spill] sm:$0xff]  ;;  %v14643_v10 = vld [vmem:[#allocation104_spill] sm:$0xff] }
 0x8b4   : > { %v4505_v37 = vrot.slane %v4484_v41, %v14527_v11  ;;  %v4509_v63 = vrot.slane %v4484_v41, %v14532_v19  ;;  %v4513_v9 = vrot.slane %v4484_v41, %v14537_v33  ;;  %v14541_v43 = vld [vmem:[#allocation37_spill] sm:$0xff]  ;;  %v14543_v11 = vld [vmem:[#allocation132_spill] sm:$0xff] }
 0x8b5   : > { %7410 = vrcp.f32 %v4489_v24  ;;  %v14555_v33 = vld [vmem:[#allocation24_spill] sm:$0xff] }
 0x8b6   : > { %7412 = vrcp.f32 %v4493_v13 }
 0x8b7   : > { %7414 = vrcp.f32 %v4497_v34 }
 0x8b8   : > { %7416 = vrcp.f32 %v4501_v7 }
 0x8b9   : > { %7418 = vrcp.f32 %v4505_v37 }
 0x8ba   : > { %7420 = vrcp.f32 %v4509_v63  ;;  %v14549_v63 = vld [vmem:[#allocation178_spill] sm:$0xff] }
 0x8bb   : > { %7422 = vrcp.f32 %v4513_v9 }
 0x8c2   : > { %v11547_v2 = vpop.eup %7410 }
 0x8c3   : > { %v11549_v25 = vpop.eup %7412  ;;  %v4528_v57 = vmul.f32 %v11547_v2, %v14528_v46  ;;  %v4527_v61 = vmul.f32 %v11547_v2, %v14529_v23  ;;  %v4529_v1 = vmul.f32 %v11547_v2, %v14534_v29  ;;  %v14552_v29 = vld [vmem:[#allocation126_spill] sm:$0xff] }
 0x8c4   : > { %v11557_v8 = vpop.eup %7414  ;;  %v4544_v48 = vmul.f32 %v11549_v25, %v14530_v32  ;;  %v4545_v44 = vmul.f32 %v11549_v25, %v14533_v39  ;;  %v4546_v45 = vmul.f32 %v11549_v25, %v14538_v51  ;;  %v4547_v37 = vmul.f32 %v11549_v25, %v14543_v11  ;;  %v14556_v51 = vld [vmem:[#allocation173_spill] sm:$0xff] }
 0x8c5   : > { %4669 = vperm.xlu1 %7122, %v4528_v57   ;;  %4664 = vperm.xlu0 %7123, %v4527_v61   ;;  %v4561_v18 = vmul.f32 %v11557_v8, %v14531_v42  ;;  %v11569_v17 = vpop.eup %7416  ;;  %v4562_v53 = vmul.f32 %v11557_v8, %v14535_v26  ;;  %v4563_v54 = vmul.f32 %v11557_v8, %v14539_v22  ;;  %v14545_v57 = vsub.s32 7, %v14523_v38  ;;  %v14546_v61 = vld [vmem:[#allocation135_spill] sm:$0xff]  ;;  %v14553_v26 = vld [vmem:[#allocation20_spill] sm:$0xff] }
 0x8c6   : > { %v4578_v60 = vmul.f32 %v11569_v17, %v14536_v15  ;;  %v11581_v24 = vpop.eup %7418  ;;  %v4579_v13 = vmul.f32 %v11569_v17, %v14540_v12  ;;  %v4530_v32 = vmul.f32 %v11547_v2, %v14546_v61  ;;  %v4564_v39 = vmul.f32 %v11557_v8, %v14549_v63  ;;  %v14554_v15 = vld [vmem:[#allocation145_spill] sm:$0xff] }
 0x8c7   : > { %v4596_v34 = vmul.f32 %v11581_v24, %v14541_v43  ;;  %v4595_v7 = vmul.f32 %v11581_v24, %v14542_v55  ;;  %v11591_v46 = vpop.eup %7420  ;;  %v4517_v23 = vrot.slane %v4484_v41, %v14545_v57  ;;  %v14551_v41 = vld [vmem:[#allocation70_spill] sm:$0xff] }
 0x8c8   : > { %14544 = vst [vmem:[#allocation130_spill] sm:$0xff] %v11591_v46  ;;  %v4613_v38 = vmul.f32 %v11591_v46, %v14551_v41 }
 0x8c9   : > { %4744 = vperm.xlu1 %7122, %v4544_v48   ;;  %4824 = vperm.xlu0 %7123, %v4561_v18   ;;  %v14547_v48 = vld [vmem:[#allocation26_spill] sm:$0xff]  ;;  %7424 = vrcp.f32 %v4517_v23  ;;  %v14563_v23 = vld [vmem:[#allocation27_spill] sm:$0xff] }
 0x8ca   : > { %v4612_v42 = vmul.f32 %v11591_v46, %v14547_v48  ;;  %v14548_v18 = vld [vmem:[#allocation62_spill] sm:$0xff] }
 0x8cb   : > { %v4580_v19 = vmul.f32 %v11569_v17, %v14548_v18 }
 0x8cd   : > { %4749 = vperm.xlu1 %7122, %v4545_v44   ;;  %4674 = vperm.xlu0 %7123, %v4529_v1   ;;  %v11603_v44 = vpop.eup %7422 }
 0x8ce   : > { %14550 = vst [vmem:[#allocation64_spill] sm:$0xff] %v11603_v44  ;;  %v4629_v1 = vmul.f32 %v11603_v44, %v14552_v29  ;;  %v4630_v9 = vmul.f32 %v11603_v44, %v14555_v33  ;;  %v4631_v61 = vmul.f32 %v11603_v44, %v14563_v23 }
 0x8d1   : > { %4829 = vperm.xlu1 %7122, %v4562_v53   ;;  %4904 = vperm.xlu0 %7123, %v4578_v60   ;;  %v4597_v53 = vmul.f32 %v11581_v24, %v14553_v26  ;;  %v4531_v60 = vmul.f32 %v11547_v2, %v14554_v15 }
 0x8d5   : > { %4754 = vperm.xlu1 %7122, %v4546_v45   ;;  %4834 = vperm.xlu0 %7123, %v4563_v54   ;;  %v4581_v45 = vmul.f32 %v11569_v17, %v14556_v51  ;;  %v14558_v54 = vld [vmem:[#allocation158_spill] sm:$0xff] }
 0x8d6   : > { %v11617_v22 = vpop.eup %7424  ;;  %v4548_v12 = vmul.f32 %v11549_v25, %v14558_v54 }
 0x8d7   : > { %14557 = vst [vmem:[#allocation94_spill] sm:$0xff] %v11617_v22 }
 0x8d9   : > { %4909 = vperm.xlu1 %7122, %v4579_v13   ;;  %4989 = vperm.xlu0 %7123, %v4596_v34   ;;  %v14559_v13 = vld [vmem:[#allocation35_spill] sm:$0xff]  ;;  %v14560_v34 = vld [vmem:[#allocation21_spill] sm:$0xff] }
 0x8da   : > { %v4646_v43 = vmul.f32 %v11617_v22, %v14559_v13  ;;  %v4614_v55 = vmul.f32 %v11591_v46, %v14560_v34 }
 0x8dd   : > { %4984 = vperm.xlu1 %7122, %v4595_v7   ;;  %4759 = vperm.xlu0 %7123, %v4547_v37   ;;  %v14561_v7 = vld [vmem:[#allocation165_spill] sm:$0xff] }
 0x8de   : > { %v4565_v11 = vmul.f32 %v11557_v8, %v14561_v7  ;;  %v14562_v37 = vld [vmem:[#allocation137_spill] sm:$0xff] }
 0x8df   : > { %v4647_v57 = vmul.f32 %v11617_v22, %v14562_v37 }
 0x8e1   : > { %4679 = vperm.xlu1 %7122, %v4530_v32   ;;  %5064 = vperm.xlu0 %7123, %v4612_v42   ;;  %v14564_v32 = vld [vmem:[#allocation39_spill] sm:$0xff]  ;;  %v14565_v42 = vld [vmem:[#allocation144_spill] sm:$0xff] }
 0x8e2   : > { %v4598_v48 = vmul.f32 %v11581_v24, %v14564_v32  ;;  %v4549_v18 = vmul.f32 %v11549_v25, %v14565_v42  ;;  %v14581_v42 = vld [vmem:[#allocation38_spill] sm:$0xff] }
 0x8e5   : > { %4914 = vperm.xlu1 %7122, %v4580_v19   ;;  %4839 = vperm.xlu0 %7123, %v4564_v39   ;;  %v14566_v19 = vld [vmem:[#allocation136_spill] sm:$0xff] }
 0x8e6   : > { %v4532_v63 = vmul.f32 %v11547_v2, %v14566_v19  ;;  %v14567_v39 = vld [vmem:[#allocation12_spill] sm:$0xff]  ;;  %v14582_v19 = vld [vmem:[#allocation117_spill] sm:$0xff] }
 0x8e7   : > { %v4615_v41 = vmul.f32 %v11591_v46, %v14567_v39  ;;  %v14583_v39 = vld [vmem:[#allocation148_spill] sm:$0xff] }
 0x8e9   : > { %5069 = vperm.xlu1 %7122, %v4613_v38   ;;  %5144 = vperm.xlu0 %7123, %v4629_v1   ;;  %v14568_v38 = vld [vmem:[#allocation44_spill] sm:$0xff]  ;;  %v14569_v1 = vld [vmem:[#allocation179_spill] sm:$0xff] }
 0x8ea   : > { %v4582_v29 = vmul.f32 %v11569_v17, %v14568_v38  ;;  %v4566_v26 = vmul.f32 %v11557_v8, %v14569_v1  ;;  %v14584_v38 = vld [vmem:[#allocation13_spill] sm:$0xff] }
 0x8ed   : > { %4994 = vperm.xlu1 %7122, %v4597_v53   ;;  %4684 = vperm.xlu0 %7123, %v4531_v60   ;;  %v14570_v53 = vld [vmem:[#allocation33_spill] sm:$0xff]  ;;  %v14571_v60 = vld [vmem:[#allocation63_spill] sm:$0xff] }
 0x8ee   : > { %v4648_v15 = vmul.f32 %v11617_v22, %v14570_v53  ;;  %v4632_v33 = vmul.f32 %v11603_v44, %v14571_v60 }
 0x8f1   : > { %5149 = vperm.xlu1 %7122, %v4630_v9   ;;  %4919 = vperm.xlu0 %7123, %v4581_v45   ;;  %v14572_v9 = vld [vmem:[#allocation57_spill] sm:$0xff]  ;;  %v14573_v45 = vld [vmem:[#allocation184_spill] sm:$0xff] }
 0x8f2   : > { %v4599_v51 = vmul.f32 %v11581_v24, %v14572_v9  ;;  %v4550_v54 = vmul.f32 %v11549_v25, %v14573_v45  ;;  %v14589_v9 = vld [vmem:[#allocation74_spill] sm:$0xff] }
 0x8f3   : > { %v14590_v45 = vld [vmem:[#allocation14_spill] sm:$0xff] }
 0x8f5   : > { %4764 = vperm.xlu1 %7122, %v4548_v12   ;;  %5224 = vperm.xlu0 %7123, %v4646_v43   ;;  %v14574_v12 = vld [vmem:[#allocation146_spill] sm:$0xff]  ;;  %v14575_v43 = vld [vmem:[#allocation32_spill] sm:$0xff] }
 0x8f6   : > { %v4533_v13 = vmul.f32 %v11547_v2, %v14574_v12  ;;  %v4616_v34 = vmul.f32 %v11591_v46, %v14575_v43  ;;  %v14591_v12 = vld [vmem:[#allocation59_spill] sm:$0xff]  ;;  %v14592_v43 = vld [vmem:[#allocation172_spill] sm:$0xff] }
 0x8f9   : > { %5074 = vperm.xlu1 %7122, %v4614_v55   ;;  %4844 = vperm.xlu0 %7123, %v4565_v11   ;;  %v14576_v55 = vld [vmem:[#allocation101_spill] sm:$0xff] }
 0x8fa   : > { %v4583_v7 = vmul.f32 %v11569_v17, %v14576_v55  ;;  %v14577_v11 = vld [vmem:[#allocation45_spill] sm:$0xff] }
 0x8fb   : > { %v4567_v37 = vmul.f32 %v11557_v8, %v14577_v11 }
 0x8fd   : > { %5229 = vperm.xlu1 %7122, %v4647_v57   ;;  %5154 = vperm.xlu0 %7123, %v4631_v61   ;;  %v14578_v57 = vld [vmem:[#allocation95_spill] sm:$0xff] }
 0x8fe   : > { %v4649_v23 = vmul.f32 %v11617_v22, %v14578_v57  ;;  %v14579_v61 = vld [vmem:[#allocation67_spill] sm:$0xff] }
 0x8ff   : > { %v4633_v32 = vmul.f32 %v11603_v44, %v14579_v61  ;;  %v14597_v61 = vld [vmem:[#allocation175_spill] sm:$0xff] }
 0x901   : > { %4999 = vperm.xlu1 %7122, %v4598_v48   ;;  %4769 = vperm.xlu0 %7123, %v4549_v18   ;;  %v11663_v48 = vpop.xlane.xlu1 %5925  ;;  %v4600_v18 = vmul.f32 %v11581_v24, %v14581_v42  ;;  %v14598_v42 = vld [vmem:[#allocation52_spill] sm:$0xff] }
 0x902   : > { %14580 = vst [vmem:[#allocation22_spill] sm:$0xff] %v11663_v48  ;;  %v14633_v48 = vld [vmem:[#allocation96_spill] sm:$0xff] }
 0x905   : > { %4689 = vperm.xlu1 %7122, %v4532_v63   ;;  %5079 = vperm.xlu0 %7123, %v4615_v41   ;;  %v4551_v63 = vmul.f32 %v11549_v25, %v14582_v19  ;;  %v4534_v41 = vmul.f32 %v11547_v2, %v14583_v39  ;;  %v11673_v1 = vpop.xlane.xlu1 %5937  ;;  %v14599_v19 = vld [vmem:[#allocation119_spill] sm:$0xff]  ;;  %v14600_v39 = vld [vmem:[#allocation118_spill] sm:$0xff] }
 0x906   : > { %14585 = vst [vmem:[#allocation141_spill] sm:$0xff] %v11673_v1  ;;  %v11817_v1 = vmul.f32 %v11557_v8, %v14631_v59  ;;  %v11837_v59 = vmul.f32 %v11547_v2, %v14636_v30  ;;  %v11857_v30 = vmul.f32 %v11603_v44, %v14643_v10  ;;  %v11877_v10 = vmul.f32 %v11591_v46, %v14651_v62 }
 0x908   : > { %14644 = vst [vmem:[#allocation102_spill] sm:$0xff] %v11857_v30  ;;  %14652 = vst [vmem:[#allocation73_spill] sm:$0xff] %v11877_v10  ;;  %v14656_v10 = vld [vmem:[#allocation85_spill] sm:$0xff] }
 0x909   : > { %4924 = vperm.xlu1 %7122, %v4582_v29   ;;  %4849 = vperm.xlu0 %7123, %v4566_v26   ;;  %v4617_v29 = vmul.f32 %v11591_v46, %v14584_v38  ;;  %v14586_v26 = vld [vmem:[#allocation46_spill] sm:$0xff] }
 0x90a   : > { %v4584_v53 = vmul.f32 %v11569_v17, %v14586_v26 }
 0x90d   : > { %5234 = vperm.xlu1 %7122, %v4648_v15   ;;  %5159 = vperm.xlu0 %7123, %v4632_v33   ;;  %v14587_v15 = vld [vmem:[#allocation169_spill] sm:$0xff]  ;;  %v11679_v33 = vpop.xlane.xlu1 %5949 }
 0x90e   : > { %v4568_v60 = vmul.f32 %v11557_v8, %v14587_v15  ;;  %14588 = vst [vmem:[#allocation109_spill] sm:$0xff] %v11679_v33  ;;  %v14623_v33 = vld [vmem:[#allocation182_spill] sm:$0xff] }
 0x911   : > { %5004 = vperm.xlu1 %7122, %v4599_v51   ;;  %4774 = vperm.xlu0 %7123, %v4550_v54   ;;  %v4650_v51 = vmul.f32 %v11617_v22, %v14589_v9  ;;  %v4634_v54 = vmul.f32 %v11603_v44, %v14590_v45  ;;  %v11689_v55 = vpop.xlane.xlu1 %5943 }
 0x912   : > { %14593 = vst [vmem:[#allocation115_spill] sm:$0xff] %v11689_v55 }
 0x915   : > { %4694 = vperm.xlu1 %7122, %v4533_v13   ;;  %5084 = vperm.xlu0 %7123, %v4616_v34   ;;  %v4601_v13 = vmul.f32 %v11581_v24, %v14591_v12  ;;  %v4552_v34 = vmul.f32 %v11549_v25, %v14592_v43 }
 0x919   : > { %4929 = vperm.xlu1 %7122, %v4583_v7   ;;  %4854 = vperm.xlu0 %7123, %v4567_v37   ;;  %v14594_v7 = vld [vmem:[#allocation128_spill] sm:$0xff] }
 0x91a   : > { %v4535_v11 = vmul.f32 %v11547_v2, %v14594_v7  ;;  %v14595_v37 = vld [vmem:[#allocation36_spill] sm:$0xff] }
 0x91b   : > { %v4618_v57 = vmul.f32 %v11591_v46, %v14595_v37 }
 0x91d   : > { %5239 = vperm.xlu1 %7122, %v4649_v23   ;;  %5164 = vperm.xlu0 %7123, %v4633_v32   ;;  %v11695_v23 = vpop.xlane.xlu1 %5955  ;;  %v4585_v32 = vmul.f32 %v11569_v17, %v14597_v61 }
 0x91e   : > { %14596 = vst [vmem:[#allocation77_spill] sm:$0xff] %v11695_v23  ;;  %v14625_v23 = vld [vmem:[#allocation25_spill] sm:$0xff] }
 0x921   : > { %5009 = vperm.xlu1 %7122, %v4600_v18   ;;  %4779 = vperm.xlu0 %7123, %v4551_v63   ;;  %v4569_v18 = vmul.f32 %v11557_v8, %v14598_v42  ;;  %v4651_v63 = vmul.f32 %v11617_v22, %v14599_v19  ;;  %v11705_v38 = vpop.xlane.xlu1 %5961 }
 0x922   : > { %14601 = vst [vmem:[#allocation28_spill] sm:$0xff] %v11705_v38 }
 0x925   : > { %4699 = vperm.xlu1 %7122, %v4534_v41   ;;  %5089 = vperm.xlu0 %7123, %v4617_v29   ;;  %v4635_v41 = vmul.f32 %v11603_v44, %v14600_v39  ;;  %v14602_v29 = vld [vmem:[#allocation40_spill] sm:$0xff] }
 0x926   : > { %v4602_v26 = vmul.f32 %v11581_v24, %v14602_v29 }
 0x929   : > { %4934 = vperm.xlu1 %7122, %v4584_v53   ;;  %4859 = vperm.xlu0 %7123, %v4568_v60   ;;  %v14603_v60 = vld [vmem:[#allocation139_spill] sm:$0xff] }
 0x92a   : > { %v4553_v9 = vmul.f32 %v11549_v25, %v14603_v60 }
 0x92d   : > { %5244 = vperm.xlu1 %7122, %v4650_v51   ;;  %5169 = vperm.xlu0 %7123, %v4634_v54   ;;  %v14604_v51 = vld [vmem:[#allocation153_spill] sm:$0xff] }
 0x92e   : > { %v4536_v45 = vmul.f32 %v11547_v2, %v14604_v51 }
 0x931   : > { %5014 = vperm.xlu1 %7122, %v4601_v13   ;;  %4784 = vperm.xlu0 %7123, %v4552_v34   ;;  %v14605_v13 = vld [vmem:[#allocation15_spill] sm:$0xff] }
 0x932   : > { %v4619_v43 = vmul.f32 %v11591_v46, %v14605_v13  ;;  %v14606_v34 = vld [vmem:[#allocation47_spill] sm:$0xff] }
 0x933   : > { %v4586_v7 = vmul.f32 %v11569_v17, %v14606_v34 }
 0x935   : > { %4704 = vperm.xlu1 %7122, %v4535_v11   ;;  %5094 = vperm.xlu0 %7123, %v4618_v57   ;;  %v14607_v57 = vld [vmem:[#allocation181_spill] sm:$0xff] }
 0x936   : > { %v4570_v61 = vmul.f32 %v11557_v8, %v14607_v57 }
 0x939   : > { %4939 = vperm.xlu1 %7122, %v4585_v32   ;;  %4864 = vperm.xlu0 %7123, %v4569_v18   ;;  %v14608_v32 = vld [vmem:[#allocation79_spill] sm:$0xff] }
 0x93a   : > { %v4652_v42 = vmul.f32 %v11617_v22, %v14608_v32 }
 0x93d   : > { %5249 = vperm.xlu1 %7122, %v4651_v63   ;;  %5174 = vperm.xlu0 %7123, %v4635_v41   ;;  %v14609_v63 = vld [vmem:[#allocation19_spill] sm:$0xff] }
 0x93e   : > { %v4636_v39 = vmul.f32 %v11603_v44, %v14609_v63  ;;  %v14610_v41 = vld [vmem:[#allocation103_spill] sm:$0xff] }
 0x93f   : > { %v4603_v29 = vmul.f32 %v11581_v24, %v14610_v41 }
 0x940   : > { %v11709_v53 = vpop.permute.xlu1 %4669  ;;  %v11711_v15 = vpop.permute.xlu0 %4664 }
 0x941   : > { %5019 = vperm.xlu1 %7122, %v4602_v26   ;;  %4789 = vperm.xlu0 %7123, %v4553_v9   ;;  %v14611_v9 = vld [vmem:[#allocation186_spill] sm:$0xff]  ;;  %v5303_v30 = vmul.f32 %v7434_v27, %v11709_v53  ;;  %v14658_v27 = vld [vmem:[#allocation120_spill] sm:$0xff] }
 0x942   : > { %v4554_v51 = vmul.f32 %v11549_v25, %v14611_v9 }
 0x944   : > { %v11717_v54 = vpop.permute.xlu1 %4744  ;;  %v11719_v12 = vpop.permute.xlu0 %4824 }
 0x945   : > { %4709 = vperm.xlu1 %7122, %v4536_v45   ;;  %5099 = vperm.xlu0 %7123, %v4619_v43   ;;  %v14612_v45 = vld [vmem:[#allocation167_spill] sm:$0xff] }
 0x946   : > { %v4537_v13 = vmul.f32 %v11547_v2, %v14612_v45 }
 0x948   : > { %v11725_v11 = vpop.permute.xlu1 %4749  ;;  %v11727_v37 = vpop.permute.xlu0 %4674 }
 0x949   : > { %4944 = vperm.xlu1 %7122, %v4586_v7   ;;  %4869 = vperm.xlu0 %7123, %v4570_v61   ;;  %v14613_v7 = vld [vmem:[#allocation99_spill] sm:$0xff]  ;;  %v14614_v61 = vld [vmem:[#allocation189_spill] sm:$0xff] }
 0x94a   : > { %v4620_v57 = vmul.f32 %v11591_v46, %v14613_v7  ;;  %v4587_v32 = vmul.f32 %v11569_v17, %v14614_v61 }
 0x94c   : > { %v11733_v18 = vpop.permute.xlu1 %4829  ;;  %v11735_v19 = vpop.permute.xlu0 %4904 }
 0x94d   : > { %5254 = vperm.xlu1 %7122, %v4652_v42   ;;  %5179 = vperm.xlu0 %7123, %v4636_v39   ;;  %v14615_v39 = vld [vmem:[#allocation54_spill] sm:$0xff] }
 0x94e   : > { %v4571_v41 = vmul.f32 %v11557_v8, %v14615_v39 }
 0x950   : > { %v11741_v26 = vpop.permute.xlu1 %4754  ;;  %v11743_v60 = vpop.permute.xlu0 %4834 }
 0x951   : > { %5024 = vperm.xlu1 %7122, %v4603_v29   ;;  %4794 = vperm.xlu0 %7123, %v4554_v51   ;;  %v14616_v29 = vld [vmem:[#allocation125_spill] sm:$0xff] }
 0x952   : > { %v4653_v9 = vmul.f32 %v11617_v22, %v14616_v29  ;;  %v14620_v29 = vld [vmem:[#allocation149_spill] sm:$0xff] }
 0x953   : > { %v4538_v58 = vmul.f32 %v11547_v2, %v14620_v29  ;;  %v4638_v29 = vmul.f32 %v11603_v44, %v14625_v23  ;;  %v14630_v23 = vld [vmem:[#allocation162_spill] sm:$0xff] }
 0x954   : > { %v11749_v43 = vpop.permute.xlu1 %4909  ;;  %v11751_v34 = vpop.permute.xlu0 %4989  ;;  %v11813_v3 = vmul.f32 %v11569_v17, %v14630_v23  ;;  %v11833_v23 = vmul.f32 %v11549_v25, %v14635_v5  ;;  %v11853_v5 = vmul.f32 %v11617_v22, %v14641_v21  ;;  %v11873_v21 = vmul.f32 %v11547_v2, %v14649_v40 }
 0x955   : > { %4714 = vperm.xlu1 %7122, %v4537_v13   ;;  %5104 = vperm.xlu0 %7123, %v4620_v57   ;;  %v14617_v13 = vld [vmem:[#allocation30_spill] sm:$0xff]  ;;  %v14618_v57 = vld [vmem:[#allocation41_spill] sm:$0xff] }
 0x956   : > { %v4637_v7 = vmul.f32 %v11603_v44, %v14617_v13  ;;  %v4604_v61 = vmul.f32 %v11581_v24, %v14618_v57  ;;  %v14622_v57 = vld [vmem:[#allocation48_spill] sm:$0xff]  ;;  %14642 = vst [vmem:[#allocation23_spill] sm:$0xff] %v11853_v5  ;;  %14650 = vst [vmem:[#allocation72_spill] sm:$0xff] %v11873_v21  ;;  %v14655_v21 = vld [vmem:[#allocation58_spill] sm:$0xff]  ;;  %v11901_v5 = vmul.f32 %v11603_v44, %v14658_v27 }
 0x957   : > { %v4588_v38 = vmul.f32 %v11569_v17, %v14622_v57  ;;  %v14628_v57 = vld [vmem:[#allocation154_spill] sm:$0xff]  ;;  %v11893_v62 = vmul.f32 %v11557_v8, %v14655_v21 }
 0x958   : > { %v11757_v42 = vpop.permute.xlu1 %4984  ;;  %v11759_v63 = vpop.permute.xlu0 %4759  ;;  %v11805_v55 = vmul.f32 %v11547_v2, %v14628_v57  ;;  %v11825_v57 = vmul.f32 %v11603_v44, %v14633_v48  ;;  %v11845_v48 = vmul.f32 %v11569_v17, %v14638_v6  ;;  %v11865_v6 = vmul.f32 %v11581_v24, %v14645_v36  ;;  %v7435_v36 = vld [vmem:[%s13404_s2] sm:$0xff]  ;;  %14659 = vst [vmem:[#allocation97_spill] sm:$0xff] %v11901_v5 }
 0x959   : > { %4949 = vperm.xlu1 %7122, %v4587_v32   ;;  %4874 = vperm.xlu0 %7123, %v4571_v41   ;;  %v14619_v32 = vld [vmem:[#allocation147_spill] sm:$0xff] }
 0x95a   : > { %v4555_v41 = vmul.f32 %v11549_v25, %v14619_v32  ;;  %v4572_v32 = vmul.f32 %v11557_v8, %v14623_v33  ;;  %v14629_v33 = vld [vmem:[#allocation106_spill] sm:$0xff]  ;;  %14646 = vst [vmem:[#allocation100_spill] sm:$0xff] %v11865_v6  ;;  %v11897_v6 = vmul.f32 %v11617_v22, %v14656_v10  ;;  %v14667_v5 = vld [vmem:[#allocation171_spill] sm:$0xff] }
 0x95c   : > { %v11765_v51 = vpop.permute.xlu1 %4679  ;;  %v11767_v45 = vpop.permute.xlu0 %5064  ;;  %14657 = vst [vmem:[#allocation112_spill] sm:$0xff] %v11897_v6  ;;  %v14665_v6 = vld [vmem:[#allocation50_spill] sm:$0xff] }
 0x95d   : > { %5259 = vperm.xlu1 %7122, %v4653_v9   ;;  %5184 = vperm.xlu0 %7123, %v4637_v7   ;;  %v14621_v9 = vld [vmem:[#allocation17_spill] sm:$0xff]  ;;  %v11921_v27 = vmul.f32 %v11569_v17, %v14665_v6  ;;  %v14671_v6 = vld [vmem:[#allocation84_spill] sm:$0xff] }
 0x95e   : > { %v4621_v7 = vmul.f32 %v11591_v46, %v14621_v9  ;;  %v14627_v9 = vld [vmem:[#allocation174_spill] sm:$0xff] }
 0x95f   : > { %14666 = vst [vmem:[#allocation129_spill] sm:$0xff] %v11921_v27  ;;  %v11941_v27 = vmul.f32 %v11603_v44, %v14671_v6  ;;  %v7438_v6 = vld [vmem:[%s13404_s2 + $0x80] sm:$0xff] }
 0x960   : > { %v11773_v0 = vpop.permute.xlu1 %4914  ;;  %v11775_v39 = vpop.permute.xlu0 %4839 }
 0x961   : > { %5029 = vperm.xlu1 %7122, %v4604_v61   ;;  %4799 = vperm.xlu0 %7123, %v4555_v41   ;;  %v14624_v61 = vld [vmem:[#allocation80_spill] sm:$0xff]  ;;  %14672 = vst [vmem:[#allocation205_spill] sm:$0xff] %v11941_v27  ;;  %v14679_v27 = vld [vmem:[#allocation11_spill] sm:$0xff] }
 0x962   : > { %v4654_v41 = vmul.f32 %v11617_v22, %v14624_v61  ;;  %v11809_v61 = vmul.f32 %v11591_v46, %v14629_v33  ;;  %v14634_v33 = vld [vmem:[#allocation42_spill] sm:$0xff] }
 0x964   : > { %v11781_v56 = vpop.permute.xlu1 %5069  ;;  %v11783_v13 = vpop.permute.xlu0 %5144 }
 0x965   : > { %4719 = vperm.xlu1 %7122, %v4538_v58   ;;  %5109 = vperm.xlu0 %7123, %v4621_v7   ;;  %v4605_v58 = vmul.f32 %v11581_v24, %v14626_v4  ;;  %v4556_v7 = vmul.f32 %v11549_v25, %v14627_v9  ;;  %v14632_v4 = vld [vmem:[#allocation134_spill] sm:$0xff] }
 0x966   : > { %v11821_v9 = vmul.f32 %v11617_v22, %v14632_v4  ;;  %v11841_v4 = vmul.f32 %v11591_v46, %v14637_v28 }
 0x968   : > { %v11795_v16 = vpop.permute.xlu1 %4994  ;;  %v11797_v49 = vpop.permute.xlu0 %4684 }
 0x969   : > { %4954 = vperm.xlu1 %7122, %v4588_v38   ;;  %4879 = vperm.xlu0 %7123, %v4572_v32   ;;  %v11829_v38 = vmul.f32 %v11581_v24, %v14634_v33  ;;  %v14639_v32 = vld [vmem:[#allocation157_spill] sm:$0xff] }
 0x96a   : > { %v11849_v33 = vmul.f32 %v11557_v8, %v14639_v32  ;;  %v11869_v32 = vmul.f32 %v11549_v25, %v14647_v20  ;;  %v5302_v20 = vmul.f32 %v7435_v36, %v11711_v15  ;;  %v14661_v36 = vld [vmem:[#allocation166_spill] sm:$0xff] }
 0x96c   : > { %14640 = vst [vmem:[#allocation138_spill] sm:$0xff] %v11849_v33  ;;  %v11859_v35 = vpop.permute.xlu1 %5149  ;;  %v11861_v28 = vpop.permute.xlu0 %4919  ;;  %14648 = vst [vmem:[#allocation34_spill] sm:$0xff] %v11869_v32  ;;  %v14653_v32 = vld [vmem:[#allocation194_spill] sm:$0xff]  ;;  %v14660_v33 = vld [vmem:[#allocation43_spill] sm:$0xff] }
 0x96d   : > { %5264 = vperm.xlu1 %7122, %v4654_v41   ;;  %v11889_v40 = vmul.f32 %v11569_v17, %v14653_v32  ;;  %5189 = vperm.xlu0 %7123, %v4638_v29   ;;  %v11905_v41 = vmul.f32 %v11581_v24, %v14660_v33  ;;  %v11909_v32 = vmul.f32 %v11549_v25, %v14661_v36  ;;  %v14663_v29 = vld [vmem:[#allocation55_spill] sm:$0xff] }
 0x96e   : > { %v11917_v10 = vmul.f32 %v11591_v46, %v14663_v29  ;;  %v11925_v33 = vmul.f32 %v11557_v8, %v14667_v5  ;;  %v6260_v25 = vrot.slane %v11709_v53, %v9634_v52  ;;  %v6256_v36 = vrot.slane %v11711_v15, %v9639_v47  ;;  %v14669_v29 = vld [vmem:[#allocation116_spill] sm:$0xff] }
 0x96f   : > { %14654 = vst [vmem:[#allocation108_spill] sm:$0xff] %v11889_v40  ;;  %v14662_v40 = vld [vmem:[#allocation142_spill] sm:$0xff]  ;;  %v5431_v8 = vsel %vm14673_vm11, %v5303_v30, 0.0  ;;  %v5430_v5 = vsel %vm14674_vm0, %v5302_v20, 0.0  ;;  %v7436_v53 = vld [vmem:[%s13404_s2 + $0x88] sm:$0xff]  ;;  %v5318_v30 = vmul.f32 %v7438_v6, %v11717_v54  ;;  %v6265_v6 = vrot.slane %v11727_v37, %v9646_v50  ;;  %vm14684_vm11 = vmmov %vm14674_vm0 }
 0x970   : > { %v11913_v21 = vmul.f32 %v11547_v2, %v14662_v40  ;;  %14664 = vst [vmem:[#allocation203_spill] sm:$0xff] %v11917_v10  ;;  %14668 = vst [vmem:[#allocation29_spill] sm:$0xff] %v11925_v33  ;;  %v11931_v2 = vpop.permute.xlu1 %4764  ;;  %v11933_v40 = vpop.permute.xlu0 %5224  ;;  %v11937_v10 = vmul.f32 %v11617_v22, %v14669_v29  ;;  %v5319_v15 = vmul.f32 %v7436_v53, %v11725_v11  ;;  %v7437_v33 = vld [vmem:[%s13404_s2 + $0x10] sm:$0xff]  ;;  %v14675_v20 = vld [vmem:[#allocation16_spill] sm:$0xff] }
 0x971   : > { %v5304_v29 = vmul.f32 %v7437_v33, %v11727_v37  ;;  %5034 = vperm.xlu1 %7122, %v4605_v58   ;;  %4804 = vperm.xlu0 %7123, %v4556_v7   ;;  %v11959_v44 = vmul.f32 %v11581_v24, %v14675_v20  ;;  %v14677_v22 = vld [vmem:[#allocation124_spill] sm:$0xff]  ;;  %v7439_v58 = vld [vmem:[%s13404_s2 + $0x100] sm:$0xff]  ;;  %v6339_v7 = vrot.slane %v11725_v11, %v9634_v52  ;;  %v14681_v20 = vld [vmem:[#allocation66_spill] sm:$0xff] }
 0x972   : > { %14670 = vst [vmem:[#allocation75_spill] sm:$0xff] %v11937_v10  ;;  %v11963_v53 = vmul.f32 %v11591_v46, %v14677_v22  ;;  %v11967_v10 = vmul.f32 %v11569_v17, %v14679_v27  ;;  %v5334_v33 = vmul.f32 %v7439_v58, %v11719_v12  ;;  %v11979_v22 = vmul.f32 %v11581_v24, %v14681_v20  ;;  %v7440_v58 = vld [vmem:[%s13404_s2 + $0x108] sm:$0xff] }
 0x973   : > { %14676 = vst [vmem:[#allocation86_spill] sm:$0xff] %v11959_v44  ;;  %v5432_v46 = vadd.f32 %v5431_v8, %v5430_v5  ;;  %v6261_v17 = vsel %vm2236_vm7, %v6260_v25, %v6256_v36  ;;  %v6335_v27 = vrot.slane %v11717_v54, %v9639_v47  ;;  %v5468_v37 = vsel %vm14683_vm1, %v5319_v15, 0.0  ;;  %v7441_v54 = vld [vmem:[%s13404_s2 + $0x90] sm:$0xff]  ;;  %v7442_v15 = vld [vmem:[%s13404_s2 + $0x180] sm:$0xff]  ;;  %vm14685_vm1 = vmmov %vm14674_vm0 }
 0x974   : > { %14678 = vst [vmem:[#allocation9_spill] sm:$0xff] %v11963_v53  ;;  %14680 = vst [vmem:[#allocation76_spill] sm:$0xff] %v11967_v10  ;;  %v5335_v10 = vmul.f32 %v7440_v58, %v11733_v18  ;;  %v11988_v11 = vpop.permute.xlu1 %5074  ;;  %v11990_v53 = vpop.permute.xlu0 %4844  ;;  %v5433_v24 = vsel %vm14684_vm11, %v5304_v29, 0.0  ;;  %v6418_v25 = vrot.slane %v11733_v18, %v9634_v52  ;;  %v5320_v36 = vmul.f32 %v7441_v54, %v11741_v26  ;;  %v7443_v18 = vld [vmem:[%s13404_s2 + $0x110] sm:$0xff] }
 0x975   : > { %14682 = vst [vmem:[#allocation89_spill] sm:$0xff] %v11979_v22  ;;  %4724 = vperm.xlu1 %7122, %v11805_v55   ;;  %v5467_v8 = vsel %vm14674_vm0, %v5318_v30, 0.0  ;;  %v6414_v5 = vrot.slane %v11719_v12, %v9639_v47  ;;  %v5350_v29 = vmul.f32 %v7442_v15, %v11735_v19  ;;  %v5336_v20 = vmul.f32 %v7443_v18, %v11743_v60  ;;  %vm14686_vm11 = vmmov %vm14674_vm0 }
 0x976   : > { %5114 = vperm.xlu0 %7123, %v11809_v61   ;;  %v5504_v55 = vsel %vm14685_vm1, %v5334_v33, 0.0  ;;  %v6340_v30 = vsel %vm2236_vm7, %v6339_v7, %v6335_v27  ;;  %v12016_v12 = vsel %vm2243_vm8, %v6265_v6, %v6261_v17  ;;  %v6344_v58 = vrot.slane %v11741_v26, %v9646_v50  ;;  %vm14687_vm1 = vmmov %vm14674_vm0  ;;  %v7445_v17 = vld [vmem:[%s13404_s2 + $0x200] sm:$0xff]  ;;  %v7446_v27 = vld [vmem:[%s13404_s2 + $0x98] sm:$0xff] }
 0x977   : > { %v5469_v54 = vadd.f32 %v5468_v37, %v5467_v8  ;;  %v12020_v15 = vadd.f32 %v5433_v24, %v5432_v46  ;;  %v5505_v22 = vsel %vm14686_vm11, %v5335_v10, 0.0  ;;  %v6423_v18 = vrot.slane %v11743_v60, %v9646_v50  ;;  %v7444_v46 = vld [vmem:[%s13404_s2 + $0x188] sm:$0xff]  ;;  %vm14688_vm11 = vmmov %vm14674_vm0 }
 0x978   : > { %v12025_v44 = vpop.permute.xlu1 %5229  ;;  %v12027_v61 = vpop.permute.xlu0 %5154  ;;  %v6419_v33 = vsel %vm2236_vm7, %v6418_v25, %v6414_v5  ;;  %v6493_v7 = vrot.slane %v11735_v19, %v9639_v47  ;;  %v5470_v6 = vsel %vm14674_vm0, %v5320_v36, 0.0  ;;  %v5351_v26 = vmul.f32 %v7444_v46, %v11749_v43  ;;  %v7447_v36 = vld [vmem:[%s13404_s2 + $0x208] sm:$0xff] }
 0x979   : > { %4959 = vperm.xlu1 %7122, %v11813_v3   ;;  %v5541_v60 = vsel %vm14687_vm1, %v5350_v29, 0.0  ;;  %v5507_v10 = vsel %vm14688_vm11, %v5336_v20, 0.0  ;;  %v5366_v19 = vmul.f32 %v7445_v17, %v11757_v42  ;;  %v5321_v37 = vmul.f32 %v7446_v27, %v11759_v63  ;;  %vm14689_vm1 = vmmov %vm14674_vm0 }
 0x97a   : > { %4884 = vperm.xlu0 %7123, %v11817_v1   ;;  %v5506_v24 = vadd.f32 %v5505_v22, %v5504_v55  ;;  %v6345_v3 = vsel %vm2243_vm8, %v6344_v58, %v6340_v30  ;;  %v6497_v25 = vrot.slane %v11749_v43, %v9634_v52  ;;  %v5367_v8 = vmul.f32 %v7447_v36, %v11751_v34  ;;  %vm14690_vm11 = vmmov %vm14674_vm0 }
 0x97b   : > { %v5471_v5 = vadd.f32 %v5470_v6, %v5469_v54  ;;  %v6424_v29 = vsel %vm2243_vm8, %v6423_v18, %v6419_v33  ;;  %v6572_v20 = vrot.slane %v11757_v42, %v9639_v47  ;;  %v6349_v1 = vrot.slane %v11759_v63, %v9652_v31  ;;  %v7448_v54 = vld [vmem:[%s13404_s2 + $0x18] sm:$0xff]  ;;  %v7449_v6 = vld [vmem:[%s13404_s2 + $0x280] sm:$0xff] }
 0x97c   : > { %v12061_v22 = vpop.permute.xlu1 %4999  ;;  %v12063_v55 = vpop.permute.xlu0 %4769  ;;  %v5508_v43 = vadd.f32 %v5507_v10, %v5506_v24  ;;  %v5542_v30 = vsel %vm14674_vm0, %v5351_v26, 0.0  ;;  %v6576_v58 = vrot.slane %v11751_v34, %v9634_v52  ;;  %v5305_v18 = vmul.f32 %v7448_v54, %v11765_v51 }
 0x97d   : > { %5269 = vperm.xlu1 %7122, %v11821_v9   ;;  %v5578_v42 = vsel %vm14689_vm1, %v5366_v19, 0.0  ;;  %v5472_v63 = vsel %vm14690_vm11, %v5321_v37, 0.0  ;;  %v6270_v33 = vrot.slane %v11765_v51, %v9652_v31  ;;  %v5382_v34 = vmul.f32 %v7449_v6, %v11767_v45  ;;  %v7450_v9 = vld [vmem:[%s13404_s2 + $0x190] sm:$0xff]  ;;  %v7451_v51 = vld [vmem:[%s13404_s2 + $0x118] sm:$0xff]  ;;  %vm14691_vm1 = vmmov %vm14674_vm0 }
 0x97e   : > { %5194 = vperm.xlu0 %7123, %v11825_v57   ;;  %v6498_v46 = vsel %vm2236_vm7, %v6497_v25, %v6493_v7  ;;  %v5579_v26 = vsel %vm14674_vm0, %v5367_v8, 0.0  ;;  %v5352_v10 = vmul.f32 %v7450_v9, %v11773_v0  ;;  %v5337_v17 = vmul.f32 %v7451_v51, %v11775_v39  ;;  %vm14692_vm11 = vmmov %vm14674_vm0 }
 0x97f   : > { %v5543_v19 = vadd.f32 %v5542_v30, %v5541_v60  ;;  %v6577_v27 = vsel %vm2236_vm7, %v6576_v58, %v6572_v20  ;;  %v12094_v57 = vsel %vm2250_vm9, %v6349_v1, %v6345_v3  ;;  %v6502_v7 = vrot.slane %v11773_v0, %v9646_v50  ;;  %v7452_v60 = vld [vmem:[%s13404_s2 + $0x288] sm:$0xff] }
 0x980   : > { %v12098_v37 = vpop.permute.xlu1 %4689  ;;  %v12100_v24 = vpop.permute.xlu0 %5079  ;;  %v5580_v25 = vadd.f32 %v5579_v26, %v5578_v42  ;;  %v12102_v36 = vadd.f32 %v5472_v63, %v5471_v5  ;;  %v5435_v8 = vsel %vm14691_vm1, %v5305_v18, 0.0  ;;  %v5383_v20 = vmul.f32 %v7452_v60, %v11781_v56  ;;  %vm14693_vm1 = vmmov %vm14674_vm0 }
 0x981   : > { %5039 = vperm.xlu1 %7122, %v11829_v38   ;;  %v6271_v0 = vsel %vm2250_vm9, %v6270_v33, %v12016_v12  ;;  %v5615_v3 = vsel %vm14692_vm11, %v5382_v34, 0.0  ;;  %v6651_v1 = vrot.slane %v11767_v45, %v9639_v47  ;;  %v6428_v5 = vrot.slane %v11775_v39, %v9652_v31  ;;  %v7453_v12 = vld [vmem:[%s13404_s2 + $0x210] sm:$0xff]  ;;  %v7454_v39 = vld [vmem:[%s13404_s2 + $0x300] sm:$0xff]  ;;  %vm14694_vm11 = vmmov %vm14674_vm0 }
 0x982   : > { %4809 = vperm.xlu0 %7123, %v11833_v23   ;;  %v5544_v30 = vsel %vm14674_vm0, %v5352_v10, 0.0  ;;  %v5509_v58 = vsel %vm14693_vm1, %v5337_v17, 0.0  ;;  %v6655_v38 = vrot.slane %v11781_v56, %v9634_v52  ;;  %v5368_v54 = vmul.f32 %v7453_v12, %v11795_v16  ;;  %v7455_v56 = vld [vmem:[%s13404_s2 + $0x20] sm:$0xff]  ;;  %vm14695_vm1 = vmmov %vm14674_vm0 }
 0x983   : > { %v5436_v45 = vadd.f32 %v5435_v8, %v12020_v15  ;;  %v6503_v18 = vsel %vm2243_vm8, %v6502_v7, %v6498_v46  ;;  %v5398_v23 = vmul.f32 %v7454_v39, %v11783_v13  ;;  %v5306_v42 = vmul.f32 %v7455_v56, %v11797_v49  ;;  %v7456_v46 = vld [vmem:[%s13404_s2 + $0x308] sm:$0xff] }
 0x984   : > { %v12136_v63 = vpop.permute.xlu1 %4924  ;;  %v12138_v33 = vpop.permute.xlu0 %4849  ;;  %v5616_v15 = vsel %vm14694_vm11, %v5383_v20, 0.0  ;;  %v6581_v6 = vrot.slane %v11795_v16, %v9646_v50  ;;  %v6275_v34 = vrot.slane %v11797_v49, %v9664_v14  ;;  %v5399_v26 = vmul.f32 %v7456_v46, %v11859_v35  ;;  %v7457_v16 = vld [vmem:[%s13404_s2 + $0x198] sm:$0xff]  ;;  %vm14696_vm11 = vmmov %vm14674_vm0 }
 0x985   : > { %4729 = vperm.xlu1 %7122, %v11837_v59   ;;  %v5545_v9 = vadd.f32 %v5544_v30, %v5543_v19  ;;  %v12150_v10 = vadd.f32 %v5509_v58, %v5508_v43  ;;  %v6429_v51 = vsel %vm2250_vm9, %v6428_v5, %v6424_v29  ;;  %v5353_v17 = vmul.f32 %v7457_v16, %v11861_v28  ;;  %v14700_v16 = vld [vmem:[#allocation23_spill] sm:$0xff] }
 0x986   : > { %5119 = vperm.xlu0 %7123, %v11841_v4   ;;  %v6656_v49 = vsel %vm2236_vm7, %v6655_v38, %v6651_v1  ;;  %v6730_v7 = vrot.slane %v11783_v13, %v9639_v47  ;;  %v5581_v59 = vsel %vm14674_vm0, %v5368_v54, 0.0  ;;  %v6734_v43 = vrot.slane %v11859_v35, %v9634_v52  ;;  %v14698_v38 = vld [vmem:[#allocation138_spill] sm:$0xff] }
 0x987   : > { %v5617_v19 = vadd.f32 %v5616_v15, %v5615_v3  ;;  %v5652_v29 = vsel %vm14695_vm1, %v5398_v23, 0.0  ;;  %v5437_v8 = vsel %vm14696_vm11, %v5306_v42, 0.0  ;;  %v6507_v60 = vrot.slane %v11861_v28, %v9652_v31  ;;  %v7458_v3 = vld [vmem:[%s13404_s2 + $0xa0] sm:$0xff]  ;;  %vm14697_vm1 = vmmov %vm14674_vm0 }
 0x988   : > { %v12168_v20 = vpop.permute.xlu1 %5234  ;;  %v12170_v4 = vpop.permute.xlu0 %5159  ;;  %v12173_v1 = vsel %vm2243_vm8, %v6581_v6, %v6577_v27  ;;  %v12176_v13 = vsel %vm2257_vm10, %v6275_v34, %v6271_v0  ;;  %v5653_v35 = vsel %vm14674_vm0, %v5399_v26, 0.0  ;;  %v5322_v5 = vmul.f32 %v7458_v3, %v11931_v2  ;;  %v7459_v0 = vld [vmem:[%s13404_s2 + $0x380] sm:$0xff]  ;;  %vm14699_vm11 = vmmov %vm14674_vm0  ;;  %v7462_v26 = vld [vmem:[%s13404_s2 + $0x388] sm:$0xff] }
 0x989   : > { %4964 = vperm.xlu1 %7122, %v11845_v48   ;;  %v12184_v28 = vadd.f32 %v5581_v59, %v5580_v25  ;;  %v5546_v30 = vsel %vm14697_vm1, %v5353_v17, 0.0  ;;  %v6354_v27 = vrot.slane %v11931_v2, %v9664_v14  ;;  %v5414_v58 = vmul.f32 %v7459_v0, %v11933_v40  ;;  %v7460_v48 = vld [vmem:[%s13404_s2 + $0x290] sm:$0xff]  ;;  %v7461_v2 = vld [vmem:[%s13404_s2 + $0x120] sm:$0xff]  ;;  %vm14702_vm1 = vmmov %vm14674_vm0 }
 0x98a   : > { %4889 = vperm.xlu0 %7123, %v14698_v38   ;;  %v12194_v12 = vadd.f32 %v5437_v8, %v5436_v45  ;;  %v6735_v54 = vsel %vm2236_vm7, %v6734_v43, %v6730_v7  ;;  %v5384_v25 = vmul.f32 %v7460_v48, %v11988_v11  ;;  %v5338_v39 = vmul.f32 %v7461_v2, %v11990_v53  ;;  %v14701_v43 = vld [vmem:[#allocation102_spill] sm:$0xff]  ;;  %v14706_v0 = vld [vmem:[#allocation100_spill] sm:$0xff] }
 0x98b   : > { %v5654_v23 = vadd.f32 %v5653_v35, %v5652_v29  ;;  %v12206_v56 = vsel %vm2250_vm9, %v6507_v60, %v6503_v18  ;;  %v6660_v45 = vrot.slane %v11988_v11, %v9646_v50  ;;  %v6433_v42 = vrot.slane %v11990_v53, %v9664_v14  ;;  %v7463_v11 = vld [vmem:[%s13404_s2 + $0x310] sm:$0xff] }
 0x98c   : > { %v12212_v15 = vpop.permute.xlu1 %5004  ;;  %v12214_v6 = vpop.permute.xlu0 %4774  ;;  %v12216_v34 = vadd.f32 %v5546_v30, %v5545_v9  ;;  %v5474_v46 = vsel %vm14699_vm11, %v5322_v5, 0.0  ;;  %v5415_v18 = vmul.f32 %v7462_v26, %v12025_v44  ;;  %v5400_v53 = vmul.f32 %v7463_v11, %v12027_v61  ;;  %vm14703_vm11 = vmmov %vm14674_vm0 }
 0x98d   : > { %5274 = vperm.xlu1 %7122, %v14700_v16   ;;  %v6355_v9 = vsel %vm2257_vm10, %v6354_v27, %v12094_v57  ;;  %v5689_v17 = vsel %vm14674_vm0, %v5414_v58, 0.0  ;;  %v6809_v7 = vrot.slane %v11933_v40, %v9639_v47  ;;  %v6813_v59 = vrot.slane %v12025_v44, %v9634_v52  ;;  %v7464_v57 = vld [vmem:[%s13404_s2 + $0x218] sm:$0xff]  ;;  %v7465_v44 = vld [vmem:[%s13404_s2 + $0xa8] sm:$0xff] }
 0x98e   : > { %5199 = vperm.xlu0 %7123, %v14701_v43   ;;  %v5618_v29 = vsel %vm14702_vm1, %v5384_v25, 0.0  ;;  %v5511_v8 = vsel %vm14703_vm11, %v5338_v39, 0.0  ;;  %v6739_v60 = vrot.slane %v12027_v61, %v9646_v50  ;;  %v5369_v35 = vmul.f32 %v7464_v57, %v12061_v22  ;;  %vm14704_vm1 = vmmov %vm14674_vm0  ;;  %v7466_v25 = vld [vmem:[%s13404_s2 + $0x28] sm:$0xff]  ;;  %v14707_v39 = vld [vmem:[#allocation34_spill] sm:$0xff] }
 0x98f   : > { %v5475_v47 = vadd.f32 %v5474_v46, %v12102_v36  ;;  %v6661_v40 = vsel %vm2243_vm8, %v6660_v45, %v6656_v49  ;;  %v6434_v52 = vsel %vm2257_vm10, %v6433_v42, %v6429_v51  ;;  %v5323_v3 = vmul.f32 %v7465_v44, %v12063_v55  ;;  %v14705_v49 = vld [vmem:[#allocation188_spill] sm:$0xff]  ;;  %vm14708_vm11 = vmmov %vm14674_vm0 }
 0x990   : > { %v12251_v5 = vpop.permute.xlu1 %4694  ;;  %v12253_v61 = vpop.permute.xlu0 %5084  ;;  %v5690_v30 = vsel %vm14674_vm0, %v5415_v18, 0.0  ;;  %v5655_v27 = vsel %vm14704_vm1, %v5400_v53, 0.0  ;;  %v6586_v36 = vrot.slane %v12061_v22, %v9652_v31  ;;  %v6359_v51 = vrot.slane %v12063_v55, %v14705_v49  ;;  %v7467_v55 = vld [vmem:[%s13404_s2 + $0x298] sm:$0xff]  ;;  %v7469_v18 = vld [vmem:[%s13404_s2 + $0x128] sm:$0xff] }
 0x991   : > { %5044 = vperm.xlu1 %7122, %v14706_v0   ;;  %v5619_v58 = vadd.f32 %v5618_v29, %v5617_v19  ;;  %v5512_v38 = vadd.f32 %v5511_v8, %v12150_v10  ;;  %v6814_v48 = vsel %vm2236_vm7, %v6813_v59, %v6809_v7  ;;  %v5307_v2 = vmul.f32 %v7466_v25, %v12098_v37  ;;  %v7468_v19 = vld [vmem:[%s13404_s2 + $0x1a0] sm:$0xff]  ;;  %vm14709_vm7 = vmmov %vm14674_vm0  ;;  %v14711_v43 = vld [vmem:[#allocation72_spill] sm:$0xff] }
 0x992   : > { %4814 = vperm.xlu0 %7123, %v14707_v39   ;;  %v6740_v22 = vsel %vm2243_vm8, %v6739_v60, %v6735_v54  ;;  %v5583_v45 = vsel %vm14708_vm11, %v5369_v35, 0.0  ;;  %v5385_v10 = vmul.f32 %v7467_v55, %v12100_v24  ;;  %v5354_v42 = vmul.f32 %v7468_v19, %v12136_v63  ;;  %vm14713_vm11 = vmmov %vm14704_vm1 }
 0x993   : > { %v12279_v46 = vadd.f32 %v5690_v30, %v5689_v17  ;;  %v12281_v26 = vadd.f32 %v5655_v27, %v5654_v23  ;;  %v5476_v54 = vsel %vm14709_vm7, %v5323_v3, 0.0  ;;  %v5339_v11 = vmul.f32 %v7469_v18, %v12138_v33  ;;  %vm14714_vm7 = vmmov %vm14704_vm1  ;;  %v7472_v3 = vld [vmem:[%s13404_s2 + $0x318] sm:$0xff] }
 0x994   : > { %v12288_v53 = vpop.permute.xlu1 %4929  ;;  %v12290_v16 = vpop.permute.xlu0 %4854  ;;  %v12294_v7 = vsel %vm2250_vm9, %v6586_v36, %v12173_v1  ;;  %vm14710_vm0 = vcmask 392512   ;;  %v6280_v23 = vrot.slane %v12098_v37, %v14705_v49  ;;  %v6665_v59 = vrot.slane %v12100_v24, %v9652_v31  ;;  %v7476_v18 = vld [vmem:[%s13404_s2 + $0xb8] sm:$0xff] }
 0x995   : > { %v6360_v17 = vsel %vm14710_vm0, %v6359_v51, %v6355_v9  ;;  %4734 = vperm.xlu1 %7122, %v14711_v43   ;;  %v12303_v29 = vadd.f32 %v5583_v45, %v12184_v28  ;;  %v5439_v8 = vsel %vm14704_vm1, %v5307_v2, 0.0  ;;  %v6512_v60 = vrot.slane %v12136_v63, %v9664_v14  ;;  %v14712_v9 = vld [vmem:[#allocation73_spill] sm:$0xff]  ;;  %vm14715_vm0 = vmmov %vm14704_vm1  ;;  %v14723_v43 = vld [vmem:[#allocation112_spill] sm:$0xff] }
 0x996   : > { %v6438_v1 = vrot.slane %v12138_v33, %v14705_v49  ;;  %5124 = vperm.xlu0 %7123, %v14712_v9   ;;  %v5477_v57 = vadd.f32 %v5476_v54, %v5475_v47  ;;  %v5620_v37 = vsel %vm14713_vm11, %v5385_v10, 0.0  ;;  %v5548_v24 = vsel %vm14714_vm7, %v5354_v42, 0.0  ;;  %v7470_v28 = vld [vmem:[%s13404_s2 + $0xb0] sm:$0xff]  ;;  %vm14720_vm7 = vmmov %vm14715_vm0 }
 0x997   : > { %v5324_v35 = vmul.f32 %v7470_v28, %v12214_v6  ;;  %v5513_v44 = vsel %vm14715_vm0, %v5339_v11, 0.0  ;;  %v7471_v63 = vld [vmem:[%s13404_s2 + $0x390] sm:$0xff]  ;;  %v6818_v47 = vrot.slane %v12168_v20, %v9646_v50  ;;  %v5401_v30 = vmul.f32 %v7472_v3, %v12170_v4 }
 0x998   : > { %v5416_v33 = vmul.f32 %v7471_v63, %v12168_v20  ;;  %v12328_v27 = vpop.permute.xlu1 %5239  ;;  %v12330_v36 = vpop.permute.xlu0 %5164  ;;  %v12333_v51 = vadd.f32 %v5439_v8, %v12194_v12  ;;  %vm14716_vm1 = vcmask 392512   ;;  %v6666_v25 = vsel %vm2250_vm9, %v6665_v59, %v6661_v40  ;;  %v14717_v20 = vld [vmem:[#allocation108_spill] sm:$0xff]  ;;  %v14719_v12 = vld [vmem:[#allocation191_spill] sm:$0xff]  ;;  %v7475_v54 = vld [vmem:[%s13404_s2 + $0x30] sm:$0xff] }
 0x999   : > { %v12337_v0 = vsel %vm14716_vm1, %v6280_v23, %v12176_v13  ;;  %v6744_v50 = vrot.slane %v12170_v4, %v9652_v31  ;;  %4969 = vperm.xlu1 %7122, %v14717_v20   ;;  %v5621_v2 = vadd.f32 %v5620_v37, %v5619_v58  ;;  %v12345_v39 = vsel %vm2257_vm10, %v6512_v60, %v12206_v56  ;;  %vm14718_vm11 = vmmov %vm14716_vm1  ;;  %v7473_v56 = vld [vmem:[%s13404_s2 + $0x2a0] sm:$0xff]  ;;  %v14722_v23 = vld [vmem:[#allocation192_spill] sm:$0xff] }
 0x99a   : > { %v12348_v45 = vsel %vm14718_vm11, %v6438_v1, %v6434_v52  ;;  %v6364_v55 = vrot.slane %v12214_v6, %v14719_v12  ;;  %4894 = vperm.xlu0 %7123, %v11893_v62   ;;  %v12354_v13 = vadd.f32 %v5548_v24, %v12216_v34  ;;  %v12356_v40 = vadd.f32 %v5513_v44, %v5512_v38  ;;  %vm14721_vm1 = vmmov %vm14715_vm0  ;;  %v7474_v6 = vld [vmem:[%s13404_s2 + $0x220] sm:$0xff]  ;;  %v7477_v1 = vld [vmem:[%s13404_s2 + $0x130] sm:$0xff] }
 0x99b   : > { %v5478_v4 = vsel %vm14720_vm7, %v5324_v35, 0.0  ;;  %v5386_v58 = vmul.f32 %v7473_v56, %v12253_v61  ;;  %v5692_v52 = vsel %vm14715_vm0, %v5416_v33, 0.0  ;;  %v12365_v10 = vsel %vm2243_vm8, %v6818_v47, %v6814_v48  ;;  %v14724_v37 = vld [vmem:[#allocation97_spill] sm:$0xff]  ;;  %vm14725_vm8 = vmmov %vm14715_vm0 }
 0x99c   : > { %v5657_v62 = vsel %vm14721_vm1, %v5401_v30, 0.0  ;;  %v5370_v34 = vmul.f32 %v7474_v6, %v12212_v15  ;;  %v12372_v38 = vpop.permute.xlu1 %5009  ;;  %v4780_v19 = vpop.permute.xlu0 %4779  ;;  %v12375_v42 = vsel %vm2250_vm9, %v6744_v50, %v6740_v22  ;;  %v5308_v48 = vmul.f32 %v7475_v54, %v12251_v5  ;;  %vm14726_vm11 = vmmov %vm14715_vm0  ;;  %v7478_v30 = vld [vmem:[%s13404_s2 + $0x2a8] sm:$0xff] }
 0x99d   : > { %v5325_v11 = vmul.f32 %v7476_v18, %v4780_v19  ;;  %v6369_v59 = vrot.slane %v4780_v19, %v14722_v23  ;;  %5279 = vperm.xlu1 %7122, %v14723_v43   ;;  %v5479_v8 = vadd.f32 %v5478_v4, %v5477_v57  ;;  %v6365_v60 = vsel %vm2271_vm12, %v6364_v55, %v6360_v17  ;;  %vm14727_vm7 = vmmov %vm14715_vm0 }
 0x99e   : > { %v6670_v22 = vrot.slane %v12253_v61, %v9664_v14  ;;  %v5340_v9 = vmul.f32 %v7477_v1, %v12290_v16  ;;  %5204 = vperm.xlu0 %7123, %v14724_v37   ;;  %v5693_v24 = vadd.f32 %v5692_v52, %v12279_v46  ;;  %v5622_v28 = vsel %vm14725_vm8, %v5386_v58, 0.0  ;;  %vm14728_vm1 = vmmov %vm14715_vm0 }
 0x99f   : > { %v5480_v35 = vsel %vm14726_vm11, %v5325_v11, 0.0  ;;  %v12398_v57 = vsel %vm2278_vm13, %v6369_v59, %v6365_v60  ;;  %v5658_v17 = vadd.f32 %v5657_v62, %v12281_v26  ;;  %v5585_v61 = vsel %vm14727_vm7, %v5370_v34, 0.0  ;;  %vm14729_vm8 = vmmov %vm14715_vm0  ;;  %v14731_v11 = vld [vmem:[#allocation203_spill] sm:$0xff] }
 0x9a0   : > { %v6591_v44 = vrot.slane %v12212_v15, %v9664_v14  ;;  %v12404_v63 = vadd.f32 %v5480_v35, %v5479_v8  ;;  %v12406_v33 = vpop.permute.xlu1 %4699  ;;  %v5090_v47 = vpop.permute.xlu0 %5089  ;;  %v5441_v46 = vsel %vm14715_vm0, %v5308_v48, 0.0  ;;  %v6285_v3 = vrot.slane %v12251_v5, %v14719_v12  ;;  %v7479_v5 = vld [vmem:[%s13404_s2 + $0x398] sm:$0xff]  ;;  %vm14732_vm7 = vmmov %vm14715_vm0 }
 0x9a1   : > { %v5387_v26 = vmul.f32 %v7478_v30, %v5090_v47  ;;  %v6675_v50 = vrot.slane %v5090_v47, %v14705_v49  ;;  %5049 = vperm.xlu1 %7122, %v11905_v41   ;;  %v5623_v15 = vadd.f32 %v5622_v28, %v5621_v2  ;;  %v6671_v20 = vsel %vm2257_vm10, %v6670_v22, %v6666_v25  ;;  %v7480_v41 = vld [vmem:[%s13404_s2 + $0x320] sm:$0xff]  ;;  %v14736_v30 = vld [vmem:[#allocation29_spill] sm:$0xff] }
 0x9a2   : > { %v5515_v55 = vsel %vm14728_vm1, %v5340_v9, 0.0  ;;  %v6443_v4 = vrot.slane %v12290_v16, %v14719_v12  ;;  %4819 = vperm.xlu0 %7123, %v11909_v32   ;;  %v5417_v56 = vmul.f32 %v7479_v5, %v12328_v27  ;;  %v5402_v2 = vmul.f32 %v7480_v41, %v12330_v36  ;;  %vm14733_vm1 = vmmov %vm14715_vm0  ;;  %v7483_v9 = vld [vmem:[%s13404_s2 + $0x3a0] sm:$0xff] }
 0x9a3   : > { %v5624_v25 = vsel %vm14729_vm8, %v5387_v26, 0.0  ;;  %vm14730_vm11 = vcmask 392512   ;;  %v6592_v32 = vsel %vm2257_vm10, %v6591_v44, %v12294_v7  ;;  %v6823_v16 = vrot.slane %v12328_v27, %v9652_v31  ;;  %v7481_v7 = vld [vmem:[%s13404_s2 + $0x138] sm:$0xff]  ;;  %vm14737_vm8 = vmmov %vm14715_vm0 }
 0x9a4   : > { %v12431_v58 = vsel %vm14730_vm11, %v6675_v50, %v6671_v20  ;;  %v6749_v52 = vrot.slane %v12330_v36, %v9664_v14  ;;  %v12439_v62 = vadd.f32 %v5624_v25, %v5623_v15  ;;  %v12441_v6 = vpop.permute.xlu1 %4934  ;;  %v4860_v34 = vpop.permute.xlu0 %4859  ;;  %v5586_v19 = vadd.f32 %v5585_v61, %v12303_v29  ;;  %v14734_v61 = vld [vmem:[#allocation129_spill] sm:$0xff]  ;;  %vm14738_vm11 = vmmov %vm14715_vm0 }
 0x9a5   : > { %v12446_v54 = vsel %vm2271_vm12, %v6285_v3, %v12337_v0  ;;  %v5341_v48 = vmul.f32 %v7481_v7, %v4860_v34  ;;  %v6448_v31 = vrot.slane %v4860_v34, %v14722_v23  ;;  %4739 = vperm.xlu1 %7122, %v11913_v21   ;;  %v12454_v27 = vadd.f32 %v5441_v46, %v12333_v51  ;;  %v7482_v0 = vld [vmem:[%s13404_s2 + $0x228] sm:$0xff]  ;;  %v7485_v46 = vld [vmem:[%s13404_s2 + $0x38] sm:$0xff]  ;;  %v14741_v7 = vld [vmem:[#allocation193_spill] sm:$0xff] }
 0x9a6   : > { %v5516_v36 = vadd.f32 %v5515_v55, %v12356_v40  ;;  %v6444_v29 = vsel %vm2271_vm12, %v6443_v4, %v12348_v45  ;;  %v5371_v18 = vmul.f32 %v7482_v0, %v12372_v38  ;;  %5129 = vperm.xlu0 %7123, %v14731_v11   ;;  %v5694_v59 = vsel %vm14732_vm7, %v5417_v56, 0.0  ;;  %v7489_v0 = vld [vmem:[%s13404_s2 + $0x1b0] sm:$0xff] }
 0x9a7   : > { %v5659_v21 = vsel %vm14715_vm0, %v5402_v2, 0.0  ;;  %v5517_v51 = vsel %vm14733_vm1, %v5341_v48, 0.0  ;;  %v12468_v43 = vsel %vm2278_vm13, %v6448_v31, %v6444_v29  ;;  %v6824_v45 = vsel %vm2250_vm9, %v6823_v16, %v12365_v10  ;;  %v7484_v10 = vld [vmem:[%s13404_s2 + $0x328] sm:$0xff]  ;;  %vm14735_vm9 = vmmov %vm14715_vm0  ;;  %v7487_v2 = vld [vmem:[%s13404_s2 + $0x230] sm:$0xff] }
 0x9a8   : > { %v6750_v40 = vsel %vm2257_vm10, %v6749_v52, %v12375_v42  ;;  %v6596_v8 = vrot.slane %v12372_v38, %v14705_v49  ;;  %v12476_v60 = vadd.f32 %v5517_v51, %v5516_v36  ;;  %v5245_v22 = vpop.permute.xlu1 %5244  ;;  %v5170_v1 = vpop.permute.xlu0 %5169  ;;  %v5695_v38 = vadd.f32 %v5694_v59, %v5693_v24  ;;  %v7488_v52 = vld [vmem:[%s13404_s2 + $0xc0] sm:$0xff]  ;;  %v14744_v11 = vld [vmem:[#allocation205_spill] sm:$0xff] }
 0x9a9   : > { %v5418_v37 = vmul.f32 %v7483_v9, %v5245_v22  ;;  %v6828_v28 = vrot.slane %v5245_v22, %v9664_v14  ;;  %v5403_v35 = vmul.f32 %v7484_v10, %v5170_v1  ;;  %v6754_v42 = vrot.slane %v5170_v1, %v14705_v49  ;;  %4974 = vperm.xlu1 %7122, %v14734_v61   ;;  %v14742_v48 = vld [vmem:[#allocation75_spill] sm:$0xff] }
 0x9aa   : > { %v5660_v44 = vadd.f32 %v5659_v21, %v5658_v17  ;;  %v5587_v47 = vsel %vm14735_vm9, %v5371_v18, 0.0  ;;  %v5309_v3 = vmul.f32 %v7485_v46, %v12406_v33  ;;  %4899 = vperm.xlu0 %7123, %v14736_v30   ;;  %vm14739_vm7 = vcmask 392512   ;;  %v7486_v17 = vld [vmem:[%s13404_s2 + $0x1a8] sm:$0xff]  ;;  %vm14745_vm9 = vmmov %vm14733_vm1  ;;  %v7490_v9 = vld [vmem:[%s13404_s2 + $0x40] sm:$0xff] }
 0x9ab   : > { %v5696_v26 = vsel %vm14737_vm8, %v5418_v37, 0.0  ;;  %v12495_v50 = vsel %vm2257_vm10, %v6828_v28, %v6824_v45  ;;  %v5661_v15 = vsel %vm14738_vm11, %v5403_v35, 0.0  ;;  %v12499_v24 = vsel %vm14739_vm7, %v6754_v42, %v6750_v40  ;;  %vm14740_vm0 = vmmov %vm14739_vm7  ;;  %v7491_v28 = vld [vmem:[%s13404_s2 + $0x2b0] sm:$0xff]  ;;  %v14747_v35 = vld [vmem:[#allocation86_spill] sm:$0xff] }
 0x9ac   : > { %v5355_v20 = vmul.f32 %v7486_v17, %v12288_v53  ;;  %v6597_v55 = vsel %vm14740_vm0, %v6596_v8, %v6592_v32  ;;  %v12506_v4 = vadd.f32 %v5696_v26, %v5695_v38  ;;  %v12508_v5 = vadd.f32 %v5661_v15, %v5660_v44  ;;  %v5015_v56 = vpop.permute.xlu1 %5014  ;;  %v4785_v41 = vpop.permute.xlu0 %4784  ;;  %vm14743_vm10 = vmmov %vm14733_vm1  ;;  %v14749_v44 = vld [vmem:[#allocation9_spill] sm:$0xff] }
 0x9ad   : > { %v5372_v25 = vmul.f32 %v7487_v2, %v5015_v56  ;;  %v6601_v16 = vrot.slane %v5015_v56, %v14719_v12  ;;  %v5326_v34 = vmul.f32 %v7488_v52, %v4785_v41  ;;  %v6374_v32 = vrot.slane %v4785_v41, %v14741_v7  ;;  %5284 = vperm.xlu1 %7122, %v14742_v48   ;;  %vm14746_vm8 = vmmov %vm14733_vm1  ;;  %v14753_v41 = vld [vmem:[#allocation76_spill] sm:$0xff]  ;;  %v14756_v52 = vld [vmem:[#allocation94_spill] sm:$0xff] }
 0x9ae   : > { %v5588_v31 = vadd.f32 %v5587_v47, %v5586_v19  ;;  %v5443_v36 = vsel %vm14743_vm10, %v5309_v3, 0.0  ;;  %v6290_v29 = vrot.slane %v12406_v33, %v14722_v23  ;;  %v5356_v18 = vmul.f32 %v7489_v0, %v12441_v6  ;;  %5209 = vperm.xlu0 %7123, %v14744_v11   ;;  %vm14748_vm11 = vmmov %vm14733_vm1 }
 0x9af   : > { %v5589_v59 = vsel %vm14733_vm1, %v5372_v25, 0.0  ;;  %v12529_v21 = vsel %vm2271_vm12, %v6601_v16, %v6597_v55  ;;  %v5482_v19 = vsel %vm14745_vm9, %v5326_v34, 0.0  ;;  %v12534_v51 = vsel %vm2285_vm14, %v6374_v32, %v12398_v57  ;;  %vm14750_vm7 = vmmov %vm14733_vm1  ;;  %v14754_v25 = vld [vmem:[#allocation89_spill] sm:$0xff]  ;;  %v14755_v16 = vld [vmem:[#allocation151_spill] sm:$0xff] }
 0x9b0   : > { %v5550_v33 = vsel %vm14746_vm8, %v5355_v20, 0.0  ;;  %v6517_v45 = vrot.slane %v12288_v53, %v14705_v49  ;;  %v12539_v40 = vadd.f32 %v5589_v59, %v5588_v31  ;;  %v12542_v8 = vadd.f32 %v5482_v19, %v12404_v63  ;;  %v4705_v22 = vpop.permute.xlu1 %4704  ;;  %v5095_v1 = vpop.permute.xlu0 %5094  ;;  %vm14751_vm0 = vmmov %vm14733_vm1  ;;  %v7492_v20 = vld [vmem:[%s13404_s2 + $0x1b8] sm:$0xff]  ;;  %v14759_v59 = vld [vmem:[#allocation88_spill] sm:$0xff] }
 0x9b1   : > { %v5310_v37 = vmul.f32 %v7490_v9, %v4705_v22  ;;  %v6295_v57 = vrot.slane %v4705_v22, %v14741_v7  ;;  %v5388_v10 = vmul.f32 %v7491_v28, %v5095_v1  ;;  %v6680_v53 = vrot.slane %v5095_v1, %v14719_v12  ;;  %5054 = vperm.xlu1 %7122, %v14747_v35   ;;  %vm14757_vm1 = vmmov %vm14751_vm0  ;;  %v14760_v19 = vld [vmem:[#allocation130_spill] sm:$0xff] }
 0x9b2   : > { %v5444_v63 = vadd.f32 %v5443_v36, %v12454_v27  ;;  %v6291_v42 = vsel %vm2278_vm13, %v6290_v29, %v12446_v54  ;;  %v5552_v61 = vsel %vm14748_vm11, %v5356_v18, 0.0  ;;  %v6522_v38 = vrot.slane %v12441_v6, %v14719_v12  ;;  %5134 = vperm.xlu0 %7123, %v14749_v44   ;;  %vm14758_vm9 = vmmov %vm14751_vm0  ;;  %v14766_v44 = vld [vmem:[#allocation31_spill] sm:$0xff] }
 0x9b3   : > { %v5445_v47 = vsel %vm14750_vm7, %v5310_v37, 0.0  ;;  %v12562_v46 = vsel %vm2285_vm14, %v6295_v57, %v6291_v42  ;;  %v5626_v3 = vsel %vm14751_vm0, %v5388_v10, 0.0  ;;  %v12567_v27 = vsel %vm2271_vm12, %v6680_v53, %v12431_v58  ;;  %v14761_v37 = vld [vmem:[#allocation133_spill] sm:$0xff]  ;;  %v14762_v57 = vld [vmem:[#allocation64_spill] sm:$0xff]  ;;  %vm14763_vm8 = vmmov %vm14751_vm0 }
 0x9b4   : > { %v5551_v54 = vadd.f32 %v5550_v33, %v12354_v13  ;;  %vm14752_vm10 = vcmask 392512   ;;  %v12572_v26 = vadd.f32 %v5445_v47, %v5444_v63  ;;  %v12575_v6 = vadd.f32 %v5626_v3, %v12439_v62  ;;  %v4940_v15 = vpop.permute.xlu1 %4939  ;;  %v4865_v17 = vpop.permute.xlu0 %4864  ;;  %v7493_v13 = vld [vmem:[%s13404_s2 + $0x140] sm:$0xff]  ;;  %vm14765_vm7 = vmmov %vm14751_vm0 }
 0x9b5   : > { %v6518_v30 = vsel %vm14752_vm10, %v6517_v45, %v12345_v39  ;;  %v5357_v55 = vmul.f32 %v7492_v20, %v4940_v15  ;;  %v6527_v58 = vrot.slane %v4940_v15, %v14722_v23  ;;  %v5342_v56 = vmul.f32 %v7493_v13, %v4865_v17  ;;  %4979 = vperm.xlu1 %7122, %v14753_v41   ;;  %v7494_v45 = vld [vmem:[%s13404_s2 + $0x3a8] sm:$0xff]  ;;  %vm14764_vm11 = vmmov %vm14752_vm10 }
 0x9b6   : > { %v6453_v39 = vrot.slane %v4865_v17, %v14741_v7  ;;  %v5553_v62 = vadd.f32 %v5552_v61, %v5551_v54  ;;  %v6523_v2 = vsel %vm2271_vm12, %v6522_v38, %v6518_v30  ;;  %5059 = vperm.xlu0 %7123, %v14754_v25   ;;  %v4659_v34 = vmul.f32 %v14756_v52, %v14755_v16  ;;  %vm14769_vm10 = vmmov %vm14751_vm0 }
 0x9b7   : > { %v5554_v32 = vsel %vm14757_vm1, %v5357_v55, 0.0  ;;  %v12592_v48 = vsel %vm2278_vm13, %v6527_v58, %v6523_v2  ;;  %v5519_v31 = vsel %vm14758_vm9, %v5342_v56, 0.0  ;;  %v4627_v33 = vmul.f32 %v14760_v19, %v14759_v59  ;;  %v14768_v55 = vld [vmem:[#allocation155_spill] sm:$0xff]  ;;  %v7498_v2 = vld [vmem:[%s13404_s2 + $0x48] sm:$0xff]  ;;  %vm14770_vm1 = vmmov %vm14751_vm0 }
 0x9b8   : > { %v12597_v36 = vsel %vm2285_vm14, %v6453_v39, %v12468_v43  ;;  %v12599_v29 = vadd.f32 %v5554_v32, %v5553_v62  ;;  %v12602_v0 = vadd.f32 %v5519_v31, %v12476_v60  ;;  %v5250_v18 = vpop.permute.xlu1 %5249  ;;  %v5175_v11 = vpop.permute.xlu0 %5174  ;;  %v7495_v43 = vld [vmem:[%s13404_s2 + $0x330] sm:$0xff]  ;;  %v4643_v28 = vmul.f32 %v14762_v57, %v14761_v37  ;;  %vm14772_vm9 = vmmov %vm14751_vm0 }
 0x9b9   : > { %v5419_v22 = vmul.f32 %v7494_v45, %v5250_v18  ;;  %v6833_v1 = vrot.slane %v5250_v18, %v14705_v49  ;;  %v5404_v9 = vmul.f32 %v7495_v43, %v5175_v11  ;;  %v6759_v60 = vrot.slane %v5175_v11, %v14719_v12  ;;  %5289 = vperm.xlu1 %7122, %v4659_v34   ;;  %v14771_v31 = vld [vmem:[#allocation93_spill] sm:$0xff] }
 0x9ba   : > { %5139 = vperm.xlu0 %7123, %v4627_v33   ;;  %v4644_v47 = vmul.f32 %v14762_v57, %v14766_v44  ;;  %v4660_v58 = vmul.f32 %v14756_v52, %v14768_v55  ;;  %v4661_v18 = vmul.f32 %v14756_v52, %v14771_v31  ;;  %v7134_v31 = vld [vmem:[%s13411_s9 + $0x38] sm:$0xff]  }
 0x9bb   : > { %v5698_v10 = vsel %vm14763_vm8, %v5419_v22, 0.0  ;;  %v12619_v53 = vsel %vm14764_vm11, %v6833_v1, %v12495_v50  ;;  %v5663_v35 = vsel %vm14765_vm7, %v5404_v9, 0.0  ;;  %v12624_v63 = vsel %vm2271_vm12, %v6759_v60, %v12499_v24  ;;  %v7496_v50 = vld [vmem:[%s13404_s2 + $0x238] sm:$0xff]  ;;  %v7497_v24 = vld [vmem:[%s13404_s2 + $0xc8] sm:$0xff]  ;;  %v7500_v22 = vld [vmem:[%s13404_s2 + $0x1c0] sm:$0xff]  ;;  %7082 = vmatpush3.bf16.msra.mxu1 %v7134_v31 }
 0x9bc   : > { %v5699_v42 = vadd.f32 %v5698_v10, %v12506_v4  ;;  %v12628_v61 = vadd.f32 %v5663_v35, %v12508_v5  ;;  %v5020_v38 = vpop.permute.xlu1 %5019  ;;  %v4790_v30 = vpop.permute.xlu0 %4789  ;;  %v14767_v5 = vld [vmem:[#allocation195_spill] sm:$0xff]  ;;  %vm14773_vm8 = vmmov %vm14751_vm0  ;;  %v7502_v35 = vld [vmem:[%s13404_s2 + $0x3b0] sm:$0xff] }
 0x9bd   : > { %v5373_v3 = vmul.f32 %v7496_v50, %v5020_v38  ;;  %v6606_v54 = vrot.slane %v5020_v38, %v14722_v23  ;;  %5214 = vperm.xlu1 %7122, %v4643_v28   ;;  %v5327_v4 = vmul.f32 %v7497_v24, %v4790_v30  ;;  %v6379_v15 = vrot.slane %v4790_v30, %v14767_v5  ;;  %vm14774_vm11 = vmmov %vm14751_vm0 }
 0x9be   : > { %5219 = vperm.xlu0 %7123, %v4644_v47   ;;  %vm14775_vm7 = vmmov %vm14751_vm0 }
 0x9bf   : > { %v5591_v17 = vsel %vm14751_vm0, %v5373_v3, 0.0  ;;  %v6607_v20 = vsel %vm2278_vm13, %v6606_v54, %v12529_v21  ;;  %v5484_v56 = vsel %vm14769_vm10, %v5327_v4, 0.0  ;;  %v6380_v39 = vsel %vm2292_vm15, %v6379_v15, %v12534_v51  ;;  %v7504_v4 = vld [vmem:[%s13404_s2 + $0x240] sm:$0xff]  ;;  %vm14778_vm10 = vmmov %vm14751_vm0 }
 0x9c0   : > { %v5592_v13 = vadd.f32 %v5591_v17, %v12539_v40  ;;  %v4710_v41 = vpop.permute.xlu1 %4709  ;;  %v5485_v62 = vadd.f32 %v5484_v56, %v12542_v8  ;;  %v5100_v16 = vpop.permute.xlu0 %5099  ;;  %v7499_v40 = vld [vmem:[%s13404_s2 + $0x2b8] sm:$0xff] }
 0x9c1   : > { %v5311_v25 = vmul.f32 %v7498_v2, %v4710_v41  ;;  %v6300_v21 = vrot.slane %v4710_v41, %v14767_v5  ;;  %5294 = vperm.xlu1 %7122, %v4660_v58   ;;  %v5389_v34 = vmul.f32 %v7499_v40, %v5100_v16  ;;  %v6685_v32 = vrot.slane %v5100_v16, %v14722_v23  ;;  %v14776_v58 = vld [vmem:[#allocation196_spill] sm:$0xff]  ;;  %v14780_v16 = vld [vmem:[#allocation90_spill] sm:$0xff] }
 0x9c2   : > { %v5864_v40 = vcombine.high %v14780_v16, %v14780_v16 }
 0x9c3   : > { %v5447_v51 = vsel %vm14770_vm1, %v5311_v25, 0.0  ;;  %v6301_v8 = vsel %vm2292_vm15, %v6300_v21, %v12562_v46  ;;  %v5628_v59 = vsel %vm14772_vm9, %v5389_v34, 0.0  ;;  %v6686_v19 = vsel %vm2278_vm13, %v6685_v32, %v12567_v27  ;;  %v7506_v32 = vld [vmem:[%s13404_s2 + $0x50] sm:$0xff]  ;;  %vm14781_vm9 = vmmov %vm14751_vm0 }
 0x9c4   : > { %v5448_v11 = vadd.f32 %v5447_v51, %v12572_v26  ;;  %v4945_v33 = vpop.permute.xlu1 %4944  ;;  %v5629_v45 = vadd.f32 %v5628_v59, %v12575_v6  ;;  %v4870_v43 = vpop.permute.xlu0 %4869  ;;  %v7501_v26 = vld [vmem:[%s13404_s2 + $0x148] sm:$0xff]  ;;  %vm14779_vm1 = vcmask 720512  }
 0x9c5   : > { %v5358_v1 = vmul.f32 %v7500_v22, %v4945_v33  ;;  %v6532_v46 = vrot.slane %v4945_v33, %v14741_v7  ;;  %5299 = vperm.xlu1 %7122, %v4661_v18   ;;  %v5343_v52 = vmul.f32 %v7501_v26, %v4870_v43  ;;  %v6458_v9 = vrot.slane %v4870_v43, %v14767_v5  ;;  %v14784_v26 = vld [vmem:[#allocation10_spill] sm:$0xff] }
 0x9c7   : > { %v5556_v27 = vsel %vm14773_vm8, %v5358_v1, 0.0  ;;  %v12679_v6 = vsel %vm2285_vm14, %v6532_v46, %v12592_v48  ;;  %v5521_v37 = vsel %vm14774_vm11, %v5343_v52, 0.0  ;;  %v12687_v57 = vsel %vm2292_vm15, %v6458_v9, %v12597_v36  ;;  %vm14782_vm8 = vmmov %vm14779_vm1 }
 0x9c8   : > { %v12682_v60 = vadd.f32 %v5556_v27, %v12599_v29  ;;  %v5255_v28 = vpop.permute.xlu1 %5254  ;;  %v12690_v10 = vadd.f32 %v5521_v37, %v12602_v0  ;;  %v5180_v44 = vpop.permute.xlu0 %5179  ;;  %v7503_v29 = vld [vmem:[%s13404_s2 + $0x338] sm:$0xff]  ;;  %vm14783_vm11 = vmmov %vm14751_vm0  ;;  %v12759_v52 = vrot.slane %v5864_v40, %v14784_v26  ;;  %v14785_v9 = vmov 0.0  }
 0x9c9   : > { %v5420_v38 = vmul.f32 %v7502_v35, %v5255_v28  ;;  %v6838_v48 = vrot.slane %v5255_v28, %v14719_v12  ;;  %v5405_v47 = vmul.f32 %v7503_v29, %v5180_v44  ;;  %v6764_v36 = vrot.slane %v5180_v44, %v14722_v23  ;;  %7083 = vmatprep.subr.bf16.mxu1 %v14785_v9  ;;  %v7509_v35 = vld [vmem:[%s13404_s2 + $0x150] sm:$0xff] }
 0x9cb   : > { %v5700_v50 = vsel %vm14775_vm7, %v5420_v38, 0.0  ;;  %v12703_v0 = vsel %vm2271_vm12, %v6838_v48, %v12619_v53  ;;  %v5665_v54 = vsel %vm14751_vm0, %v5405_v47, 0.0  ;;  %v12710_v12 = vsel %vm2278_vm13, %v6764_v36, %v12624_v63  ;;  %vm14777_vm12 = vmmov %vm14751_vm0 }
 0x9cc   : > { %v12705_v3 = vadd.f32 %v5700_v50, %v5699_v42  ;;  %v5025_v30 = vpop.permute.xlu1 %5024  ;;  %v12713_v24 = vadd.f32 %v5665_v54, %v12628_v61  ;;  %v4795_v17 = vpop.permute.xlu0 %4794  ;;  %v7505_v42 = vld [vmem:[%s13404_s2 + $0xd0] sm:$0xff]  ;;  %vm14786_vm7 = vmmov %vm14751_vm0 }
 0x9cd   : > { %v5374_v15 = vmul.f32 %v7504_v4, %v5025_v30  ;;  %v6611_v53 = vrot.slane %v5025_v30, %v14741_v7  ;;  %v5328_v55 = vmul.f32 %v7505_v42, %v4795_v17  ;;  %v6384_v63 = vrot.slane %v4795_v17, %v14776_v58  ;;  %v7510_v4 = vld [vmem:[%s13404_s2 + $0x3b8] sm:$0xff] }
 0x9cf   : > { %v5593_v56 = vsel %vm14777_vm12, %v5374_v15, 0.0  ;;  %v12725_v61 = vsel %vm2285_vm14, %v6611_v53, %v6607_v20  ;;  %v5486_v2 = vsel %vm14778_vm10, %v5328_v55, 0.0  ;;  %v12731_v25 = vsel %vm14779_vm1, %v6384_v63, %v6380_v39  ;;  %v7507_v39 = vld [vmem:[%s13404_s2 + $0x2c0] sm:$0xff]  ;;  %vm14787_vm12 = vmmov %vm14779_vm1 }
 0x9d0   : > { %v12727_v41 = vadd.f32 %v5593_v56, %v5592_v13  ;;  %v4715_v21 = vpop.permute.xlu1 %4714  ;;  %v12735_v34 = vadd.f32 %v5486_v2, %v5485_v62  ;;  %v5105_v13 = vpop.permute.xlu0 %5104  ;;  %vm14788_vm10 = vmmov %vm14751_vm0 }
 0x9d1   : > { %v5312_v51 = vmul.f32 %v7506_v32, %v4715_v21  ;;  %v6305_v20 = vrot.slane %v4715_v21, %v14776_v58  ;;  %v5390_v18 = vmul.f32 %v7507_v39, %v5105_v13  ;;  %v6690_v62 = vrot.slane %v5105_v13, %v14741_v7  ;;  %vm14789_vm1 = vmmov %vm14751_vm0 }
 0x9d3   : > { %v5449_v59 = vsel %vm14781_vm9, %v5312_v51, 0.0  ;;  %v12750_v33 = vsel %vm14782_vm8, %v6305_v20, %v6301_v8  ;;  %v5630_v1 = vsel %vm14783_vm11, %v5390_v18, 0.0  ;;  %v12756_v46 = vsel %vm2285_vm14, %v6690_v62, %v6686_v19  ;;  %v7508_v8 = vld [vmem:[%s13404_s2 + $0x1c8] sm:$0xff]  ;;  %v5813_v19 = vld [vmem:[%s13405_s3 + $0x70] sm:$0xff]  ;;  %vm14790_vm9 = vmmov %vm14751_vm0 }
 0x9d4   : > { %v12752_v22 = vadd.f32 %v5449_v59, %v5448_v11  ;;  %v4950_v43 = vpop.permute.xlu1 %4949  ;;  %v5631_v27 = vadd.f32 %v5630_v1, %v5629_v45  ;;  %v4875_v28 = vpop.permute.xlu0 %4874  ;;  %v5919_v54 = vmul.f32 %v12759_v52, %v5813_v19  ;;  %v14791_v51 = vld [vmem:[#allocation197_spill] sm:$0xff]  ;;  %vm14793_vm8 = vmmov %vm14751_vm0  ;;  %vm14794_vm11 = vcmask 786112   ;;  %v7514_v1 = vld [vmem:[%s13404_s2 + $0x58] sm:$0xff] }
 0x9d5   : > { %v5359_v37 = vmul.f32 %v7508_v8, %v4950_v43  ;;  %v6537_v11 = vrot.slane %v4950_v43, %v14767_v5  ;;  %v5344_v38 = vmul.f32 %v7509_v35, %v4875_v28  ;;  %v6463_v48 = vrot.slane %v4875_v28, %v14776_v58 }
 0x9d6   : > { %v5963_v2 = vsel %vm14790_vm9, %v5919_v54, 0.0  ;;  %v7517_v54 = vld [vmem:[%s13404_s2 + $0x158] sm:$0xff] }
 0x9d7   : > { %v5558_v45 = vsel %vm14786_vm7, %v5359_v37, 0.0  ;;  %v6538_v44 = vsel %vm2292_vm15, %v6537_v11, %v12679_v6  ;;  %v5523_v47 = vsel %vm14751_vm0, %v5344_v38, 0.0  ;;  %v12780_v36 = vsel %vm14787_vm12, %v6463_v48, %v12687_v57  ;;  %vm14795_vm7 = vmmov %vm14751_vm0 }
 0x9d8   : > { %v5559_v29 = vadd.f32 %v5558_v45, %v12682_v60  ;;  %v5260_v50 = vpop.permute.xlu1 %5259  ;;  %v5524_v30 = vadd.f32 %v5523_v47, %v12690_v10  ;;  %v5185_v53 = vpop.permute.xlu0 %5184  ;;  %v7511_v60 = vld [vmem:[%s13404_s2 + $0x340] sm:$0xff]  ;;  %vm14797_vm12 = vmmov %vm14789_vm1  ;;  %v7516_v47 = vld [vmem:[%s13404_s2 + $0x1d0] sm:$0xff] }
 0x9d9   : > { %v5421_v15 = vmul.f32 %v7510_v4, %v5260_v50  ;;  %v6843_v6 = vrot.slane %v5260_v50, %v14722_v23  ;;  %v5406_v17 = vmul.f32 %v7511_v60, %v5185_v53  ;;  %v6769_v57 = vrot.slane %v5185_v53, %v14741_v7  ;;  %vm14800_vm9 = vmmov %vm14795_vm7 }
 0x9db   : > { %v5702_v42 = vsel %vm14788_vm10, %v5421_v15, 0.0  ;;  %v12795_v10 = vsel %vm2278_vm13, %v6843_v6, %v12703_v0  ;;  %v5667_v63 = vsel %vm14789_vm1, %v5406_v17, 0.0  ;;  %v12803_v23 = vsel %vm2285_vm14, %v6769_v57, %v12710_v12  ;;  %v7512_v0 = vld [vmem:[%s13404_s2 + $0x248] sm:$0xff]  ;;  %v7513_v12 = vld [vmem:[%s13404_s2 + $0xd8] sm:$0xff]  ;;  %vm14792_vm13 = vmmov %vm14751_vm0 }
 0x9dc   : > { %v12798_v55 = vadd.f32 %v5702_v42, %v12705_v3  ;;  %v5030_v56 = vpop.permute.xlu1 %5029  ;;  %v12807_v21 = vadd.f32 %v5667_v63, %v12713_v24  ;;  %v4800_v40 = vpop.permute.xlu0 %4799  ;;  %vm14796_vm0 = vmmov %vm14794_vm11 }
 0x9dd   : > { %v5375_v16 = vmul.f32 %v7512_v0, %v5030_v56  ;;  %v6616_v3 = vrot.slane %v5030_v56, %v14767_v5  ;;  %5964 = vadd.xlane.f32.xlu0 %v5963_v2  ;;  %v5329_v32 = vmul.f32 %v7513_v12, %v4800_v40  ;;  %v6389_v20 = vrot.slane %v4800_v40, %v14791_v51  ;;  %vm14798_vm10 = vmmov %vm14789_vm1 }
 0x9de   : > { %vm14799_vm1 = vcmask 720512  }
 0x9df   : > { %v5595_v13 = vsel %vm14792_vm13, %v5375_v16, 0.0  ;;  %v12820_v24 = vsel %vm2292_vm15, %v6616_v3, %v12725_v61  ;;  %v5488_v39 = vsel %vm14793_vm8, %v5329_v32, 0.0  ;;  %v12828_v18 = vsel %vm14794_vm11, %v6389_v20, %v12731_v25  ;;  %v7515_v25 = vld [vmem:[%s13404_s2 + $0x2c8] sm:$0xff]  ;;  %vm14801_vm13 = vmmov %vm14796_vm0 }
 0x9e0   : > { %v12823_v31 = vadd.f32 %v5595_v13, %v12727_v41  ;;  %v4720_v62 = vpop.permute.xlu1 %4719  ;;  %v12831_v59 = vadd.f32 %v5488_v39, %v12735_v34  ;;  %v5110_v26 = vpop.permute.xlu0 %5109  ;;  %v5814_v41 = vld [vmem:[%s13405_s3 + $0x78] sm:$0xff]  ;;  %vm14802_vm8 = vmmov %vm14795_vm7  ;;  %v7520_v13 = vld [vmem:[%s13404_s2 + $0x250] sm:$0xff] }
 0x9e1   : > { %v5313_v43 = vmul.f32 %v7514_v1, %v4720_v62  ;;  %v6310_v61 = vrot.slane %v4720_v62, %v14791_v51  ;;  %v5391_v8 = vmul.f32 %v7515_v25, %v5110_v26  ;;  %v6695_v34 = vrot.slane %v5110_v26, %v14767_v5  ;;  %vm14803_vm11 = vmmov %vm14795_vm7 }
 0x9e2   : > { %v5920_v48 = vmul.f32 %v12759_v52, %v5814_v41 }
 0x9e3   : > { %v5451_v37 = vsel %vm14795_vm7, %v5313_v43, 0.0  ;;  %v12847_v11 = vsel %vm14796_vm0, %v6310_v61, %v12750_v33  ;;  %v5632_v19 = vsel %vm14797_vm12, %v5391_v8, 0.0  ;;  %v12855_v35 = vsel %vm2292_vm15, %v6695_v34, %v12756_v46  ;;  %vm14806_vm0 = vmmov %vm14799_vm1 }
 0x9e4   : > { %v12850_v28 = vadd.f32 %v5451_v37, %v12752_v22  ;;  %v4955_v38 = vpop.permute.xlu1 %4954  ;;  %v12858_v45 = vadd.f32 %v5632_v19, %v5631_v27  ;;  %v4880_v22 = vpop.permute.xlu0 %4879  ;;  %v7135_v27 = vld [vmem:[%s13411_s9 + $0x30] sm:$0xff]   ;;  %v5966_v57 = vsel %vm14802_vm8, %v5920_v48, 0.0  ;;  %vm14807_vm12 = vmmov %vm14795_vm7  ;;  %v7522_v19 = vld [vmem:[%s13404_s2 + $0x60] sm:$0xff] }
 0x9e5   : > { %v5360_v33 = vmul.f32 %v7516_v47, %v4955_v38  ;;  %v6542_v50 = vrot.slane %v4955_v38, %v14776_v58  ;;  %v5345_v4 = vmul.f32 %v7517_v54, %v4880_v22  ;;  %v6468_v46 = vrot.slane %v4880_v22, %v14791_v51  ;;  %7084 = vmatpush3.bf16.msra.mxu1 %v7135_v27  ;;  %v7523_v54 = vld [vmem:[%s13404_s2 + $0x1d8] sm:$0xff]  ;;  %vm14814_vm8 = vmmov %vm14795_vm7 }
 0x9e6   : > { %7085 = vmatprep.subr.bf16.mxu1 %v14785_v9 }
 0x9e7   : > { %v5560_v15 = vsel %vm14798_vm10, %v5360_v33, 0.0  ;;  %v12870_v52 = vsel %vm14799_vm1, %v6542_v50, %v6538_v44  ;;  %v5525_v53 = vsel %vm14800_vm9, %v5345_v4, 0.0  ;;  %v12880_v60 = vsel %vm14801_vm13, %v6468_v46, %v12780_v36  ;;  %v7518_v44 = vld [vmem:[%s13404_s2 + $0x3c0] sm:$0xff]  ;;  %v7519_v36 = vld [vmem:[%s13404_s2 + $0x348] sm:$0xff]  ;;  %vm14808_vm10 = vmmov %vm14795_vm7 }
 0x9e8   : > { %v12875_v6 = vadd.f32 %v5560_v15, %v5559_v29  ;;  %v5265_v17 = vpop.permute.xlu1 %5264  ;;  %v12883_v42 = vadd.f32 %v5525_v53, %v5524_v30  ;;  %v5190_v29 = vpop.permute.xlu0 %5189  ;;  %v7136_v30 = vld [vmem:[%s13411_s9 + $0x28] sm:$0xff]   ;;  %vm14810_vm1 = vmmov %vm14806_vm0  ;;  %v7138_v15 = vld [vmem:[%s13411_s9 + $0x18] sm:$0xff]  }
 0x9e9   : > { %v5422_v63 = vmul.f32 %v7518_v44, %v5265_v17  ;;  %v6848_v56 = vrot.slane %v5265_v17, %v14741_v7  ;;  %5967 = vadd.xlane.f32.xlu1 %v5966_v57  ;;  %v5407_v2 = vmul.f32 %v7519_v36, %v5190_v29  ;;  %v6774_v0 = vrot.slane %v5190_v29, %v14767_v5  ;;  %vm14811_vm9 = vmmov %vm14795_vm7  ;;  %v7139_v17 = vld [vmem:[%s13411_s9 + $0x10] sm:$0xff]  }
 0x9ea   : > { %7086 = vmatpush3.bf16.msra.mxu1 %v7136_v30 }
 0x9eb   : > { %v5704_v16 = vsel %vm14803_vm11, %v5422_v63, 0.0  ;;  %v6849_v7 = vsel %vm2285_vm14, %v6848_v56, %v12795_v10  ;;  %v5669_v40 = vsel %vm14795_vm7, %v5407_v2, 0.0  ;;  %v12906_v12 = vsel %vm2292_vm15, %v6774_v0, %v12803_v23  ;;  %v7521_v23 = vld [vmem:[%s13404_s2 + $0xe0] sm:$0xff]  ;;  %7087 = vmatprep.subr.bf16.mxu1 %v14785_v9  ;;  %vm14805_vm14 = vmmov %vm14795_vm7  ;;  %v14812_v63 = vld [vmem:[#allocation5_spill] sm:$0xff] }
 0x9ec   : > { %v12901_v3 = vadd.f32 %v5704_v16, %v12798_v55  ;;  %v5035_v32 = vpop.permute.xlu1 %5034  ;;  %v12909_v20 = vadd.f32 %v5669_v40, %v12807_v21  ;;  %v4805_v62 = vpop.permute.xlu0 %4804  ;;  %v7137_v55 = vld [vmem:[%s13411_s9 + $0x20] sm:$0xff]   ;;  %v14804_v21 = vld [vmem:[#allocation198_spill] sm:$0xff]  ;;  %v7524_v16 = vld [vmem:[%s13404_s2 + $0x2d0] sm:$0xff] }
 0x9ed   : > { %v5376_v39 = vmul.f32 %v7520_v13, %v5035_v32  ;;  %v6621_v10 = vrot.slane %v5035_v32, %v14776_v58  ;;  %v5330_v1 = vmul.f32 %v7521_v23, %v4805_v62  ;;  %v6394_v43 = vrot.slane %v4805_v62, %v14804_v21  ;;  %v7525_v40 = vld [vmem:[%s13404_s2 + $0x160] sm:$0xff]  ;;  %v7526_v13 = vld [vmem:[%s13404_s2 + $0x3c8] sm:$0xff]  ;;  %v7527_v23 = vld [vmem:[%s13404_s2 + $0x350] sm:$0xff] }
 0x9ee   : > { %7088 = vmatpush3.bf16.msra.mxu1 %v7137_v55  ;;  %vm14815_vm11 = vmmov %vm14795_vm7 }
 0x9ef   : > { %v5597_v61 = vsel %vm14805_vm14, %v5376_v39, 0.0  ;;  %v12926_v26 = vsel %vm14806_vm0, %v6621_v10, %v12820_v24  ;;  %v5490_v25 = vsel %vm14807_vm12, %v5330_v1, 0.0  ;;  %v12934_v8 = vsel %vm2313_vm3, %v6394_v43, %v12828_v18  ;;  %7089 = vmatprep.subr.bf16.mxu1 %v14785_v9  ;;  %v7528_v43 = vld [vmem:[%s13404_s2 + $0x258] sm:$0xff]  ;;  %vm14817_vm14 = vmmov %vm14795_vm7 }
 0x9f0   : > { %v12929_v41 = vadd.f32 %v5597_v61, %v12823_v31  ;;  %v4725_v34 = vpop.permute.xlu1 %4724  ;;  %v12937_v37 = vadd.f32 %v5490_v25, %v12831_v59  ;;  %v14809_v59 = vld [vmem:[#allocation7_spill] sm:$0xff]  ;;  %vm14818_vm12 = vmmov %vm14795_vm7 }
 0x9f1   : > { %v5314_v38 = vmul.f32 %v7522_v19, %v4725_v34  ;;  %v6315_v24 = vrot.slane %v4725_v34, %v14804_v21  ;;  %v5115_v48 = vpop.permute.xlu0 %5114 }
 0x9f2   : > { %v6700_v31 = vrot.slane %v5115_v48, %v14776_v58  ;;  %7090 = vmatpush3.bf16.msra.mxu1 %v7138_v15 }
 0x9f3   : > { %v5453_v18 = vsel %vm14808_vm10, %v5314_v38, 0.0  ;;  %v12948_v47 = vsel %vm2313_vm3, %v6315_v24, %v12847_v11  ;;  %6084 = vrot.lane.b32.xlu0 %v14809_v59, %s7581_s1  ;;  %7091 = vmatprep.subr.bf16.mxu1 %v14785_v9  ;;  %v7529_v38 = vld [vmem:[%s13404_s2 + $0xe8] sm:$0xff]  ;;  %vm14819_vm10 = vmmov %vm14801_vm13 }
 0x9f4   : > { %v12952_v33 = vadd.f32 %v5453_v18, %v12850_v28  ;;  %v12956_v50 = vsel %vm14810_vm1, %v6700_v31, %v12855_v35  ;;  %v4960_v22 = vpop.permute.xlu1 %4959  ;;  %v7530_v59 = vld [vmem:[%s13404_s2 + $0x68] sm:$0xff]  ;;  %vm14820_vm1 = vmmov %vm14795_vm7 }
 0x9f5   : > { %v5361_v4 = vmul.f32 %v7523_v54, %v4960_v22  ;;  %v6547_v46 = vrot.slane %v4960_v22, %v14791_v51  ;;  %v4885_v11 = vpop.permute.xlu0 %4884 }
 0x9f6   : > { %7092 = vmatpush3.bf16.msra.mxu1 %v7139_v17  ;;  %v5346_v32 = vmul.f32 %v7525_v40, %v4885_v11  ;;  %v6473_v55 = vrot.slane %v4885_v11, %v14804_v21  ;;  %v14816_v11 = vld [vmem:[#allocation199_spill] sm:$0xff] }
 0x9f7   : > { %v5562_v28 = vsel %vm14811_vm9, %v5361_v4, 0.0  ;;  %v12968_v27 = vsel %vm14801_vm13, %v6547_v46, %v12870_v52  ;;  %7093 = vmatprep.subr.bf16.mxu1 %v14785_v9  ;;  %vm14821_vm9 = vmmov %vm14820_vm1 }
 0x9f8   : > { %v12971_v35 = vadd.f32 %v5562_v28, %v12875_v6  ;;  %v5270_v53 = vpop.permute.xlu1 %5269  ;;  %v7140_v6 = vld [vmem:[%s13411_s9 + $0x8] sm:$0xff]   ;;  %v5527_v25 = vsel %vm14814_vm8, %v5346_v32, 0.0  ;;  %v6474_v4 = vsel %vm2313_vm3, %v6473_v55, %v12880_v60  ;;  %vm14822_vm13 = vmmov %vm14819_vm10 }
 0x9f9   : > { %v6853_v57 = vrot.slane %v5270_v53, %v14767_v5  ;;  %v5195_v44 = vpop.permute.xlu0 %5194  ;;  %v7141_v5 = vld [vmem:[%s13411_s9] sm:$0xff]   ;;  %vm14824_vm8 = vmmov %vm14820_vm1 }
 0x9fa   : > { %6090 = vrot.lane.b32.xlu1 %v14812_v63, %s7581_s1  ;;  %7094 = vmatpush3.bf16.msra.mxu1 %v7140_v6  ;;  %v5408_v1 = vmul.f32 %v7527_v23, %v5195_v44  ;;  %v6779_v19 = vrot.slane %v5195_v44, %v14776_v58  ;;  %v7532_v6 = vld [vmem:[%s13404_s2 + $0x1e0] sm:$0xff] }
 0x9fb   : > { %v12980_v56 = vsel %vm2292_vm15, %v6853_v57, %v6849_v7  ;;  %7095 = vmatprep.subr.bf16.mxu1 %v14785_v9  ;;  %v5392_v7 = vmul.f32 %v7524_v16, %v5115_v48  ;;  %v5423_v9 = vmul.f32 %v7526_v13, %v5270_v53  ;;  %vm14813_vm15 = vmmov %vm14795_vm7  ;;  %v5528_v53 = vadd.f32 %v5527_v25, %v12883_v42  ;;  %v7537_v25 = vld [vmem:[%s13404_s2 + $0xf0] sm:$0xff] }
 0x9fc   : > { %v5040_v52 = vpop.permute.xlu1 %5039  ;;  %v5671_v46 = vsel %vm14795_vm7, %v5408_v1, 0.0  ;;  %v6780_v60 = vsel %vm14806_vm0, %v6779_v19, %v12906_v12  ;;  %v7538_v19 = vld [vmem:[%s13404_s2 + $0x70] sm:$0xff]  ;;  %vm14826_vm7 = vmmov %vm14806_vm0 }
 0x9fd   : > { %v4810_v29 = vpop.permute.xlu0 %4809  ;;  %v5634_v62 = vsel %vm14813_vm15, %v5392_v7, 0.0  ;;  %v5377_v61 = vmul.f32 %v7528_v43, %v5040_v52  ;;  %v5706_v34 = vsel %vm14815_vm11, %v5423_v9, 0.0  ;;  %v6626_v18 = vrot.slane %v5040_v52, %v14791_v51  ;;  %vm14823_vm15 = vmmov %vm14820_vm1 }
 0x9fe   : > { %7096 = vmatpush3.bf16.msra.mxu1 %v7141_v5  ;;  %v5331_v24 = vmul.f32 %v7529_v38, %v4810_v29  ;;  %v5635_v31 = vadd.f32 %v5634_v62, %v12858_v45  ;;  %v6399_v15 = vrot.slane %v4810_v29, %v14816_v11  ;;  %v7531_v45 = vld [vmem:[%s13404_s2 + $0x2d8] sm:$0xff]  ;;  %v5707_v17 = vadd.f32 %v5706_v34, %v12901_v3  ;;  %v7533_v5 = vld [vmem:[%s13404_s2 + $0x168] sm:$0xff]  ;;  %vm14825_vm11 = vmmov %vm14820_vm1 }
 0x9ff   : > { %v5599_v57 = vsel %vm14817_vm14, %v5377_v61, 0.0  ;;  %v5672_v3 = vadd.f32 %v5671_v46, %v12909_v20  ;;  %vm14828_vm14 = vmmov %vm14820_vm1 }
 0xa00   : > { %v4730_v36 = vpop.permute.xlu1 %4729  ;;  %v5492_v63 = vsel %vm14818_vm12, %v5331_v24, 0.0  ;;  %v5600_v7 = vadd.f32 %v5599_v57, %v12929_v41  ;;  %v6400_v40 = vsel %vm2320_vm4, %v6399_v15, %v12934_v8  ;;  %vm14829_vm0 = vmmov %vm14820_vm1 }
 0xa01   : > { %v12989_v2 = vpop.permute.xlu0 %5119  ;;  %v5315_v22 = vmul.f32 %v7530_v59, %v4730_v36  ;;  %v6320_v44 = vrot.slane %v4730_v36, %v14816_v11  ;;  %v6627_v36 = vsel %vm14819_vm10, %v6626_v18, %v12926_v26  ;;  %v7534_v26 = vld [vmem:[%s13404_s2 + $0x3d0] sm:$0xff]  ;;  %v5493_v13 = vadd.f32 %v5492_v63, %v12937_v37  ;;  %vm14830_vm12 = vmmov %vm14819_vm10 }
 0xa02   : > { %v5393_v28 = vmul.f32 %v7531_v45, %v12989_v2  ;;  %v6705_v52 = vrot.slane %v12989_v2, %v14791_v51  ;;  %v14827_v45 = vld [vmem:[#allocation200_spill] sm:$0xff]  ;;  %vm14831_vm10 = vmmov %vm14829_vm0 }
 0xa03   : > { %v5455_v12 = vsel %vm14820_vm1, %v5315_v22, 0.0  ;;  %v6321_v9 = vsel %vm2320_vm4, %v6320_v44, %v12948_v47  ;;  %vm14832_vm1 = vmmov %vm14829_vm0 }
 0xa04   : > { %v12992_v0 = vpop.permute.xlu1 %4964  ;;  %v5636_v20 = vsel %vm14821_vm9, %v5393_v28, 0.0  ;;  %v5456_v8 = vadd.f32 %v5455_v12, %v12952_v33  ;;  %v6706_v55 = vsel %vm14822_vm13, %v6705_v52, %v12956_v50  ;;  %v7536_v33 = vld [vmem:[%s13404_s2 + $0x260] sm:$0xff]  ;;  %vm14833_vm9 = vmmov %vm14829_vm0 }
 0xa05   : > { %v12994_v30 = vpop.permute.xlu0 %4889  ;;  %v5362_v42 = vmul.f32 %v7532_v6, %v12992_v0  ;;  %v6552_v62 = vrot.slane %v12992_v0, %v14804_v21  ;;  %v5637_v43 = vadd.f32 %v5636_v20, %v5635_v31  ;;  %v7535_v0 = vld [vmem:[%s13404_s2 + $0x358] sm:$0xff]  ;;  %vm14834_vm13 = vmmov %vm14829_vm0 }
 0xa06   : > { %v5347_v2 = vmul.f32 %v7533_v5, %v12994_v30  ;;  %v6478_v41 = vrot.slane %v12994_v30, %v14816_v11 }
 0xa07   : > { %v5564_v23 = vsel %vm14823_vm15, %v5362_v42, 0.0  ;;  %v6553_v31 = vsel %vm2313_vm3, %v6552_v62, %v12968_v27  ;;  %vm14835_vm15 = vmmov %vm14829_vm0 }
 0xa08   : > { %v13005_v39 = vpop.permute.xlu1 %5274  ;;  %v5529_v47 = vsel %vm14824_vm8, %v5347_v2, 0.0  ;;  %v5565_v24 = vadd.f32 %v5564_v23, %v12971_v35  ;;  %v6479_v18 = vsel %vm2320_vm4, %v6478_v41, %v6474_v4  ;;  %v7542_v41 = vld [vmem:[%s13404_s2 + $0x3d8] sm:$0xff]  ;;  %vm14837_vm8 = vmmov %vm14829_vm0 }
 0xa09   : > { %v13007_v10 = vpop.permute.xlu0 %5199  ;;  %v5424_v32 = vmul.f32 %v7534_v26, %v13005_v39  ;;  %v6858_v1 = vrot.slane %v13005_v39, %v14776_v58  ;;  %v5530_v22 = vadd.f32 %v5529_v47, %v5528_v53 }
 0xa0a   : > { %v5409_v30 = vmul.f32 %v7535_v0, %v13007_v10  ;;  %v6784_v39 = vrot.slane %v13007_v10, %v14791_v51  ;;  %v7539_v10 = vld [vmem:[%s13404_s2 + $0x2e0] sm:$0xff] }
 0xa0b   : > { %v5708_v58 = vsel %vm14825_vm11, %v5424_v32, 0.0  ;;  %v6859_v46 = vsel %vm14826_vm7, %v6858_v1, %v12980_v56  ;;  %v7544_v0 = vld [vmem:[%s13404_s2 + $0x360] sm:$0xff]  ;;  %vm14838_vm11 = vmmov %vm14829_vm0 }
 0xa0c   : > { %v13023_v48 = vpop.permute.xlu1 %5044  ;;  %v5709_v27 = vadd.f32 %v5708_v58, %v5707_v17  ;;  %v5673_v4 = vsel %vm14828_vm14, %v5409_v30, 0.0  ;;  %v6785_v53 = vsel %vm14830_vm12, %v6784_v39, %v6780_v60  ;;  %v7540_v17 = vld [vmem:[%s13404_s2 + $0x1e8] sm:$0xff]  ;;  %v7541_v60 = vld [vmem:[%s13404_s2 + $0x170] sm:$0xff]  ;;  %vm14839_vm7 = vmmov %vm14829_vm0 }
 0xa0d   : > { %v13030_v54 = vpop.permute.xlu0 %4814  ;;  %v5378_v50 = vmul.f32 %v7536_v33, %v13023_v48  ;;  %v6631_v15 = vrot.slane %v13023_v48, %v14804_v21  ;;  %v13140_v12 = vadd.f32 %v5673_v4, %v5672_v3  ;;  %vm14840_vm14 = vmmov %vm14830_vm12 }
 0xa0e   : > { %v5332_v34 = vmul.f32 %v7537_v25, %v13030_v54  ;;  %v6404_v35 = vrot.slane %v13030_v54, %v14827_v45  ;;  %v7545_v25 = vld [vmem:[%s13404_s2 + $0x78] sm:$0xff]  ;;  %vm14842_vm12 = vmmov %vm14832_vm1 }
 0xa0f   : > { %v5601_v57 = vsel %vm14829_vm0, %v5378_v50, 0.0  ;;  %v13145_v2 = vsel %vm2313_vm3, %v6631_v15, %v6627_v36  ;;  %vm14841_vm0 = vcmask 1041409  }
 0xa10   : > { %v13053_v29 = vpop.permute.xlu1 %4734  ;;  %v5494_v56 = vsel %vm14831_vm10, %v5332_v34, 0.0  ;;  %v13142_v5 = vadd.f32 %v5601_v57, %v5600_v7  ;;  %vm14843_vm10 = vmmov %vm14832_vm1 }
 0xa11   : > { %v13063_v16 = vpop.permute.xlu0 %5124  ;;  %v5316_v38 = vmul.f32 %v7538_v19, %v13053_v29  ;;  %v6325_v44 = vrot.slane %v13053_v29, %v14827_v45  ;;  %v5495_v26 = vadd.f32 %v5494_v56, %v5493_v13 }
 0xa12   : > { %v5394_v59 = vmul.f32 %v7539_v10, %v13063_v16  ;;  %v6710_v48 = vrot.slane %v13063_v16, %v14804_v21  ;;  %v6405_v16 = vsel %vm2327_vm5, %v6404_v35, %v6400_v40  ;;  %v7543_v40 = vld [vmem:[%s13404_s2 + $0xf8] sm:$0xff] }
 0xa13   : > { %v5457_v52 = vsel %vm14832_vm1, %v5316_v38, 0.0  ;;  %v6326_v62 = vsel %vm2327_vm5, %v6325_v44, %v6321_v9 }
 0xa14   : > { %v4970_v37 = vpop.permute.xlu1 %4969  ;;  %v5638_v54 = vsel %vm14833_vm9, %v5394_v59, 0.0  ;;  %v5458_v32 = vadd.f32 %v5457_v52, %v5456_v8  ;;  %v13157_v7 = vsel %vm2313_vm3, %v6710_v48, %v6706_v55  ;;  %v7546_v59 = vld [vmem:[%s13404_s2 + $0x268] sm:$0xff]  ;;  %vm14844_vm9 = vcmask 1042434  }
 0xa15   : > { %v13095_v61 = vpop.permute.xlu0 %4894  ;;  %v5363_v6 = vmul.f32 %v7540_v17, %v4970_v37  ;;  %v6557_v42 = vrot.slane %v4970_v37, %v14816_v11  ;;  %v13154_v1 = vadd.f32 %v5638_v54, %v5637_v43  ;;  %v14836_v43 = vld [vmem:[#allocation113_spill] sm:$0xff] }
 0xa16   : > { %v5348_v29 = vmul.f32 %v7541_v60, %v13095_v61  ;;  %v6483_v36 = vrot.slane %v13095_v61, %v14827_v45 }
 0xa17   : > { %v5566_v9 = vsel %vm14834_vm13, %v5363_v6, 0.0  ;;  %v13166_v8 = vsel %vm2320_vm4, %v6557_v42, %v6553_v31  ;;  %v7548_v42 = vld [vmem:[%s13404_s2 + $0x178] sm:$0xff]  ;;  %vm14845_vm13 = vmmov %vm14832_vm1 }
 0xa18   : > { %v5280_v28 = vpop.permute.xlu1 %5279  ;;  %v5531_v37 = vsel %vm14835_vm15, %v5348_v29, 0.0  ;;  %v5567_v38 = vadd.f32 %v5566_v9, %v5565_v24  ;;  %v6484_v10 = vsel %vm2327_vm5, %v6483_v36, %v6479_v18  ;;  %vm14846_vm15 = vmmov %vm14832_vm1 }
 0xa19   : > { %v5205_v63 = vpop.permute.xlu0 %5204  ;;  %v5425_v23 = vmul.f32 %v7542_v41, %v5280_v28  ;;  %v6863_v55 = vrot.slane %v5280_v28, %v14791_v51  ;;  %v5532_v31 = vadd.f32 %v5531_v37, %v5530_v22  ;;  %v7550_v37 = vld [vmem:[%s13404_s2 + $0x3e0] sm:$0xff] }
 0xa1a   : > { %v5410_v30 = vmul.f32 %v7544_v0, %v5205_v63  ;;  %v6789_v33 = vrot.slane %v5205_v63, %v14804_v21 }
 0xa1b   : > { %v5710_v58 = vsel %vm14838_vm11, %v5425_v23, 0.0  ;;  %v13190_v63 = vsel %vm14840_vm14, %v6863_v55, %v6859_v46  ;;  %v7547_v46 = vld [vmem:[%s13404_s2 + $0x2e8] sm:$0xff]  ;;  %vm14848_vm11 = vmmov %vm14832_vm1 }
 0xa1c   : > { %v13148_v20 = vpop.permute.xlu1 %5049  ;;  %v5711_v44 = vadd.f32 %v5710_v58, %v5709_v27  ;;  %v5675_v56 = vsel %vm14842_vm12, %v5410_v30, 0.0  ;;  %v13195_v52 = vsel %vm2313_vm3, %v6789_v33, %v6785_v53  ;;  %vm14850_vm14 = vmmov %vm14841_vm0 }
 0xa1d   : > { %v4820_v3 = vpop.permute.xlu0 %4819  ;;  %v5379_v15 = vmul.f32 %v7546_v59, %v13148_v20  ;;  %v6636_v48 = vrot.slane %v13148_v20, %v14816_v11  ;;  %v5676_v0 = vadd.f32 %v5675_v56, %v13140_v12 }
 0xa1e   : > { %v5333_v13 = vmul.f32 %v7543_v40, %v4820_v3  ;;  %v6409_v47 = vrot.slane %v4820_v3, %v14836_v43 }
 0xa1f   : > { %v5603_v53 = vsel %vm14843_vm10, %v5379_v15, 0.0  ;;  %vm14854_vm10 = vcmask 1043459  }
 0xa20   : > { %v5496_v50 = vsel %vm14837_vm8, %v5333_v13, 0.0  ;;  %v4740_v61 = vpop.permute.xlu1 %4739  ;;  %v6410_v28 = vsel %vm2334_vm6, %v6409_v47, %v6405_v16  ;;  %v5604_v58 = vadd.f32 %v5603_v53, %v13142_v5  ;;  %vm14847_vm8 = vmmov %vm14832_vm1 }
 0xa21   : > { %v5497_v39 = vadd.f32 %v5496_v50, %v5495_v26  ;;  %v5317_v34 = vmul.f32 %v7545_v25, %v4740_v61  ;;  %v6330_v51 = vrot.slane %v4740_v61, %v14836_v43  ;;  %v5130_v19 = vpop.permute.xlu0 %5129  ;;  %v7549_v26 = vld [vmem:[%s13404_s2 + $0x1f0] sm:$0xff]  ;;  %v7551_v50 = vld [vmem:[%s13404_s2 + $0x368] sm:$0xff] }
 0xa22   : > { %v5395_v27 = vmul.f32 %v7547_v46, %v5130_v19  ;;  %v6715_v20 = vrot.slane %v5130_v19, %v14816_v11 }
 0xa23   : > { %v5498_v35 = vrot.slane %v5497_v39, 4  ;;  %v5459_v4 = vsel %vm14839_vm7, %v5317_v34, 0.0  ;;  %v6331_v57 = vsel %vm2334_vm6, %v6330_v51, %v6326_v62  ;;  %vm14849_vm7 = vmmov %vm14832_vm1 }
 0xa24   : > { %v5460_v24 = vadd.f32 %v5459_v4, %v5458_v32  ;;  %v6885_v18 = vsel %vm14841_vm0, %v6410_v28, %v6331_v57  ;;  %v4975_v22 = vpop.permute.xlu1 %4974  ;;  %v5640_v33 = vsel %vm14845_vm13, %v5395_v27, 0.0  ;;  %v6716_v12 = vsel %vm2320_vm4, %v6715_v20, %v13157_v7  ;;  %v7552_v7 = vld [vmem:[%s13404_s2 + $0x270] sm:$0xff]  ;;  %v7555_v20 = vld [vmem:[%s13404_s2 + $0x278] sm:$0xff]  ;;  %vm14852_vm0 = vmmov %vm14832_vm1 }
 0xa25   : > { %v5499_v54 = vadd.f32 %v5498_v35, %v5497_v39  ;;  %v4900_v17 = vpop.permute.xlu0 %4899  ;;  %v5364_v32 = vmul.f32 %v7549_v26, %v4975_v22  ;;  %v6562_v41 = vrot.slane %v4975_v22, %v14827_v45  ;;  %v6637_v39 = vsel %vm2320_vm4, %v6636_v48, %v13145_v2  ;;  %vm14853_vm12 = vmmov %vm14852_vm0 }
 0xa26   : > { %v5461_v6 = vrot.slane %v5460_v24, 4  ;;  %v5349_v60 = vmul.f32 %v7548_v42, %v4900_v17  ;;  %v6488_v29 = vrot.slane %v4900_v17, %v14836_v43  ;;  %v5641_v59 = vadd.f32 %v5640_v33, %v13154_v1  ;;  %vm14857_vm13 = vmmov %vm14852_vm0 }
 0xa27   : > { %v5500_v16 = vrot.slane %v5499_v54, 2  ;;  %v5568_v25 = vsel %vm14846_vm15, %v5364_v32, 0.0  ;;  %v6563_v15 = vsel %vm2327_vm5, %v6562_v41, %v13166_v8  ;;  %v7553_v8 = vld [vmem:[%s13404_s2 + $0x2f0] sm:$0xff]  ;;  %vm14858_vm15 = vmmov %vm14852_vm0 }
 0xa28   : > { %v5462_v62 = vadd.f32 %v5461_v6, %v5460_v24  ;;  %v5533_v23 = vsel %vm14832_vm1, %v5349_v60, 0.0  ;;  %v6489_v3 = vsel %vm2334_vm6, %v6488_v29, %v6484_v10  ;;  %v5285_v36 = vpop.permute.xlu1 %5284  ;;  %v5569_v4 = vadd.f32 %v5568_v25, %v5567_v38  ;;  %v7554_v29 = vld [vmem:[%s13404_s2 + $0x1f8] sm:$0xff] }
 0xa29   : > { %v5501_v40 = vadd.f32 %v5500_v16, %v5499_v54  ;;  %v5534_v13 = vadd.f32 %v5533_v23, %v5532_v31  ;;  %v6886_v9 = vsel %vm14844_vm9, %v6489_v3, %v6885_v18  ;;  %v5426_v47 = vmul.f32 %v7550_v37, %v5285_v36  ;;  %v5210_v55 = vpop.permute.xlu0 %5209 }
 0xa2a   : > { %v5463_v30 = vrot.slane %v5462_v62, 2  ;;  %v5411_v61 = vmul.f32 %v7551_v50, %v5210_v55  ;;  %v6868_v35 = vrot.slane %v5285_v36, %v14804_v21  ;;  %v6794_v1 = vrot.slane %v5210_v55, %v14816_v11 }
 0xa2b   : > { %v5535_v34 = vrot.slane %v5534_v13, 4  ;;  %v5502_v51 = vrot.slane %v5501_v40, 1  ;;  %v5712_v31 = vsel %vm14847_vm8, %v5426_v47, 0.0  ;;  %vm14859_vm8 = vmmov %vm14852_vm0 }
 0xa2c   : > { %v5464_v19 = vadd.f32 %v5463_v30, %v5462_v62  ;;  %v5055_v10 = vpop.permute.xlu1 %5054  ;;  %v5677_v57 = vsel %vm14848_vm11, %v5411_v61, 0.0  ;;  %v13238_v22 = vadd.f32 %v5712_v31, %v5711_v44  ;;  %v13248_v46 = vsel %vm2313_vm3, %v6868_v35, %v13190_v63  ;;  %vm14851_vm3 = vmmov %vm14832_vm1 }
 0xa2d   : > { %v5536_v5 = vadd.f32 %v5535_v34, %v5534_v13  ;;  %v5135_v2 = vpop.permute.xlu0 %5134  ;;  %v5380_v24 = vmul.f32 %v7552_v7, %v5055_v10  ;;  %v5503_v56 = vadd.f32 %v5502_v51, %v5501_v40  ;;  %v6641_v54 = vrot.slane %v5055_v10, %v14827_v45  ;;  %vm14855_vm1 = vmmov %vm14844_vm9 }
 0xa2e   : > { %v5465_v28 = vrot.slane %v5464_v19, 1  ;;  %v5396_v21 = vmul.f32 %v7553_v8, %v5135_v2  ;;  %v5678_v44 = vadd.f32 %v5677_v57, %v5676_v0  ;;  %v6720_v27 = vrot.slane %v5135_v2, %v14827_v45  ;;  %vm14860_vm11 = vmmov %vm14852_vm0 }
 0xa2f   : > { %v5537_v18 = vrot.slane %v5536_v5, 2  ;;  %v5605_v38 = vsel %vm14849_vm7, %v5380_v24, 0.0  ;;  %v6642_v23 = vsel %vm2327_vm5, %v6641_v54, %v6637_v39  ;;  %v6795_v33 = vsel %vm2320_vm4, %v6794_v1, %v13195_v52  ;;  %v7557_v52 = vld [vmem:[%s13404_s2 + $0x3e8] sm:$0xff] }
 0xa30   : > { %v5466_v48 = vadd.f32 %v5465_v28, %v5464_v19  ;;  %v4980_v17 = vpop.permute.xlu1 %4979  ;;  %v5606_v32 = vadd.f32 %v5605_v38, %v5604_v58  ;;  %v5642_v62 = vsel %vm14851_vm3, %v5396_v21, 0.0  ;;  %v7556_v58 = vld [vmem:[%s13404_s2 + $0x2f8] sm:$0xff]  ;;  %vm14856_vm9 = vcmask 1044484  }
 0xa31   : > { %v5538_v6 = vadd.f32 %v5537_v18, %v5536_v5  ;;  %v5060_v42 = vpop.permute.xlu0 %5059  ;;  %v5365_v53 = vmul.f32 %v7554_v29, %v4980_v17  ;;  %v6567_v16 = vrot.slane %v4980_v17, %v14836_v43  ;;  %v5643_v50 = vadd.f32 %v5642_v62, %v5641_v59  ;;  %v7559_v18 = vld [vmem:[%s13404_s2 + $0x378] sm:$0xff]  ;;  %vm14864_vm3 = vmmov %vm14856_vm9 }
 0xa32   : > { %v5977_v60 = vsel %vm14850_vm14, %v5503_v56, %v5466_v48  ;;  %v5381_v26 = vmul.f32 %v7555_v20, %v5060_v42  ;;  %v6646_v41 = vrot.slane %v5060_v42, %v14836_v43  ;;  %v7560_v20 = vld [vmem:[%s13404_s2 + $0x3f0] sm:$0xff]  ;;  %vm14861_vm7 = vcmask 1046534   ;;  %vm14862_vm14 = vmmov %vm14852_vm0 }
 0xa33   : > { %v5539_v63 = vrot.slane %v5538_v6, 1  ;;  %v5570_v3 = vsel %vm14852_vm0, %v5365_v53, 0.0  ;;  %v6568_v36 = vsel %vm2334_vm6, %v6567_v16, %v6563_v15 }
 0xa34   : > { %v5607_v40 = vsel %vm14853_vm12, %v5381_v26, 0.0  ;;  %v5290_v13 = vpop.permute.xlu1 %5289  ;;  %v5571_v47 = vadd.f32 %v5570_v3, %v5569_v4  ;;  %v6887_v55 = vsel %vm14854_vm10, %v6568_v36, %v6886_v9  ;;  %v6647_v61 = vsel %vm2334_vm6, %v6646_v41, %v6642_v23 }
 0xa35   : > { %v5540_v37 = vadd.f32 %v5539_v63, %v5538_v6  ;;  %v5608_v0 = vadd.f32 %v5607_v40, %v5606_v32  ;;  %v5140_v30 = vpop.permute.xlu0 %5139  ;;  %v6888_v19 = vsel %vm14856_vm9, %v6647_v61, %v6887_v55  ;;  %v6721_v9 = vsel %vm2327_vm5, %v6720_v27, %v6716_v12  ;;  %v7558_v12 = vld [vmem:[%s13404_s2 + $0x370] sm:$0xff] }
 0xa36   : > { %v5397_v39 = vmul.f32 %v7556_v58, %v5140_v30  ;;  %v5572_v34 = vrot.slane %v5571_v47, 4  ;;  %v5427_v31 = vmul.f32 %v7557_v52, %v5290_v13  ;;  %v6725_v59 = vrot.slane %v5140_v30, %v14836_v43  ;;  %v7561_v30 = vld [vmem:[%s13404_s2 + $0x3f8] sm:$0xff] }
 0xa37   : > { %v5978_v25 = vsel %vm14855_vm1, %v5540_v37, %v5977_v60  ;;  %v5609_v51 = vrot.slane %v5608_v0, 4  ;;  %v6873_v2 = vrot.slane %v5290_v13, %v14816_v11  ;;  %vm14877_vm1 = vcmask 392512  }
 0xa38   : > { %v5644_v10 = vsel %vm14857_vm13, %v5397_v39, 0.0  ;;  %v5215_v15 = vpop.permute.xlu1 %5214  ;;  %v5573_v5 = vadd.f32 %v5572_v34, %v5571_v47  ;;  %v6726_v57 = vsel %vm2334_vm6, %v6725_v59, %v6721_v9  ;;  %v5714_v48 = vsel %vm14858_vm15, %v5427_v31, 0.0  ;;  %vm14878_vm9 = vmmov %vm14877_vm1 }
 0xa39   : > { %v5610_v35 = vadd.f32 %v5609_v51, %v5608_v0  ;;  %v5645_v28 = vadd.f32 %v5644_v10, %v5643_v50  ;;  %v5220_v4 = vpop.permute.xlu0 %5219  ;;  %v5412_v7 = vmul.f32 %v7558_v12, %v5215_v15  ;;  %v6799_v24 = vrot.slane %v5215_v15, %v14827_v45  ;;  %vm14879_vm13 = vmmov %vm14877_vm1 }
 0xa3a   : > { %v5413_v1 = vmul.f32 %v7559_v18, %v5220_v4  ;;  %v5574_v8 = vrot.slane %v5573_v5, 2  ;;  %v6889_v11 = vsel %vm2897_vm2, %v6726_v57, %v6888_v19  ;;  %v6804_v17 = vrot.slane %v5220_v4, %v14836_v43  ;;  %v14870_v18 = vld [vmem:[#allocation141_spill] sm:$0xff]  ;;  %vm14880_vm15 = vmmov %vm14877_vm1 }
 0xa3b   : > { %v5611_v21 = vrot.slane %v5610_v35, 2  ;;  %v5646_v56 = vrot.slane %v5645_v28, 4  ;;  %v5679_v38 = vsel %vm14859_vm8, %v5412_v7, 0.0  ;;  %v6800_v54 = vsel %vm2327_vm5, %v6799_v24, %v6795_v33  ;;  %v14869_v7 = vld [vmem:[#allocation22_spill] sm:$0xff] }
 0xa3c   : > { %v5295_v6 = vpop.permute.xlu1 %5294  ;;  %v5575_v27 = vadd.f32 %v5574_v8, %v5573_v5  ;;  %v5680_v29 = vadd.f32 %v5679_v38, %v5678_v44  ;;  %v5681_v53 = vsel %vm14860_vm11, %v5413_v1, 0.0  ;;  %v6805_v16 = vsel %vm2334_vm6, %v6804_v17, %v6800_v54  ;;  %v14871_v8 = vld [vmem:[#allocation61_spill] sm:$0xff]  ;;  %v14874_v54 = vld [vmem:[#allocation110_spill] sm:$0xff] }
 0xa3d   : > { %v5612_v42 = vadd.f32 %v5611_v21, %v5610_v35  ;;  %v5647_v60 = vadd.f32 %v5646_v56, %v5645_v28  ;;  %v5428_v26 = vmul.f32 %v7560_v20, %v5295_v6  ;;  %v6878_v63 = vrot.slane %v5295_v6, %v14827_v45  ;;  %v14872_v56 = vld [vmem:[#allocation111_spill] sm:$0xff] }
 0xa3e   : > { %v5576_v32 = vrot.slane %v5575_v27, 1  ;;  %v5682_v23 = vadd.f32 %v5681_v53, %v5680_v29  ;;  %v5715_v3 = vadd.f32 %v5714_v48, %v13238_v22  ;;  %v6874_v44 = vsel %vm2320_vm4, %v6873_v2, %v13248_v46  ;;  %vm14863_vm4 = vmmov %vm14854_vm10  ;;  %v14873_v48 = vld [vmem:[#allocation115_spill] sm:$0xff] }
 0xa3f   : > { %v5613_v62 = vrot.slane %v5612_v42, 1  ;;  %v5648_v41 = vrot.slane %v5647_v60, 2  ;;  %v6890_v36 = vsel %vm14861_vm7, %v6805_v16, %v6889_v11  ;;  %v5716_v40 = vsel %vm14862_vm14, %v5428_v26, 0.0  ;;  %vm14868_vm10 = vmmov %vm14852_vm0  ;;  %v14875_v6 = vld [vmem:[#allocation107_spill] sm:$0xff]  ;;  %v14881_v26 = vld [vmem:[#allocation77_spill] sm:$0xff] }
 0xa40   : > { %v5300_v13 = vpop.permute.xlu1 %5299  ;;  %v5577_v37 = vadd.f32 %v5576_v32, %v5575_v27  ;;  %v5683_v0 = vrot.slane %v5682_v23, 4  ;;  %v6879_v45 = vsel %vm2327_vm5, %v6878_v63, %v6874_v44  ;;  %v5717_v58 = vadd.f32 %v5716_v40, %v5715_v3  ;;  %v14885_v44 = vld [vmem:[#allocation105_spill] sm:$0xff]  ;;  %vm14890_vm14 = vmmov %vm14877_vm1 }
 0xa41   : > { %v5614_v47 = vadd.f32 %v5613_v62, %v5612_v42  ;;  %v5649_v55 = vadd.f32 %v5648_v41, %v5647_v60  ;;  %v5429_v22 = vmul.f32 %v7561_v30, %v5300_v13  ;;  %v6883_v33 = vrot.slane %v5300_v13, %v14836_v43  ;;  %v14876_v42 = vld [vmem:[#allocation53_spill] sm:$0xff]  ;;  %v14887_v13 = vld [vmem:[#allocation87_spill] sm:$0xff] }
 0xa42   : > { %v5979_v46 = vsel %vm14863_vm4, %v5577_v37, %v5978_v25  ;;  %v5684_v61 = vadd.f32 %v5683_v0, %v5682_v23  ;;  %vm14865_vm5 = vcmask 1047559   ;;  %v6009_v24 = vrot.slane %v14869_v7, %v14705_v49  ;;  %v14883_v62 = vld [vmem:[#allocation109_spill] sm:$0xff]  ;;  %v14884_v23 = vld [vmem:[#allocation28_spill] sm:$0xff] }
 0xa43   : > { %v5650_v50 = vrot.slane %v5649_v55, 1  ;;  %v5980_v39 = vsel %vm14864_vm3, %v5614_v47, %v5979_v46  ;;  %v5718_v34 = vsel %vm14852_vm0, %v5429_v22, 0.0  ;;  %v6884_v51 = vsel %vm2334_vm6, %v6883_v33, %v6879_v45  ;;  %vm14866_vm6 = vmmov %vm14861_vm7  ;;  %v14888_v47 = vld [vmem:[#allocation81_spill] sm:$0xff] }
 0xa44   : > { %v5685_v9 = vrot.slane %v5684_v61, 2  ;;  %v5719_v52 = vadd.f32 %v5718_v34, %v5717_v58  ;;  %v6891_v31 = vsel %vm14865_vm5, %v6884_v51, %v6890_v36  ;;  %vm14867_vm12 = vmmov %vm14865_vm5  ;;  %v6027_v1 = vrot.slane %v14870_v18, %v14705_v49 }
 0xa45   : > { %v5651_v19 = vadd.f32 %v5650_v50, %v5649_v55  ;;  %6893 = vst [vmem:[%s548_s22] sm:$0xff] %v6891_v31  ;;  %v6005_v21 = vrot.slane %v14871_v8, %v9664_v14  ;;  %v6018_v11 = vrot.slane %v14872_v56, %v14705_v49  ;;  %v6036_v38 = vrot.slane %v14873_v48, %v14705_v49  ;;  %vm14889_vm7 = vmmov %vm14863_vm4  ;;  %v14896_v56 = vld [vmem:[#allocation6_spill] sm:$0xff] }
 0xa46   : > { %v5686_v43 = vadd.f32 %v5685_v9, %v5684_v61  ;;  %v5720_v25 = vrot.slane %v5719_v52, 4  ;;  %v6023_v17 = vrot.slane %v14874_v54, %v9664_v14  ;;  %v6014_v27 = vrot.slane %v14875_v6, %v9664_v14  ;;  %vm14891_vm4 = vmmov %vm14877_vm1 }
 0xa47   : > { %v5981_v10 = vsel %vm2897_vm2, %v5651_v19, %v5980_v39  ;;  %v6032_v60 = vrot.slane %v14876_v42, %v9664_v14  ;;  %v6010_v29 = vsel %vm14877_vm1, %v6009_v24, %v6005_v21  ;;  %v6054_v63 = vrot.slane %v14881_v26, %v14705_v49  ;;  %vm14892_vm3 = vmmov %vm14877_vm1 }
 0xa48   : > { %v5687_v59 = vrot.slane %v5686_v43, 1  ;;  %v5721_v15 = vadd.f32 %v5720_v25, %v5719_v52  ;;  %v6028_v53 = vsel %vm14878_vm9, %v6027_v1, %v6023_v17  ;;  %v6019_v16 = vsel %vm14879_vm13, %v6018_v11, %v6014_v27 }
 0xa49   : > { %v6037_v20 = vsel %vm14880_vm15, %v6036_v38, %v6032_v60  ;;  %vm14882_vm8 = vcmask 1041409   ;;  %v6045_v41 = vrot.slane %v14883_v62, %v14705_v49  ;;  %v6063_v3 = vrot.slane %v14884_v23, %v14705_v49 }
 0xa4a   : > { %v5688_v5 = vadd.f32 %v5687_v59, %v5686_v43  ;;  %v5722_v35 = vrot.slane %v5721_v15, 2  ;;  %v6074_v32 = vsel %vm14882_vm8, %v6019_v16, %v6010_v29  ;;  %v6050_v36 = vrot.slane %v14885_v44, %v9664_v14 }
 0xa4b   : > { %vm14886_vm11 = vcmask 1042434   ;;  %v6041_v37 = vrot.slane %v14887_v13, %v9664_v14  ;;  %v6059_v55 = vrot.slane %v14888_v47, %v9664_v14  ;;  %vm14893_vm0 = vcmask 1044484  }
 0xa4c   : > { %v5723_v2 = vadd.f32 %v5722_v35, %v5721_v15  ;;  %v5982_v28 = vsel %vm14866_vm6, %v5688_v5, %v5981_v10  ;;  %v6075_v40 = vsel %vm14886_vm11, %v6028_v53, %v6074_v32  ;;  %v6055_v30 = vsel %vm14890_vm14, %v6054_v63, %v6050_v36  ;;  %v7000_v35 = vld [vmem:[%s13418_s16 + $0x8] sm:$0xff] }
 0xa4d   : > { %v6076_v0 = vsel %vm14889_vm7, %v6037_v20, %v6075_v40  ;;  %v6046_v22 = vsel %vm14891_vm4, %v6045_v41, %v6041_v37  ;;  %v6064_v33 = vsel %vm14892_vm3, %v6063_v3, %v6059_v55  ;;  %vm6082_vm5 = vcmask 392448  }
 0xa4e   : > { %v5724_v4 = vrot.slane %v5723_v2, 1  ;;  %v6077_v50 = vsel %vm14893_vm0, %v6046_v22, %v6076_v0  ;;  %vm6093_vm9 = vcmask 917120  }
 0xa4f   : > { %v6078_v39 = vsel %vm2897_vm2, %v6055_v30, %v6077_v50  ;;  %vm14897_vm2 = vcmask 261120  }
 0xa50   : > { %v5725_v57 = vadd.f32 %v5724_v4, %v5723_v2  ;;  %v6079_v34 = vsel %vm14866_vm6, %v6064_v33, %v6078_v39  ;;  %vm14898_vm13 = vmmov %vm14897_vm2 }
 0xa51   : > { %vm14899_vm15 = vmmov %vm14897_vm2 }
 0xa52   : > { %v5983_v12 = vsel %vm14867_vm12, %v5725_v57, %v5982_v28  ;;  %vm14894_vm12 = vmmov %vm14877_vm1  ;;  %vm14895_vm1 = vcmask 1047559  }
 0xa53   : > { %5985 = vst.msk [vmem:[#allocation3] sm:$0xff] %vm14868_vm10, %v5983_v12  ;;  %vm6087_vm10 = vcmask 654720   ;;  %vm14901_vm8 = vmmov %vm14897_vm2 }
 0xa66   : > { %v5965_v45 = vpop.xlane.xlu0 %5964 }
 0xa67   : > { %v6068_v61 = vrot.slane %v5965_v45, %v9664_v14 }
 0xa6a   : > { %v6085_v52 = vpop.permute.xlu0 %6084 }
 0xa72   : > { %v5968_v46 = vpop.xlane.xlu1 %5967 }
 0xa73   : > { %v6072_v58 = vrot.slane %v5968_v46, %v14705_v49  ;;  %v7018_v49 = vld [vmem:[%s13412_s10] ss:$0 sm:$0xff] }
 0xa75   : > { %v6073_v51 = vsel %vm14894_vm12, %v6072_v58, %v6068_v61 }
 0xa76   : > { %v6080_v19 = vsel %vm14895_vm1, %v6073_v51, %v6079_v34  ;;  %v6091_v9 = vpop.permute.xlu1 %6090 }
 0xa77   : > { %6083 = vst.msk [vmem:[#allocation3] sm:$0xff] %vm6082_vm5, %v6080_v19 }
 0xa78   : > { %6088 = vst.msk [vmem:[#allocation3] sm:$0xff] %vm6087_vm10, %v6085_v52 }
 0xa79   : > { %6094 = vst.msk [vmem:[#allocation3] sm:$0xff] %vm6093_vm9, %v6091_v9 }
 0xa80   : > { %v6095_v31 = vld [vmem:[#allocation3] sm:$0xff] }
 0xa81   : > { %v6096_v14 = vpack.c.bf16 %v6095_v31, %v6095_v31 }
 0xa83   : > { %7098 = vmatmul.mubr.bf16.vlgmr.msra.gmra.mxu1 %v6096_v14 }
 0xb43   : > { %v6202_v43 = vpop.f32.mrf.mxu1 }
 0xb44   : > { %v6203_v25 = vadd.f32 %v7018_v49, %v6202_v43 }
 0xb45   : > { %v7099_v10 = vpop.f32.mrf.mxu1 }
 0xb46   : > { %7426 = vtanh.f32 %v6203_v25  ;;  %v7027_v2 = vmul.f32 -1.442695, %v6203_v25 }
 0xb47   : > { %v6205_v59 = vpop.f32.mrf.mxu1 }
 0xb48   : > { %7428 = vpow2.f32 %v7027_v2 }
 0xb49   : > { %v7100_v15 = vpop.f32.mrf.mxu1 }
 0xb53   : > { %v7427_v5 = vpop.eup %7426 }
 0xb54   : > { %6221 = vrot.lane.b32.xlu1 %v7427_v5, %s7573_s30 }
 0xb55   : > { %v7429_v28 = vpop.eup %7428 }
 0xb56   : > { %v6211_v4 = vadd.f32 1.0, %v7429_v28 }
 0xb58   : > { %6216 = vrot.lane.b32.xlu1 %v7000_v35, %s7571_s20  ;;  %7430 = vrcp.f32 %v6211_v4 }
 0xb65   : > { %v7431_v57 = vpop.eup %7430 }
 0xbc6   : > { %v6222_v12 = vpop.permute.xlu1 %6221 }
 0xbc7   : > { %v6224_v7 = vmul.f32 %v7431_v57, %v6222_v12 }
 0xbc9   : > { %6226 = vrot.lane.b32.xlu0 %v6224_v7, %s7571_s20 }
 0xbca   : > { %v6217_v24 = vpop.permute.xlu1 %6216 }
 0xbcb   : > { %v6219_v18 = vmul.f32 %v7431_v57, %v6217_v24 }
 0xc3b   : > { %v6227_v1 = vpop.permute.xlu0 %6226 }
 0xc3c   : > { %v6229_v8 = vadd.f32 %v6227_v1, %v6219_v18 }
 0xc3e   : > { %7432 = vtanh.f32 %v6229_v8 }
 0xc4b   : > { %v7433_v21 = vpop.eup %7432 }
 0xc4c   : > { %6232 = vrot.lane.b32.xlu1 %v7433_v21, %s7573_s30 }
 0xc50   : > { %6243 = vrot.lane.b32.xlu1 %v14896_v56, %s7582_s26 }
 0xcbe   : > { %v6233_v11 = vpop.permute.xlu1 %6232 }
 0xcbf   : > { %v6235_v48 = vmul.f32 %v7431_v57, %v6233_v11 }
 0xcc1   : > { %6238 = vrot.lane.b32.xlu0 %v6235_v48, %s7571_s20 }
 0xcc2   : > { %v6244_v38 = vpop.permute.xlu1 %6243 }
 0xcc3   : > { %6246 = vst.msk [vmem:[%s13418_s16] sm:$0xff] %vm14897_vm2, %v6244_v38 }
 0xcc5   : > { %6248 = vrot.lane.b32.xlu0 %v6229_v8, %s7582_s26 }
 0xd33   : > { %v6239_v54 = vpop.permute.xlu0 %6238 }
 0xd34   : > { %7028 = vst.msk [vmem:[%s13417_s15 + $0x8] sm:$0xff] %vm14898_vm13, %v6239_v54 }
 0xd35   : > { %6252 = vst.msk [vmem:[%s14900_s19] sm:$0xff] %vm14899_vm15, %v6239_v54 }
 0xd37   : > { %v6249_v17 = vpop.permute.xlu0 %6248 }
 0xd38   : > { %7029 = vst.msk [vmem:[%s13418_s16 + $0x8] sm:$0xff] %vm14901_vm8, %v6249_v17 }
 0xd39 PF: > { %s14902_s22 = sld [smem:[#allocation4_spill]] }
 0xd3f   : > { %s28_s24 = sadd.s32 1, %s14902_s22  }
 0xd40   : > { %p25_p5 = scmp.ge.s32.totalorder %s28_s24, 6  }
 0xd42   :  { %27 = sbr.rel (!%p25_p5) target bundleno = 3 (0x3), region = 140 }

</bundles_post_ra>
